<compile_context>
chip_gen: v7x
topology: tpu7x:2x2x1
jax: 0.10.0
libtpu: 0.0.40
codegen_flags: <defaults>
</compile_context>

<pallas_src>
import functools

import jax
import jax.numpy as jnp
from jax.experimental import pallas as pl
from jax.experimental.pallas import tpu as pltpu


def _espcn_kernel(x_ref, mask_ref, w1_ref, b1_ref, w2_ref, b2_ref,
                  w3_ref, b3_ref, o_ref, a1_ref, a2_ref, *, wp, start, length):
    """Fused Conv5x5+Tanh -> Conv3x3+Tanh -> Conv3x3 on the flat batch grid.

    x_ref:    (1, N)    zero-embedded input, N = R*wp flat positions (bf16)
    mask_ref: (1, L)    1.0 at real pixels of the window, 0.0 at padding (f32)
    w1_ref:   (64, 25)  bf16    b1_ref: (64, 1) f32
    w2_ref:   (32, 576) bf16    b2_ref: (32, 1) f32
    w3_ref:   (4, 288)  bf16    b3_ref: (4, 1)  f32
    o_ref:    (4, L)    conv-3 output over the window (f32)
    a1_ref:   (64, N)   bf16 VMEM scratch (layer-1 activation, flat grid)
    a2_ref:   (32, N)   bf16 VMEM scratch (layer-2 activation, flat grid)
    """
    S, L = start, length
    mask = mask_ref[...] > 0.5          # (1, L) valid-pixel mask

    def tap_matrix(src_ref, radius):
        """Stack the (2r+1)^2 lane-shifted views of the flat grid along K."""
        offs = range(-radius, radius + 1)
        return jnp.concatenate(
            [src_ref[:, S + dr * wp + dc:S + dr * wp + dc + L]
             for dr in offs for dc in offs], axis=0)

    def store_with_halo(dst_ref, act, cch):
        # Lane-dense window store; only the two small halo strips that the
        # next 3x3 conv reads but the window does not cover are zeroed
        # (everything else it touches is freshly (re)written above), so no
        # full-scratch zero fill is needed.
        dst_ref[:, S:S + L] = act.astype(jnp.bfloat16)
        zeros = jnp.zeros((cch, wp + 1), jnp.bfloat16)
        dst_ref[:, S - wp - 1:S] = zeros
        dst_ref[:, S + L:S + L + wp + 1] = zeros

    # ---- Layer 1: 5x5 conv (1 -> 64) == one (64,25)x(25,L) bf16 matmul.
    h1 = jnp.dot(w1_ref[...], tap_matrix(x_ref, 2),
                 preferred_element_type=jnp.float32)
    h1 = jnp.where(mask, jnp.tanh(h1 + b1_ref[...]), 0.0)
    store_with_halo(a1_ref, h1, 64)

    # ---- Layer 2: 3x3 conv (64 -> 32) == one (32,576)x(576,L) bf16 matmul.
    h2 = jnp.dot(w2_ref[...], tap_matrix(a1_ref, 1),
                 preferred_element_type=jnp.float32)
    h2 = jnp.where(mask, jnp.tanh(h2 + b2_ref[...]), 0.0)
    store_with_halo(a2_ref, h2, 32)

    # ---- Layer 3: 3x3 conv (32 -> 4) == one (4,288)x(288,L) bf16 matmul.
    # Padding-lane results are junk but discarded by the wrapper; no masking.
    h3 = jnp.dot(w3_ref[...], tap_matrix(a2_ref, 1),
                 preferred_element_type=jnp.float32)
    o_ref[...] = h3 + b3_ref[...]


def _embed_flat(img_bhw, wp):
    """(B, H, W) -> (1, R*wp) flat grid: every image gets a 2-wide zero halo
    (covers the 5x5 pad-2 AND 3x3 pad-1 halos) and images are stacked along
    rows, so the whole batch is one lane-major position axis."""
    B, H, W = img_bhw.shape
    x = jnp.pad(img_bhw, ((0, 0), (0, 2), (2, 2)))     # side + bottom halo
    x = x.reshape(B * (H + 2), wp)
    x = jnp.pad(x, ((2, 0), (0, 0)))                   # top halo
    return x.reshape(1, -1)


@jax.jit
def net_forward(x_nchw, params):
    """ESPCN Net forward: NCHW (B, 1, H, W) -> NCHW (B, 1, 2H, 2W)."""
    (w1, b1), (w2, b2), (w3, b3) = params          # PyTorch (Cout, Cin, KH, KW)
    B, C, H, W = x_nchw.shape
    assert C == 1

    wp = W + 4                       # padded row width (2-wide halo each side)
    R = B * (H + 2) + 2              # stacked padded row count
    N = R * wp                       # flat grid positions
    S = 2 * wp + 2                   # window start (first 5x5-reachable pos)
    L = N - 2 * S                    # window length (covers all valid pixels)

    x_flat = _embed_flat(x_nchw[:, 0], wp).astype(jnp.bfloat16)            # (1, N)
    mask_w = _embed_flat(jnp.ones((B, H, W), jnp.float32), wp)[:, S:S + L]  # (1, L)

    # Channel-major matmul weight layouts, bf16 (MXU native); biases f32.
    w1r = w1.reshape(64, 25).astype(jnp.bfloat16)                   # [co, kh*5+kw]
    w2r = jnp.transpose(w2, (0, 2, 3, 1)).reshape(32, 576).astype(jnp.bfloat16)
    w3r = jnp.transpose(w3, (0, 2, 3, 1)).reshape(4, 288).astype(jnp.bfloat16)

    kernel = functools.partial(_espcn_kernel, wp=wp, start=S, length=L)
    # TODO(synk): for large images/batches, add a row-tile grid axis with a
    # 2-row halo (re-zeroing ragged last tiles) sized for v7x's 64 MiB VMEM and
    # mark it CORE_PARALLEL so the second TensorCore is used; at 16x16 a single
    # grid step minimizes the ~0.35us/step pipeline overhead instead.
    y = pl.pallas_call(
        kernel,
        out_shape=jax.ShapeDtypeStruct((4, L), jnp.float32),
        grid=(1,),
        in_specs=[
            pl.BlockSpec((1, N), lambda i: (0, 0)),      # flat input
            pl.BlockSpec((1, L), lambda i: (0, 0)),      # valid-pixel mask
            pl.BlockSpec((64, 25), lambda i: (0, 0)),    # w1
            pl.BlockSpec((64, 1), lambda i: (0, 0)),     # b1
            pl.BlockSpec((32, 576), lambda i: (0, 0)),   # w2
            pl.BlockSpec((32, 1), lambda i: (0, 0)),     # b2
            pl.BlockSpec((4, 288), lambda i: (0, 0)),    # w3
            pl.BlockSpec((4, 1), lambda i: (0, 0)),      # b3
        ],
        out_specs=pl.BlockSpec((4, L), lambda i: (0, 0)),
        scratch_shapes=[
            pltpu.VMEM((64, N), jnp.bfloat16),   # layer-1 activation, flat grid
            pltpu.VMEM((32, N), jnp.bfloat16),   # layer-2 activation, flat grid
        ],
        compiler_params=pltpu.CompilerParams(
            dimension_semantics=("arbitrary",)),
    )(x_flat, mask_w, w1r, b1.reshape(64, 1).astype(jnp.float32),
      w2r, b2.reshape(32, 1).astype(jnp.float32),
      w3r, b3.reshape(4, 1).astype(jnp.float32))

    # Scatter the window back onto the flat grid, pull out per-image interiors
    # and apply PixelShuffle(2): out[b, 0, 2h+i, 2w+j] = conv3[2i+j, b, h, w].
    full = jnp.pad(y, ((0, 0), (S, N - S - L))).reshape(4, R, wp)
    y4 = full[:, 2:, :].reshape(4, B, H + 2, wp)[:, :, :H, 2:2 + W]  # (4,B,H,W)
    out = y4.reshape(2, 2, B, H, W).transpose(2, 3, 0, 4, 1)         # (B,H,2,W,2)
    return out.reshape(B, 1, 2 * H, 2 * W)


def init_params(key):
    """Deterministic synthetic parameters in PyTorch (Cout, Cin, KH, KW) layout."""
    ks = jax.random.split(key, 6)
    w1 = jax.random.normal(ks[0], (64, 1, 5, 5), jnp.float32) * 0.1
    b1 = jax.random.normal(ks[1], (64,), jnp.float32) * 0.05
    w2 = jax.random.normal(ks[2], (32, 64, 3, 3), jnp.float32) * 0.1
    b2 = jax.random.normal(ks[3], (32,), jnp.float32) * 0.05
    w3 = jax.random.normal(ks[4], (4, 32, 3, 3), jnp.float32) * 0.1
    b3 = jax.random.normal(ks[5], (4,), jnp.float32) * 0.05
    return (w1, b1), (w2, b2), (w3, b3)


def _reference_forward(x_nchw, params):
    """Pure-XLA f32 reference (conv_general_dilated + pixel shuffle)."""
    (w1, b1), (w2, b2), (w3, b3) = params
    dn = ("NCHW", "OIHW", "NCHW")
    y = jax.lax.conv_general_dilated(x_nchw, w1, (1, 1), ((2, 2), (2, 2)),
                                     dimension_numbers=dn)
    y = jnp.tanh(y + b1.reshape(1, -1, 1, 1))
    y = jax.lax.conv_general_dilated(y, w2, (1, 1), ((1, 1), (1, 1)),
                                     dimension_numbers=dn)
    y = jnp.tanh(y + b2.reshape(1, -1, 1, 1))
    y = jax.lax.conv_general_dilated(y, w3, (1, 1), ((1, 1), (1, 1)),
                                     dimension_numbers=dn)
    y = y + b3.reshape(1, -1, 1, 1)
    B, C4, H, W = y.shape
    r = 2
    y = y.reshape(B, C4 // (r * r), r, r, H, W).transpose(0, 1, 4, 2, 5, 3)
    return y.reshape(B, C4 // (r * r), H * r, W * r)


if __name__ == "__main__":
    key = jax.random.PRNGKey(0)
    k_x, k_p = jax.random.split(key)

    B, H, W = 2, 16, 16
    x = jax.random.normal(k_x, (B, 1, H, W), jnp.float32)   # NCHW, 1 channel
    params = init_params(k_p)

    out = jax.block_until_ready(net_forward(x, params))
    assert out.shape == (B, 1, 2 * H, 2 * W), out.shape
    assert out.dtype == jnp.float32

    ref = _reference_forward(x, params)
    err = float(jnp.max(jnp.abs(out - ref)))
    # bf16 operands / f32 accumulation: expect ~1e-2 abs error (f32 ~1e-5).
    assert err < 7.5e-2, f"max abs error vs XLA reference: {err}"

    print("KERNEL_OK")
</pallas_src>

<mosaic_0001>
module attributes {stable_mosaic.version = 11 : i64} {
  func.func @_espcn_kernel(%arg0: i32, %arg1: memref<1x760xbf16, #tpu.memory_space<vmem>>, %arg2: memref<1x676xf32, #tpu.memory_space<vmem>>, %arg3: memref<64x25xbf16, #tpu.memory_space<vmem>>, %arg4: memref<64x1xf32, #tpu.memory_space<vmem>>, %arg5: memref<32x576xbf16, #tpu.memory_space<vmem>>, %arg6: memref<32x1xf32, #tpu.memory_space<vmem>>, %arg7: memref<4x288xbf16, #tpu.memory_space<vmem>>, %arg8: memref<4x1xf32, #tpu.memory_space<vmem>>, %arg9: memref<4x676xf32, #tpu.memory_space<vmem>>, %arg10: memref<64x760xbf16, #tpu.memory_space<vmem>>, %arg11: memref<32x760xbf16, #tpu.memory_space<vmem>>) attributes {dimension_semantics = [#tpu.dimension_semantics<arbitrary>], iteration_bounds = array<i64: 1>, scalar_prefetch = 0 : i64, scratch_operands = 2 : i64, tpu.core_type = #tpu.core_type<tc>, window_params = [{pipeline_mode = #tpu.pipeline_mode<synchronous>, transform_indices = @transform_0, window_bounds = array<i64: 1, 760>}, {pipeline_mode = #tpu.pipeline_mode<synchronous>, transform_indices = @transform_1, window_bounds = array<i64: 1, 676>}, {pipeline_mode = #tpu.pipeline_mode<synchronous>, transform_indices = @transform_2, window_bounds = array<i64: 64, 25>}, {pipeline_mode = #tpu.pipeline_mode<synchronous>, transform_indices = @transform_3, window_bounds = array<i64: 64, 1>}, {pipeline_mode = #tpu.pipeline_mode<synchronous>, transform_indices = @transform_4, window_bounds = array<i64: 32, 576>}, {pipeline_mode = #tpu.pipeline_mode<synchronous>, transform_indices = @transform_5, window_bounds = array<i64: 32, 1>}, {pipeline_mode = #tpu.pipeline_mode<synchronous>, transform_indices = @transform_6, window_bounds = array<i64: 4, 288>}, {pipeline_mode = #tpu.pipeline_mode<synchronous>, transform_indices = @transform_7, window_bounds = array<i64: 4, 1>}, {pipeline_mode = #tpu.pipeline_mode<synchronous>, transform_indices = @transform_8, window_bounds = array<i64: 4, 676>}]} {
    %c0 = arith.constant 0 : index
    %c0_0 = arith.constant 0 : index
    %0 = vector.load %arg2[%c0, %c0_0] : memref<1x676xf32, #tpu.memory_space<vmem>>, vector<1x676xf32>
    %cst = arith.constant 5.000000e-01 : f32
    %1 = vector.broadcast %cst : f32 to vector<1x676xf32>
    %2 = arith.cmpf ogt, %0, %1 : vector<1x676xf32>
    %c0_1 = arith.constant 0 : index
    %c0_2 = arith.constant 0 : index
    %3 = vector.load %arg3[%c0_1, %c0_2] : memref<64x25xbf16, #tpu.memory_space<vmem>>, vector<64x25xbf16>
    %c0_3 = arith.constant 0 : index
    %c0_4 = arith.constant 0 : index
    %4 = vector.load %arg1[%c0_3, %c0_4] : memref<1x760xbf16, #tpu.memory_space<vmem>>, vector<1x676xbf16>
    %c0_5 = arith.constant 0 : index
    %c1 = arith.constant 1 : index
    %5 = vector.load %arg1[%c0_5, %c1] : memref<1x760xbf16, #tpu.memory_space<vmem>>, vector<1x676xbf16>
    %c0_6 = arith.constant 0 : index
    %c2 = arith.constant 2 : index
    %6 = vector.load %arg1[%c0_6, %c2] : memref<1x760xbf16, #tpu.memory_space<vmem>>, vector<1x676xbf16>
    %c0_7 = arith.constant 0 : index
    %c3 = arith.constant 3 : index
    %7 = vector.load %arg1[%c0_7, %c3] : memref<1x760xbf16, #tpu.memory_space<vmem>>, vector<1x676xbf16>
    %c0_8 = arith.constant 0 : index
    %c4 = arith.constant 4 : index
    %8 = vector.load %arg1[%c0_8, %c4] : memref<1x760xbf16, #tpu.memory_space<vmem>>, vector<1x676xbf16>
    %c0_9 = arith.constant 0 : index
    %c20 = arith.constant 20 : index
    %9 = vector.load %arg1[%c0_9, %c20] : memref<1x760xbf16, #tpu.memory_space<vmem>>, vector<1x676xbf16>
    %c0_10 = arith.constant 0 : index
    %c21 = arith.constant 21 : index
    %10 = vector.load %arg1[%c0_10, %c21] : memref<1x760xbf16, #tpu.memory_space<vmem>>, vector<1x676xbf16>
    %c0_11 = arith.constant 0 : index
    %c22 = arith.constant 22 : index
    %11 = vector.load %arg1[%c0_11, %c22] : memref<1x760xbf16, #tpu.memory_space<vmem>>, vector<1x676xbf16>
    %c0_12 = arith.constant 0 : index
    %c23 = arith.constant 23 : index
    %12 = vector.load %arg1[%c0_12, %c23] : memref<1x760xbf16, #tpu.memory_space<vmem>>, vector<1x676xbf16>
    %c0_13 = arith.constant 0 : index
    %c24 = arith.constant 24 : index
    %13 = vector.load %arg1[%c0_13, %c24] : memref<1x760xbf16, #tpu.memory_space<vmem>>, vector<1x676xbf16>
    %c0_14 = arith.constant 0 : index
    %c40 = arith.constant 40 : index
    %14 = vector.load %arg1[%c0_14, %c40] : memref<1x760xbf16, #tpu.memory_space<vmem>>, vector<1x676xbf16>
    %c0_15 = arith.constant 0 : index
    %c41 = arith.constant 41 : index
    %15 = vector.load %arg1[%c0_15, %c41] : memref<1x760xbf16, #tpu.memory_space<vmem>>, vector<1x676xbf16>
    %c0_16 = arith.constant 0 : index
    %c42 = arith.constant 42 : index
    %16 = vector.load %arg1[%c0_16, %c42] : memref<1x760xbf16, #tpu.memory_space<vmem>>, vector<1x676xbf16>
    %c0_17 = arith.constant 0 : index
    %c43 = arith.constant 43 : index
    %17 = vector.load %arg1[%c0_17, %c43] : memref<1x760xbf16, #tpu.memory_space<vmem>>, vector<1x676xbf16>
    %c0_18 = arith.constant 0 : index
    %c44 = arith.constant 44 : index
    %18 = vector.load %arg1[%c0_18, %c44] : memref<1x760xbf16, #tpu.memory_space<vmem>>, vector<1x676xbf16>
    %c0_19 = arith.constant 0 : index
    %c60 = arith.constant 60 : index
    %19 = vector.load %arg1[%c0_19, %c60] : memref<1x760xbf16, #tpu.memory_space<vmem>>, vector<1x676xbf16>
    %c0_20 = arith.constant 0 : index
    %c61 = arith.constant 61 : index
    %20 = vector.load %arg1[%c0_20, %c61] : memref<1x760xbf16, #tpu.memory_space<vmem>>, vector<1x676xbf16>
    %c0_21 = arith.constant 0 : index
    %c62 = arith.constant 62 : index
    %21 = vector.load %arg1[%c0_21, %c62] : memref<1x760xbf16, #tpu.memory_space<vmem>>, vector<1x676xbf16>
    %c0_22 = arith.constant 0 : index
    %c63 = arith.constant 63 : index
    %22 = vector.load %arg1[%c0_22, %c63] : memref<1x760xbf16, #tpu.memory_space<vmem>>, vector<1x676xbf16>
    %c0_23 = arith.constant 0 : index
    %c64 = arith.constant 64 : index
    %23 = vector.load %arg1[%c0_23, %c64] : memref<1x760xbf16, #tpu.memory_space<vmem>>, vector<1x676xbf16>
    %c0_24 = arith.constant 0 : index
    %c80 = arith.constant 80 : index
    %24 = vector.load %arg1[%c0_24, %c80] : memref<1x760xbf16, #tpu.memory_space<vmem>>, vector<1x676xbf16>
    %c0_25 = arith.constant 0 : index
    %c81 = arith.constant 81 : index
    %25 = vector.load %arg1[%c0_25, %c81] : memref<1x760xbf16, #tpu.memory_space<vmem>>, vector<1x676xbf16>
    %c0_26 = arith.constant 0 : index
    %c82 = arith.constant 82 : index
    %26 = vector.load %arg1[%c0_26, %c82] : memref<1x760xbf16, #tpu.memory_space<vmem>>, vector<1x676xbf16>
    %c0_27 = arith.constant 0 : index
    %c83 = arith.constant 83 : index
    %27 = vector.load %arg1[%c0_27, %c83] : memref<1x760xbf16, #tpu.memory_space<vmem>>, vector<1x676xbf16>
    %c0_28 = arith.constant 0 : index
    %c84 = arith.constant 84 : index
    %28 = vector.load %arg1[%c0_28, %c84] : memref<1x760xbf16, #tpu.memory_space<vmem>>, vector<1x676xbf16>
    %29 = tpu.concatenate %4, %5, %6, %7, %8, %9, %10, %11, %12, %13, %14, %15, %16, %17, %18, %19 in 0 : vector<1x676xbf16>, vector<1x676xbf16>, vector<1x676xbf16>, vector<1x676xbf16>, vector<1x676xbf16>, vector<1x676xbf16>, vector<1x676xbf16>, vector<1x676xbf16>, vector<1x676xbf16>, vector<1x676xbf16>, vector<1x676xbf16>, vector<1x676xbf16>, vector<1x676xbf16>, vector<1x676xbf16>, vector<1x676xbf16>, vector<1x676xbf16> -> vector<16x676xbf16>
    %30 = tpu.concatenate %20, %21, %22, %23, %24, %25, %26, %27, %28 in 0 : vector<1x676xbf16>, vector<1x676xbf16>, vector<1x676xbf16>, vector<1x676xbf16>, vector<1x676xbf16>, vector<1x676xbf16>, vector<1x676xbf16>, vector<1x676xbf16>, vector<1x676xbf16> -> vector<9x676xbf16>
    %31 = tpu.concatenate %29, %30 in 0 : vector<16x676xbf16>, vector<9x676xbf16> -> vector<25x676xbf16>
    %cst_29 = arith.constant dense<0.000000e+00> : vector<64x676xf32>
    %32 = tpu.matmul %3, %31, %cst_29 {dimension_numbers = #tpu.dot_dimension_numbers<[1], [0], [0], [1], [0, 0, 1, 1], [], []>} : vector<64x25xbf16>, vector<25x676xbf16>, vector<64x676xf32> -> vector<64x676xf32>
    %c0_30 = arith.constant 0 : index
    %c0_31 = arith.constant 0 : index
    %33 = vector.load %arg4[%c0_30, %c0_31] : memref<64x1xf32, #tpu.memory_space<vmem>>, vector<64x1xf32>
    %34 = vector.broadcast %33 : vector<64x1xf32> to vector<64x676xf32>
    %35 = arith.addf %32, %34 : vector<64x676xf32>
    %36 = math.tanh %35 : vector<64x676xf32>
    %cst_32 = arith.constant 0.000000e+00 : f32
    %37 = vector.shape_cast %2 : vector<1x676xi1> to vector<1x676xi1>
    %38 = vector.broadcast %37 : vector<1x676xi1> to vector<64x676xi1>
    %39 = vector.broadcast %cst_32 : f32 to vector<64x676xf32>
    %40 = arith.select %38, %36, %39 : vector<64x676xi1>, vector<64x676xf32>
    %41 = arith.truncf %40 : vector<64x676xf32> to vector<64x676xbf16>
    %c0_33 = arith.constant 0 : index
    %c42_34 = arith.constant 42 : index
    %42 = vector.load %arg10[%c0_33, %c42_34] : memref<64x760xbf16, #tpu.memory_space<vmem>>, vector<64x676xbf16>
    tpu.vector_store %arg10[%c0_33, %c42_34], %41 {strides = array<i32>} : memref<64x760xbf16, #tpu.memory_space<vmem>>, vector<64x676xbf16>,
    %cst_35 = arith.constant 0.000000e+00 : bf16
    %43 = vector.broadcast %cst_35 : bf16 to vector<64x21xbf16>
    %c0_36 = arith.constant 0 : index
    %c21_37 = arith.constant 21 : index
    %44 = vector.load %arg10[%c0_36, %c21_37] : memref<64x760xbf16, #tpu.memory_space<vmem>>, vector<64x21xbf16>
    tpu.vector_store %arg10[%c0_36, %c21_37], %43 {strides = array<i32>} : memref<64x760xbf16, #tpu.memory_space<vmem>>, vector<64x21xbf16>,
    %c0_38 = arith.constant 0 : index
    %c718 = arith.constant 718 : index
    %45 = vector.load %arg10[%c0_38, %c718] : memref<64x760xbf16, #tpu.memory_space<vmem>>, vector<64x21xbf16>
    tpu.vector_store %arg10[%c0_38, %c718], %43 {strides = array<i32>} : memref<64x760xbf16, #tpu.memory_space<vmem>>, vector<64x21xbf16>,
    %c0_39 = arith.constant 0 : index
    %c0_40 = arith.constant 0 : index
    %46 = vector.load %arg5[%c0_39, %c0_40] : memref<32x576xbf16, #tpu.memory_space<vmem>>, vector<32x576xbf16>
    %c0_41 = arith.constant 0 : index
    %c21_42 = arith.constant 21 : index
    %47 = vector.load %arg10[%c0_41, %c21_42] : memref<64x760xbf16, #tpu.memory_space<vmem>>, vector<64x676xbf16>
    %c0_43 = arith.constant 0 : index
    %c22_44 = arith.constant 22 : index
    %48 = vector.load %arg10[%c0_43, %c22_44] : memref<64x760xbf16, #tpu.memory_space<vmem>>, vector<64x676xbf16>
    %c0_45 = arith.constant 0 : index
    %c23_46 = arith.constant 23 : index
    %49 = vector.load %arg10[%c0_45, %c23_46] : memref<64x760xbf16, #tpu.memory_space<vmem>>, vector<64x676xbf16>
    %c0_47 = arith.constant 0 : index
    %c41_48 = arith.constant 41 : index
    %50 = vector.load %arg10[%c0_47, %c41_48] : memref<64x760xbf16, #tpu.memory_space<vmem>>, vector<64x676xbf16>
    %c0_49 = arith.constant 0 : index
    %c42_50 = arith.constant 42 : index
    %51 = vector.load %arg10[%c0_49, %c42_50] : memref<64x760xbf16, #tpu.memory_space<vmem>>, vector<64x676xbf16>
    %c0_51 = arith.constant 0 : index
    %c43_52 = arith.constant 43 : index
    %52 = vector.load %arg10[%c0_51, %c43_52] : memref<64x760xbf16, #tpu.memory_space<vmem>>, vector<64x676xbf16>
    %c0_53 = arith.constant 0 : index
    %c61_54 = arith.constant 61 : index
    %53 = vector.load %arg10[%c0_53, %c61_54] : memref<64x760xbf16, #tpu.memory_space<vmem>>, vector<64x676xbf16>
    %c0_55 = arith.constant 0 : index
    %c62_56 = arith.constant 62 : index
    %54 = vector.load %arg10[%c0_55, %c62_56] : memref<64x760xbf16, #tpu.memory_space<vmem>>, vector<64x676xbf16>
    %c0_57 = arith.constant 0 : index
    %c63_58 = arith.constant 63 : index
    %55 = vector.load %arg10[%c0_57, %c63_58] : memref<64x760xbf16, #tpu.memory_space<vmem>>, vector<64x676xbf16>
    %56 = tpu.concatenate %47, %48, %49, %50, %51, %52, %53, %54, %55 in 0 : vector<64x676xbf16>, vector<64x676xbf16>, vector<64x676xbf16>, vector<64x676xbf16>, vector<64x676xbf16>, vector<64x676xbf16>, vector<64x676xbf16>, vector<64x676xbf16>, vector<64x676xbf16> -> vector<576x676xbf16>
    %cst_59 = arith.constant dense<0.000000e+00> : vector<32x676xf32>
    %57 = tpu.matmul %46, %56, %cst_59 {dimension_numbers = #tpu.dot_dimension_numbers<[1], [0], [0], [1], [0, 0, 1, 1], [], []>} : vector<32x576xbf16>, vector<576x676xbf16>, vector<32x676xf32> -> vector<32x676xf32>
    %c0_60 = arith.constant 0 : index
    %c0_61 = arith.constant 0 : index
    %58 = vector.load %arg6[%c0_60, %c0_61] : memref<32x1xf32, #tpu.memory_space<vmem>>, vector<32x1xf32>
    %59 = vector.broadcast %58 : vector<32x1xf32> to vector<32x676xf32>
    %60 = arith.addf %57, %59 : vector<32x676xf32>
    %61 = math.tanh %60 : vector<32x676xf32>
    %cst_62 = arith.constant 0.000000e+00 : f32
    %62 = vector.shape_cast %2 : vector<1x676xi1> to vector<1x676xi1>
    %63 = vector.broadcast %62 : vector<1x676xi1> to vector<32x676xi1>
    %64 = vector.broadcast %cst_62 : f32 to vector<32x676xf32>
    %65 = arith.select %63, %61, %64 : vector<32x676xi1>, vector<32x676xf32>
    %66 = arith.truncf %65 : vector<32x676xf32> to vector<32x676xbf16>
    %c0_63 = arith.constant 0 : index
    %c42_64 = arith.constant 42 : index
    %67 = vector.load %arg11[%c0_63, %c42_64] : memref<32x760xbf16, #tpu.memory_space<vmem>>, vector<32x676xbf16>
    tpu.vector_store %arg11[%c0_63, %c42_64], %66 {strides = array<i32>} : memref<32x760xbf16, #tpu.memory_space<vmem>>, vector<32x676xbf16>,
    %cst_65 = arith.constant 0.000000e+00 : bf16
    %68 = vector.broadcast %cst_65 : bf16 to vector<32x21xbf16>
    %c0_66 = arith.constant 0 : index
    %c21_67 = arith.constant 21 : index
    %69 = vector.load %arg11[%c0_66, %c21_67] : memref<32x760xbf16, #tpu.memory_space<vmem>>, vector<32x21xbf16>
    tpu.vector_store %arg11[%c0_66, %c21_67], %68 {strides = array<i32>} : memref<32x760xbf16, #tpu.memory_space<vmem>>, vector<32x21xbf16>,
    %c0_68 = arith.constant 0 : index
    %c718_69 = arith.constant 718 : index
    %70 = vector.load %arg11[%c0_68, %c718_69] : memref<32x760xbf16, #tpu.memory_space<vmem>>, vector<32x21xbf16>
    tpu.vector_store %arg11[%c0_68, %c718_69], %68 {strides = array<i32>} : memref<32x760xbf16, #tpu.memory_space<vmem>>, vector<32x21xbf16>,
    %c0_70 = arith.constant 0 : index
    %c0_71 = arith.constant 0 : index
    %71 = vector.load %arg7[%c0_70, %c0_71] : memref<4x288xbf16, #tpu.memory_space<vmem>>, vector<4x288xbf16>
    %c0_72 = arith.constant 0 : index
    %c21_73 = arith.constant 21 : index
    %72 = vector.load %arg11[%c0_72, %c21_73] : memref<32x760xbf16, #tpu.memory_space<vmem>>, vector<32x676xbf16>
    %c0_74 = arith.constant 0 : index
    %c22_75 = arith.constant 22 : index
    %73 = vector.load %arg11[%c0_74, %c22_75] : memref<32x760xbf16, #tpu.memory_space<vmem>>, vector<32x676xbf16>
    %c0_76 = arith.constant 0 : index
    %c23_77 = arith.constant 23 : index
    %74 = vector.load %arg11[%c0_76, %c23_77] : memref<32x760xbf16, #tpu.memory_space<vmem>>, vector<32x676xbf16>
    %c0_78 = arith.constant 0 : index
    %c41_79 = arith.constant 41 : index
    %75 = vector.load %arg11[%c0_78, %c41_79] : memref<32x760xbf16, #tpu.memory_space<vmem>>, vector<32x676xbf16>
    %c0_80 = arith.constant 0 : index
    %c42_81 = arith.constant 42 : index
    %76 = vector.load %arg11[%c0_80, %c42_81] : memref<32x760xbf16, #tpu.memory_space<vmem>>, vector<32x676xbf16>
    %c0_82 = arith.constant 0 : index
    %c43_83 = arith.constant 43 : index
    %77 = vector.load %arg11[%c0_82, %c43_83] : memref<32x760xbf16, #tpu.memory_space<vmem>>, vector<32x676xbf16>
    %c0_84 = arith.constant 0 : index
    %c61_85 = arith.constant 61 : index
    %78 = vector.load %arg11[%c0_84, %c61_85] : memref<32x760xbf16, #tpu.memory_space<vmem>>, vector<32x676xbf16>
    %c0_86 = arith.constant 0 : index
    %c62_87 = arith.constant 62 : index
    %79 = vector.load %arg11[%c0_86, %c62_87] : memref<32x760xbf16, #tpu.memory_space<vmem>>, vector<32x676xbf16>
    %c0_88 = arith.constant 0 : index
    %c63_89 = arith.constant 63 : index
    %80 = vector.load %arg11[%c0_88, %c63_89] : memref<32x760xbf16, #tpu.memory_space<vmem>>, vector<32x676xbf16>
    %81 = tpu.concatenate %72, %73, %74, %75, %76, %77, %78, %79, %80 in 0 : vector<32x676xbf16>, vector<32x676xbf16>, vector<32x676xbf16>, vector<32x676xbf16>, vector<32x676xbf16>, vector<32x676xbf16>, vector<32x676xbf16>, vector<32x676xbf16>, vector<32x676xbf16> -> vector<288x676xbf16>
    %cst_90 = arith.constant dense<0.000000e+00> : vector<4x676xf32>
    %82 = tpu.matmul %71, %81, %cst_90 {dimension_numbers = #tpu.dot_dimension_numbers<[1], [0], [0], [1], [0, 0, 1, 1], [], []>} : vector<4x288xbf16>, vector<288x676xbf16>, vector<4x676xf32> -> vector<4x676xf32>
    %c0_91 = arith.constant 0 : index
    %c0_92 = arith.constant 0 : index
    %83 = vector.load %arg8[%c0_91, %c0_92] : memref<4x1xf32, #tpu.memory_space<vmem>>, vector<4x1xf32>
    %84 = vector.broadcast %83 : vector<4x1xf32> to vector<4x676xf32>
    %85 = arith.addf %82, %84 : vector<4x676xf32>
    %c0_93 = arith.constant 0 : index
    %c0_94 = arith.constant 0 : index
    %86 = vector.load %arg9[%c0_93, %c0_94] : memref<4x676xf32, #tpu.memory_space<vmem>>, vector<4x676xf32>
    tpu.vector_store %arg9[%c0_93, %c0_94], %85 {strides = array<i32>} : memref<4x676xf32, #tpu.memory_space<vmem>>, vector<4x676xf32>,
    return
  }
  func.func @transform_0(%arg0: i32) -> (i32, i32) {
    %c0_i32 = arith.constant 0 : i32
    %c0_i32_0 = arith.constant 0 : i32
    %c0_i32_1 = arith.constant 0 : i32
    return %c0_i32, %c0_i32_0 : i32, i32
  }
  func.func @transform_1(%arg0: i32) -> (i32, i32) {
    %c0_i32 = arith.constant 0 : i32
    %c0_i32_0 = arith.constant 0 : i32
    %c0_i32_1 = arith.constant 0 : i32
    return %c0_i32, %c0_i32_0 : i32, i32
  }
  func.func @transform_2(%arg0: i32) -> (i32, i32) {
    %c0_i32 = arith.constant 0 : i32
    %c0_i32_0 = arith.constant 0 : i32
    %c0_i32_1 = arith.constant 0 : i32
    return %c0_i32, %c0_i32_0 : i32, i32
  }
  func.func @transform_3(%arg0: i32) -> (i32, i32) {
    %c0_i32 = arith.constant 0 : i32
    %c0_i32_0 = arith.constant 0 : i32
    %c0_i32_1 = arith.constant 0 : i32
    return %c0_i32, %c0_i32_0 : i32, i32
  }
  func.func @transform_4(%arg0: i32) -> (i32, i32) {
    %c0_i32 = arith.constant 0 : i32
    %c0_i32_0 = arith.constant 0 : i32
    %c0_i32_1 = arith.constant 0 : i32
    return %c0_i32, %c0_i32_0 : i32, i32
  }
  func.func @transform_5(%arg0: i32) -> (i32, i32) {
    %c0_i32 = arith.constant 0 : i32
    %c0_i32_0 = arith.constant 0 : i32
    %c0_i32_1 = arith.constant 0 : i32
    return %c0_i32, %c0_i32_0 : i32, i32
  }
  func.func @transform_6(%arg0: i32) -> (i32, i32) {
    %c0_i32 = arith.constant 0 : i32
    %c0_i32_0 = arith.constant 0 : i32
    %c0_i32_1 = arith.constant 0 : i32
    return %c0_i32, %c0_i32_0 : i32, i32
  }
  func.func @transform_7(%arg0: i32) -> (i32, i32) {
    %c0_i32 = arith.constant 0 : i32
    %c0_i32_0 = arith.constant 0 : i32
    %c0_i32_1 = arith.constant 0 : i32
    return %c0_i32, %c0_i32_0 : i32, i32
  }
  func.func @transform_8(%arg0: i32) -> (i32, i32) {
    %c0_i32 = arith.constant 0 : i32
    %c0_i32_0 = arith.constant 0 : i32
    %c0_i32_1 = arith.constant 0 : i32
    return %c0_i32, %c0_i32_0 : i32, i32
  }
}

</mosaic_0001>

<bundles_post_ra>
// kernel: net_forward.1
= control target key start
LH: loop header
LB: loop body
LE: loop exit
PB: predicated region body
PF: predicated region fallthrough
CT: control target
= control target key end

     0   :  { %v46_v0 = vlaneseq  ;;  %v4974_v2 = vmov 1966171168   ;;  %s4976_s29 = smov 127   ;;  %s4977_s30 = smov 125   ;;  %vm9542_vm0 = vcmask 1039360   ;;  %vm9545_vm1 = vcmask 1031168   ;;  %s9533_s0 = inlined_call_operand.vmem [shape: bf16[1,760], index: 0, kind: input, shape index: {}]   ;;  %s9534_s2 = inlined_call_operand.vmem [shape: bf16[64,25], index: 2, kind: input, shape index: {}]   ;;  %s9535_s3 = inlined_call_operand.vmem [shape: f32[64,1], index: 3, kind: input, shape index: {}]   ;;  %s9536_s1 = inlined_call_operand.vmem [shape: f32[1,676], index: 1, kind: input, shape index: {}]   ;;  %s9537_s4 = inlined_call_operand.vmem [shape: bf16[32,576], index: 4, kind: input, shape index: {}]   ;;  %s9538_s5 = inlined_call_operand.vmem [shape: f32[32,1], index: 5, kind: input, shape index: {}]   ;;  %s9539_s6 = inlined_call_operand.vmem [shape: bf16[4,288], index: 6, kind: input, shape index: {}]   ;;  %s9540_s7 = inlined_call_operand.vmem [shape: f32[4,1], index: 7, kind: input, shape index: {}]   ;;  %s9541_s8 = inlined_call_operand.vmem [shape: f32[4,676], index: 8, kind: output, shape index: {}]  }
   0x1   :  { %v40_v1 = vld [vmem:[%s9533_s0] sm:$0x3f]  ;;  %v44_v3 = vunpack.c.l.s4 %v4974_v2  ;;  %s4975_s0 = smov 126   ;;  %s4978_s9 = smov 109   ;;  %vm533_vm2 = vcmask 1040384   ;;  %vm198_vm4 = vcmask 1022976  }
   0x2   :  { %v5044_v4 = vshrl.u32 %v46_v0, 7  ;;  %v137_v6 = vcombine.low %v40_v1, %v40_v1  ;;  %v42_v7 = vcombine.high %v40_v1, %v40_v1  ;;  %s4979_s10 = smov 108   ;;  %s4980_s11 = smov 107   ;;  %vm534_vm3 = vsmask.f32 256 }
   0x3   :  { %v45_v5 = vunpack.c.0.s8 %v44_v3  ;;  %s4981_s12 = smov 106   ;;  %s4982_s13 = smov 105   ;;  %vm9548_vm5 = vcmask 1041408   ;;  %vm568_vm6 = vsmask.f32 1280  ;;  %vm792_vm7 = vcmask 891904   ;;  %vm5368_vm11 = vmand %vm533_vm2, %vm534_vm3 }
   0x4   :  { %9691 = vst [vmem:[#allocation4_spill] sm:$0xff] %v5044_v4  ;;  %s4983_s14 = smov 124   ;;  %s4984_s15 = smov 104   ;;  %vm9544_vm8 = vcmask 883712   ;;  %vm9547_vm9 = vcmask 1042432   ;;  %vm9546_vm12 = vcmask 875520   ;;  %vm5416_vm3 = vmand %vm9548_vm5, %vm568_vm6 }
   0x5   :  { %v5047_v8 = vsub.s32 %v45_v5, %v5044_v4  ;;  %s4985_s16 = smov 88   ;;  %s4986_s17 = smov 87   ;;  %vm602_vm10 = vsmask.f32 2304  ;;  %vm9543_vm13 = vcmask 867328   ;;  %vm9629_vm14 = vcmask 1043456  }
   0x6   :  { %s4987_s18 = smov 86   ;;  %s4988_s19 = smov 85   ;;  %vm636_vm15 = vsmask.f32 3328 }
   0x7   :  { %v49_v9 = vrot.slane %v40_v1, %v5047_v8  ;;  %v5051_v10 = vrot.slane %v137_v6, %v5047_v8  ;;  %v5054_v11 = vrot.slane %v42_v7, %v5047_v8  ;;  %s4989_s20 = smov 84   ;;  %s4990_s21 = smov 68   ;;  %vm5503_vm6 = vmand %vm9629_vm14, %vm636_vm15  ;;  %vm9551_vm15 = vcmask 711680  }
   0x8   :  { %s4991_s22 = smov 67  }
   0x9   :  { %v5057_v12 = vrot.slane %v49_v9, %v5047_v8  ;;  %v145_v13 = vcombine.high %v5051_v10, %v5051_v10  ;;  %v57_v14 = vcombine.high %v49_v9, %v49_v9  ;;  %v58_v15 = vcombine.high %v5054_v11, %v5054_v11 }
   0xa   :  { %v5070_v17 = vrot.slane %v5051_v10, %v5047_v8  ;;  %v5092_v23 = vrot.slane %v5054_v11, %v5047_v8  ;;  %v210_v39 = vcombine.low %v49_v9, %v49_v9  ;;  %v211_v5 = vcombine.low %v5054_v11, %v5054_v11 }
   0xb   :  { %170 = vrot.lane.b32.xlu0 %v5057_v12, %s4975_s0  ;;  %v5066_v16 = vrot.slane %v145_v13, %v5047_v8  ;;  %v5073_v18 = vrot.slane %v58_v15, %v5047_v8  ;;  %v5077_v19 = vcombine.high %v5057_v12, %v5057_v12  ;;  %v5082_v20 = vrot.slane %v57_v14, %v5047_v8 }
   0xc   :  { %v5085_v21 = vshll.u32 %v5057_v12, 16  ;;  %v5105_v26 = vcombine.high %v5070_v17, %v5070_v17  ;;  %v5122_v31 = vshll.u32 %v5092_v23, 16  ;;  %v5155_v56 = vrot.slane %v210_v39, %v5047_v8 }
   0xd   :  { %164 = vrot.lane.b32.xlu1 %v5066_v16, %s4975_s0  ;;  %v5088_v22 = vshll.u32 %v5073_v18, 16  ;;  %v5098_v24 = vcombine.high %v5082_v20, %v5082_v20  ;;  %v5101_v25 = vshll.u32 %v5082_v20, 16  ;;  %v5108_v27 = vshll.u32 %v5077_v19, 16 }
   0xe   :  { %v161_v32 = vcombine.high %v5066_v16, %v5066_v16  ;;  %v184_v36 = vrot.slane %v5122_v31, 7  ;;  %v180_v38 = vrot.slane %v5085_v21, 7  ;;  %v358_v45 = vrot.slane %v5122_v31, 4 }
   0xf   :  { %162 = vrot.lane.b32.xlu0 %v5070_v17, %s4975_s0  ;;  %v4687_v28 = vpack.i.bf16 %v5085_v21, %v5088_v22  ;;  %v4682_v29 = vpack.i.bf16 %v5108_v27, %v5101_v25  ;;  %v5119_v30 = vshll.u32 %v5098_v24, 16  ;;  %v181_v33 = vrot.slane %v5101_v25, 7 }
  0x10   :  { %v182_v34 = vrot.slane %v5108_v27, 7  ;;  %v185_v40 = vrot.slane %v5088_v22, 7  ;;  %v355_v41 = vrot.slane %v5101_v25, 4  ;;  %v356_v42 = vrot.slane %v5108_v27, 4 }
  0x11   :  { %172 = vrot.lane.b32.xlu1 %v5082_v20, %s4975_s0  ;;  %v183_v35 = vrot.slane %v5119_v30, 7  ;;  %v4692_v37 = vpack.i.bf16 %v5122_v31, %v5119_v30  ;;  %v357_v43 = vrot.slane %v5119_v30, 4  ;;  %v354_v46 = vrot.slane %v5085_v21, 4 }
  0x12   :  { %v4697_v44 = vpack.i.bf16 %v182_v34, %v181_v33  ;;  %v359_v47 = vrot.slane %v5088_v22, 4  ;;  %v5143_v49 = vpack.i.bf16 %v356_v42, %v355_v41  ;;  %v405_v50 = vrot.slane %v5101_v25, 3 }
  0x13   :  { %166 = vrot.lane.b32.xlu0 %v5105_v26, %s4975_s0  ;;  %v4702_v48 = vpack.i.bf16 %v184_v36, %v183_v35  ;;  %v406_v51 = vrot.slane %v5108_v27, 3  ;;  %v5148_v52 = vpack.i.bf16 %v358_v45, %v357_v43  ;;  %v407_v54 = vrot.slane %v5119_v30, 3 }
  0x14   :  { %v5150_v53 = vpack.i.bf16 %v359_v47, %v354_v46  ;;  %v408_v55 = vrot.slane %v5122_v31, 3  ;;  %v404_v58 = vrot.slane %v5085_v21, 3  ;;  %v409_v59 = vrot.slane %v5088_v22, 3 }
  0x15   :  { %4688 = vrot.lane.b32.xlu1 %v4687_v28, %s4976_s29  ;;  %v5157_v57 = vpack.i.bf16 %v406_v51, %v405_v50  ;;  %v4707_v60 = vpack.i.bf16 %v180_v38, %v185_v40  ;;  %v455_v62 = vrot.slane %v5101_v25, 2  ;;  %v456_v63 = vrot.slane %v5108_v27, 2 }
  0x16   :  { %v5161_v61 = vpack.i.bf16 %v408_v55, %v407_v54  ;;  %v5165_v0 = vpack.i.bf16 %v409_v59, %v404_v58  ;;  %v457_v1 = vrot.slane %v5119_v30, 2  ;;  %v458_v2 = vrot.slane %v5122_v31, 2 }
  0x17   :  { %4683 = vrot.lane.b32.xlu0 %v4682_v29, %s4976_s29  ;;  %v454_v3 = vrot.slane %v5085_v21, 2  ;;  %v5172_v6 = vpack.i.bf16 %v456_v63, %v455_v62  ;;  %v459_v7 = vrot.slane %v5088_v22, 2  ;;  %v504_v13 = vrot.slane %v5101_v25, 1 }
  0x18   :  { %v5175_v9 = vpack.i.bf16 %v458_v2, %v457_v1  ;;  %v505_v14 = vrot.slane %v5108_v27, 1  ;;  %v506_v15 = vrot.slane %v5119_v30, 1  ;;  %v5182_v28 = vcombine.high %v5155_v56, %v5155_v56 }
  0x19   :  { %168 = vrot.lane.b32.xlu1 %v161_v32, %s4975_s0  ;;  %v5184_v29 = vpack.i.bf16 %v459_v7, %v454_v3  ;;  %v507_v11 = vrot.slane %v5122_v31, 1  ;;  %v503_v32 = vrot.slane %v5085_v21, 1  ;;  %v508_v34 = vrot.slane %v5088_v22, 1 }
  0x1a   :  { %v5188_v33 = vpack.i.bf16 %v505_v14, %v504_v13  ;;  %v246_v38 = vrot.slane %v5101_v25, 6  ;;  %v247_v39 = vrot.slane %v5108_v27, 6  ;;  %v248_v40 = vrot.slane %v5119_v30, 6 }
  0x1b   :  { %4693 = vrot.lane.b32.xlu0 %v4692_v37, %s4976_s29  ;;  %v5192_v35 = vpack.i.bf16 %v507_v11, %v506_v15  ;;  %v5194_v36 = vpack.i.bf16 %v508_v34, %v503_v32  ;;  %v5198_v37 = vrot.slane %v211_v5, %v5047_v8  ;;  %v249_v41 = vrot.slane %v5122_v31, 6 }
  0x1c   :  { %v4712_v42 = vpack.i.bf16 %v247_v39, %v246_v38  ;;  %v245_v43 = vrot.slane %v5085_v21, 6  ;;  %v275_v46 = vcombine.low %v5051_v10, %v5051_v10  ;;  %v303_v10 = vrot.slane %v5101_v25, 5 }
  0x1d   :  { %4698 = vrot.lane.b32.xlu1 %v4697_v44, %s4977_s30  ;;  %v250_v44 = vrot.slane %v5088_v22, 6  ;;  %v4717_v45 = vpack.i.bf16 %v249_v41, %v248_v40  ;;  %v305_v51 = vrot.slane %v5119_v30, 5  ;;  %v306_v54 = vrot.slane %v5122_v31, 5 }
  0x1e   :  { %v302_v58 = vrot.slane %v5085_v21, 5  ;;  %v307_v59 = vrot.slane %v5088_v22, 5  ;;  %v5248_v21 = vcombine.low %v5092_v23, %v5092_v23  ;;  %v335_v22 = vcombine.low %v5073_v18, %v5073_v18 }
  0x1f   :  { %4703 = vrot.lane.b32.xlu0 %v4702_v48, %s4977_s30  ;;  %v4722_v47 = vpack.i.bf16 %v245_v43, %v250_v44  ;;  %v5214_v48 = vrot.slane %v275_v46, %v5047_v8  ;;  %v304_v8 = vrot.slane %v5108_v27, 5  ;;  %v4732_v25 = vpack.i.bf16 %v306_v54, %v305_v51 }
  0x20   :  { %v5241_v27 = vcombine.low %v5082_v20, %v5082_v20  ;;  %v5256_v30 = vcombine.low %v5057_v12, %v5057_v12  ;;  %v385_v31 = vcombine.low %v5066_v16, %v5066_v16 }
  0x21   :  { %4708 = vrot.lane.b32.xlu1 %v4707_v60, %s4977_s30  ;;  %v283_v50 = vcombine.high %v5214_v48, %v5214_v48  ;;  %v4727_v55 = vpack.i.bf16 %v304_v8, %v303_v10  ;;  %v384_v60 = vcombine.low %v5070_v17, %v5070_v17  ;;  %v484_v63 = vcombine.low %v5214_v48, %v5214_v48 }
  0x23   :  { %782 = vrot.lane.b32.xlu0 %v5057_v12, %s4978_s9 }
  0x25   :  { %784 = vrot.lane.b32.xlu1 %v5182_v28, %s4978_s9 }
  0x27   :  { %786 = vrot.lane.b32.xlu0 %v5077_v19, %s4978_s9 }
  0x29   :  { %788 = vrot.lane.b32.xlu1 %v5198_v37, %s4978_s9 }
  0x2b   :  { %790 = vrot.lane.b32.xlu0 %v5092_v23, %s4978_s9 }
  0x2d   :  { %4713 = vrot.lane.b32.xlu1 %v4712_v42, %s4979_s10 }
  0x2f   :  { %4718 = vrot.lane.b32.xlu0 %v4717_v45, %s4979_s10 }
  0x31   :  { %4723 = vrot.lane.b32.xlu1 %v4722_v47, %s4979_s10 }
  0x33   :  { %780 = vrot.lane.b32.xlu0 %v5155_v56, %s4978_s9 }
  0x35   :  { %286 = vrot.lane.b32.xlu1 %v5070_v17, %s4980_s11 }
  0x37   :  { %288 = vrot.lane.b32.xlu0 %v283_v50, %s4980_s11 }
  0x39   :  { %290 = vrot.lane.b32.xlu1 %v5105_v26, %s4980_s11  ;;  %v4737_v26 = vpack.i.bf16 %v302_v58, %v307_v59 }
  0x3b   :  { %292 = vrot.lane.b32.xlu0 %v5155_v56, %s4980_s11 }
  0x3d   :  { %294 = vrot.lane.b32.xlu1 %v5057_v12, %s4980_s11 }
  0x3f   :  { %284 = vrot.lane.b32.xlu0 %v5214_v48, %s4980_s11 }
  0x41   :  { %4728 = vrot.lane.b32.xlu1 %v4727_v55, %s4981_s12 }
  0x43   :  { %4733 = vrot.lane.b32.xlu0 %v4732_v25, %s4981_s12 }
  0x45   :  { %4738 = vrot.lane.b32.xlu1 %v4737_v26, %s4981_s12 }
  0x47   :  { %338 = vrot.lane.b32.xlu0 %v5241_v27, %s4982_s13 }
  0x49   :  { %340 = vrot.lane.b32.xlu1 %v5057_v12, %s4982_s13 }
  0x4b   :  { %342 = vrot.lane.b32.xlu0 %v5082_v20, %s4982_s13 }
  0x4d   :  { %344 = vrot.lane.b32.xlu1 %v5248_v21, %s4982_s13 }
  0x4f   :  { %346 = vrot.lane.b32.xlu0 %v335_v22, %s4982_s13 }
  0x51   :  { %336 = vrot.lane.b32.xlu1 %v5256_v30, %s4982_s13 }
  0x53   :  { %229 = vrot.lane.b32.xlu0 %v5057_v12, %s4983_s14 }
  0x55   :  { %231 = vrot.lane.b32.xlu1 %v5182_v28, %s4983_s14 }
  0x57   :  { %233 = vrot.lane.b32.xlu0 %v5077_v19, %s4983_s14 }
  0x59   :  { %235 = vrot.lane.b32.xlu1 %v5198_v37, %s4983_s14 }
  0x5b   :  { %227 = vrot.lane.b32.xlu0 %v5155_v56, %s4983_s14 }
  0x5d   :  { %4743 = vrot.lane.b32.xlu1 %v5143_v49, %s4984_s15  ;;  %v434_v49 = vcombine.low %v5155_v56, %v5155_v56 }
  0x5f   :  { %4748 = vrot.lane.b32.xlu0 %v5148_v52, %s4984_s15 }
  0x61   :  { %4753 = vrot.lane.b32.xlu1 %v5150_v53, %s4984_s15 }
  0x63   :  { %388 = vrot.lane.b32.xlu0 %v385_v31, %s4985_s16 }
  0x65   :  { %390 = vrot.lane.b32.xlu1 %v5070_v17, %s4985_s16 }
  0x67   :  { %392 = vrot.lane.b32.xlu0 %v5066_v16, %s4985_s16  ;;  %v435_v16 = vcombine.low %v5198_v37, %v5198_v37 }
  0x69   :  { %394 = vrot.lane.b32.xlu1 %v5256_v30, %s4985_s16 }
  0x6b   :  { %386 = vrot.lane.b32.xlu0 %v384_v60, %s4985_s16 }
  0x6d   :  { %4758 = vrot.lane.b32.xlu1 %v5157_v57, %s4986_s17 }
  0x6f   :  { %4763 = vrot.lane.b32.xlu0 %v5161_v61, %s4986_s17 }
  0x71   :  { %4768 = vrot.lane.b32.xlu1 %v5165_v0, %s4986_s17 }
  0x73   :  { %438 = vrot.lane.b32.xlu0 %v5256_v30, %s4987_s18 }
  0x75   :  { %440 = vrot.lane.b32.xlu1 %v5155_v56, %s4987_s18 }
  0x77   :  { %442 = vrot.lane.b32.xlu0 %v5057_v12, %s4987_s18 }
  0x79   :  { %444 = vrot.lane.b32.xlu1 %v435_v16, %s4987_s18 }
  0x7b   :  { %436 = vrot.lane.b32.xlu0 %v434_v49, %s4987_s18 }
  0x7d   :  { %v5302_v52 = vpop.permute.xlu0 %170  ;;  %4773 = vrot.lane.b32.xlu1 %v5172_v6, %s4988_s19 }
  0x7f   :  { %v5305_v53 = vpop.permute.xlu1 %164  ;;  %4778 = vrot.lane.b32.xlu0 %v5175_v9, %s4988_s19 }
  0x81   :  { %v163_v57 = vpop.permute.xlu0 %162  ;;  %4783 = vrot.lane.b32.xlu1 %v5184_v29, %s4988_s19 }
  0x82   :  { %v175_v44 = vsel %vm9545_vm1, %v163_v57, %v5305_v53 }
  0x83   :  { %v5309_v61 = vpop.permute.xlu1 %172  ;;  %487 = vrot.lane.b32.xlu0 %v384_v60, %s4989_s20 }
  0x84   :  { %v179_v25 = vsel %vm9545_vm1, %v5302_v52, %v5309_v61 }
  0x85   :  { %v5312_v56 = vpop.permute.xlu0 %166  ;;  %489 = vrot.lane.b32.xlu1 %v5214_v48, %s4989_s20 }
  0x86   :  { %v176_v26 = vsel %vm9545_vm1, %v5305_v53, %v5312_v56 }
  0x87   :  { %491 = vrot.lane.b32.xlu0 %v5070_v17, %s4989_s20  ;;  %v5318_v62 = vpop.permute.xlu1 %4688 }
  0x88   :  { %v4691_v32 = vunpack.i.h.bf16 %v5318_v62  ;;  %v4690_v41 = vunpack.i.l.bf16 %v5318_v62 }
  0x89   :  { %v4684_v0 = vpop.permute.xlu0 %4683  ;;  %493 = vrot.lane.b32.xlu1 %v434_v49, %s4989_s20 }
  0x8b   :  { %485 = vrot.lane.b32.xlu0 %v484_v63, %s4989_s20  ;;  %v5324_v1 = vpop.permute.xlu1 %168 }
  0x8c   :  { %v178_v22 = vsel %vm9545_vm1, %v5324_v1, %v5302_v52 }
  0x8d   :  { %v4694_v2 = vpop.permute.xlu0 %4693  ;;  %4788 = vrot.lane.b32.xlu1 %v5188_v33, %s4990_s21  ;;  %v4685_v33 = vunpack.i.l.bf16 %v4684_v0 }
  0x8e   :  { %v4696_v38 = vunpack.i.h.bf16 %v4694_v2 }
  0x8f   :  { %4793 = vrot.lane.b32.xlu0 %v5192_v35, %s4990_s21  ;;  %v5328_v3 = vpop.permute.xlu1 %4698  ;;  %v4686_v35 = vunpack.i.h.bf16 %v4684_v0  ;;  %v126_v39 = vsel %vm9542_vm0, %v4691_v32, %v4685_v33 }
  0x90   :  { %v4701_v46 = vunpack.i.h.bf16 %v5328_v3  ;;  %v4700_v47 = vunpack.i.l.bf16 %v5328_v3  ;;  %v536_v50 = vsel %vm5368_vm11, %v5057_v12, %v126_v39  ;;  %v130_v8 = vsel %vm9542_vm0, %v4696_v38, %v4690_v41 }
  0x91   :  { %v5330_v17 = vpop.permute.xlu0 %4703  ;;  %4798 = vrot.lane.b32.xlu1 %v5194_v36, %s4990_s21  ;;  %v4695_v36 = vunpack.i.l.bf16 %v4694_v2  ;;  %v127_v42 = vsel %vm9542_vm0, %v4685_v33, %v4686_v35  ;;  %v540_v60 = vsel %vm5368_vm11, %v5092_v23, %v130_v8 }
  0x92   :  { %v4705_v51 = vunpack.i.l.bf16 %v5330_v17  ;;  %v537_v54 = vsel %vm5368_vm11, %v5082_v20, %v127_v42  ;;  %v4706_v12 = vunpack.i.h.bf16 %v5330_v17  ;;  %v177_v20 = vsel %vm9545_vm1, %v5312_v56, %v5324_v1 }
  0x93   :  { %v5333_v5 = vpop.permute.xlu1 %4708  ;;  %v128_v43 = vsel %vm9542_vm0, %v4686_v35, %v4695_v36  ;;  %v129_v10 = vsel %vm9542_vm0, %v4695_v36, %v4696_v38  ;;  %v200_v16 = vsel %vm198_vm4, %v4700_v47, %v4701_v46  ;;  %vm348_vm0 = vcmask 859136  }
  0x94   :  { %v538_v55 = vsel %vm5368_vm11, %v5077_v19, %v128_v43  ;;  %v4710_v58 = vunpack.i.l.bf16 %v5333_v5  ;;  %v4711_v19 = vunpack.i.h.bf16 %v5333_v5  ;;  %v539_v31 = vsel %vm5368_vm11, %v5098_v24, %v129_v10 }
  0x95   :  { %v5335_v6 = vpop.permute.xlu0 %782  ;;  %v201_v52 = vsel %vm198_vm4, %v4701_v46, %v4705_v51  ;;  %v549_v57 = vsel %vm533_vm2, %v537_v54, %v176_v26  ;;  %v553_v24 = vsel %vm533_vm2, %v538_v55, %v177_v20  ;;  %v545_v56 = vsel %vm533_vm2, %v536_v50, %v175_v44 }
  0x96   :  { %v202_v63 = vsel %vm198_vm4, %v4705_v51, %v4706_v12  ;;  %v203_v0 = vsel %vm198_vm4, %v4706_v12, %v4710_v58  ;;  %v199_v17 = vsel %vm198_vm4, %v4711_v19, %v4700_v47  ;;  %v5437_v32 = vsel %vm5416_vm3, %v549_v57, %v200_v16  ;;  %vm5475_vm4 = vmand %vm9547_vm9, %vm602_vm10 }
  0x97   :  { %v5337_v7 = vpop.permute.xlu1 %784  ;;  %v557_v33 = vsel %vm533_vm2, %v539_v31, %v178_v22  ;;  %v561_v35 = vsel %vm533_vm2, %v540_v60, %v179_v25  ;;  %v5446_v38 = vsel %vm5416_vm3, %v553_v24, %v201_v52  ;;  %v5471_v51 = vsel %vm5416_vm3, %v545_v56, %v199_v17 }
  0x98   :  { %v794_v36 = vsel %vm792_vm7, %v5335_v6, %v5337_v7  ;;  %v5454_v43 = vsel %vm5416_vm3, %v557_v33, %v202_v63  ;;  %v5461_v46 = vsel %vm5416_vm3, %v561_v35, %v203_v0  ;;  %vm9690_vm10 = vcmask 719872  }
  0x99   :  { %v5339_v9 = vpop.permute.xlu0 %786  ;;  %v802_v12 = vsel %vm9548_vm5, %v5437_v32, %v794_v36  ;;  %vm472_vm1 = vcmask 695296  }
  0x9b   :  { %v5341_v13 = vpop.permute.xlu1 %788 }
  0x9c   :  { %v796_v44 = vsel %vm792_vm7, %v5339_v9, %v5341_v13 }
  0x9d   :  { %v5343_v14 = vpop.permute.xlu0 %790  ;;  %v808_v20 = vsel %vm9548_vm5, %v5454_v43, %v796_v44 }
  0x9f   :  { %v5345_v15 = vpop.permute.xlu1 %4713 }
  0xa0   :  { %v4716_v1 = vunpack.i.h.bf16 %v5345_v15  ;;  %v4715_v2 = vunpack.i.l.bf16 %v5345_v15 }
  0xa1   :  { %v5347_v28 = vpop.permute.xlu0 %4718 }
  0xa2   :  { %v4720_v47 = vunpack.i.l.bf16 %v5347_v28  ;;  %v5465_v50 = vsel %vm9544_vm8, %v4715_v2, %v4716_v1  ;;  %v4721_v10 = vunpack.i.h.bf16 %v5347_v28  ;;  %v795_v28 = vsel %vm792_vm7, %v5337_v7, %v5339_v9 }
  0xa3   :  { %v5349_v29 = vpop.permute.xlu1 %4723  ;;  %v817_v52 = vsel %vm5475_vm4, %v802_v12, %v5465_v50 }
  0xa4   :  { %v4726_v8 = vunpack.i.h.bf16 %v5349_v29  ;;  %v5485_v25 = vunpack.i.l.bf16 %v5349_v29  ;;  %v797_v29 = vsel %vm792_vm7, %v5341_v13, %v5343_v14  ;;  %v5511_v60 = vsel %vm9544_vm8, %v4716_v1, %v4720_v47 }
  0xa5   :  { %v5351_v11 = vpop.permute.xlu0 %780  ;;  %v5520_v57 = vsel %vm9544_vm8, %v4720_v47, %v4721_v10  ;;  %v811_v44 = vsel %vm9548_vm5, %v5461_v46, %v797_v29 }
  0xa6   :  { %v793_v16 = vsel %vm792_vm7, %v5351_v11, %v5335_v6  ;;  %v5523_v24 = vsel %vm9544_vm8, %v4726_v8, %v4715_v2  ;;  %v5531_v0 = vsel %vm9544_vm8, %v4721_v10, %v5485_v25  ;;  %v819_v47 = vsel %vm5475_vm4, %v808_v20, %v5520_v57 }
  0xa7   :  { %v5354_v34 = vpop.permute.xlu1 %286  ;;  %v799_v2 = vsel %vm9548_vm5, %v5471_v51, %v793_v16  ;;  %vm669_vm7 = vcmask 1044480   ;;  %vm704_vm8 = vsmask.f32 5376 }
  0xa8   :  { %v816_v29 = vsel %vm5475_vm4, %v799_v2, %v5523_v24 }
  0xa9   :  { %v5356_v37 = vpop.permute.xlu0 %288 }
  0xaa   :  { %v5490_v26 = vsel %vm9546_vm12, %v5354_v34, %v5356_v37 }
  0xab   :  { %v5359_v40 = vpop.permute.xlu1 %290  ;;  %v826_v13 = vsel %vm9547_vm9, %v817_v52, %v5490_v26 }
  0xad   :  { %v5374_v48 = vpop.permute.xlu0 %292 }
  0xae   :  { %v5536_v6 = vsel %vm9546_vm12, %v5359_v40, %v5374_v48 }
  0xaf   :  { %v5392_v59 = vpop.permute.xlu1 %294 }
  0xb0   :  { %v5561_v10 = vsel %vm9546_vm12, %v5374_v48, %v5392_v59  ;;  %v820_v48 = vsel %vm5475_vm4, %v811_v44, %v5531_v0 }
  0xb1   :  { %v5420_v53 = vpop.permute.xlu0 %284 }
  0xb2   :  { %v5579_v20 = vsel %vm9546_vm12, %v5420_v53, %v5354_v34  ;;  %v835_v34 = vsel %vm9547_vm9, %v820_v48, %v5561_v10 }
  0xb3   :  { %v5432_v3 = vpop.permute.xlu1 %4728 }
  0xb4   :  { %v4731_v15 = vunpack.i.h.bf16 %v5432_v3  ;;  %v4730_v39 = vunpack.i.l.bf16 %v5432_v3 }
  0xb5   :  { %v5450_v42 = vpop.permute.xlu0 %4733 }
  0xb6   :  { %v4736_v19 = vunpack.i.h.bf16 %v5450_v42  ;;  %v4735_v22 = vunpack.i.l.bf16 %v5450_v42  ;;  %v5499_v7 = vsel %vm9543_vm13, %v4730_v39, %v4731_v15  ;;  %v805_v42 = vsel %vm9548_vm5, %v5446_v38, %v795_v28 }
  0xb7   :  { %v4739_v55 = vpop.permute.xlu1 %4738  ;;  %v841_v1 = vsel %vm5503_vm6, %v826_v13, %v5499_v7  ;;  %v818_v8 = vsel %vm5475_vm4, %v805_v42, %v5511_v60  ;;  %v9554_v42 = vmov 0  }
  0xb8   :  { %v5527_v56 = vunpack.i.l.bf16 %v4739_v55  ;;  %v4741_v17 = vunpack.i.h.bf16 %v4739_v55  ;;  %v5549_v36 = vsel %vm9543_vm13, %v4735_v22, %v4736_v19  ;;  %v832_v55 = vsel %vm9547_vm9, %v819_v47, %v5536_v6  ;;  %1088 = vmatprep.mubr.bf16.mxu1 %v9554_v42  ;;  %1015 = vmatprep.mubr.bf16.mxu0 %v9554_v42 }
  0xb9   :  { %v339_v31 = vpop.permute.xlu0 %338  ;;  %4803 = vset.pattern.permute.xlu1 %v9554_v42  ;;  %4802 = vset.pattern.permute.xlu0 %v9554_v42 }
  0xba   :  { %v5571_v28 = vsel %vm9543_vm13, %v4736_v19, %v5527_v56  ;;  %v843_v19 = vsel %vm5503_vm6, %v832_v55, %v5549_v36  ;;  %v5597_v53 = vsel %vm9543_vm13, %v4741_v17, %v4730_v39  ;;  %v823_v39 = vsel %vm9547_vm9, %v816_v29, %v5579_v20 }
  0xbb   :  { %v341_v63 = vpop.permute.xlu1 %340  ;;  %v840_v55 = vsel %vm5503_vm6, %v823_v39, %v5597_v53 }
  0xbc   :  { %v5539_v11 = vsel %vm348_vm0, %v339_v31, %v341_v63 }
  0xbd   :  { %v343_v33 = vpop.permute.xlu0 %342  ;;  %v849_v35 = vsel %vm9629_vm14, %v841_v1, %v5539_v11  ;;  %v5602_v1 = vsel %vm9546_vm12, %v5356_v37, %v5359_v40  ;;  %v5620_v40 = vsel %vm9543_vm13, %v4731_v15, %v4735_v22  ;;  %vm703_vm13 = vcmask 1045504  }
  0xbe   :  { %866 = vrot.lane.b32.xlu0 %v849_v35, %s4991_s22  ;;  %v844_v35 = vsel %vm5503_vm6, %v835_v34, %v5571_v28  ;;  %v5625_v44 = vsel %vm348_vm0, %v341_v63, %v343_v33  ;;  %v829_v3 = vsel %vm9547_vm9, %v818_v8, %v5602_v1  ;;  %v541_v8 = vsel %vm5368_vm11, %v5073_v18, %v4690_v41 }
  0xbf   :  { %v345_v12 = vpop.permute.xlu1 %344  ;;  %v565_v29 = vsel %vm533_vm2, %v541_v8, %v5309_v61  ;;  %vm9549_vm2 = vcmask 1014784   ;;  %vm670_vm11 = vsmask.f32 4352  ;;  %vm9553_vm12 = vcmask 1046528  }
  0xc0   :  { %v5585_v16 = vsel %vm348_vm0, %v343_v33, %v345_v12  ;;  %v5663_v62 = vsel %vm5416_vm3, %v565_v29, %v4710_v58  ;;  %vm9550_vm3 = vcmask 703488  }
  0xc1   :  { %v5590_v52 = vpop.permute.xlu0 %346  ;;  %v853_v13 = vsel %vm9629_vm14, %v843_v19, %v5585_v16  ;;  %v814_v18 = vsel %vm9548_vm5, %v5663_v62, %v5343_v14 }
  0xc2   :  { %870 = vrot.lane.b32.xlu0 %v853_v13, %s4991_s22  ;;  %v5607_v2 = vsel %vm348_vm0, %v345_v12, %v5590_v52 }
  0xc3   :  { %v337_v17 = vpop.permute.xlu1 %336  ;;  %v855_v37 = vsel %vm9629_vm14, %v844_v35, %v5607_v2 }
  0xc4   :  { %v5628_v47 = vsel %vm348_vm0, %v337_v17, %v339_v31  ;;  %872 = vrot.lane.b32.xlu1 %v855_v37, %s4991_s22  ;;  %v842_v31 = vsel %vm5503_vm6, %v829_v3, %v5620_v40  ;;  %vm372_vm0 = vcmask 850944  }
  0xc5   :  { %v230_v15 = vpop.permute.xlu0 %229  ;;  %v847_v22 = vsel %vm9629_vm14, %v840_v55, %v5628_v47  ;;  %v851_v33 = vsel %vm9629_vm14, %v842_v31, %v5625_v44 }
  0xc6   :  { %864 = vrot.lane.b32.xlu0 %v847_v22, %s4991_s22 }
  0xc7   :  { %v232_v63 = vpop.permute.xlu1 %231 }
  0xc8   :  { %868 = vrot.lane.b32.xlu1 %v851_v33, %s4991_s22  ;;  %v241_v55 = vsel %vm9549_vm2, %v230_v15, %v232_v63 }
  0xc9   :  { %v234_v12 = vpop.permute.xlu0 %233  ;;  %v583_v31 = vsel %vm9548_vm5, %v5437_v32, %v241_v55 }
  0xca   :  { %396 = vrot.lane.b32.xlu0 %v5241_v27, %s4985_s16  ;;  %v242_v3 = vsel %vm9549_vm2, %v232_v63, %v234_v12  ;;  %v605_v63 = vsel %vm5475_vm4, %v583_v31, %v5465_v50 }
  0xcb   :  { %v5653_v48 = vpop.permute.xlu1 %235  ;;  %v587_v33 = vsel %vm9548_vm5, %v5446_v38, %v242_v3 }
  0xcc   :  { %237 = vrot.lane.b32.xlu1 %v5092_v23, %s4983_s14  ;;  %v821_v23 = vsel %vm5475_vm4, %v814_v18, %v5485_v25  ;;  %v243_v29 = vsel %vm9549_vm2, %v234_v12, %v5653_v48  ;;  %v606_v32 = vsel %vm5475_vm4, %v587_v33, %v5511_v60 }
  0xcd   :  { %v228_v19 = vpop.permute.xlu0 %227  ;;  %v838_v61 = vsel %vm9547_vm9, %v821_v23, %v5392_v59  ;;  %v591_v38 = vsel %vm9548_vm5, %v5454_v43, %v243_v29 }
  0xce   :  { %495 = vrot.lane.b32.xlu0 %v5256_v30, %s4989_s20  ;;  %v845_v30 = vsel %vm5503_vm6, %v838_v61, %v5527_v56  ;;  %v240_v18 = vsel %vm9549_vm2, %v228_v19, %v230_v15  ;;  %v617_v15 = vsel %vm9547_vm9, %v605_v63, %v5490_v26  ;;  %v621_v19 = vsel %vm9547_vm9, %v606_v32, %v5602_v1 }
  0xcf   :  { %v5670_v27 = vpop.permute.xlu1 %4743  ;;  %v857_v14 = vsel %vm9629_vm14, %v845_v30, %v5590_v52  ;;  %v579_v12 = vsel %vm9548_vm5, %v5471_v51, %v240_v18  ;;  %v607_v50 = vsel %vm5475_vm4, %v591_v38, %v5520_v57  ;;  %v639_v51 = vsel %vm5503_vm6, %v617_v15, %v5499_v7  ;;  %vm5782_vm5 = vmand %vm669_vm7, %vm670_vm11 }
  0xd0   :  { %446 = vrot.lane.b32.xlu1 %v5248_v21, %s4987_s18  ;;  %v604_v43 = vsel %vm5475_vm4, %v579_v12, %v5523_v24  ;;  %v640_v26 = vsel %vm5503_vm6, %v621_v19, %v5620_v40  ;;  %v625_v1 = vsel %vm9547_vm9, %v607_v50, %v5536_v6  ;;  %v4746_v57 = vunpack.i.h.bf16 %v5670_v27  ;;  %vm5828_vm11 = vmand %vm703_vm13, %vm704_vm8 }
  0xd1   :  { %v4749_v5 = vpop.permute.xlu0 %4748  ;;  %v613_v3 = vsel %vm9547_vm9, %v604_v43, %v5579_v20  ;;  %v651_v6 = vsel %vm9629_vm14, %v639_v51, %v5539_v11  ;;  %v641_v20 = vsel %vm5503_vm6, %v625_v1, %v5549_v36  ;;  %vm738_vm9 = vsmask.f32 6400 }
  0xd2   :  { %v4751_v45 = vunpack.i.h.bf16 %v4749_v5  ;;  %v4750_v55 = vunpack.i.l.bf16 %v4749_v5  ;;  %v638_v29 = vsel %vm5503_vm6, %v613_v3, %v5597_v53  ;;  %vm497_vm2 = vcmask 687104  }
  0xd3   :  { %v5682_v41 = vpop.permute.xlu1 %4753  ;;  %v659_v32 = vsel %vm9629_vm14, %v641_v20, %v5585_v16  ;;  %v647_v1 = vsel %vm9629_vm14, %v638_v29, %v5628_v47  ;;  %vm772_vm8 = vsmask.f32 7424 }
  0xd4   :  { %v4756_v58 = vunpack.i.h.bf16 %v5682_v41  ;;  %874 = vrot.lane.b32.xlu1 %v857_v14, %s4991_s22  ;;  %v4745_v14 = vunpack.i.l.bf16 %v5670_v27  ;;  %v4755_v7 = vunpack.i.l.bf16 %v5682_v41  ;;  %v655_v27 = vsel %vm9629_vm14, %v640_v26, %v5625_v44 }
  0xd5   :  { %v5688_v21 = vpop.permute.xlu0 %388  ;;  %v375_v31 = vsel %vm372_vm0, %v4746_v57, %v4750_v55  ;;  %v376_v33 = vsel %vm372_vm0, %v4750_v55, %v4751_v45 }
  0xd6   :  { %v5693_v49 = vsel %vm372_vm0, %v4751_v45, %v4756_v58  ;;  %v374_v5 = vsel %vm372_vm0, %v4745_v14, %v4746_v57  ;;  %v373_v53 = vsel %vm372_vm0, %v4755_v7, %v4745_v14  ;;  %v674_v51 = vsel %vm5782_vm5, %v655_v27, %v375_v31 }
  0xd7   :  { %v5695_v13 = vpop.permute.xlu1 %390  ;;  %v673_v43 = vsel %vm5782_vm5, %v651_v6, %v374_v5  ;;  %v675_v26 = vsel %vm5782_vm5, %v659_v32, %v376_v33  ;;  %vm521_vm0 = vcmask 556032   ;;  %v672_v55 = vsel %vm5782_vm5, %v647_v1, %v373_v53  ;;  %v4808_v1 = vld [vmem:[%s9534_s2 + $0x10] sm:$0xff]  }
  0xd9   :  { %v5697_v34 = vpop.permute.xlu0 %392 }
  0xda   :  { %v401_v19 = vsel %vm9690_vm10, %v5695_v13, %v5697_v34 }
  0xdb   :  { %v5699_v35 = vpop.permute.xlu1 %394  ;;  %v689_v6 = vsel %vm669_vm7, %v674_v51, %v401_v19 }
  0xdc   :  { %v402_v57 = vsel %vm9690_vm10, %v5697_v34, %v5699_v35 }
  0xdd   :  { %v5701_v39 = vpop.permute.xlu0 %386  ;;  %v693_v33 = vsel %vm669_vm7, %v675_v26, %v402_v57 }
  0xde   :  { %v399_v14 = vsel %vm9690_vm10, %v5701_v39, %v5688_v21 }
  0xdf   :  { %v5703_v17 = vpop.permute.xlu1 %4758  ;;  %v681_v29 = vsel %vm669_vm7, %v672_v55, %v399_v14 }
  0xe0   :  { %v4761_v36 = vunpack.i.h.bf16 %v5703_v17  ;;  %v4760_v44 = vunpack.i.l.bf16 %v5703_v17  ;;  %v400_v17 = vsel %vm9690_vm10, %v5688_v21, %v5695_v13 }
  0xe1   :  { %v5705_v37 = vpop.permute.xlu0 %4763  ;;  %v685_v47 = vsel %vm669_vm7, %v673_v43, %v400_v17 }
  0xe2   :  { %v4766_v38 = vunpack.i.h.bf16 %v5705_v37  ;;  %v4765_v12 = vunpack.i.l.bf16 %v5705_v37  ;;  %v424_v3 = vsel %vm9551_vm15, %v4760_v44, %v4761_v36 }
  0xe3   :  { %v5709_v22 = vpop.permute.xlu1 %4768  ;;  %v707_v53 = vsel %vm5828_vm11, %v685_v47, %v424_v3 }
  0xe4   :  { %v4770_v50 = vunpack.i.l.bf16 %v5709_v22  ;;  %v425_v34 = vsel %vm9551_vm15, %v4761_v36, %v4765_v12  ;;  %v426_v21 = vsel %vm9551_vm15, %v4765_v12, %v4766_v38 }
  0xe5   :  { %v5715_v8 = vpop.permute.xlu0 %438  ;;  %v708_v19 = vsel %vm5828_vm11, %v689_v6, %v425_v34 }
  0xe6   :  { %v423_v27 = vsel %vm9551_vm15, %v4770_v50, %v4760_v44  ;;  %v882_v44 = vld [vmem:[%s9535_s3] sm:$0xff]  ;;  %v709_v50 = vsel %vm5828_vm11, %v693_v33, %v426_v21 }
  0xe7   :  { %v5720_v23 = vpop.permute.xlu1 %440  ;;  %892 = vperm.xlu0 %4802, %v882_v44  }
  0xe8   :  { %v450_v36 = vsel %vm9550_vm3, %v5715_v8, %v5720_v23 }
  0xe9   :  { %v5730_v61 = vpop.permute.xlu0 %442 }
  0xeb   :  { %v5738_v30 = vpop.permute.xlu1 %444 }
  0xec   :  { %v452_v12 = vsel %vm9550_vm3, %v5730_v61, %v5738_v30 }
  0xed   :  { %v5746_v60 = vpop.permute.xlu0 %436  ;;  %v727_v3 = vsel %vm703_vm13, %v709_v50, %v452_v12 }
  0xee   :  { %v449_v17 = vsel %vm9550_vm3, %v5746_v60, %v5715_v8  ;;  %v884_v8 = vld [vmem:[%s9535_s3 + $0x10] sm:$0xff]  ;;  %v719_v60 = vsel %vm703_vm13, %v707_v53, %v450_v36  ;;  %v887_v53 = vld [vmem:[%s9535_s3 + $0x28] sm:$0xff] }
  0xef   :  { %v5758_v24 = vpop.permute.xlu1 %4773 }
  0xf0   :  { %v4776_v20 = vunpack.i.h.bf16 %v5758_v24  ;;  %v4775_v5 = vunpack.i.l.bf16 %v5758_v24  ;;  %v883_v24 = vld [vmem:[%s9535_s3 + $0x8] sm:$0xff] }
  0xf1   :  { %v5763_v40 = vpop.permute.xlu0 %4778  ;;  %897 = vperm.xlu1 %4803, %v883_v24  }
  0xf2   :  { %v4781_v45 = vunpack.i.h.bf16 %v5763_v40  ;;  %v4780_v31 = vunpack.i.l.bf16 %v5763_v40  ;;  %v451_v40 = vsel %vm9550_vm3, %v5720_v23, %v5730_v61  ;;  %v706_v23 = vsel %vm5828_vm11, %v681_v29, %v423_v27  ;;  %v885_v61 = vld [vmem:[%s9535_s3 + $0x18] sm:$0xff]  ;;  %vm5883_vm3 = vmand %vm9553_vm12, %vm738_vm9 }
  0xf3   :  { %v5778_v18 = vpop.permute.xlu1 %4783  ;;  %v474_v26 = vsel %vm472_vm1, %v4775_v5, %v4776_v20  ;;  %v723_v55 = vsel %vm703_vm13, %v708_v19, %v451_v40  ;;  %v715_v47 = vsel %vm703_vm13, %v706_v23, %v449_v17  ;;  %vm9706_vm9 = vcmask 1047552   ;;  %907 = vperm.xlu0 %4802, %v885_v61   ;;  %v886_v17 = vld [vmem:[%s9535_s3 + $0x20] sm:$0xff] }
  0xf4   :  { %v4786_v63 = vunpack.i.h.bf16 %v5778_v18  ;;  %v4785_v43 = vunpack.i.l.bf16 %v5778_v18  ;;  %v476_v57 = vsel %vm472_vm1, %v4780_v31, %v4781_v45  ;;  %v475_v14 = vsel %vm472_vm1, %v4776_v20, %v4780_v31  ;;  %vm5899_vm15 = vmand %vm9706_vm9, %vm772_vm8 }
  0xf5   :  { %v5795_v15 = vpop.permute.xlu0 %487  ;;  %902 = vperm.xlu1 %4803, %v884_v8   ;;  %v741_v31 = vsel %vm5883_vm3, %v719_v60, %v474_v26  ;;  %vm9709_vm8 = vcmask 1014784   ;;  %vm9710_vm9 = vcmask 1041408  }
  0xf6   :  { %v5807_v16 = vsel %vm472_vm1, %v4781_v45, %v4786_v63  ;;  %v473_v36 = vsel %vm472_vm1, %v4785_v43, %v4775_v5  ;;  %vm9552_vm1 = vcmask 547840   ;;  %v4809_v45 = vld [vmem:[%s9534_s2 + $0x18] sm:$0xff]  }
  0xf7   :  { %v490_v13 = vpop.permute.xlu1 %489  ;;  %917 = vperm.xlu0 %4802, %v887_v53  }
  0xf8   :  { %v499_v6 = vsel %vm497_vm2, %v5795_v15, %v490_v13 }
  0xf9   :  { %v492_v39 = vpop.permute.xlu0 %491  ;;  %v753_v12 = vsel %vm9553_vm12, %v741_v31, %v499_v6  ;;  %912 = vperm.xlu1 %4803, %v886_v17  }
  0xfa   :  { %v500_v21 = vsel %vm497_vm2, %v490_v13, %v492_v39  ;;  %v743_v13 = vsel %vm5883_vm3, %v727_v3, %v476_v57  ;;  %v740_v57 = vsel %vm5883_vm3, %v715_v47, %v473_v36 }
  0xfb   :  { %v5849_v32 = vpop.permute.xlu1 %493 }
  0xfc   :  { %v501_v27 = vsel %vm497_vm2, %v492_v39, %v5849_v32  ;;  %v742_v39 = vsel %vm5883_vm3, %v723_v55, %v475_v14  ;;  %v889_v14 = vld [vmem:[%s9535_s3 + $0x38] sm:$0xff] }
  0xfd   :  { %v486_v51 = vpop.permute.xlu0 %485  ;;  %v761_v23 = vsel %vm9553_vm12, %v743_v13, %v501_v27  ;;  %v757_v43 = vsel %vm9553_vm12, %v742_v39, %v500_v21  ;;  %927 = vperm.xlu0 %4802, %v889_v14   ;;  %v4993_v27 = vmov 65535  }
  0xfe   :  { %v498_v19 = vsel %vm497_vm2, %v486_v51, %v5795_v15 }
  0xff   :  { %v4789_v34 = vpop.permute.xlu1 %4788  ;;  %v749_v3 = vsel %vm9553_vm12, %v740_v57, %v498_v19  ;;  %vm9712_vm12 = vcmask 1042432  }
 0x100   :  { %v4791_v33 = vunpack.i.h.bf16 %v4789_v34  ;;  %v4790_v29 = vunpack.i.l.bf16 %v4789_v34  ;;  %v888_v34 = vld [vmem:[%s9535_s3 + $0x30] sm:$0xff] }
 0x101   :  { %v4794_v20 = vpop.permute.xlu0 %4793  ;;  %922 = vperm.xlu1 %4803, %v888_v34  }
 0x102   :  { %v4796_v44 = vunpack.i.h.bf16 %v4794_v20  ;;  %v4795_v24 = vunpack.i.l.bf16 %v4794_v20  ;;  %v523_v40 = vsel %vm521_vm0, %v4790_v29, %v4791_v33 }
 0x103   :  { %v5920_v50 = vpop.permute.xlu1 %4798  ;;  %v775_v5 = vsel %vm5899_vm15, %v753_v12, %v523_v40 }
 0x104   :  { %v4801_v61 = vunpack.i.h.bf16 %v5920_v50  ;;  %v4800_v8 = vunpack.i.l.bf16 %v5920_v50  ;;  %983 = vmatprep.subr.bf16.mxu0 %v775_v5  ;;  %v525_v60 = vsel %vm521_vm0, %v4795_v24, %v4796_v44  ;;  %v524_v26 = vsel %vm521_vm0, %v4791_v33, %v4795_v24  ;;  %v5966_v5 = vld [vmem:[%s9534_s2] sm:$0xff]  }
 0x105   :  { %v777_v15 = vsel %vm5899_vm15, %v761_v23, %v525_v60  ;;  %v776_v51 = vsel %vm5899_vm15, %v757_v43, %v524_v26  ;;  %v963_v33 = vsel %vm9629_vm14, 4294967295, %v4993_v27 }
 0x106   :  { %1056 = vmatprep.subr.bf16.mxu1 %v777_v15  ;;  %v522_v55 = vsel %vm521_vm0, %v4800_v8, %v4790_v29  ;;  %v5944_v6 = vsel %vm521_vm0, %v4796_v44, %v4801_v61  ;;  %v5953_v20 = vsel %vm669_vm7, %v963_v33, 0  ;;  %vm950_vm0 = vcmask 203776  }
 0x107   :  { %1057 = vmatpush1.bf16.msra.mxu1 %v776_v51  ;;  %v774_v47 = vsel %vm5899_vm15, %v749_v3, %v522_v55 }
 0x108   :  { %984 = vmatpush1.bf16.msra.mxu0 %v774_v47  ;;  %v30_v47 = vld [vmem:[%s9536_s1] sm:$0x3f]  ;;  %s4994_s1 = smov 42  }
 0x130   :  { %v867_v21 = vpop.permute.xlu0 %866 }
 0x134   :  { %v871_v29 = vpop.permute.xlu0 %870 }
 0x136   :  { %v873_v31 = vpop.permute.xlu1 %872 }
 0x137   :  { %v880_v13 = vsel %vm9552_vm1, %v871_v29, %v873_v31 }
 0x138   :  { %v865_v39 = vpop.permute.xlu0 %864  ;;  %v975_v36 = vand.u32 %v5953_v20, %v880_v13 }
 0x139   :  { %v877_v53 = vsel %vm9552_vm1, %v865_v39, %v867_v21 }
 0x13a   :  { %1058 = vmatprep.subr.bf16.mxu1 %v975_v36  ;;  %v869_v44 = vpop.permute.xlu1 %868  ;;  %v966_v19 = vand.u32 %v5953_v20, %v877_v53 }
 0x13b   :  { %v878_v24 = vsel %vm9552_vm1, %v867_v21, %v869_v44  ;;  %v879_v40 = vsel %vm9552_vm1, %v869_v44, %v871_v29  ;;  %vm9711_vm1 = vmmov %vm9710_vm9 }
 0x13c   :  { %v969_v12 = vand.u32 %v5953_v20, %v878_v24  ;;  %v972_v17 = vand.u32 %v5953_v20, %v879_v40  ;;  %v397_v60 = vpop.permute.xlu0 %396 }
 0x13e   :  { %985 = vmatprep.subr.bf16.mxu0 %v969_v12  ;;  %1059 = vmatpush1.bf16.msra.mxu1 %v972_v17  ;;  %v238_v23 = vpop.permute.xlu1 %237  ;;  %v1253_v17 = vsub.s32 0, %v5044_v4 }
 0x13f   :  { %v244_v43 = vsel %vm9709_vm8, %v5653_v48, %v238_v23  ;;  %v599_v8 = vsel %vm9710_vm9, %v5663_v62, %v238_v23  ;;  %986 = vmatpush1.bf16.msra.mxu0 %v966_v19  ;;  %v4771_v48 = vunpack.i.h.bf16 %v5709_v22  ;;  %vm9713_vm8 = vmmov %vm9712_vm12  ;;  %v1261_v19 = vsub.s32 2, %v5044_v4 }
 0x140   :  { %v595_v26 = vsel %vm9711_vm1, %v5461_v46, %v244_v43  ;;  %v609_v15 = vsel %vm5475_vm4, %v599_v8, %v5485_v25  ;;  %v496_v41 = vpop.permute.xlu0 %495  ;;  %v1265_v43 = vsub.s32 3, %v5044_v4  ;;  %vm1470_vm9 = vcmask 1047888  }
 0x141   :  { %v608_v51 = vsel %vm5475_vm4, %v595_v26, %v5531_v0  ;;  %v633_v57 = vsel %vm9712_vm12, %v609_v15, %v5392_v59  ;;  %4543 = vmatmul.mubr.msk.bf16.vlgmr.msra.gmra.mrb[0].mxu1 %vm950_vm0, %v5966_v5  ;;  %vm9714_vm12 = vcmask 711680   ;;  %v502_v55 = vsel %vm497_vm2, %v5849_v32, %v496_v41 }
 0x142   :  { %v629_v62 = vsel %vm9713_vm8, %v608_v51, %v5561_v10  ;;  %v643_v46 = vsel %vm5503_vm6, %v633_v57, %v5527_v56  ;;  %4539 = vmatmul.mubr.msk.bf16.vlgmr.msra.gmra.mrb[0].mxu0 %vm950_vm0, %v5966_v5  ;;  %v447_v54 = vpop.permute.xlu1 %446  ;;  %1098 = vmatprep.mubr.bf16.mxu1 %v9554_v42  ;;  %v403_v10 = vsel %vm9690_vm10, %v5699_v35, %v397_v60  ;;  %vm9716_vm4 = vcmask 1046528  }
 0x143   :  { %v642_v59 = vsel %vm5503_vm6, %v629_v62, %v5571_v28  ;;  %v667_v25 = vsel %vm9629_vm14, %v643_v46, %v5590_v52  ;;  %1025 = vmatprep.mubr.bf16.mxu0 %v9554_v42  ;;  %v4807_v52 = vld [vmem:[%s9534_s2 + $0x8] sm:$0xff]   ;;  %vm9718_vm6 = vcmask 547840   ;;  %vm31_vm2 = vcmp.gt.f32.partialorder %v30_v47, 0.5 }
 0x144   :  { %v663_v0 = vsel %vm9629_vm14, %v642_v59, %v5607_v2  ;;  %v677_v56 = vsel %vm5782_vm5, %v667_v25, %v4756_v58  ;;  %v427_v2 = vsel %vm9714_vm12, %v4766_v38, %v4771_v48  ;;  %v6090_v23 = vsel %vm31_vm2, 1, %v9554_v42 }
 0x145   :  { %v676_v9 = vsel %vm5782_vm5, %v663_v0, %v5693_v49  ;;  %v701_v28 = vsel %vm669_vm7, %v677_v56, %v397_v60  ;;  %vm9715_vm5 = vcmask 703488   ;;  %v1257_v15 = vsub.s32 1, %v5044_v4 }
 0x146   :  { %v697_v58 = vsel %vm669_vm7, %v676_v9, %v403_v10  ;;  %v711_v35 = vsel %vm5828_vm11, %v701_v28, %v4771_v48  ;;  %v453_v49 = vsel %vm9715_vm5, %v5738_v30, %v447_v54  ;;  %v875_v38 = vpop.permute.xlu1 %874  ;;  %v6100_v62 = vrot.slane %v6090_v23, %v1253_v17 }
 0x147   :  { %v710_v22 = vsel %vm5828_vm11, %v697_v58, %v427_v2  ;;  %v735_v11 = vsel %vm703_vm13, %v711_v35, %v447_v54  ;;  %v881_v32 = vsel %vm9718_vm6, %v873_v31, %v875_v38  ;;  %v981_v3 = vand.u32 %v5953_v20, %v875_v38 }
 0x148   :  { %v731_v14 = vsel %vm703_vm13, %v710_v22, %v453_v49  ;;  %v745_v37 = vsel %vm5883_vm3, %v735_v11, %v4786_v63  ;;  %vm9717_vm13 = vmmov %vm9716_vm4  ;;  %v978_v50 = vand.u32 %v5953_v20, %v881_v32  ;;  %9719 = vst [vmem:[#allocation5_spill] sm:$0xff] %v6100_v62  ;;  %v6103_v46 = vrot.slane %v6090_v23, %v1261_v19 }
 0x149   :  { %4544 = vmatmul.mubr.msk.bf16.gmra.mrb[4].mxu1 %vm950_vm0, %v4807_v52  ;;  %v769_v7 = vsel %vm9716_vm4, %v745_v37, %v496_v41  ;;  %v744_v30 = vsel %vm5883_vm3, %v731_v14, %v5807_v16  ;;  %v6108_v56 = vrot.slane %v6090_v23, %v1265_v43  ;;  %v6114_v58 = vrot.slane %v6090_v23, %v1257_v15 }
 0x14a   :  { %4540 = vmatmul.mubr.msk.bf16.gmra.mrb[4].mxu0 %vm950_vm0, %v4807_v52  ;;  %v779_v18 = vsel %vm5899_vm15, %v769_v7, %v4801_v61  ;;  %v765_v63 = vsel %vm9717_vm13, %v744_v30, %v502_v55  ;;  %1108 = vmatprep.mubr.bf16.mxu1 %v9554_v42  ;;  %9720 = vst [vmem:[#allocation6_spill] sm:$0xff] %v6103_v46  ;;  %vm1277_vm7 = vcmp.eq.s32.totalorder %v6103_v46, 1  ;;  %vm1496_vm8 = vcmask 343208  }
 0x14b   :  { %1129 = vmatprep.subr.bf16.mxu0 %v779_v18  ;;  %v778_v16 = vsel %vm5899_vm15, %v765_v63, %v5944_v6  ;;  %1035 = vmatprep.mubr.bf16.mxu0 %v9554_v42  ;;  %9721 = vst [vmem:[#allocation7_spill] sm:$0xff] %v6108_v56  ;;  %9722 = vst [vmem:[#allocation8_spill] sm:$0xff] %v6114_v58  ;;  %vm1275_vm15 = vcmp.eq.s32.totalorder %v6100_v62, 1  ;;  %vm1278_vm3 = vcmp.eq.s32.totalorder %v6108_v56, 1  ;;  %vm1276_vm11 = vcmp.eq.s32.totalorder %v6114_v58, 1 }
 0x14c   :  { %1130 = vmatpush1.bf16.msra.mxu0 %v778_v16  ;;  %vm1425_vm12 = vcmask 343040   ;;  %vm1476_vm5 = vcmask 637952   ;;  %vm9663_vm4 = vcmask 810608   ;;  %vm9728_vm13 = vcmask 875520  }
 0x14d   :  { %1131 = vmatprep.subr.bf16.mxu0 %v981_v3  ;;  %vm9729_vm6 = vmmov %vm9728_vm13  ;;  %vm9848_vm14 = vcmask 875520  }
 0x14e   :  { %vm9742_vm2 = vmmov %vm9729_vm6 }
 0x150   :  { %1132 = vmatpush1.bf16.msra.mxu0 %v978_v50 }
 0x151   :  { %4545 = vmatmul.mubr.msk.bf16.gmra.mrb[8].mxu1 %vm950_vm0, %v4808_v1 }
 0x152   :  { %4541 = vmatmul.mubr.msk.bf16.gmra.mrb[8].mxu0 %vm950_vm0, %v4808_v1  ;;  %1118 = vmatprep.mubr.bf16.mxu1 %v9554_v42 }
 0x153   :  { %1045 = vmatprep.mubr.bf16.mxu0 %v9554_v42 }
 0x159   :  { %4546 = vmatmul.mubr.msk.bf16.gmra.mrb[12].mxu1 %vm950_vm0, %v4809_v45 }
 0x15a   :  { %4542 = vmatmul.mubr.msk.bf16.gmra.mrb[12].mxu0 %vm950_vm0, %v4809_v45 }
 0x15b   :  { %1161 = vmatprep.mubr.bf16.mxu0 %v9554_v42 }
 0x162   :  { %4547 = vmatmul.mubr.msk.bf16.vlgmr.msra.gmra.mrb[16].mxu0 %vm950_vm0, %v5966_v5 }
 0x163   :  { %1171 = vmatprep.mubr.bf16.mxu0 %v9554_v42 }
 0x166   :  { %v6072_v61 = vpop.permute.xlu0 %892 }
 0x16a   :  { %4548 = vmatmul.mubr.msk.bf16.gmra.mrb[20].mxu0 %vm950_vm0, %v4807_v52 }
 0x16b   :  { %1181 = vmatprep.mubr.bf16.mxu0 %v9554_v42 }
 0x170   :  { %v6074_v6 = vpop.permute.xlu1 %897 }
 0x172   :  { %4549 = vmatmul.mubr.msk.bf16.gmra.mrb[24].mxu0 %vm950_vm0, %v4808_v1  ;;  %v6093_v8 = vpop.permute.xlu0 %907 }
 0x173   :  { %1191 = vmatprep.mubr.bf16.mxu0 %v9554_v42 }
 0x174   :  { %v6095_v60 = vpop.permute.xlu1 %902 }
 0x176   :  { %v6121_v37 = vpop.permute.xlu0 %917 }
 0x178   :  { %v6123_v55 = vpop.permute.xlu1 %912 }
 0x17a   :  { %4550 = vmatmul.mubr.msk.bf16.gmra.mrb[28].mxu0 %vm950_vm0, %v4809_v45 }
 0x214   :  { %v1090_v34 = vpop.f32.mrb[0].mxu1 }
 0x215   :  { %v1091_v21 = vadd.f32 %v1090_v34, %v6072_v61  ;;  %v1017_v27 = vpop.f32.mrb[0].mxu0  ;;  %v1092_v33 = vpop.f32.mrb[1].mxu1 }
 0x216   :  { %v1018_v29 = vadd.f32 %v1017_v27, %v6072_v61  ;;  %v1093_v20 = vadd.f32 %v1092_v33, %v6072_v61  ;;  %v1019_v31 = vpop.f32.mrb[1].mxu0  ;;  %v1094_v13 = vpop.f32.mrb[2].mxu1 }
 0x217   :  { %4825 = vtanh.f32 %v1091_v21  ;;  %v1020_v39 = vadd.f32 %v1019_v31, %v6072_v61  ;;  %v1095_v36 = vadd.f32 %v1094_v13, %v6074_v6  ;;  %v1021_v53 = vpop.f32.mrb[2].mxu0  ;;  %v1096_v44 = vpop.f32.mrb[3].mxu1 }
 0x218   :  { %4827 = vtanh.f32 %v1018_v29  ;;  %v1022_v24 = vadd.f32 %v1021_v53, %v6074_v6  ;;  %v1023_v40 = vpop.f32.mrb[3].mxu0  ;;  %v1097_v12 = vadd.f32 %v1096_v44, %v6074_v6 }
 0x219   :  { %4829 = vtanh.f32 %v1093_v20  ;;  %v1024_v5 = vadd.f32 %v1023_v40, %v6074_v6 }
 0x21a   :  { %4831 = vtanh.f32 %v1020_v39 }
 0x21b   :  { %4833 = vtanh.f32 %v1095_v36 }
 0x21c   :  { %4835 = vtanh.f32 %v1022_v24  ;;  %v1100_v26 = vpop.f32.mrb[4].mxu1 }
 0x21d   :  { %4837 = vtanh.f32 %v1097_v12  ;;  %v1101_v51 = vadd.f32 %v1100_v26, %v6095_v60  ;;  %v1027_v57 = vpop.f32.mrb[4].mxu0  ;;  %v1102_v48 = vpop.f32.mrb[5].mxu1 }
 0x21e   :  { %4839 = vtanh.f32 %v1024_v5  ;;  %v1028_v54 = vadd.f32 %v1027_v57, %v6095_v60  ;;  %v1103_v59 = vadd.f32 %v1102_v48, %v6095_v60  ;;  %v1029_v25 = vpop.f32.mrb[5].mxu0  ;;  %v1104_v0 = vpop.f32.mrb[6].mxu1 }
 0x21f   :  { %4841 = vtanh.f32 %v1101_v51  ;;  %v1030_v10 = vadd.f32 %v1029_v25, %v6095_v60  ;;  %v1105_v9 = vadd.f32 %v1104_v0, %v6093_v8  ;;  %v1031_v28 = vpop.f32.mrb[6].mxu0  ;;  %v1106_v52 = vpop.f32.mrb[7].mxu1 }
 0x220   :  { %4843 = vtanh.f32 %v1028_v54  ;;  %v1032_v2 = vadd.f32 %v1031_v28, %v6093_v8  ;;  %v1033_v41 = vpop.f32.mrb[7].mxu0  ;;  %v1107_v22 = vadd.f32 %v1106_v52, %v6093_v8  ;;  %v6153_v48 = vpop.permute.xlu0 %927 }
 0x221   :  { %v4826_v35 = vpop.eup %4825  ;;  %4845 = vtanh.f32 %v1103_v59  ;;  %v1034_v11 = vadd.f32 %v1033_v41, %v6093_v8  ;;  %v6156_v25 = vpop.permute.xlu1 %922 }
 0x222   :  { %v4828_v49 = vpop.eup %4827  ;;  %4847 = vtanh.f32 %v1030_v10  ;;  %v1283_v30 = vsel %vm1277_vm7, %v4826_v35, 0.0 }
 0x223   :  { %v4830_v14 = vpop.eup %4829  ;;  %4849 = vtanh.f32 %v1105_v9  ;;  %v1281_v16 = vsel %vm1275_vm15, %v4828_v49, 0.0 }
 0x224   :  { %v4832_v38 = vpop.eup %4831  ;;  %4851 = vtanh.f32 %v1032_v2  ;;  %v1110_v7 = vpop.f32.mrb[8].mxu1  ;;  %v6133_v1 = vsel %vm1278_vm3, %v4830_v14, 0.0 }
 0x225   :  { %v4834_v18 = vpop.eup %4833  ;;  %4853 = vtanh.f32 %v1107_v22  ;;  %v1111_v63 = vadd.f32 %v1110_v7, %v6123_v55  ;;  %v1037_v32 = vpop.f32.mrb[8].mxu0  ;;  %v1282_v40 = vsel %vm1276_vm11, %v4832_v38, 0.0 }
 0x226   :  { %v1112_v3 = vpop.f32.mrb[9].mxu1  ;;  %v4836_v50 = vpop.eup %4835  ;;  %4855 = vtanh.f32 %v1034_v11  ;;  %v1038_v45 = vadd.f32 %v1037_v32, %v6123_v55  ;;  %v1289_v27 = vsel %vm1277_vm7, %v4834_v18, 0.0 }
 0x227   :  { %v1113_v34 = vadd.f32 %v1112_v3, %v6123_v55  ;;  %v1039_v47 = vpop.f32.mrb[9].mxu0  ;;  %v1114_v21 = vpop.f32.mrb[10].mxu1  ;;  %4857 = vtanh.f32 %v1111_v63  ;;  %v1287_v39 = vsel %vm1275_vm15, %v4836_v50, 0.0  ;;  %v1331_v5 = vpack.c.bf16 %v1289_v27, %v1283_v30 }
 0x228   :  { %v4838_v33 = vpop.eup %4837  ;;  %v1040_v29 = vadd.f32 %v1039_v47, %v6123_v55  ;;  %v1115_v20 = vadd.f32 %v1114_v21, %v6121_v37  ;;  %v1041_v31 = vpop.f32.mrb[10].mxu0  ;;  %4859 = vtanh.f32 %v1038_v45  ;;  %v1329_v24 = vpack.c.bf16 %v1287_v39, %v1281_v16 }
 0x229   :  { %v1116_v13 = vpop.f32.mrb[11].mxu1  ;;  %v4840_v36 = vpop.eup %4839  ;;  %v1042_v53 = vadd.f32 %v1041_v31, %v6121_v37  ;;  %4861 = vtanh.f32 %v1113_v34  ;;  %v1290_v51 = vsel %vm1278_vm3, %v4838_v33, 0.0 }
 0x22a   :  { %v1043_v44 = vpop.f32.mrb[11].mxu0  ;;  %v4842_v12 = vpop.eup %4841  ;;  %v1117_v17 = vadd.f32 %v1116_v13, %v6121_v37  ;;  %v1288_v19 = vsel %vm1276_vm11, %v4840_v36, 0.0  ;;  %4863 = vtanh.f32 %v1040_v29  ;;  %1377 = vrot.lane.b32.xlu1 %v1329_v24, %s4994_s1  ;;  %v1332_v54 = vpack.c.bf16 %v1290_v51, %v6133_v1 }
 0x22b   :  { %v4844_v43 = vpop.eup %4843  ;;  %v1044_v26 = vadd.f32 %v1043_v44, %v6121_v37  ;;  %v1330_v15 = vpack.c.bf16 %v1288_v19, %v1282_v40  ;;  %4865 = vtanh.f32 %v1115_v20  ;;  %v1295_v10 = vsel %vm1277_vm7, %v4842_v12, 0.0 }
 0x22c   :  { %v4846_v57 = vpop.eup %4845  ;;  %4867 = vtanh.f32 %v1042_v53  ;;  %v1120_v0 = vpop.f32.mrb[12].mxu1  ;;  %v1293_v41 = vsel %vm1275_vm15, %v4844_v43, 0.0  ;;  %v1269_v24 = vsub.s32 4, %v5044_v4 }
 0x22d   :  { %v4848_v59 = vpop.eup %4847  ;;  %1379 = vrot.lane.b32.xlu0 %v1330_v15, %s4994_s1  ;;  %4869 = vtanh.f32 %v1117_v17  ;;  %v1121_v28 = vadd.f32 %v1120_v0, %v6156_v25  ;;  %v1047_v52 = vpop.f32.mrb[12].mxu0  ;;  %v1296_v35 = vsel %vm1278_vm3, %v4846_v57, 0.0 }
 0x22e   :  { %v4850_v9 = vpop.eup %4849  ;;  %v1122_v2 = vpop.f32.mrb[13].mxu1  ;;  %4871 = vtanh.f32 %v1044_v26  ;;  %1381 = vrot.lane.b32.xlu1 %v1331_v5, %s4994_s1  ;;  %v1048_v49 = vadd.f32 %v1047_v52, %v6156_v25  ;;  %v1294_v47 = vsel %vm1276_vm11, %v4848_v59, 0.0  ;;  %v1273_v5 = vsub.s32 5, %v5044_v4 }
 0x22f   :  { %v4852_v22 = vpop.eup %4851  ;;  %v1123_v11 = vadd.f32 %v1122_v2, %v6156_v25  ;;  %v1049_v14 = vpop.f32.mrb[13].mxu0  ;;  %v1301_v7 = vsel %vm1277_vm7, %v4850_v9, 0.0  ;;  %4873 = vtanh.f32 %v1121_v28 }
 0x230   :  { %v1124_v38 = vpop.f32.mrb[14].mxu1  ;;  %v4854_v30 = vpop.eup %4853  ;;  %v1050_v18 = vadd.f32 %v1049_v14, %v6156_v25  ;;  %v1299_v16 = vsel %vm1275_vm15, %v4852_v22, 0.0  ;;  %4875 = vtanh.f32 %v1048_v49  ;;  %v1337_v29 = vpack.c.bf16 %v1301_v7, %v1295_v10 }
 0x231   :  { %v1125_v63 = vadd.f32 %v1124_v38, %v6153_v48  ;;  %v1051_v32 = vpop.f32.mrb[14].mxu0  ;;  %v1126_v3 = vpop.f32.mrb[15].mxu1  ;;  %1383 = vrot.lane.b32.xlu0 %v1332_v54, %s4994_s1  ;;  %v1335_v34 = vpack.c.bf16 %v1299_v16, %v1293_v41  ;;  %4877 = vtanh.f32 %v1123_v11  ;;  %v1302_v39 = vsel %vm1278_vm3, %v4854_v30, 0.0 }
 0x232   :  { %v4856_v1 = vpop.eup %4855  ;;  %v1052_v50 = vadd.f32 %v1051_v32, %v6153_v48  ;;  %v1053_v45 = vpop.f32.mrb[15].mxu0  ;;  %v1127_v27 = vadd.f32 %v1126_v3, %v6153_v48  ;;  %4879 = vtanh.f32 %v1050_v18  ;;  %v1338_v53 = vpack.c.bf16 %v1302_v39, %v1296_v35 }
 0x233   :  { %v4858_v21 = vpop.eup %4857  ;;  %v1300_v33 = vsel %vm1276_vm11, %v4856_v1, 0.0  ;;  %v1054_v31 = vadd.f32 %v1053_v45, %v6153_v48  ;;  %1389 = vrot.lane.b32.xlu1 %v1335_v34, %s4994_s1  ;;  %4881 = vtanh.f32 %v1125_v63  ;;  %v6219_v16 = vrot.slane %v6090_v23, %v1273_v5 }
 0x234   :  { %v4860_v20 = vpop.eup %4859  ;;  %v1336_v13 = vpack.c.bf16 %v1300_v33, %v1294_v47  ;;  %4883 = vtanh.f32 %v1052_v50  ;;  %v1307_v19 = vsel %vm1277_vm7, %v4858_v21, 0.0 }
 0x235   :  { %v4862_v36 = vpop.eup %4861  ;;  %4885 = vtanh.f32 %v1127_v27  ;;  %v1163_v12 = vpop.f32.mrb[16].mxu0  ;;  %v1305_v17 = vsel %vm1275_vm15, %v4860_v20, 0.0  ;;  %9724 = vst [vmem:[#allocation10_spill] sm:$0xff] %v6219_v16  ;;  %vm1280_vm0 = vcmp.eq.s32.totalorder %v6219_v16, 1 }
 0x236   :  { %v4864_v44 = vpop.eup %4863  ;;  %1391 = vrot.lane.b32.xlu0 %v1336_v13, %s4994_s1  ;;  %4887 = vtanh.f32 %v1054_v31  ;;  %v1164_v26 = vadd.f32 %v1163_v12, %v6072_v61  ;;  %v1165_v15 = vpop.f32.mrb[17].mxu0  ;;  %v1308_v57 = vsel %vm1278_vm3, %v4862_v36, 0.0 }
 0x237   :  { %v4866_v40 = vpop.eup %4865  ;;  %1393 = vrot.lane.b32.xlu1 %v1337_v29, %s4994_s1  ;;  %v1166_v59 = vadd.f32 %v1165_v15, %v6072_v61  ;;  %v1167_v0 = vpop.f32.mrb[18].mxu0  ;;  %v1306_v9 = vsel %vm1276_vm11, %v4864_v44, 0.0 }
 0x238   :  { %v4868_v43 = vpop.eup %4867  ;;  %v1313_v51 = vsel %vm1277_vm7, %v4866_v40, 0.0  ;;  %4889 = vtanh.f32 %v1164_v26  ;;  %v1168_v2 = vadd.f32 %v1167_v0, %v6074_v6  ;;  %v1169_v41 = vpop.f32.mrb[19].mxu0 }
 0x239   :  { %v4870_v54 = vpop.eup %4869  ;;  %v1311_v10 = vsel %vm1275_vm15, %v4868_v43, 0.0  ;;  %v1343_v28 = vpack.c.bf16 %v1313_v51, %v1307_v19  ;;  %4891 = vtanh.f32 %v1166_v59  ;;  %v1170_v49 = vadd.f32 %v1169_v41, %v6074_v6 }
 0x23a   :  { %v4872_v52 = vpop.eup %4871  ;;  %1395 = vrot.lane.b32.xlu0 %v1338_v53, %s4994_s1  ;;  %v1341_v35 = vpack.c.bf16 %v1311_v10, %v1305_v17  ;;  %v1314_v22 = vsel %vm1278_vm3, %v4870_v54, 0.0  ;;  %4893 = vtanh.f32 %v1168_v2  ;;  %v6216_v6 = vrot.slane %v6090_v23, %v1269_v24 }
 0x23b   :  { %v4874_v61 = vpop.eup %4873  ;;  %v1312_v11 = vsel %vm1276_vm11, %v4872_v52, 0.0  ;;  %v1344_v14 = vpack.c.bf16 %v1314_v22, %v1308_v57  ;;  %4895 = vtanh.f32 %v1170_v49 }
 0x23c   :  { %v4876_v38 = vpop.eup %4875  ;;  %1401 = vrot.lane.b32.xlu1 %v1341_v35, %s4994_s1  ;;  %v1342_v7 = vpack.c.bf16 %v1312_v11, %v1306_v9  ;;  %v1319_v3 = vsel %vm1277_vm7, %v4874_v61, 0.0  ;;  %9723 = vst [vmem:[#allocation9_spill] sm:$0xff] %v6216_v6  ;;  %vm1279_vm1 = vcmp.eq.s32.totalorder %v6216_v6, 1 }
 0x23d   :  { %v4878_v30 = vpop.eup %4877  ;;  %v1173_v32 = vpop.f32.mrb[20].mxu0  ;;  %v1317_v34 = vsel %vm1275_vm15, %v4876_v38, 0.0 }
 0x23e   :  { %v4880_v18 = vpop.eup %4879  ;;  %1403 = vrot.lane.b32.xlu0 %v1342_v7, %s4994_s1  ;;  %v1174_v50 = vadd.f32 %v1173_v32, %v6095_v60  ;;  %v1175_v45 = vpop.f32.mrb[21].mxu0  ;;  %v1320_v21 = vsel %vm1278_vm3, %v4878_v30, 0.0 }
 0x23f   :  { %v4882_v63 = vpop.eup %4881  ;;  %v1176_v33 = vadd.f32 %v1175_v45, %v6095_v60  ;;  %v1177_v23 = vpop.f32.mrb[22].mxu0  ;;  %v1318_v20 = vsel %vm1276_vm11, %v4880_v18, 0.0 }
 0x240   :  { %v4884_v1 = vpop.eup %4883  ;;  %1405 = vrot.lane.b32.xlu1 %v1343_v28, %s4994_s1  ;;  %v1325_v47 = vsel %vm1277_vm7, %v4882_v63, 0.0  ;;  %4897 = vtanh.f32 %v1174_v50  ;;  %v1178_v39 = vadd.f32 %v1177_v23, %v6093_v8  ;;  %v1179_v36 = vpop.f32.mrb[23].mxu0 }
 0x241   :  { %v4886_v27 = vpop.eup %4885  ;;  %v1323_v29 = vsel %vm1275_vm15, %v4884_v1, 0.0  ;;  %v1349_v31 = vpack.c.bf16 %v1325_v47, %v1319_v3  ;;  %4899 = vtanh.f32 %v1176_v33  ;;  %v1180_v60 = vadd.f32 %v1179_v36, %v6093_v8 }
 0x242   :  { %v4888_v13 = vpop.eup %4887  ;;  %1407 = vrot.lane.b32.xlu0 %v1344_v14, %s4994_s1  ;;  %v1347_v53 = vpack.c.bf16 %v1323_v29, %v1317_v34  ;;  %v1326_v44 = vsel %vm1278_vm3, %v4886_v27, 0.0  ;;  %4901 = vtanh.f32 %v1178_v39 }
 0x243   :  { %v1324_v24 = vsel %vm1276_vm11, %v4888_v13, 0.0  ;;  %v1350_v40 = vpack.c.bf16 %v1326_v44, %v1320_v21  ;;  %v4890_v12 = vpop.eup %4889  ;;  %4903 = vtanh.f32 %v1180_v60 }
 0x244   :  { %1413 = vrot.lane.b32.xlu1 %v1347_v53, %s4994_s1  ;;  %v1348_v17 = vpack.c.bf16 %v1324_v24, %v1318_v20  ;;  %v4892_v19 = vpop.eup %4891  ;;  %v1285_v26 = vsel %vm1279_vm1, %v4890_v12, 0.0 }
 0x245   :  { %v4894_v5 = vpop.eup %4893  ;;  %v1183_v8 = vpop.f32.mrb[24].mxu0  ;;  %v1286_v59 = vsel %vm1280_vm0, %v4892_v19, 0.0 }
 0x246   :  { %1415 = vrot.lane.b32.xlu0 %v1348_v17, %s4994_s1  ;;  %v4896_v43 = vpop.eup %4895  ;;  %v1291_v15 = vsel %vm1279_vm1, %v4894_v5, 0.0  ;;  %v1184_v51 = vadd.f32 %v1183_v8, %v6123_v55  ;;  %v1185_v57 = vpop.f32.mrb[25].mxu0 }
 0x247   :  { %v1333_v54 = vpack.c.bf16 %v1291_v15, %v1285_v26  ;;  %v1292_v0 = vsel %vm1280_vm0, %v4896_v43, 0.0  ;;  %v1186_v10 = vadd.f32 %v1185_v57, %v6123_v55  ;;  %v1187_v9 = vpop.f32.mrb[26].mxu0 }
 0x248   :  { %1417 = vrot.lane.b32.xlu1 %v1349_v31, %s4994_s1  ;;  %v1334_v28 = vpack.c.bf16 %v1292_v0, %v1286_v59  ;;  %4905 = vtanh.f32 %v1184_v51  ;;  %v1188_v52 = vadd.f32 %v1187_v9, %v6121_v37  ;;  %v1189_v2 = vpop.f32.mrb[27].mxu0 }
 0x249   :  { %4907 = vtanh.f32 %v1186_v10  ;;  %v1190_v41 = vadd.f32 %v1189_v2, %v6121_v37 }
 0x24a   :  { %1419 = vrot.lane.b32.xlu0 %v1350_v40, %s4994_s1  ;;  %v4898_v35 = vpop.eup %4897  ;;  %4909 = vtanh.f32 %v1188_v52 }
 0x24b   :  { %v4900_v22 = vpop.eup %4899  ;;  %4911 = vtanh.f32 %v1190_v41  ;;  %v1297_v11 = vsel %vm1279_vm1, %v4898_v35, 0.0 }
 0x24c   :  { %1385 = vrot.lane.b32.xlu1 %v1333_v54, %s4994_s1  ;;  %v4902_v61 = vpop.eup %4901  ;;  %v1298_v30 = vsel %vm1280_vm0, %v4900_v22, 0.0 }
 0x24d   :  { %v4904_v55 = vpop.eup %4903  ;;  %v1193_v49 = vpop.f32.mrb[28].mxu0  ;;  %v1303_v14 = vsel %vm1279_vm1, %v4902_v61, 0.0 }
 0x24e   :  { %1387 = vrot.lane.b32.xlu0 %v1334_v28, %s4994_s1  ;;  %v1194_v38 = vadd.f32 %v1193_v49, %v6156_v25  ;;  %v1195_v37 = vpop.f32.mrb[29].mxu0  ;;  %v1339_v7 = vpack.c.bf16 %v1303_v14, %v1297_v11  ;;  %v1304_v18 = vsel %vm1280_vm0, %v4904_v55, 0.0 }
 0x24f   :  { %v1196_v63 = vadd.f32 %v1195_v37, %v6156_v25  ;;  %v1197_v32 = vpop.f32.mrb[30].mxu0  ;;  %v1340_v3 = vpack.c.bf16 %v1304_v18, %v1298_v30 }
 0x250   :  { %4913 = vtanh.f32 %v1194_v38  ;;  %v1198_v1 = vadd.f32 %v1197_v32, %v6153_v48  ;;  %v1199_v50 = vpop.f32.mrb[31].mxu0  ;;  %1397 = vrot.lane.b32.xlu1 %v1339_v7, %s4994_s1 }
 0x251   :  { %4915 = vtanh.f32 %v1196_v63  ;;  %v1200_v45 = vadd.f32 %v1199_v50, %v6153_v48 }
 0x252   :  { %1399 = vrot.lane.b32.xlu0 %v1340_v3, %s4994_s1  ;;  %v4906_v34 = vpop.eup %4905  ;;  %4917 = vtanh.f32 %v1198_v1 }
 0x253   :  { %v4908_v47 = vpop.eup %4907  ;;  %4919 = vtanh.f32 %v1200_v45  ;;  %v1309_v25 = vsel %vm1279_vm1, %v4906_v34, 0.0 }
 0x254   :  { %v4910_v21 = vpop.eup %4909  ;;  %v1310_v29 = vsel %vm1280_vm0, %v4908_v47, 0.0 }
 0x255   :  { %v4912_v27 = vpop.eup %4911  ;;  %v1315_v33 = vsel %vm1279_vm1, %v4910_v21, 0.0 }
 0x256   :  { %v1345_v23 = vpack.c.bf16 %v1315_v33, %v1309_v25  ;;  %v1316_v48 = vsel %vm1280_vm0, %v4912_v27, 0.0 }
 0x257   :  { %v1346_v20 = vpack.c.bf16 %v1316_v48, %v1310_v29 }
 0x258   :  { %1409 = vrot.lane.b32.xlu1 %v1345_v23, %s4994_s1 }
 0x259   :  { %1411 = vrot.lane.b32.xlu0 %v1346_v20, %s4994_s1 }
 0x25a   :  { %v4914_v31 = vpop.eup %4913 }
 0x25b   :  { %v4916_v13 = vpop.eup %4915  ;;  %v1321_v53 = vsel %vm1279_vm1, %v4914_v31, 0.0 }
 0x25c   :  { %v4918_v39 = vpop.eup %4917  ;;  %v1322_v24 = vsel %vm1280_vm0, %v4916_v13, 0.0 }
 0x25d   :  { %v4920_v36 = vpop.eup %4919  ;;  %v1327_v44 = vsel %vm1279_vm1, %v4918_v39, 0.0 }
 0x25e   :  { %v1351_v60 = vpack.c.bf16 %v1327_v44, %v1321_v53  ;;  %v1328_v40 = vsel %vm1280_vm0, %v4920_v36, 0.0 }
 0x25f   :  { %v1352_v12 = vpack.c.bf16 %v1328_v40, %v1322_v24 }
 0x260   :  { %1421 = vrot.lane.b32.xlu1 %v1351_v60, %s4994_s1 }
 0x261   :  { %1423 = vrot.lane.b32.xlu0 %v1352_v12, %s4994_s1 }
 0x29c   :  { %v1378_v17 = vpop.permute.xlu1 %1377 }
 0x29d   :  { %1471 = vst.msk [vmem:[#allocation2] sm:$0xff] %vm1470_vm9, %v1378_v17 }
 0x29e   :  { %1497 = vst.msk [vmem:[#allocation2] sm:$0xff] %vm1496_vm8, %v9554_v42 }
 0x29f   :  { %v1380_v19 = vpop.permute.xlu0 %1379 }
 0x2a0   :  { %v6299_v5 = vsel %vm1425_vm12, %v1378_v17, %v1380_v19  ;;  %v1382_v43 = vpop.permute.xlu1 %1381 }
 0x2a1   :  { %1568 = vrot.lane.b32.xlu0 %v6299_v5, %s4976_s29  ;;  %v6304_v8 = vsel %vm1425_vm12, %v1380_v19, %v1382_v43 }
 0x2a3   :  { %v1384_v26 = vpop.permute.xlu0 %1383 }
 0x2a4   :  { %v6307_v15 = vsel %vm1425_vm12, %v1382_v43, %v1384_v26 }
 0x2a5   :  { %v1390_v51 = vpop.permute.xlu1 %1389  ;;  %1572 = vrot.lane.b32.xlu0 %v6307_v15, %s4976_s29  ;;  %v1518_v57 = vld [vmem:[#allocation2] sm:$0xff] }
 0x2a6   :  { %1478 = vst.msk [vmem:[#allocation2 + $0x30] sm:$0xff] %vm1470_vm9, %v1390_v51  ;;  %1566 = vrot.lane.b32.xlu1 %v1518_v57, %s4976_s29 }
 0x2a7   :  { %1498 = vst.msk [vmem:[#allocation2 + $0x30] sm:$0xff] %vm1496_vm8, %v9554_v42 }
 0x2a8   :  { %v1392_v54 = vpop.permute.xlu0 %1391 }
 0x2a9   :  { %v6316_v59 = vsel %vm1425_vm12, %v1390_v51, %v1392_v54  ;;  %v1394_v0 = vpop.permute.xlu1 %1393  ;;  %1636 = vrot.lane.b32.xlu0 %v6299_v5, %s4975_s0 }
 0x2aa   :  { %v6321_v10 = vsel %vm1425_vm12, %v1392_v54, %v1394_v0  ;;  %1634 = vrot.lane.b32.xlu1 %v1518_v57, %s4975_s0 }
 0x2ac   :  { %v1396_v9 = vpop.permute.xlu0 %1395 }
 0x2ad   :  { %v6325_v28 = vsel %vm1425_vm12, %v1394_v0, %v1396_v9  ;;  %1640 = vrot.lane.b32.xlu0 %v6307_v15, %s4975_s0 }
 0x2ae   :  { %v1402_v52 = vpop.permute.xlu1 %1401  ;;  %1702 = vrot.lane.b32.xlu1 %v1518_v57, %s4979_s10  ;;  %v1524_v33 = vld [vmem:[#allocation2 + $0x30] sm:$0xff] }
 0x2af   :  { %1484 = vst.msk [vmem:[#allocation2 + $0x60] sm:$0xff] %vm1470_vm9, %v1402_v52 }
 0x2b0   :  { %1499 = vst.msk [vmem:[#allocation2 + $0x60] sm:$0xff] %vm1496_vm8, %v9554_v42  ;;  %v1404_v2 = vpop.permute.xlu0 %1403 }
 0x2b1   :  { %v6334_v41 = vsel %vm1425_vm12, %v1402_v52, %v1404_v2  ;;  %1704 = vrot.lane.b32.xlu0 %v6299_v5, %s4979_s10 }
 0x2b2   :  { %v1406_v35 = vpop.permute.xlu1 %1405  ;;  %1770 = vrot.lane.b32.xlu1 %v1518_v57, %s4980_s11 }
 0x2b3   :  { %v6339_v22 = vsel %vm1425_vm12, %v1404_v2, %v1406_v35 }
 0x2b4   :  { %v1408_v61 = vpop.permute.xlu0 %1407 }
 0x2b5   :  { %v6343_v55 = vsel %vm1425_vm12, %v1406_v35, %v1408_v61  ;;  %1708 = vrot.lane.b32.xlu0 %v6307_v15, %s4979_s10 }
 0x2b6   :  { %v1414_v49 = vpop.permute.xlu1 %1413  ;;  %1838 = vrot.lane.b32.xlu1 %v1518_v57, %s4981_s12 }
 0x2b7   :  { %1490 = vst.msk [vmem:[#allocation2 + $0x90] sm:$0xff] %vm1470_vm9, %v1414_v49  ;;  %v1530_v13 = vld [vmem:[#allocation2 + $0x60] sm:$0xff] }
 0x2b8   :  { %1500 = vst.msk [vmem:[#allocation2 + $0x90] sm:$0xff] %vm1496_vm8, %v9554_v42  ;;  %v1416_v11 = vpop.permute.xlu0 %1415 }
 0x2b9   :  { %v6352_v14 = vsel %vm1425_vm12, %v1414_v49, %v1416_v11  ;;  %1772 = vrot.lane.b32.xlu0 %v6299_v5, %s4980_s11 }
 0x2ba   :  { %v1418_v38 = vpop.permute.xlu1 %1417  ;;  %1906 = vrot.lane.b32.xlu1 %v1518_v57, %s4985_s16 }
 0x2bb   :  { %v6357_v37 = vsel %vm1425_vm12, %v1416_v11, %v1418_v38 }
 0x2bc   :  { %v1420_v7 = vpop.permute.xlu0 %1419 }
 0x2bd   :  { %v6361_v30 = vsel %vm1425_vm12, %v1418_v38, %v1420_v7  ;;  %1776 = vrot.lane.b32.xlu0 %v6307_v15, %s4980_s11 }
 0x2be   :  { %v1386_v18 = vpop.permute.xlu1 %1385  ;;  %1974 = vrot.lane.b32.xlu1 %v1518_v57, %s4986_s17 }
 0x2bf   :  { %v6366_v63 = vsel %vm1425_vm12, %v1384_v26, %v1386_v18 }
 0x2c0   :  { %1475 = vst [vmem:[#allocation2 + $0x20] sm:$0xff] %v6366_v63  ;;  %v1388_v32 = vpop.permute.xlu0 %1387 }
 0x2c1   :  { %v1430_v3 = vsel %vm1425_vm12, %v1386_v18, %v1388_v32  ;;  %1842 = vrot.lane.b32.xlu0 %v6304_v8, %s4981_s12 }
 0x2c2   :  { %1477 = vst.msk [vmem:[#allocation2 + $0x28] sm:$0xff] %vm1476_vm5, %v1430_v3  ;;  %2042 = vrot.lane.b32.xlu1 %v1518_v57, %s4987_s18  ;;  %v1398_v1 = vpop.permute.xlu1 %1397 }
 0x2c3   :  { %1502 = vst.msk [vmem:[#allocation2 + $0x28] sm:$0xff] %vm9663_vm4, %v9554_v42  ;;  %v6378_v50 = vsel %vm1425_vm12, %v1396_v9, %v1398_v1 }
 0x2c4   :  { %v1400_v45 = vpop.permute.xlu0 %1399  ;;  %1482 = vst [vmem:[#allocation2 + $0x50] sm:$0xff] %v6378_v50 }
 0x2c5   :  { %v1435_v34 = vsel %vm1425_vm12, %v1398_v1, %v1400_v45  ;;  %1910 = vrot.lane.b32.xlu0 %v6304_v8, %s4985_s16 }
 0x2c6   :  { %1483 = vst.msk [vmem:[#allocation2 + $0x58] sm:$0xff] %vm1476_vm5, %v1435_v34  ;;  %1570 = vrot.lane.b32.xlu1 %v6304_v8, %s4976_s29 }
 0x2c7   :  { %1503 = vst.msk [vmem:[#allocation2 + $0x58] sm:$0xff] %vm9663_vm4, %v9554_v42 }
 0x2c9   :  { %1978 = vrot.lane.b32.xlu0 %v6304_v8, %s4986_s17 }
 0x2ca   :  { %1638 = vrot.lane.b32.xlu1 %v6304_v8, %s4975_s0  ;;  %v1410_v47 = vpop.permute.xlu1 %1409 }
 0x2cb   :  { %v6394_v21 = vsel %vm1425_vm12, %v1408_v61, %v1410_v47  ;;  %v1412_v27 = vpop.permute.xlu0 %1411 }
 0x2cc   :  { %1488 = vst [vmem:[#allocation2 + $0x80] sm:$0xff] %v6394_v21  ;;  %v1440_v25 = vsel %vm1425_vm12, %v1410_v47, %v1412_v27 }
 0x2cd   :  { %2046 = vrot.lane.b32.xlu0 %v6304_v8, %s4987_s18  ;;  %1489 = vst.msk [vmem:[#allocation2 + $0x88] sm:$0xff] %vm1476_vm5, %v1440_v25 }
 0x2ce   :  { %1504 = vst.msk [vmem:[#allocation2 + $0x88] sm:$0xff] %vm9663_vm4, %v9554_v42  ;;  %1706 = vrot.lane.b32.xlu1 %v6304_v8, %s4979_s10 }
 0x2d1   :  { %1850 = vrot.lane.b32.xlu0 %v1524_v33, %s4981_s12 }
 0x2d2   :  { %1774 = vrot.lane.b32.xlu1 %v6304_v8, %s4980_s11  ;;  %v1422_v23 = vpop.permute.xlu1 %1421 }
 0x2d3   :  { %v6409_v29 = vsel %vm1425_vm12, %v1420_v7, %v1422_v23  ;;  %v1424_v48 = vpop.permute.xlu0 %1423  ;;  %v1536_v7 = vld [vmem:[#allocation2 + $0x90] sm:$0xff] }
 0x2d4   :  { %1494 = vst [vmem:[#allocation2 + $0xb0] sm:$0xff] %v6409_v29  ;;  %v1445_v20 = vsel %vm1425_vm12, %v1422_v23, %v1424_v48 }
 0x2d5   :  { %1918 = vrot.lane.b32.xlu0 %v1524_v33, %s4985_s16  ;;  %1495 = vst.msk [vmem:[#allocation2 + $0xb8] sm:$0xff] %vm1476_vm5, %v1445_v20 }
 0x2d6   :  { %1505 = vst.msk [vmem:[#allocation2 + $0xb8] sm:$0xff] %vm9663_vm4, %v9554_v42  ;;  %1840 = vrot.lane.b32.xlu1 %v6299_v5, %s4981_s12 }
 0x2d9   :  { %1986 = vrot.lane.b32.xlu0 %v1524_v33, %s4986_s17 }
 0x2da   :  { %1844 = vrot.lane.b32.xlu1 %v6307_v15, %s4981_s12 }
 0x2dd   :  { %1580 = vrot.lane.b32.xlu0 %v6316_v59, %s4976_s29 }
 0x2de   :  { %1908 = vrot.lane.b32.xlu1 %v6299_v5, %s4985_s16 }
 0x2e1   :  { %1584 = vrot.lane.b32.xlu0 %v6325_v28, %s4976_s29 }
 0x2e2   :  { %1912 = vrot.lane.b32.xlu1 %v6307_v15, %s4985_s16 }
 0x2e5   :  { %1648 = vrot.lane.b32.xlu0 %v6316_v59, %s4975_s0 }
 0x2e6   :  { %1976 = vrot.lane.b32.xlu1 %v6299_v5, %s4986_s17 }
 0x2e9   :  { %1652 = vrot.lane.b32.xlu0 %v6325_v28, %s4975_s0 }
 0x2ea   :  { %1980 = vrot.lane.b32.xlu1 %v6307_v15, %s4986_s17 }
 0x2ed   :  { %1716 = vrot.lane.b32.xlu0 %v6316_v59, %s4979_s10 }
 0x2ee   :  { %2044 = vrot.lane.b32.xlu1 %v6299_v5, %s4987_s18 }
 0x2f1   :  { %1720 = vrot.lane.b32.xlu0 %v6325_v28, %s4979_s10 }
 0x2f2   :  { %2048 = vrot.lane.b32.xlu1 %v6307_v15, %s4987_s18 }
 0x2f5   :  { %1784 = vrot.lane.b32.xlu0 %v6316_v59, %s4980_s11 }
 0x2f6   :  { %1578 = vrot.lane.b32.xlu1 %v1524_v33, %s4976_s29 }
 0x2f9   :  { %1788 = vrot.lane.b32.xlu0 %v6325_v28, %s4980_s11 }
 0x2fa   :  { %1646 = vrot.lane.b32.xlu1 %v1524_v33, %s4975_s0 }
 0x2fd   :  { %1852 = vrot.lane.b32.xlu0 %v6316_v59, %s4981_s12 }
 0x2fe   :  { %1714 = vrot.lane.b32.xlu1 %v1524_v33, %s4979_s10 }
 0x301   :  { %1856 = vrot.lane.b32.xlu0 %v6325_v28, %s4981_s12 }
 0x302   :  { %1782 = vrot.lane.b32.xlu1 %v1524_v33, %s4980_s11 }
 0x305   :  { %1920 = vrot.lane.b32.xlu0 %v6316_v59, %s4985_s16 }
 0x306   :  { %2054 = vrot.lane.b32.xlu1 %v1524_v33, %s4987_s18 }
 0x309   :  { %1924 = vrot.lane.b32.xlu0 %v6325_v28, %s4985_s16 }
 0x30a   :  { %1582 = vrot.lane.b32.xlu1 %v6321_v10, %s4976_s29 }
 0x30d   :  { %1988 = vrot.lane.b32.xlu0 %v6316_v59, %s4986_s17 }
 0x30e   :  { %1650 = vrot.lane.b32.xlu1 %v6321_v10, %s4975_s0 }
 0x311   :  { %1992 = vrot.lane.b32.xlu0 %v6325_v28, %s4986_s17 }
 0x312   :  { %1718 = vrot.lane.b32.xlu1 %v6321_v10, %s4979_s10 }
 0x313   :  { %v6473_v31 = vpop.permute.xlu0 %1568 }
 0x315   :  { %2058 = vrot.lane.b32.xlu0 %v6321_v10, %s4987_s18 }
 0x316   :  { %1786 = vrot.lane.b32.xlu1 %v6321_v10, %s4980_s11 }
 0x317   :  { %v6479_v39 = vpop.permute.xlu0 %1572 }
 0x318   :  { %9725 = vst [vmem:[#allocation11_spill] sm:$0xff] %v6479_v39  ;;  %v6481_v36 = vpop.permute.xlu1 %1566 }
 0x319   :  { %1794 = vrot.lane.b32.xlu0 %v1530_v13, %s4980_s11 }
 0x31a   :  { %1854 = vrot.lane.b32.xlu1 %v6321_v10, %s4981_s12 }
 0x31b   :  { %v6486_v53 = vpop.permute.xlu0 %1636 }
 0x31c   :  { %v6488_v44 = vpop.permute.xlu1 %1634 }
 0x31d   :  { %2066 = vrot.lane.b32.xlu0 %v1530_v13, %s4987_s18 }
 0x31e   :  { %1922 = vrot.lane.b32.xlu1 %v6321_v10, %s4985_s16 }
 0x31f   :  { %v6493_v60 = vpop.permute.xlu0 %1640 }
 0x320   :  { %v6495_v24 = vpop.permute.xlu1 %1702 }
 0x321   :  { %1592 = vrot.lane.b32.xlu0 %v6334_v41, %s4976_s29 }
 0x322   :  { %1990 = vrot.lane.b32.xlu1 %v6321_v10, %s4986_s17 }
 0x323   :  { %v6501_v40 = vpop.permute.xlu0 %1704 }
 0x324   :  { %v1771_v12 = vpop.permute.xlu1 %1770 }
 0x325   :  { %1596 = vrot.lane.b32.xlu0 %v6343_v55, %s4976_s29 }
 0x326   :  { %2056 = vrot.lane.b32.xlu1 %v6316_v59, %s4987_s18 }
 0x327   :  { %v6507_v17 = vpop.permute.xlu0 %1708 }
 0x328   :  { %v6509_v19 = vpop.permute.xlu1 %1838 }
 0x329   :  { %1660 = vrot.lane.b32.xlu0 %v6334_v41, %s4975_s0 }
 0x32a   :  { %2060 = vrot.lane.b32.xlu1 %v6325_v28, %s4987_s18 }
 0x32b   :  { %v1773_v5 = vpop.permute.xlu0 %1772 }
 0x32c   :  { %v6515_v43 = vpop.permute.xlu1 %1906  ;;  %v6569_v35 = vsel %vm9729_vm6, %v1771_v12, %v1773_v5  ;;  %vm9770_vm6 = vmmov %vm9742_vm2 }
 0x32d   :  { %1664 = vrot.lane.b32.xlu0 %v6343_v55, %s4975_s0 }
 0x32e   :  { %1590 = vrot.lane.b32.xlu1 %v1530_v13, %s4976_s29 }
 0x32f   :  { %v6520_v8 = vpop.permute.xlu0 %1776 }
 0x330   :  { %v6522_v26 = vpop.permute.xlu1 %1974 }
 0x331   :  { %1728 = vrot.lane.b32.xlu0 %v6334_v41, %s4979_s10 }
 0x332   :  { %1658 = vrot.lane.b32.xlu1 %v1530_v13, %s4975_s0 }
 0x333   :  { %v6527_v15 = vpop.permute.xlu0 %1842 }
 0x334   :  { %v6529_v51 = vpop.permute.xlu1 %2042 }
 0x335   :  { %9726 = vst [vmem:[#allocation12_spill] sm:$0xff] %v6529_v51  ;;  %1732 = vrot.lane.b32.xlu0 %v6343_v55, %s4979_s10 }
 0x336   :  { %1726 = vrot.lane.b32.xlu1 %v1530_v13, %s4979_s10 }
 0x337   :  { %v6534_v57 = vpop.permute.xlu0 %1910 }
 0x338   :  { %v6536_v54 = vpop.permute.xlu1 %1570 }
 0x339   :  { %1796 = vrot.lane.b32.xlu0 %v6334_v41, %s4980_s11 }
 0x33a   :  { %1862 = vrot.lane.b32.xlu1 %v1530_v13, %s4981_s12 }
 0x33b   :  { %v6541_v59 = vpop.permute.xlu0 %1978 }
 0x33c   :  { %v6543_v0 = vpop.permute.xlu1 %1638 }
 0x33d   :  { %1866 = vrot.lane.b32.xlu0 %v6339_v22, %s4981_s12 }
 0x33e   :  { %1930 = vrot.lane.b32.xlu1 %v1530_v13, %s4985_s16 }
 0x33f   :  { %v6548_v10 = vpop.permute.xlu0 %2046 }
 0x340   :  { %9727 = vst [vmem:[#allocation13_spill] sm:$0xff] %v6548_v10  ;;  %v6550_v9 = vpop.permute.xlu1 %1706 }
 0x341   :  { %1934 = vrot.lane.b32.xlu0 %v6339_v22, %s4985_s16 }
 0x342   :  { %1998 = vrot.lane.b32.xlu1 %v1530_v13, %s4986_s17 }
 0x343   :  { %v6555_v28 = vpop.permute.xlu0 %1850 }
 0x344   :  { %v6557_v52 = vpop.permute.xlu1 %1774 }
 0x345   :  { %2002 = vrot.lane.b32.xlu0 %v6339_v22, %s4986_s17  ;;  %v6563_v2 = vsel %vm9728_vm13, %v1773_v5, %v6557_v52  ;;  %vm9743_vm13 = vmmov %vm9742_vm2 }
 0x346   :  { %1594 = vrot.lane.b32.xlu1 %v6339_v22, %s4976_s29  ;;  %2951 = vmatprep.subr.bf16.mxu1 %v6563_v2 }
 0x347   :  { %v6571_v61 = vpop.permute.xlu0 %1918  ;;  %2952 = vmatpush1.bf16.msra.mxu1 %v6569_v35 }
 0x348   :  { %v6574_v49 = vpop.permute.xlu1 %1840 }
 0x349   :  { %2068 = vrot.lane.b32.xlu0 %v6334_v41, %s4987_s18 }
 0x34a   :  { %1662 = vrot.lane.b32.xlu1 %v6339_v22, %s4975_s0 }
 0x34b   :  { %v6580_v11 = vpop.permute.xlu0 %1986 }
 0x34c   :  { %9730 = vst [vmem:[#allocation14_spill] sm:$0xff] %v6580_v11  ;;  %v6582_v38 = vpop.permute.xlu1 %1844 }
 0x34d   :  { %9731 = vst [vmem:[#allocation15_spill] sm:$0xff] %v6582_v38  ;;  %2072 = vrot.lane.b32.xlu0 %v6343_v55, %s4987_s18 }
 0x34e   :  { %1730 = vrot.lane.b32.xlu1 %v6339_v22, %s4979_s10 }
 0x34f   :  { %v6588_v18 = vpop.permute.xlu0 %1580 }
 0x350   :  { %v6590_v32 = vpop.permute.xlu1 %1908 }
 0x351   :  { %1806 = vrot.lane.b32.xlu0 %v1536_v7, %s4980_s11 }
 0x352   :  { %1798 = vrot.lane.b32.xlu1 %v6339_v22, %s4980_s11 }
 0x353   :  { %v6595_v3 = vpop.permute.xlu0 %1584 }
 0x354   :  { %v6597_v1 = vpop.permute.xlu1 %1912 }
 0x355   :  { %9732 = vst [vmem:[#allocation16_spill] sm:$0xff] %v6597_v1  ;;  %1874 = vrot.lane.b32.xlu0 %v1536_v7, %s4981_s12 }
 0x356   :  { %1800 = vrot.lane.b32.xlu1 %v6343_v55, %s4980_s11 }
 0x357   :  { %v6602_v45 = vpop.permute.xlu0 %1648 }
 0x358   :  { %v6604_v34 = vpop.permute.xlu1 %1976 }
 0x359   :  { %1942 = vrot.lane.b32.xlu0 %v1536_v7, %s4985_s16 }
 0x35a   :  { %1864 = vrot.lane.b32.xlu1 %v6334_v41, %s4981_s12 }
 0x35b   :  { %v6609_v47 = vpop.permute.xlu0 %1652 }
 0x35c   :  { %v6611_v27 = vpop.permute.xlu1 %1980 }
 0x35d   :  { %9733 = vst [vmem:[#allocation17_spill] sm:$0xff] %v6611_v27  ;;  %2010 = vrot.lane.b32.xlu0 %v1536_v7, %s4986_s17 }
 0x35e   :  { %1868 = vrot.lane.b32.xlu1 %v6343_v55, %s4981_s12 }
 0x35f   :  { %v6616_v25 = vpop.permute.xlu0 %1716 }
 0x360   :  { %v6618_v33 = vpop.permute.xlu1 %2044 }
 0x361   :  { %9734 = vst [vmem:[#allocation18_spill] sm:$0xff] %v6618_v33  ;;  %1604 = vrot.lane.b32.xlu0 %v6352_v14, %s4976_s29 }
 0x362   :  { %1932 = vrot.lane.b32.xlu1 %v6334_v41, %s4985_s16 }
 0x363   :  { %v6624_v23 = vpop.permute.xlu0 %1720 }
 0x364   :  { %v6626_v48 = vpop.permute.xlu1 %2048 }
 0x365   :  { %9735 = vst [vmem:[#allocation19_spill] sm:$0xff] %v6626_v48  ;;  %1608 = vrot.lane.b32.xlu0 %v6361_v30, %s4976_s29 }
 0x366   :  { %1936 = vrot.lane.b32.xlu1 %v6343_v55, %s4985_s16 }
 0x367   :  { %v1785_v20 = vpop.permute.xlu0 %1784 }
 0x368   :  { %v6632_v13 = vpop.permute.xlu1 %1578 }
 0x369   :  { %1672 = vrot.lane.b32.xlu0 %v6352_v14, %s4975_s0 }
 0x36a   :  { %2000 = vrot.lane.b32.xlu1 %v6334_v41, %s4986_s17 }
 0x36b   :  { %v6638_v12 = vpop.permute.xlu0 %1788 }
 0x36c   :  { %v6640_v5 = vpop.permute.xlu1 %1646 }
 0x36d   :  { %1676 = vrot.lane.b32.xlu0 %v6361_v30, %s4975_s0 }
 0x36e   :  { %2004 = vrot.lane.b32.xlu1 %v6343_v55, %s4986_s17 }
 0x36f   :  { %v6646_v42 = vpop.permute.xlu0 %1852 }
 0x370   :  { %v6648_v4 = vpop.permute.xlu1 %1714 }
 0x371   :  { %1740 = vrot.lane.b32.xlu0 %v6352_v14, %s4979_s10 }
 0x372   :  { %2070 = vrot.lane.b32.xlu1 %v6339_v22, %s4987_s18 }
 0x373   :  { %v6654_v41 = vpop.permute.xlu0 %1856 }
 0x374   :  { %9736 = vst [vmem:[#allocation20_spill] sm:$0xff] %v6654_v41  ;;  %v1783_v16 = vpop.permute.xlu1 %1782 }
 0x375   :  { %1744 = vrot.lane.b32.xlu0 %v6361_v30, %s4979_s10  ;;  %v6699_v10 = vsel %vm9743_vm13, %v1783_v16, %v1785_v20  ;;  %vm9801_vm13 = vcmask 1039360  }
 0x376   :  { %1602 = vrot.lane.b32.xlu1 %v1536_v7, %s4976_s29 }
 0x377   :  { %v6659_v6 = vpop.permute.xlu0 %1920 }
 0x378   :  { %v6661_v55 = vpop.permute.xlu1 %2054 }
 0x379   :  { %9737 = vst [vmem:[#allocation21_spill] sm:$0xff] %v6661_v55  ;;  %1810 = vrot.lane.b32.xlu0 %v6357_v37, %s4980_s11 }
 0x37a   :  { %1670 = vrot.lane.b32.xlu1 %v1536_v7, %s4975_s0 }
 0x37b   :  { %v6666_v56 = vpop.permute.xlu0 %1924 }
 0x37c   :  { %9738 = vst [vmem:[#allocation22_spill] sm:$0xff] %v6666_v56  ;;  %v6668_v22 = vpop.permute.xlu1 %1582 }
 0x37d   :  { %1876 = vrot.lane.b32.xlu0 %v6352_v14, %s4981_s12 }
 0x37e   :  { %1738 = vrot.lane.b32.xlu1 %v1536_v7, %s4979_s10 }
 0x37f   :  { %v6673_v46 = vpop.permute.xlu0 %1988 }
 0x380   :  { %9739 = vst [vmem:[#allocation23_spill] sm:$0xff] %v6673_v46  ;;  %v6675_v58 = vpop.permute.xlu1 %1650 }
 0x381   :  { %1880 = vrot.lane.b32.xlu0 %v6361_v30, %s4981_s12 }
 0x382   :  { %2078 = vrot.lane.b32.xlu1 %v1536_v7, %s4987_s18 }
 0x383   :  { %v6680_v62 = vpop.permute.xlu0 %1992 }
 0x384   :  { %9740 = vst [vmem:[#allocation24_spill] sm:$0xff] %v6680_v62  ;;  %v6682_v55 = vpop.permute.xlu1 %1718 }
 0x385   :  { %1944 = vrot.lane.b32.xlu0 %v6352_v14, %s4985_s16 }
 0x386   :  { %1606 = vrot.lane.b32.xlu1 %v6357_v37, %s4976_s29 }
 0x387   :  { %v6688_v51 = vpop.permute.xlu0 %2058 }
 0x388   :  { %9741 = vst [vmem:[#allocation25_spill] sm:$0xff] %v6688_v51  ;;  %v6690_v33 = vpop.permute.xlu1 %1786 }
 0x389   :  { %1948 = vrot.lane.b32.xlu0 %v6361_v30, %s4985_s16  ;;  %v6696_v7 = vsel %vm9742_vm2, %v1785_v20, %v6690_v33 }
 0x38a   :  { %1674 = vrot.lane.b32.xlu1 %v6357_v37, %s4975_s0  ;;  %2953 = vmatprep.subr.bf16.mxu1 %v6696_v7 }
 0x38b   :  { %v6704_v48 = vpop.permute.xlu0 %1794  ;;  %2954 = vmatpush1.bf16.msra.mxu1 %v6699_v10 }
 0x38c   :  { %v6707_v51 = vpop.permute.xlu1 %1854 }
 0x38d   :  { %2012 = vrot.lane.b32.xlu0 %v6352_v14, %s4986_s17 }
 0x38e   :  { %1742 = vrot.lane.b32.xlu1 %v6357_v37, %s4979_s10 }
 0x38f   :  { %v6713_v62 = vpop.permute.xlu0 %2066 }
 0x390   :  { %9744 = vst [vmem:[#allocation26_spill] sm:$0xff] %v6713_v62  ;;  %v6715_v16 = vpop.permute.xlu1 %1922 }
 0x391   :  { %2016 = vrot.lane.b32.xlu0 %v6361_v30, %s4986_s17 }
 0x392   :  { %1808 = vrot.lane.b32.xlu1 %v6352_v14, %s4980_s11 }
 0x393   :  { %v6721_v20 = vpop.permute.xlu0 %1592 }
 0x394   :  { %9745 = vst [vmem:[#allocation27_spill] sm:$0xff] %v6721_v20  ;;  %v6723_v56 = vpop.permute.xlu1 %1990 }
 0x395   :  { %9746 = vst [vmem:[#allocation28_spill] sm:$0xff] %v6723_v56  ;;  %2082 = vrot.lane.b32.xlu0 %v6357_v37, %s4987_s18 }
 0x396   :  { %1812 = vrot.lane.b32.xlu1 %v6361_v30, %s4980_s11 }
 0x397   :  { %v6729_v11 = vpop.permute.xlu0 %1596 }
 0x398   :  { %9747 = vst [vmem:[#allocation29_spill] sm:$0xff] %v6729_v11  ;;  %v6731_v62 = vpop.permute.xlu1 %2056 }
 0x399   :  { %9748 = vst [vmem:[#allocation30_spill] sm:$0xff] %v6731_v62  ;;  %1846 = vrot.lane.b32.xlu0 %v6366_v63, %s4981_s12  ;;  %v6751_v62 = vld [vmem:[#allocation2 + $0x28] sm:$0xff] }
 0x39a   :  { %1878 = vrot.lane.b32.xlu1 %v6357_v37, %s4981_s12  ;;  %9753 = vst [vmem:[#allocation35_spill] sm:$0xff] %v6751_v62 }
 0x39b   :  { %v6737_v41 = vpop.permute.xlu0 %1660 }
 0x39c   :  { %9749 = vst [vmem:[#allocation31_spill] sm:$0xff] %v6737_v41  ;;  %v6739_v20 = vpop.permute.xlu1 %2060 }
 0x39d   :  { %9750 = vst [vmem:[#allocation32_spill] sm:$0xff] %v6739_v20  ;;  %1914 = vrot.lane.b32.xlu0 %v6366_v63, %s4985_s16 }
 0x39e   :  { %1946 = vrot.lane.b32.xlu1 %v6357_v37, %s4985_s16 }
 0x39f   :  { %v6745_v46 = vpop.permute.xlu0 %1664 }
 0x3a0   :  { %9751 = vst [vmem:[#allocation33_spill] sm:$0xff] %v6745_v46  ;;  %v6747_v11 = vpop.permute.xlu1 %1590 }
 0x3a1   :  { %9752 = vst [vmem:[#allocation34_spill] sm:$0xff] %v6747_v11  ;;  %1982 = vrot.lane.b32.xlu0 %v6366_v63, %s4986_s17 }
 0x3a2   :  { %2014 = vrot.lane.b32.xlu1 %v6357_v37, %s4986_s17 }
 0x3a3   :  { %v6755_v41 = vpop.permute.xlu0 %1728 }
 0x3a4   :  { %9754 = vst [vmem:[#allocation36_spill] sm:$0xff] %v6755_v41  ;;  %v6757_v20 = vpop.permute.xlu1 %1658 }
 0x3a5   :  { %9755 = vst [vmem:[#allocation37_spill] sm:$0xff] %v6757_v20  ;;  %1576 = vrot.lane.b32.xlu0 %v6751_v62, %s4976_s29 }
 0x3a6   :  { %2080 = vrot.lane.b32.xlu1 %v6352_v14, %s4987_s18 }
 0x3a7   :  { %v6763_v46 = vpop.permute.xlu0 %1732 }
 0x3a8   :  { %9756 = vst [vmem:[#allocation38_spill] sm:$0xff] %v6763_v46  ;;  %v6765_v11 = vpop.permute.xlu1 %1726 }
 0x3a9   :  { %9757 = vst [vmem:[#allocation39_spill] sm:$0xff] %v6765_v11  ;;  %1644 = vrot.lane.b32.xlu0 %v6751_v62, %s4975_s0  ;;  %v6783_v11 = vld [vmem:[#allocation2 + $0x58] sm:$0xff] }
 0x3aa   :  { %2084 = vrot.lane.b32.xlu1 %v6361_v30, %s4987_s18  ;;  %9761 = vst [vmem:[#allocation43_spill] sm:$0xff] %v6783_v11 }
 0x3ab   :  { %v1797_v37 = vpop.permute.xlu0 %1796 }
 0x3ac   :  { %v6771_v41 = vpop.permute.xlu1 %1862 }
 0x3ad   :  { %9758 = vst [vmem:[#allocation40_spill] sm:$0xff] %v6771_v41  ;;  %1712 = vrot.lane.b32.xlu0 %v6751_v62, %s4979_s10 }
 0x3ae   :  { %1574 = vrot.lane.b32.xlu1 %v6366_v63, %s4976_s29 }
 0x3af   :  { %v6777_v14 = vpop.permute.xlu0 %1866 }
 0x3b0   :  { %9759 = vst [vmem:[#allocation41_spill] sm:$0xff] %v6777_v14  ;;  %v6779_v46 = vpop.permute.xlu1 %1930 }
 0x3b1   :  { %9760 = vst [vmem:[#allocation42_spill] sm:$0xff] %v6779_v46  ;;  %1780 = vrot.lane.b32.xlu0 %v6751_v62, %s4980_s11 }
 0x3b2   :  { %1642 = vrot.lane.b32.xlu1 %v6366_v63, %s4975_s0 }
 0x3b3   :  { %v6787_v30 = vpop.permute.xlu0 %1934 }
 0x3b4   :  { %9762 = vst [vmem:[#allocation44_spill] sm:$0xff] %v6787_v30  ;;  %v6789_v41 = vpop.permute.xlu1 %1998 }
 0x3b5   :  { %9763 = vst [vmem:[#allocation45_spill] sm:$0xff] %v6789_v41  ;;  %1588 = vrot.lane.b32.xlu0 %v6783_v11, %s4976_s29 }
 0x3b6   :  { %1710 = vrot.lane.b32.xlu1 %v6366_v63, %s4979_s10 }
 0x3b7   :  { %v6795_v14 = vpop.permute.xlu0 %2002 }
 0x3b8   :  { %9764 = vst [vmem:[#allocation46_spill] sm:$0xff] %v6795_v14  ;;  %v6797_v46 = vpop.permute.xlu1 %1594 }
 0x3b9   :  { %9765 = vst [vmem:[#allocation47_spill] sm:$0xff] %v6797_v46  ;;  %1656 = vrot.lane.b32.xlu0 %v6783_v11, %s4975_s0 }
 0x3ba   :  { %1778 = vrot.lane.b32.xlu1 %v6366_v63, %s4980_s11 }
 0x3bb   :  { %v6803_v20 = vpop.permute.xlu0 %2068 }
 0x3bc   :  { %9766 = vst [vmem:[#allocation48_spill] sm:$0xff] %v6803_v20  ;;  %v6805_v30 = vpop.permute.xlu1 %1662 }
 0x3bd   :  { %9767 = vst [vmem:[#allocation49_spill] sm:$0xff] %v6805_v30  ;;  %1724 = vrot.lane.b32.xlu0 %v6783_v11, %s4979_s10 }
 0x3be   :  { %1848 = vrot.lane.b32.xlu1 %v6751_v62, %s4981_s12 }
 0x3bf   :  { %v6811_v41 = vpop.permute.xlu0 %2072 }
 0x3c0   :  { %9768 = vst [vmem:[#allocation50_spill] sm:$0xff] %v6811_v41  ;;  %v6813_v14 = vpop.permute.xlu1 %1730  ;;  %v6834_v41 = vsel %vm9742_vm2, %v6704_v48, %v1797_v37 }
 0x3c1   :  { %9769 = vst [vmem:[#allocation51_spill] sm:$0xff] %v6813_v14  ;;  %1860 = vrot.lane.b32.xlu0 %v6783_v11, %s4981_s12  ;;  %9771 = vst [vmem:[#allocation52_spill] sm:$0xff] %v6834_v41 }
 0x3c2   :  { %1916 = vrot.lane.b32.xlu1 %v6751_v62, %s4985_s16 }
 0x3c3   :  { %v6819_v63 = vpop.permute.xlu0 %1806 }
 0x3c4   :  { %v6821_v20 = vpop.permute.xlu1 %1798 }
 0x3c5   :  { %1928 = vrot.lane.b32.xlu0 %v6783_v11, %s4985_s16  ;;  %v6827_v30 = vsel %vm9770_vm6, %v1797_v37, %v6821_v20  ;;  %vm9802_vm6 = vmmov %vm9742_vm2 }
 0x3c6   :  { %1984 = vrot.lane.b32.xlu1 %v6751_v62, %s4986_s17  ;;  %2955 = vmatprep.subr.bf16.mxu1 %v6827_v30 }
 0x3c7   :  { %v6836_v14 = vpop.permute.xlu0 %1874  ;;  %2956 = vmatpush1.bf16.msra.mxu1 %v6834_v41 }
 0x3c8   :  { %9772 = vst [vmem:[#allocation53_spill] sm:$0xff] %v6836_v14  ;;  %v6839_v46 = vpop.permute.xlu1 %1800 }
 0x3c9   :  { %1996 = vrot.lane.b32.xlu0 %v6783_v11, %s4986_s17 }
 0x3ca   :  { %1586 = vrot.lane.b32.xlu1 %v6378_v50, %s4976_s29 }
 0x3cb   :  { %v6845_v56 = vpop.permute.xlu0 %1942 }
 0x3cc   :  { %9773 = vst [vmem:[#allocation54_spill] sm:$0xff] %v6845_v56  ;;  %v6847_v62 = vpop.permute.xlu1 %1864 }
 0x3cd   :  { %9774 = vst [vmem:[#allocation55_spill] sm:$0xff] %v6847_v62  ;;  %1802 = vrot.lane.b32.xlu0 %v6394_v21, %s4980_s11 }
 0x3ce   :  { %1654 = vrot.lane.b32.xlu1 %v6378_v50, %s4975_s0 }
 0x3cf   :  { %v6853_v48 = vpop.permute.xlu0 %2010 }
 0x3d0   :  { %9775 = vst [vmem:[#allocation56_spill] sm:$0xff] %v6853_v48  ;;  %v6855_v37 = vpop.permute.xlu1 %1868 }
 0x3d1   :  { %9776 = vst [vmem:[#allocation57_spill] sm:$0xff] %v6855_v37  ;;  %1870 = vrot.lane.b32.xlu0 %v6394_v21, %s4981_s12  ;;  %v6875_v37 = vld [vmem:[#allocation2 + $0x88] sm:$0xff] }
 0x3d2   :  { %1722 = vrot.lane.b32.xlu1 %v6378_v50, %s4979_s10  ;;  %9781 = vst [vmem:[#allocation62_spill] sm:$0xff] %v6875_v37 }
 0x3d3   :  { %v6861_v14 = vpop.permute.xlu0 %1604 }
 0x3d4   :  { %9777 = vst [vmem:[#allocation58_spill] sm:$0xff] %v6861_v14  ;;  %v6863_v56 = vpop.permute.xlu1 %1932 }
 0x3d5   :  { %9778 = vst [vmem:[#allocation59_spill] sm:$0xff] %v6863_v56  ;;  %1938 = vrot.lane.b32.xlu0 %v6394_v21, %s4985_s16 }
 0x3d6   :  { %1790 = vrot.lane.b32.xlu1 %v6378_v50, %s4980_s11 }
 0x3d7   :  { %v6869_v62 = vpop.permute.xlu0 %1608 }
 0x3d8   :  { %9779 = vst [vmem:[#allocation60_spill] sm:$0xff] %v6869_v62  ;;  %v6871_v48 = vpop.permute.xlu1 %1936 }
 0x3d9   :  { %9780 = vst [vmem:[#allocation61_spill] sm:$0xff] %v6871_v48  ;;  %2006 = vrot.lane.b32.xlu0 %v6394_v21, %s4986_s17 }
 0x3da   :  { %1858 = vrot.lane.b32.xlu1 %v6378_v50, %s4981_s12 }
 0x3db   :  { %v6879_v14 = vpop.permute.xlu0 %1672 }
 0x3dc   :  { %9782 = vst [vmem:[#allocation63_spill] sm:$0xff] %v6879_v14  ;;  %v6881_v56 = vpop.permute.xlu1 %2000 }
 0x3dd   :  { %9783 = vst [vmem:[#allocation64_spill] sm:$0xff] %v6881_v56  ;;  %1600 = vrot.lane.b32.xlu0 %v6875_v37, %s4976_s29 }
 0x3de   :  { %1926 = vrot.lane.b32.xlu1 %v6378_v50, %s4985_s16 }
 0x3df   :  { %v6887_v62 = vpop.permute.xlu0 %1676 }
 0x3e0   :  { %9784 = vst [vmem:[#allocation65_spill] sm:$0xff] %v6887_v62  ;;  %v6889_v48 = vpop.permute.xlu1 %2004 }
 0x3e1   :  { %9785 = vst [vmem:[#allocation66_spill] sm:$0xff] %v6889_v48  ;;  %1668 = vrot.lane.b32.xlu0 %v6875_v37, %s4975_s0  ;;  %v6909_v48 = vld [vmem:[#allocation2 + $0xb8] sm:$0xff] }
 0x3e2   :  { %1994 = vrot.lane.b32.xlu1 %v6378_v50, %s4986_s17  ;;  %9790 = vst [vmem:[#allocation71_spill] sm:$0xff] %v6909_v48 }
 0x3e3   :  { %v6895_v41 = vpop.permute.xlu0 %1740 }
 0x3e4   :  { %9786 = vst [vmem:[#allocation67_spill] sm:$0xff] %v6895_v41  ;;  %v6897_v14 = vpop.permute.xlu1 %2070 }
 0x3e5   :  { %9787 = vst [vmem:[#allocation68_spill] sm:$0xff] %v6897_v14  ;;  %1736 = vrot.lane.b32.xlu0 %v6875_v37, %s4979_s10 }
 0x3e6   :  { %1792 = vrot.lane.b32.xlu1 %v6783_v11, %s4980_s11 }
 0x3e7   :  { %v6903_v56 = vpop.permute.xlu0 %1744 }
 0x3e8   :  { %9788 = vst [vmem:[#allocation69_spill] sm:$0xff] %v6903_v56  ;;  %v6905_v62 = vpop.permute.xlu1 %1602 }
 0x3e9   :  { %9789 = vst [vmem:[#allocation70_spill] sm:$0xff] %v6905_v62  ;;  %1804 = vrot.lane.b32.xlu0 %v6875_v37, %s4980_s11 }
 0x3ea   :  { %1598 = vrot.lane.b32.xlu1 %v6394_v21, %s4976_s29 }
 0x3eb   :  { %v6913_v50 = vpop.permute.xlu0 %1810 }
 0x3ec   :  { %v6915_v14 = vpop.permute.xlu1 %1670 }
 0x3ed   :  { %9791 = vst [vmem:[#allocation72_spill] sm:$0xff] %v6915_v14  ;;  %1612 = vrot.lane.b32.xlu0 %v6909_v48, %s4976_s29 }
 0x3ee   :  { %1666 = vrot.lane.b32.xlu1 %v6394_v21, %s4975_s0 }
 0x3ef   :  { %v6921_v11 = vpop.permute.xlu0 %1876 }
 0x3f0   :  { %9792 = vst [vmem:[#allocation73_spill] sm:$0xff] %v6921_v11  ;;  %v6923_v41 = vpop.permute.xlu1 %1738 }
 0x3f1   :  { %9793 = vst [vmem:[#allocation74_spill] sm:$0xff] %v6923_v41  ;;  %1680 = vrot.lane.b32.xlu0 %v6909_v48, %s4975_s0 }
 0x3f2   :  { %1734 = vrot.lane.b32.xlu1 %v6394_v21, %s4979_s10 }
 0x3f3   :  { %v6929_v56 = vpop.permute.xlu0 %1880 }
 0x3f4   :  { %9794 = vst [vmem:[#allocation75_spill] sm:$0xff] %v6929_v56  ;;  %v6931_v62 = vpop.permute.xlu1 %2078 }
 0x3f5   :  { %9795 = vst [vmem:[#allocation76_spill] sm:$0xff] %v6931_v62  ;;  %1748 = vrot.lane.b32.xlu0 %v6909_v48, %s4979_s10 }
 0x3f6   :  { %1872 = vrot.lane.b32.xlu1 %v6875_v37, %s4981_s12 }
 0x3f7   :  { %v6937_v14 = vpop.permute.xlu0 %1944 }
 0x3f8   :  { %9796 = vst [vmem:[#allocation77_spill] sm:$0xff] %v6937_v14  ;;  %v6939_v11 = vpop.permute.xlu1 %1606 }
 0x3f9   :  { %1816 = vrot.lane.b32.xlu0 %v6909_v48, %s4980_s11 }
 0x3fa   :  { %1940 = vrot.lane.b32.xlu1 %v6875_v37, %s4985_s16 }
 0x3fb   :  { %v6945_v21 = vpop.permute.xlu0 %1948 }
 0x3fc   :  { %9797 = vst [vmem:[#allocation78_spill] sm:$0xff] %v6945_v21  ;;  %v6947_v56 = vpop.permute.xlu1 %1674  ;;  %v1616_v21 = vsel %vm9801_vm13, %v6536_v54, %v6479_v39 }
 0x3fd   :  { %9798 = vst [vmem:[#allocation79_spill] sm:$0xff] %v6947_v56  ;;  %1884 = vrot.lane.b32.xlu0 %v6909_v48, %s4981_s12 }
 0x3fe   :  { %2008 = vrot.lane.b32.xlu1 %v6875_v37, %s4986_s17 }
 0x3ff   :  { %v6953_v62 = vpop.permute.xlu0 %2012 }
 0x400   :  { %9799 = vst [vmem:[#allocation80_spill] sm:$0xff] %v6953_v62  ;;  %v6955_v14 = vpop.permute.xlu1 %1742 }
 0x401   :  { %1952 = vrot.lane.b32.xlu0 %v6909_v48, %s4985_s16 }
 0x402   :  { %1610 = vrot.lane.b32.xlu1 %v6409_v29, %s4976_s29 }
 0x403   :  { %v6961_v41 = vpop.permute.xlu0 %2016 }
 0x404   :  { %9800 = vst [vmem:[#allocation81_spill] sm:$0xff] %v6961_v41  ;;  %v1809_v56 = vpop.permute.xlu1 %1808 }
 0x405   :  { %2188 = vrot.lane.b32.xlu0 %v1616_v21, %s4980_s11  ;;  %v6969_v37 = vsel %vm9802_vm6, %v1809_v56, %v6913_v50  ;;  %v6973_v62 = vsel %vm9742_vm2, %v6819_v63, %v1809_v56  ;;  %v1614_v21 = vsel %vm9801_vm13, %v6481_v36, %v6473_v31  ;;  %vm9806_vm6 = vcmask 1031168  }
 0x406   :  { %9803 = vst [vmem:[#allocation82_spill] sm:$0xff] %v6973_v62  ;;  %1678 = vrot.lane.b32.xlu1 %v6409_v29, %s4975_s0  ;;  %2957 = vmatprep.subr.bf16.mxu1 %v6969_v37  ;;  %v1683_v63 = vsel %vm9806_vm6, %v6486_v53, %v6543_v0  ;;  %vm9808_vm2 = vcmask 883712   ;;  %vm9811_vm13 = vcmask 875520   ;;  %vm9813_vm6 = vcmask 867328  }
 0x407   :  { %v6978_v41 = vpop.permute.xlu0 %2082  ;;  %2958 = vmatpush1.bf16.msra.mxu1 %v6973_v62 }
 0x408   :  { %9804 = vst [vmem:[#allocation83_spill] sm:$0xff] %v6978_v41  ;;  %v6984_v48 = vpop.permute.xlu1 %1812 }
 0x409   :  { %2184 = vrot.lane.b32.xlu0 %v1614_v21, %s4980_s11  ;;  %v1751_v21 = vsel %vm9808_vm2, %v6501_v40, %v6550_v9  ;;  %vm9815_vm2 = vcmask 1039360  }
 0x40a   :  { %1746 = vrot.lane.b32.xlu1 %v6409_v29, %s4979_s10 }
 0x40b   :  { %v6989_v56 = vpop.permute.xlu0 %1846 }
 0x40c   :  { %9805 = vst [vmem:[#allocation84_spill] sm:$0xff] %v6989_v56  ;;  %v6994_v41 = vpop.permute.xlu1 %1878 }
 0x40d   :  { %2234 = vrot.lane.b32.xlu0 %v1683_v63, %s4980_s11  ;;  %v1820_v63 = vsel %vm9811_vm13, %v6557_v52, %v6520_v8  ;;  %v1615_v52 = vsel %vm9815_vm2, %v6473_v31, %v6536_v54  ;;  %vm9817_vm13 = vmmov %vm9813_vm6  ;;  %v1956_v31 = vsel %vm9690_vm10, %v6534_v57, %v6597_v1 }
 0x40e   :  { %1814 = vrot.lane.b32.xlu1 %v6409_v29, %s4980_s11 }
 0x40f   :  { %v6999_v36 = vpop.permute.xlu0 %1914 }
 0x410   :  { %9807 = vst [vmem:[#allocation85_spill] sm:$0xff] %v6999_v36  ;;  %v7004_v39 = vpop.permute.xlu1 %1946 }
 0x411   :  { %9809 = vst [vmem:[#allocation86_spill] sm:$0xff] %v7004_v39  ;;  %2282 = vrot.lane.b32.xlu0 %v1751_v21, %s4980_s11  ;;  %v1888_v21 = vsel %vm9813_vm6, %v6527_v15, %v6582_v38  ;;  %vm9819_vm6 = vcmask 1031168   ;;  %v9923_v38 = vld [vmem:[#allocation79_spill] sm:$0xff] }
 0x412   :  { %1882 = vrot.lane.b32.xlu1 %v6409_v29, %s4981_s12  ;;  %vm9821_vm2 = vmmov %vm9819_vm6 }
 0x413   :  { %v7009_v56 = vpop.permute.xlu0 %1982 }
 0x414   :  { %9810 = vst [vmem:[#allocation87_spill] sm:$0xff] %v7009_v56  ;;  %v7014_v62 = vpop.permute.xlu1 %2014 }
 0x415   :  { %9812 = vst [vmem:[#allocation88_spill] sm:$0xff] %v7014_v62  ;;  %2332 = vrot.lane.b32.xlu0 %v1820_v63, %s4980_s11 }
 0x416   :  { %1950 = vrot.lane.b32.xlu1 %v6409_v29, %s4985_s16  ;;  %v1886_v29 = vsel %vm9817_vm13, %v6509_v19, %v6574_v49  ;;  %v1682_v19 = vsel %vm9821_vm2, %v6488_v44, %v6486_v53  ;;  %vm9823_vm13 = vcmask 711680   ;;  %vm9825_vm2 = vcmask 1039360  }
 0x417   :  { %v7019_v36 = vpop.permute.xlu0 %1576  ;;  %v1621_v53 = vsel %vm9825_vm2, %v6668_v22, %v6595_v3 }
 0x418   :  { %v7024_v39 = vpop.permute.xlu1 %2080 }
 0x419   :  { %9814 = vst [vmem:[#allocation89_spill] sm:$0xff] %v7024_v39  ;;  %2380 = vrot.lane.b32.xlu0 %v1888_v21, %s4980_s11  ;;  %v1684_v21 = vsel %vm9819_vm6, %v6543_v0, %v6493_v60  ;;  %v2024_v0 = vsel %vm9823_vm13, %v6541_v59, %v6611_v27  ;;  %vm9824_vm6 = vcmask 883712  }
 0x41a   :  { %2186 = vrot.lane.b32.xlu1 %v1615_v52, %s4980_s11  ;;  %vm9826_vm13 = vmmov %vm9824_vm6 }
 0x41b   :  { %v7031_v56 = vpop.permute.xlu0 %1644 }
 0x41c   :  { %9816 = vst [vmem:[#allocation90_spill] sm:$0xff] %v7031_v56  ;;  %v7036_v62 = vpop.permute.xlu1 %2084 }
 0x41d   :  { %9818 = vst [vmem:[#allocation91_spill] sm:$0xff] %v7036_v62  ;;  %2376 = vrot.lane.b32.xlu0 %v1886_v29, %s4980_s11 }
 0x41e   :  { %2236 = vrot.lane.b32.xlu1 %v1684_v21, %s4980_s11  ;;  %v1752_v21 = vsel %vm9824_vm6, %v6550_v9, %v6507_v17  ;;  %vm9828_vm6 = vmmov %vm9825_vm2  ;;  %vm9829_vm2 = vcmask 875520  }
 0x41f   :  { %v7043_v39 = vpop.permute.xlu0 %1712  ;;  %v1619_v9 = vsel %vm9828_vm6, %v6632_v13, %v6588_v18 }
 0x420   :  { %9820 = vst [vmem:[#allocation92_spill] sm:$0xff] %v7043_v39  ;;  %v7048_v54 = vpop.permute.xlu1 %1574 }
 0x421   :  { %2428 = vrot.lane.b32.xlu0 %v1956_v31, %s4980_s11 }
 0x422   :  { %2232 = vrot.lane.b32.xlu1 %v1682_v19, %s4980_s11  ;;  %v1750_v19 = vsel %vm9826_vm13, %v6495_v24, %v6501_v40  ;;  %vm9831_vm13 = vcmask 1031168  }
 0x423   :  { %v7055_v52 = vpop.permute.xlu0 %1780  ;;  %v1689_v40 = vsel %vm9831_vm13, %v6675_v58, %v6609_v47  ;;  %vm9834_vm6 = vmmov %vm9831_vm13  ;;  %vm9838_vm13 = vcmask 883712  }
 0x424   :  { %9822 = vst [vmem:[#allocation93_spill] sm:$0xff] %v7055_v52  ;;  %v7060_v29 = vpop.permute.xlu1 %1642 }
 0x425   :  { %2476 = vrot.lane.b32.xlu0 %v2024_v0, %s4980_s11 }
 0x426   :  { %2284 = vrot.lane.b32.xlu1 %v1752_v21, %s4980_s11 }
 0x427   :  { %v7067_v31 = vpop.permute.xlu0 %1588 }
 0x428   :  { %v7072_v44 = vpop.permute.xlu1 %1710 }
 0x429   :  { %2200 = vrot.lane.b32.xlu0 %v1621_v53, %s4980_s11 }
 0x42a   :  { %2280 = vrot.lane.b32.xlu1 %v1750_v19, %s4980_s11 }
 0x42b   :  { %v7079_v0 = vpop.permute.xlu0 %1656 }
 0x42c   :  { %9827 = vst [vmem:[#allocation94_spill] sm:$0xff] %v7079_v0  ;;  %v7084_v21 = vpop.permute.xlu1 %1778 }
 0x42d   :  { %2196 = vrot.lane.b32.xlu0 %v1619_v9, %s4980_s11  ;;  %v7090_v53 = vsel %vm9829_vm2, %v6520_v8, %v7084_v21  ;;  %vm9836_vm2 = vcmask 867328  }
 0x42e   :  { %2330 = vrot.lane.b32.xlu1 %v6563_v2, %s4980_s11  ;;  %3110 = vmatprep.subr.bf16.mxu0 %v7090_v53  ;;  %v1687_v2 = vsel %vm9834_vm6, %v6640_v5, %v6602_v45  ;;  %v1955_v5 = vsel %vm9690_vm10, %v6590_v32, %v6534_v57  ;;  %vm9841_vm6 = vmmov %vm9838_vm13 }
 0x42f   :  { %v7095_v24 = vpop.permute.xlu0 %1724  ;;  %3111 = vmatpush1.bf16.msra.mxu0 %v1820_v63  ;;  %v1887_v63 = vsel %vm9836_vm2, %v6574_v49, %v6527_v15  ;;  %v1755_v15 = vsel %vm9841_vm6, %v6648_v4, %v6616_v25  ;;  %vm9842_vm2 = vcmask 711680   ;;  %vm9846_vm6 = vcmask 867328  }
 0x430   :  { %9830 = vst [vmem:[#allocation95_spill] sm:$0xff] %v7095_v24  ;;  %v7100_v13 = vpop.permute.xlu1 %1848  ;;  %v2023_v4 = vsel %vm9842_vm2, %v6604_v34, %v6541_v59  ;;  %v1892_v59 = vsel %vm9846_vm6, %v6646_v42, %v6707_v51 }
 0x431   :  { %9832 = vst [vmem:[#allocation96_spill] sm:$0xff] %v7100_v13  ;;  %2248 = vrot.lane.b32.xlu0 %v1689_v40, %s4980_s11 }
 0x432   :  { %2328 = vrot.lane.b32.xlu1 %v6569_v35, %s4980_s11  ;;  %v1757_v35 = vsel %vm9838_vm13, %v6682_v55, %v6624_v23  ;;  %vm9844_vm13 = vmmov %vm9842_vm2  ;;  %vm9847_vm2 = vcmask 1039360  }
 0x433   :  { %v7105_v8 = vpop.permute.xlu0 %1860 }
 0x434   :  { %9833 = vst [vmem:[#allocation97_spill] sm:$0xff] %v7105_v8  ;;  %v7110_v19 = vpop.permute.xlu1 %1916 }
 0x435   :  { %9835 = vst [vmem:[#allocation98_spill] sm:$0xff] %v7110_v19  ;;  %2244 = vrot.lane.b32.xlu0 %v1687_v2, %s4980_s11 }
 0x436   :  { %2378 = vrot.lane.b32.xlu1 %v1887_v63, %s4980_s11  ;;  %v1954_v63 = vsel %vm9690_vm10, %v6515_v43, %v6590_v32  ;;  %v2022_v43 = vsel %vm9844_vm13, %v6522_v26, %v6604_v34  ;;  %vm9849_vm13 = vmmov %vm9848_vm14 }
 0x437   :  { %v7117_v9 = vpop.permute.xlu0 %1928  ;;  %v1825_v34 = vsel %vm9849_vm13, %v6690_v33, %v6638_v12  ;;  %vm9851_vm6 = vmmov %vm9849_vm13 }
 0x438   :  { %9837 = vst [vmem:[#allocation99_spill] sm:$0xff] %v7117_v9  ;;  %v7122_v40 = vpop.permute.xlu1 %1984  ;;  %vm9856_vm13 = vmmov %vm9851_vm6 }
 0x439   :  { %9839 = vst [vmem:[#allocation100_spill] sm:$0xff] %v7122_v40  ;;  %2296 = vrot.lane.b32.xlu0 %v1757_v35, %s4980_s11 }
 0x43a   :  { %2426 = vrot.lane.b32.xlu1 %v1955_v5, %s4980_s11 }
 0x43b   :  { %v7129_v2 = vpop.permute.xlu0 %1996 }
 0x43c   :  { %9840 = vst [vmem:[#allocation101_spill] sm:$0xff] %v7129_v2  ;;  %v7134_v49 = vpop.permute.xlu1 %1586 }
 0x43d   :  { %2292 = vrot.lane.b32.xlu0 %v1755_v15, %s4980_s11 }
 0x43e   :  { %2424 = vrot.lane.b32.xlu1 %v1954_v63, %s4980_s11 }
 0x43f   :  { %v7141_v35 = vpop.permute.xlu0 %1802 }
 0x440   :  { %v7143_v57 = vpop.permute.xlu1 %1654 }
 0x441   :  { %2342 = vrot.lane.b32.xlu0 %v6696_v7, %s4980_s11 }
 0x442   :  { %2474 = vrot.lane.b32.xlu1 %v2023_v4, %s4980_s11 }
 0x443   :  { %v7151_v5 = vpop.permute.xlu0 %1870 }
 0x444   :  { %9843 = vst [vmem:[#allocation102_spill] sm:$0xff] %v7151_v5  ;;  %v7153_v15 = vpop.permute.xlu1 %1722  ;;  %v9901_v5 = vld [vmem:[#allocation41_spill] sm:$0xff] }
 0x445   :  { %2340 = vrot.lane.b32.xlu0 %v6699_v10, %s4980_s11  ;;  %v1620_v10 = vsel %vm9847_vm2, %v6588_v18, %v6668_v22  ;;  %v7187_v18 = vsel %vm9851_vm6, %v6839_v46, %v7141_v35  ;;  %vm9855_vm2 = vcmask 1031168   ;;  %vm9859_vm6 = vcmask 883712  }
 0x446   :  { %2472 = vrot.lane.b32.xlu1 %v2022_v43, %s4980_s11  ;;  %9852 = vst [vmem:[#allocation105_spill] sm:$0xff] %v7187_v18  ;;  %v1688_v33 = vsel %vm9855_vm2, %v6602_v45, %v6675_v58  ;;  %v1756_v58 = vsel %vm9859_vm6, %v6616_v25, %v6682_v55  ;;  %v1959_v45 = vsel %vm9690_vm10, %v6571_v61, %v6659_v6  ;;  %vm9868_vm2 = vcmask 867328  }
 0x447   :  { %v7161_v32 = vpop.permute.xlu0 %1938  ;;  %vm9875_vm6 = vcmask 1039360  }
 0x448   :  { %9845 = vst [vmem:[#allocation103_spill] sm:$0xff] %v7161_v32  ;;  %v7166_v7 = vpop.permute.xlu1 %1790 }
 0x449   :  { %2390 = vrot.lane.b32.xlu0 %v1892_v59, %s4980_s11  ;;  %v7175_v26 = vsel %vm9848_vm14, %v6638_v12, %v7166_v7  ;;  %vm9853_vm14 = vcmask 867328   ;;  %v7203_v12 = vsel %vm9856_vm13, %v6821_v20, %v6839_v46 }
 0x44a   :  { %2198 = vrot.lane.b32.xlu1 %v1620_v10, %s4980_s11  ;;  %3112 = vmatprep.subr.bf16.mxu0 %v7175_v26  ;;  %v1891_v22 = vsel %vm9853_vm14, %v6555_v28, %v6646_v42  ;;  %v1960_v42 = vsel %vm9690_vm10, %v6659_v6, %v6715_v16  ;;  %v9863_v10 = vld [vmem:[#allocation28_spill] sm:$0xff]  ;;  %vm9865_vm14 = vcmask 711680  }
 0x44b   :  { %v7182_v63 = vpop.permute.xlu0 %2006  ;;  %3113 = vmatpush1.bf16.msra.mxu0 %v1825_v34  ;;  %vm9871_vm13 = vmmov %vm9865_vm14 }
 0x44c   :  { %9850 = vst [vmem:[#allocation104_spill] sm:$0xff] %v7182_v63  ;;  %3114 = vmatprep.subr.bf16.mxu0 %v7187_v18  ;;  %v7193_v4 = vpop.permute.xlu1 %1858 }
 0x44d   :  { %9854 = vst [vmem:[#allocation106_spill] sm:$0xff] %v7193_v4  ;;  %2388 = vrot.lane.b32.xlu0 %v1891_v22, %s4980_s11  ;;  %v9864_v22 = vld [vmem:[#allocation23_spill] sm:$0xff] }
 0x44e   :  { %2246 = vrot.lane.b32.xlu1 %v1688_v33, %s4980_s11  ;;  %v2028_v25 = vsel %vm9865_vm14, %v9864_v22, %v9863_v10  ;;  %v9867_v33 = vld [vmem:[#allocation20_spill] sm:$0xff]  ;;  %vm9877_vm14 = vmmov %vm9871_vm13 }
 0x44f   :  { %v7205_v43 = vpop.permute.xlu0 %1600  ;;  %3115 = vmatpush1.bf16.msra.mxu0 %v7203_v12  ;;  %v1893_v6 = vsel %vm9868_vm2, %v6707_v51, %v9867_v33  ;;  %v9873_v51 = vld [vmem:[#allocation47_spill] sm:$0xff]  ;;  %vm9881_vm2 = vcmask 1031168   ;;  %v9913_v33 = vld [vmem:[#allocation70_spill] sm:$0xff] }
 0x450   :  { %9857 = vst [vmem:[#allocation107_spill] sm:$0xff] %v7205_v43  ;;  %v7211_v28 = vpop.permute.xlu1 %1926 }
 0x451   :  { %9858 = vst [vmem:[#allocation108_spill] sm:$0xff] %v7211_v28  ;;  %2438 = vrot.lane.b32.xlu0 %v1960_v42, %s4980_s11  ;;  %v9889_v28 = vld [vmem:[#allocation34_spill] sm:$0xff] }
 0x452   :  { %2294 = vrot.lane.b32.xlu1 %v1756_v58, %s4980_s11 }
 0x453   :  { %v7218_v46 = vpop.permute.xlu0 %1668 }
 0x454   :  { %9860 = vst [vmem:[#allocation109_spill] sm:$0xff] %v7218_v46  ;;  %v7223_v20 = vpop.permute.xlu1 %1994 }
 0x455   :  { %9861 = vst [vmem:[#allocation110_spill] sm:$0xff] %v7223_v20  ;;  %2436 = vrot.lane.b32.xlu0 %v1959_v45, %s4980_s11  ;;  %v9872_v45 = vld [vmem:[#allocation22_spill] sm:$0xff] }
 0x456   :  { %2344 = vrot.lane.b32.xlu1 %v1825_v34, %s4980_s11  ;;  %v9870_v34 = vld [vmem:[#allocation14_spill] sm:$0xff] }
 0x457   :  { %v7227_v59 = vpop.permute.xlu0 %1736  ;;  %v2027_v42 = vsel %vm9871_vm13, %v9870_v34, %v9864_v22  ;;  %v9876_v22 = vld [vmem:[#allocation24_spill] sm:$0xff]  ;;  %vm9883_vm13 = vmmov %vm9875_vm6 }
 0x458   :  { %9862 = vst [vmem:[#allocation111_spill] sm:$0xff] %v7227_v59  ;;  %v7232_v55 = vpop.permute.xlu1 %1792  ;;  %v2029_v34 = vsel %vm9877_vm14, %v9863_v10, %v9876_v22  ;;  %v9885_v10 = vld [vmem:[#allocation51_spill] sm:$0xff]  ;;  %vm9890_vm14 = vmmov %vm9883_vm13 }
 0x459   :  { %9866 = vst [vmem:[#allocation28_spill] sm:$0xff] %v7232_v55  ;;  %2486 = vrot.lane.b32.xlu0 %v2028_v25, %s4980_s11  ;;  %v1961_v25 = vsel %vm9690_vm10, %v6715_v16, %v9872_v45  ;;  %v9879_v16 = vld [vmem:[#allocation49_spill] sm:$0xff] }
 0x45a   :  { %2392 = vrot.lane.b32.xlu1 %v1893_v6, %s4980_s11  ;;  %v9874_v6 = vld [vmem:[#allocation27_spill] sm:$0xff]  ;;  %v9882_v45 = vld [vmem:[#allocation29_spill] sm:$0xff] }
 0x45b   :  { %v7239_v61 = vpop.permute.xlu0 %1804  ;;  %v1625_v63 = vsel %vm9875_vm6, %v9874_v6, %v9873_v51  ;;  %vm9887_vm6 = vcmask 883712  }
 0x45c   :  { %9869 = vst [vmem:[#allocation23_spill] sm:$0xff] %v7239_v61  ;;  %v7244_v58 = vpop.permute.xlu1 %1598 }
 0x45d   :  { %2484 = vrot.lane.b32.xlu0 %v2027_v42, %s4980_s11 }
 0x45e   :  { %2440 = vrot.lane.b32.xlu1 %v1961_v25, %s4980_s11  ;;  %v9880_v25 = vld [vmem:[#allocation31_spill] sm:$0xff] }
 0x45f   :  { %v7251_v2 = vpop.permute.xlu0 %1612  ;;  %v1693_v20 = vsel %vm9881_vm2, %v9880_v25, %v9879_v16 }
 0x460   :  { %v7256_v27 = vpop.permute.xlu1 %1666 }
 0x461   :  { %2210 = vrot.lane.b32.xlu0 %v1625_v63, %s4980_s11  ;;  %v1626_v63 = vsel %vm9883_vm13, %v9873_v51, %v9882_v45  ;;  %vm9898_vm13 = vmmov %vm9881_vm2 }
 0x462   :  { %2488 = vrot.lane.b32.xlu1 %v2029_v34, %s4980_s11  ;;  %v9886_v34 = vld [vmem:[#allocation36_spill] sm:$0xff] }
 0x463   :  { %v7263_v42 = vpop.permute.xlu0 %1680  ;;  %v1761_v22 = vsel %vm9887_vm6, %v9886_v34, %v9885_v10  ;;  %vm9902_vm6 = vcmask 867328  }
 0x464   :  { %9878 = vst [vmem:[#allocation14_spill] sm:$0xff] %v7263_v42  ;;  %v7268_v40 = vpop.permute.xlu1 %1734 }
 0x465   :  { %2258 = vrot.lane.b32.xlu0 %v1693_v20, %s4980_s11  ;;  %v1624_v20 = vsel %vm9890_vm14, %v9889_v28, %v9874_v6  ;;  %v9896_v28 = vld [vmem:[#allocation52_spill] sm:$0xff]  ;;  %v9897_v6 = vld [vmem:[#allocation37_spill] sm:$0xff]  ;;  %vm9904_vm14 = vcmask 883712  }
 0x466   :  { %2212 = vrot.lane.b32.xlu1 %v1626_v63, %s4980_s11  ;;  %v9893_v63 = vld [vmem:[#allocation33_spill] sm:$0xff] }
 0x467   :  { %v7275_v32 = vpop.permute.xlu0 %1748  ;;  %v1694_v19 = vsel %vm9881_vm2, %v9879_v16, %v9893_v63  ;;  %vm9908_vm2 = vmmov %vm9904_vm14 }
 0x468   :  { %9884 = vst [vmem:[#allocation47_spill] sm:$0xff] %v7275_v32  ;;  %v7280_v1 = vpop.permute.xlu1 %1872 }
 0x469   :  { %9888 = vst [vmem:[#allocation27_spill] sm:$0xff] %v7280_v1  ;;  %2306 = vrot.lane.b32.xlu0 %v1761_v22, %s4980_s11 }
 0x46a   :  { %2208 = vrot.lane.b32.xlu1 %v1624_v20, %s4980_s11  ;;  %v1692_v20 = vsel %vm9898_vm13, %v9897_v6, %v9880_v25  ;;  %v9905_v25 = vld [vmem:[#allocation61_spill] sm:$0xff]  ;;  %v9906_v6 = vld [vmem:[#allocation44_spill] sm:$0xff]  ;;  %vm9910_vm13 = vcmask 1039360  }
 0x46b   :  { %v7287_v9 = vpop.permute.xlu0 %1816 }
 0x46c   :  { %9891 = vst [vmem:[#allocation49_spill] sm:$0xff] %v7287_v9  ;;  %v7289_v51 = vpop.permute.xlu1 %1940 }
 0x46d   :  { %9892 = vst [vmem:[#allocation31_spill] sm:$0xff] %v7289_v51  ;;  %2354 = vrot.lane.b32.xlu0 %v6827_v30, %s4980_s11  ;;  %v9900_v51 = vld [vmem:[#allocation57_spill] sm:$0xff] }
 0x46e   :  { %2260 = vrot.lane.b32.xlu1 %v1694_v19, %s4980_s11  ;;  %v1898_v16 = vsel %vm9902_vm6, %v9901_v5, %v9900_v51  ;;  %v9907_v51 = vld [vmem:[#allocation39_spill] sm:$0xff]  ;;  %vm9914_vm6 = vmmov %vm9910_vm13 }
 0x46f   :  { %v7297_v22 = vpop.permute.xlu0 %1884 }
 0x470   :  { %9894 = vst [vmem:[#allocation29_spill] sm:$0xff] %v7297_v22  ;;  %v7299_v62 = vpop.permute.xlu1 %2008 }
 0x471   :  { %9895 = vst [vmem:[#allocation51_spill] sm:$0xff] %v7299_v62  ;;  %2352 = vrot.lane.b32.xlu0 %v9896_v28, %s4980_s11  ;;  %v9903_v62 = vld [vmem:[#allocation38_spill] sm:$0xff] }
 0x472   :  { %2256 = vrot.lane.b32.xlu1 %v1692_v20, %s4980_s11  ;;  %v1762_v28 = vsel %vm9904_vm14, %v9885_v10, %v9903_v62  ;;  %v1966_v20 = vsel %vm9690_vm10, %v9906_v6, %v9905_v25  ;;  %v9909_v10 = vld [vmem:[#allocation60_spill] sm:$0xff]  ;;  %vm9917_vm14 = vcmask 867328  }
 0x473   :  { %v7307_v30 = vpop.permute.xlu0 %1952 }
 0x474   :  { %9899 = vst [vmem:[#allocation36_spill] sm:$0xff] %v7307_v30  ;;  %v7312_v19 = vpop.permute.xlu1 %1610 }
 0x475   :  { %2404 = vrot.lane.b32.xlu0 %v1898_v16, %s4980_s11  ;;  %v1760_v16 = vsel %vm9908_vm2, %v9907_v51, %v9886_v34  ;;  %vm9918_vm2 = vcmask 875520  }
 0x476   :  { %2308 = vrot.lane.b32.xlu1 %v1762_v28, %s4980_s11  ;;  %v1631_v28 = vsel %vm9910_vm13, %v6939_v11, %v9909_v10  ;;  %vm9920_vm13 = vmmov %vm9918_vm2 }
 0x477   :  { %v7319_v22 = vpop.permute.xlu0 %2188 }
 0x478   :  { %v7324_v30 = vpop.permute.xlu1 %1678 }
 0x479   :  { %2452 = vrot.lane.b32.xlu0 %v1966_v20, %s4980_s11  ;;  %v9912_v20 = vld [vmem:[#allocation58_spill] sm:$0xff] }
 0x47a   :  { %2304 = vrot.lane.b32.xlu1 %v1760_v16, %s4980_s11  ;;  %v1629_v34 = vsel %vm9914_vm6, %v9913_v33, %v9912_v20  ;;  %v9916_v16 = vld [vmem:[#allocation55_spill] sm:$0xff]  ;;  %vm9924_vm6 = vcmask 1031168  }
 0x47b   :  { %v2185_v1 = vpop.permute.xlu0 %2184  ;;  %v1897_v4 = vsel %vm9917_vm14, %v9916_v16, %v9901_v5 }
 0x47c   :  { %v7334_v8 = vpop.permute.xlu1 %1746 }
 0x47d   :  { %2224 = vrot.lane.b32.xlu0 %v1631_v28, %s4980_s11 }
 0x47e   :  { %2356 = vrot.lane.b32.xlu1 %v7203_v12, %s4980_s11  ;;  %v1835_v12 = vsel %vm9920_vm13, %v6913_v50, %v6984_v48  ;;  %v9929_v50 = vld [vmem:[#allocation72_spill] sm:$0xff]  ;;  %vm9935_vm13 = vcmask 883712  }
 0x47f   :  { %v7339_v25 = vpop.permute.xlu0 %2234 }
 0x480   :  { %9911 = vst [vmem:[#allocation34_spill] sm:$0xff] %v7339_v25  ;;  %v7344_v51 = vpop.permute.xlu1 %1814 }
 0x481   :  { %9915 = vst [vmem:[#allocation33_spill] sm:$0xff] %v7344_v51  ;;  %2220 = vrot.lane.b32.xlu0 %v1629_v34, %s4980_s11  ;;  %v7353_v28 = vsel %vm9918_vm2, %v6984_v48, %v7344_v51  ;;  %v9922_v34 = vld [vmem:[#allocation65_spill] sm:$0xff]  ;;  %v9926_v51 = vld [vmem:[#allocation40_spill] sm:$0xff]  ;;  %v9928_v48 = vld [vmem:[#allocation63_spill] sm:$0xff] }
 0x482   :  { %9919 = vst [vmem:[#allocation52_spill] sm:$0xff] %v7353_v28  ;;  %2402 = vrot.lane.b32.xlu1 %v1897_v4, %s4980_s11  ;;  %3116 = vmatprep.subr.bf16.mxu0 %v7353_v28  ;;  %v1699_v5 = vsel %vm9924_vm6, %v9923_v38, %v9922_v34  ;;  %v1896_v4 = vsel %vm9917_vm14, %v9926_v51, %v9916_v16  ;;  %vm9930_vm2 = vmmov %vm9924_vm6  ;;  %v9934_v51 = vld [vmem:[#allocation69_spill] sm:$0xff]  ;;  %vm9937_vm6 = vcmask 875520  }
 0x483   :  { %v7360_v33 = vpop.permute.xlu0 %2282  ;;  %3117 = vmatpush1.bf16.msra.mxu0 %v1835_v12  ;;  %v1767_v16 = vsel %vm9935_vm13, %v6955_v14, %v9934_v51  ;;  %vm9938_vm14 = vmmov %vm9937_vm6 }
 0x484   :  { %9921 = vst [vmem:[#allocation37_spill] sm:$0xff] %v7360_v33  ;;  %v7365_v13 = vpop.permute.xlu1 %1882  ;;  %v1697_v33 = vsel %vm9930_vm2, %v9929_v50, %v9928_v48  ;;  %v9936_v50 = vld [vmem:[#allocation42_spill] sm:$0xff]  ;;  %vm9942_vm2 = vmmov %vm9935_vm13  ;;  %vm9943_vm13 = vcmask 1039360  }
 0x485   :  { %9925 = vst [vmem:[#allocation41_spill] sm:$0xff] %v7365_v13  ;;  %2272 = vrot.lane.b32.xlu0 %v1699_v5, %s4980_s11  ;;  %v9932_v13 = vld [vmem:[#allocation59_spill] sm:$0xff] }
 0x486   :  { %2400 = vrot.lane.b32.xlu1 %v1896_v4, %s4980_s11  ;;  %v1965_v5 = vsel %vm9690_vm10, %v9932_v13, %v9906_v6 }
 0x487   :  { %v7372_v9 = vpop.permute.xlu0 %2332 }
 0x488   :  { %9927 = vst [vmem:[#allocation38_spill] sm:$0xff] %v7372_v9  ;;  %v7377_v25 = vpop.permute.xlu1 %1950  ;;  %v9941_v9 = vld [vmem:[#allocation74_spill] sm:$0xff] }
 0x489   :  { %9931 = vst [vmem:[#allocation44_spill] sm:$0xff] %v7377_v25  ;;  %2268 = vrot.lane.b32.xlu0 %v1697_v33, %s4980_s11  ;;  %v1964_v25 = vsel %vm9690_vm10, %v9936_v50, %v9932_v13  ;;  %v1630_v13 = vsel %vm9943_vm13, %v9912_v20, %v6939_v11 }
 0x48a   :  { %2450 = vrot.lane.b32.xlu1 %v1965_v5, %s4980_s11 }
 0x48b   :  { %v7384_v28 = vpop.permute.xlu0 %2380 }
 0x48c   :  { %9933 = vst [vmem:[#allocation39_spill] sm:$0xff] %v7384_v28  ;;  %v2187_v4 = vpop.permute.xlu1 %2186  ;;  %v9940_v28 = vld [vmem:[#allocation67_spill] sm:$0xff] }
 0x48d   :  { %2320 = vrot.lane.b32.xlu0 %v1767_v16, %s4980_s11  ;;  %v2569_v33 = vsel %vm9937_vm6, %v2187_v4, %v7319_v22  ;;  %v2568_v6 = vsel %vm9938_vm14, %v2185_v1, %v2187_v4  ;;  %v1765_v18 = vsel %vm9942_vm2, %v9941_v9, %v9940_v28  ;;  %vm9945_vm6 = vcmask 1031168   ;;  %v9947_v4 = vld [vmem:[#allocation73_spill] sm:$0xff] }
 0x48e   :  { %2448 = vrot.lane.b32.xlu1 %v1964_v25, %s4980_s11  ;;  %2959 = vmatprep.subr.bf16.mxu1 %v2569_v33  ;;  %v1698_v9 = vsel %vm9945_vm6, %v9928_v48, %v9923_v38  ;;  %vm9948_vm14 = vcmask 867328   ;;  %v9949_v38 = vld [vmem:[#allocation53_spill] sm:$0xff] }
 0x48f   :  { %v7397_v5 = vpop.permute.xlu0 %2376  ;;  %2960 = vmatpush1.bf16.msra.mxu1 %v2568_v6  ;;  %v1902_v11 = vsel %vm9948_vm14, %v9947_v4, %v6994_v41  ;;  %vm9950_vm13 = vmmov %vm9948_vm14  ;;  %vm9958_vm14 = vcmask 1039360  }
 0x490   :  { %9939 = vst [vmem:[#allocation60_spill] sm:$0xff] %v7397_v5  ;;  %v7402_v16 = vpop.permute.xlu1 %2236  ;;  %v1901_v48 = vsel %vm9950_vm13, %v9949_v38, %v9947_v4  ;;  %v9954_v4 = vld [vmem:[#allocation54_spill] sm:$0xff]  ;;  %vm9956_vm6 = vmmov %vm9950_vm13 }
 0x491   :  { %2316 = vrot.lane.b32.xlu0 %v1765_v18, %s4980_s11 }
 0x492   :  { %2222 = vrot.lane.b32.xlu1 %v1630_v13, %s4980_s11  ;;  %v9951_v13 = vld [vmem:[#allocation86_spill] sm:$0xff] }
 0x493   :  { %v7409_v1 = vpop.permute.xlu0 %2428 }
 0x494   :  { %9944 = vst [vmem:[#allocation58_spill] sm:$0xff] %v7409_v1  ;;  %v7411_v25 = vpop.permute.xlu1 %2232 }
 0x495   :  { %2366 = vrot.lane.b32.xlu0 %v6969_v37, %s4980_s11  ;;  %v1766_v37 = vsel %vm9942_vm2, %v9940_v28, %v6955_v14  ;;  %v9953_v28 = vld [vmem:[#allocation82_spill] sm:$0xff]  ;;  %vm9960_vm2 = vcmask 1031168  }
 0x496   :  { %2270 = vrot.lane.b32.xlu1 %v1698_v9, %s4980_s11  ;;  %v9952_v9 = vld [vmem:[#allocation77_spill] sm:$0xff]  ;;  %vm9961_vm13 = vmmov %vm9960_vm2 }
 0x497   :  { %v7419_v18 = vpop.permute.xlu0 %2476  ;;  %v1969_v38 = vsel %vm9690_vm10, %v9954_v4, %v9952_v9 }
 0x498   :  { %9946 = vst [vmem:[#allocation70_spill] sm:$0xff] %v7419_v18  ;;  %v7424_v20 = vpop.permute.xlu1 %2284 }
 0x499   :  { %2414 = vrot.lane.b32.xlu0 %v1902_v11, %s4980_s11  ;;  %v1970_v11 = vsel %vm9690_vm10, %v9952_v9, %v9951_v13  ;;  %v9959_v9 = vld [vmem:[#allocation78_spill] sm:$0xff] }
 0x49a   :  { %2318 = vrot.lane.b32.xlu1 %v1766_v37, %s4980_s11  ;;  %v1971_v4 = vsel %vm9690_vm10, %v9951_v13, %v9959_v9 }
 0x49b   :  { %v7431_v50 = vpop.permute.xlu0 %2200 }
 0x49c   :  { %v7436_v33 = vpop.permute.xlu1 %2280 }
 0x49d   :  { %2412 = vrot.lane.b32.xlu0 %v1901_v48, %s4980_s11 }
 0x49e   :  { %2368 = vrot.lane.b32.xlu1 %v1835_v12, %s4980_s11  ;;  %v9955_v12 = vld [vmem:[#allocation75_spill] sm:$0xff] }
 0x49f   :  { %v2197_v6 = vpop.permute.xlu0 %2196  ;;  %v1903_v18 = vsel %vm9956_vm6, %v6994_v41, %v9955_v12  ;;  %v4812_v41 = vld [vmem:[%s9537_s4 + $0x4] ss:$20 sps:$4 sm:$0xff]   ;;  %vm9962_vm6 = vcmask 883712  }
 0x4a0   :  { %v7443_v14 = vpop.permute.xlu1 %2330  ;;  %2983 = vmatprep.mubr.bf16.mxu1 %v4812_v41  ;;  %3142 = vmatprep.mubr.bf16.mxu0 %v4812_v41 }
 0x4a1   :  { %2462 = vrot.lane.b32.xlu0 %v1970_v11, %s4980_s11 }
 0x4a2   :  { %2364 = vrot.lane.b32.xlu1 %v9953_v28, %s4980_s11  ;;  %v9957_v28 = vld [vmem:[#allocation11_spill] sm:$0xff] }
 0x4a3   :  { %v7448_v37 = vpop.permute.xlu0 %2248  ;;  %v1617_v1 = vsel %vm9958_vm14, %v9957_v28, %v7048_v54  ;;  %vm9963_vm14 = vmmov %vm9962_vm6 }
 0x4a4   :  { %v7453_v48 = vpop.permute.xlu1 %2328 }
 0x4a5   :  { %2460 = vrot.lane.b32.xlu0 %v1969_v38, %s4980_s11 }
 0x4a6   :  { %2416 = vrot.lane.b32.xlu1 %v1903_v18, %s4980_s11  ;;  %v1686_v18 = vsel %vm9960_vm2, %v7060_v29, %v7031_v56  ;;  %vm9964_vm2 = vcmask 1039360  }
 0x4a7   :  { %v7460_v11 = vpop.permute.xlu0 %2244 }
 0x4a8   :  { %v7465_v5 = vpop.permute.xlu1 %2378 }
 0x4a9   :  { %2190 = vrot.lane.b32.xlu0 %v1617_v1, %s4980_s11  ;;  %v1685_v1 = vsel %vm9961_vm13, %v6493_v60, %v7060_v29  ;;  %v1622_v29 = vsel %vm9964_vm2, %v6595_v3, %v7134_v49 }
 0x4aa   :  { %2464 = vrot.lane.b32.xlu1 %v1971_v4, %s4980_s11  ;;  %v1754_v4 = vsel %vm9962_vm6, %v7072_v44, %v7043_v39  ;;  %vm9967_vm6 = vmmov %vm9964_vm2 }
 0x4ab   :  { %v7472_v38 = vpop.permute.xlu0 %2296  ;;  %v1618_v3 = vsel %vm9967_vm6, %v7048_v54, %v7019_v36  ;;  %vm9970_vm6 = vmmov %vm9964_vm2 }
 0x4ac   :  { %v7480_v28 = vpop.permute.xlu1 %2426 }
 0x4ad   :  { %2240 = vrot.lane.b32.xlu0 %v1686_v18, %s4980_s11  ;;  %v1753_v18 = vsel %vm9963_vm14, %v6507_v17, %v7072_v44  ;;  %v1690_v17 = vsel %vm9961_vm13, %v6609_v47, %v7143_v57  ;;  %v1623_v47 = vsel %vm9964_vm2, %v7134_v49, %v7067_v31  ;;  %vm9968_vm13 = vcmask 875520  }
 0x4ae   :  { %2238 = vrot.lane.b32.xlu1 %v1685_v1, %s4980_s11  ;;  %vm9969_vm4 = vmmov %vm9968_vm13  ;;  %vm9973_vm2 = vcmask 883712  }
 0x4af   :  { %v7487_v13 = vpop.permute.xlu0 %2292 }
 0x4b0   :  { %v7492_v9 = vpop.permute.xlu1 %2424 }
 0x4b1   :  { %2288 = vrot.lane.b32.xlu0 %v1754_v4, %s4980_s11 }
 0x4b2   :  { %2286 = vrot.lane.b32.xlu1 %v1753_v18, %s4980_s11 }
 0x4b3   :  { %v7499_v60 = vpop.permute.xlu0 %2342 }
 0x4b4   :  { %v7504_v41 = vpop.permute.xlu1 %2474 }
 0x4b5   :  { %9965 = vst [vmem:[#allocation55_spill] sm:$0xff] %v7504_v41  ;;  %2202 = vrot.lane.b32.xlu0 %v1622_v29, %s4980_s11 }
 0x4b6   :  { %2334 = vrot.lane.b32.xlu1 %v7090_v53, %s4980_s11  ;;  %v1758_v53 = vsel %vm9963_vm14, %v6624_v23, %v7153_v15  ;;  %v1628_v23 = vsel %vm9970_vm6, %v7244_v58, %v7205_v43  ;;  %vm9971_vm14 = vcmask 1031168   ;;  %v4972_v43 = vld [vmem:[#allocation2 + $0x80] sm:$0xff] }
 0x4b7   :  { %v7509_v1 = vpop.permute.xlu0 %2340  ;;  %v1691_v49 = vsel %vm9971_vm14, %v7143_v57, %v7079_v0  ;;  %v10002_v0 = vld [vmem:[#allocation81_spill] sm:$0xff] }
 0x4b8   :  { %v7514_v44 = vpop.permute.xlu1 %2472 }
 0x4b9   :  { %9966 = vst [vmem:[#allocation65_spill] sm:$0xff] %v7514_v44  ;;  %2250 = vrot.lane.b32.xlu0 %v1690_v17, %s4980_s11 }
 0x4ba   :  { %2192 = vrot.lane.b32.xlu1 %v1618_v3, %s4980_s11 }
 0x4bb   :  { %v7521_v4 = vpop.permute.xlu0 %2390 }
 0x4bc   :  { %v2199_v18 = vpop.permute.xlu1 %2198 }
 0x4bd   :  { %2298 = vrot.lane.b32.xlu0 %v1758_v53, %s4980_s11  ;;  %v2574_v29 = vsel %vm9968_vm13, %v2199_v18, %v7431_v50  ;;  %v2573_v54 = vsel %vm9969_vm4, %v2197_v6, %v2199_v18  ;;  %vm9972_vm4 = vmmov %vm9971_vm14 }
 0x4be   :  { %2204 = vrot.lane.b32.xlu1 %v1623_v47, %s4980_s11  ;;  %2961 = vmatprep.subr.bf16.mxu1 %v2574_v29  ;;  %v1696_v53 = vsel %vm9972_vm4, %v7256_v27, %v7218_v46  ;;  %v1759_v47 = vsel %vm9973_vm2, %v7153_v15, %v7095_v24  ;;  %vm9975_vm13 = vmmov %vm9973_vm2 }
 0x4bf   :  { %v7534_v17 = vpop.permute.xlu0 %2388  ;;  %2962 = vmatpush1.bf16.msra.mxu1 %v2573_v54  ;;  %v1764_v57 = vsel %vm9975_vm13, %v7268_v40, %v7227_v59  ;;  %vm9977_vm14 = vmmov %vm9970_vm6 }
 0x4c0   :  { %v7539_v3 = vpop.permute.xlu1 %2246  ;;  %v1632_v15 = vsel %vm9977_vm14, %v9909_v10, %v7312_v19  ;;  %vm9979_vm2 = vmmov %vm9972_vm4  ;;  %v1763_v10 = vsel %vm9975_vm13, %v9903_v62, %v7268_v40 }
 0x4c1   :  { %2216 = vrot.lane.b32.xlu0 %v1628_v23, %s4980_s11  ;;  %v1627_v23 = vsel %vm9970_vm6, %v9882_v45, %v7244_v58  ;;  %v1700_v58 = vsel %vm9979_vm2, %v9922_v34, %v7324_v30  ;;  %vm9980_vm6 = vmmov %vm9975_vm13  ;;  %v1633_v34 = vsel %vm9977_vm14, %v7312_v19, %v7251_v2 }
 0x4c2   :  { %2252 = vrot.lane.b32.xlu1 %v1691_v49, %s4980_s11 }
 0x4c3   :  { %v7546_v6 = vpop.permute.xlu0 %2438 }
 0x4c4   :  { %v7551_v18 = vpop.permute.xlu1 %2294 }
 0x4c5   :  { %2264 = vrot.lane.b32.xlu0 %v1696_v53, %s4980_s11 }
 0x4c6   :  { %2300 = vrot.lane.b32.xlu1 %v1759_v47, %s4980_s11  ;;  %v1695_v47 = vsel %vm9972_vm4, %v9893_v63, %v7256_v27  ;;  %v1768_v27 = vsel %vm9980_vm6, %v9934_v51, %v7334_v8  ;;  %vm9982_vm4 = vcmask 875520   ;;  %v1701_v51 = vsel %vm9979_vm2, %v7324_v30, %v7263_v42  ;;  %v4970_v42 = vld [vmem:[#allocation2 + $0x20] sm:$0xff] }
 0x4c7   :  { %v7558_v29 = vpop.permute.xlu0 %2436  ;;  %v7609_v62 = vsel %vm9982_vm4, %v7084_v21, %v7055_v52  ;;  %vm9984_vm13 = vmmov %vm9982_vm4  ;;  %v9986_v21 = vld [vmem:[#allocation46_spill] sm:$0xff]  ;;  %vm9987_vm6 = vcmask 711680   ;;  %v9991_v52 = vld [vmem:[#allocation64_spill] sm:$0xff] }
 0x4c8   :  { %9974 = vst [vmem:[#allocation79_spill] sm:$0xff] %v7558_v29  ;;  %v7563_v54 = vpop.permute.xlu1 %2344  ;;  %9983 = vst [vmem:[#allocation59_spill] sm:$0xff] %v7609_v62 }
 0x4c9   :  { %2312 = vrot.lane.b32.xlu0 %v1764_v57, %s4980_s11  ;;  %vm9988_vm14 = vmmov %vm9982_vm4  ;;  %vm9989_vm4 = vcmask 883712  }
 0x4ca   :  { %2214 = vrot.lane.b32.xlu1 %v1627_v23, %s4980_s11  ;;  %v1769_v30 = vsel %vm9989_vm4, %v7334_v8, %v7275_v32  ;;  %vm9992_vm2 = vmmov %vm9987_vm6  ;;  %v7648_v8 = vld [vmem:[#allocation2 + $0xb0] sm:$0xff]  ;;  %v9994_v32 = vld [vmem:[#allocation80_spill] sm:$0xff]  ;;  %v7672_v46 = vsel %vm9988_vm14, %v7166_v7, %v7232_v55 }
 0x4cb   :  { %v7570_v49 = vpop.permute.xlu0 %2486  ;;  %9999 = vst [vmem:[#allocation42_spill] sm:$0xff] %v7672_v46  ;;  %vm10001_vm4 = vmmov %vm9992_vm2 }
 0x4cc   :  { %9976 = vst [vmem:[#allocation40_spill] sm:$0xff] %v7570_v49  ;;  %v7575_v53 = vpop.permute.xlu1 %2392 }
 0x4cd   :  { %2226 = vrot.lane.b32.xlu0 %v1632_v15, %s4980_s11 }
 0x4ce   :  { %2262 = vrot.lane.b32.xlu1 %v1695_v47, %s4980_s11 }
 0x4cf   :  { %v7582_v57 = vpop.permute.xlu0 %2484 }
 0x4d0   :  { %9978 = vst [vmem:[#allocation63_spill] sm:$0xff] %v7582_v57  ;;  %v7587_v45 = vpop.permute.xlu1 %2440 }
 0x4d1   :  { %2274 = vrot.lane.b32.xlu0 %v1700_v58, %s4980_s11  ;;  %v9985_v58 = vld [vmem:[#allocation66_spill] sm:$0xff] }
 0x4d2   :  { %2310 = vrot.lane.b32.xlu1 %v1763_v10, %s4980_s11  ;;  %v2034_v10 = vsel %vm9987_vm6, %v9986_v21, %v9985_v58  ;;  %vm9997_vm6 = vmmov %vm9992_vm2 }
 0x4d3   :  { %v2211_v23 = vpop.permute.xlu0 %2210 }
 0x4d4   :  { %v7597_v63 = vpop.permute.xlu1 %2488 }
 0x4d5   :  { %9981 = vst [vmem:[#allocation72_spill] sm:$0xff] %v7597_v63  ;;  %2322 = vrot.lane.b32.xlu0 %v1768_v27, %s4980_s11 }
 0x4d6   :  { %2228 = vrot.lane.b32.xlu1 %v1633_v34, %s4980_s11 }
 0x4d7   :  { %v7604_v15 = vpop.permute.xlu0 %2258 }
 0x4d8   :  { %v7611_v40 = vpop.permute.xlu1 %2212 }
 0x4d9   :  { %2336 = vrot.lane.b32.xlu0 %v7609_v62, %s4980_s11  ;;  %v2579_v19 = vsel %vm9984_vm13, %v2211_v23, %v7611_v40  ;;  %v9990_v62 = vld [vmem:[#allocation71_spill] sm:$0xff]  ;;  %vm9995_vm13 = vmmov %vm9992_vm2 }
 0x4da   :  { %2276 = vrot.lane.b32.xlu1 %v1701_v51, %s4980_s11  ;;  %2963 = vmatprep.subr.bf16.mxu1 %v2579_v19 }
 0x4db   :  { %v7621_v47 = vpop.permute.xlu0 %2306 }
 0x4dc   :  { %v2209_v27 = vpop.permute.xlu1 %2208 }
 0x4dd   :  { %2500 = vrot.lane.b32.xlu0 %v2034_v10, %s4980_s11  ;;  %v2578_v34 = vsel %vm9988_vm14, %v2209_v27, %v2211_v23  ;;  %v2033_v10 = vsel %vm9992_vm2, %v9991_v52, %v9986_v21 }
 0x4de   :  { %2324 = vrot.lane.b32.xlu1 %v1769_v30, %s4980_s11  ;;  %2964 = vmatpush1.bf16.msra.mxu1 %v2578_v34  ;;  %v9993_v30 = vld [vmem:[#allocation88_spill] sm:$0xff] }
 0x4df   :  { %v7632_v51 = vpop.permute.xlu0 %2354  ;;  %v2038_v21 = vsel %vm9995_vm13, %v9994_v32, %v9993_v30  ;;  %vm10003_vm13 = vmmov %vm9988_vm14 }
 0x4e0   :  { %v7634_v19 = vpop.permute.xlu1 %2260 }
 0x4e1   :  { %2020 = vrot.lane.b32.xlu0 %v9990_v62, %s4986_s17 }
 0x4e2   :  { %2498 = vrot.lane.b32.xlu1 %v2033_v10, %s4980_s11  ;;  %v9996_v10 = vld [vmem:[#allocation45_spill] sm:$0xff] }
 0x4e3   :  { %v7642_v23 = vpop.permute.xlu0 %2352  ;;  %v2032_v24 = vsel %vm9997_vm6, %v9996_v10, %v9991_v52  ;;  %v10000_v52 = vld [vmem:[#allocation56_spill] sm:$0xff]  ;;  %vm10008_vm6 = vcmask 703488  }
 0x4e4   :  { %v7644_v27 = vpop.permute.xlu1 %2256  ;;  %vm10013_vm14 = vmmov %vm10008_vm6 }
 0x4e5   :  { %2346 = vrot.lane.b32.xlu0 %v7175_v26, %s4980_s11 }
 0x4e6   :  { %2018 = vrot.lane.b32.xlu1 %v7648_v8, %s4986_s17 }
 0x4e7   :  { %v7652_v34 = vpop.permute.xlu0 %2404 }
 0x4e8   :  { %v7657_v59 = vpop.permute.xlu1 %2308 }
 0x4e9   :  { %2510 = vrot.lane.b32.xlu0 %v2038_v21, %s4980_s11 }
 0x4ea   :  { %2496 = vrot.lane.b32.xlu1 %v2032_v24, %s4980_s11  ;;  %v2037_v24 = vsel %vm10001_vm4, %v10000_v52, %v9994_v32  ;;  %v10005_v32 = vld [vmem:[#allocation35_spill] sm:$0xff]  ;;  %vm10018_vm4 = vmmov %vm10008_vm6 }
 0x4eb   :  { %v7664_v26 = vpop.permute.xlu0 %2452 }
 0x4ec   :  { %9998 = vst [vmem:[#allocation69_spill] sm:$0xff] %v7664_v26  ;;  %v7666_v39 = vpop.permute.xlu1 %2304 }
 0x4ed   :  { %2050 = vrot.lane.b32.xlu0 %v4970_v42, %s4987_s18  ;;  %v2039_v42 = vsel %vm9992_vm2, %v9993_v30, %v10002_v0  ;;  %v10007_v30 = vld [vmem:[#allocation13_spill] sm:$0xff]  ;;  %vm10020_vm2 = vmmov %vm10018_vm4 }
 0x4ee   :  { %2348 = vrot.lane.b32.xlu1 %v7672_v46, %s4980_s11  ;;  %v7691_v46 = vsel %vm10003_vm13, %v7141_v35, %v7239_v61  ;;  %v10009_v35 = vld [vmem:[#allocation105_spill] sm:$0xff] }
 0x4ef   :  { %v7676_v21 = vpop.permute.xlu0 %2224  ;;  %10004 = vst [vmem:[#allocation67_spill] sm:$0xff] %v7691_v46  ;;  %v10016_v0 = vld [vmem:[#allocation25_spill] sm:$0xff] }
 0x4f0   :  { %v7681_v10 = vpop.permute.xlu1 %2356 }
 0x4f1   :  { %2508 = vrot.lane.b32.xlu0 %v2037_v24, %s4980_s11  ;;  %v10006_v24 = vld [vmem:[#allocation19_spill] sm:$0xff] }
 0x4f2   :  { %2512 = vrot.lane.b32.xlu1 %v2039_v42, %s4980_s11  ;;  %v2092_v42 = vsel %vm10008_vm6, %v10007_v30, %v10006_v24  ;;  %vm10021_vm6 = vmmov %vm10003_vm13 }
 0x4f3   :  { %v2221_v7 = vpop.permute.xlu0 %2220 }
 0x4f4   :  { %v7693_v55 = vpop.permute.xlu1 %2402 }
 0x4f5   :  { %2360 = vrot.lane.b32.xlu0 %v7691_v46, %s4980_s11  ;;  %v10011_v46 = vld [vmem:[#allocation43_spill] sm:$0xff] }
 0x4f6   :  { %2052 = vrot.lane.b32.xlu1 %v10005_v32, %s4987_s18  ;;  %v10012_v32 = vld [vmem:[#allocation18_spill] sm:$0xff] }
 0x4f7   :  { %v7699_v52 = vpop.permute.xlu0 %2272  ;;  %v2091_v63 = vsel %vm10013_vm14, %v10012_v32, %v10007_v30  ;;  %vm10023_vm14 = vmmov %vm10021_vm6 }
 0x4f8   :  { %v7704_v57 = vpop.permute.xlu1 %2400 }
 0x4f9   :  { %2524 = vrot.lane.b32.xlu0 %v2092_v42, %s4980_s11  ;;  %v10015_v42 = vld [vmem:[#allocation52_spill] sm:$0xff] }
 0x4fa   :  { %2358 = vrot.lane.b32.xlu1 %v10009_v35, %s4980_s11  ;;  %v4971_v35 = vld [vmem:[#allocation2 + $0x50] sm:$0xff] }
 0x4fb   :  { %v2269_v61 = vpop.permute.xlu0 %2268 }
 0x4fc   :  { %v7709_v49 = vpop.permute.xlu1 %2450 }
 0x4fd   :  { %10010 = vst [vmem:[#allocation74_spill] sm:$0xff] %v7709_v49  ;;  %2064 = vrot.lane.b32.xlu0 %v10011_v46, %s4987_s18  ;;  %v10017_v46 = vld [vmem:[#allocation30_spill] sm:$0xff] }
 0x4fe   :  { %2522 = vrot.lane.b32.xlu1 %v2091_v63, %s4980_s11  ;;  %v2096_v41 = vsel %vm10018_vm4, %v10017_v46, %v10016_v0  ;;  %v10019_v63 = vld [vmem:[#allocation12_spill] sm:$0xff]  ;;  %v10022_v49 = vld [vmem:[#allocation34_spill] sm:$0xff]  ;;  %vm10026_vm4 = vmmov %vm10021_vm6 }
 0x4ff   :  { %v7717_v24 = vpop.permute.xlu0 %2320  ;;  %v2090_v30 = vsel %vm10020_vm2, %v10019_v63, %v10012_v32  ;;  %v2589_v26 = vsel %vm10023_vm14, %v10022_v49, %v7402_v16  ;;  %v10024_v32 = vld [vmem:[#allocation49_spill] sm:$0xff]  ;;  %vm10028_vm2 = vmmov %vm10026_vm4 }
 0x500   :  { %v7719_v56 = vpop.permute.xlu1 %2448  ;;  %v10025_v63 = vld [vmem:[#allocation33_spill] sm:$0xff] }
 0x501   :  { %10014 = vst [vmem:[#allocation73_spill] sm:$0xff] %v7719_v56  ;;  %2370 = vrot.lane.b32.xlu0 %v10015_v42, %s4980_s11  ;;  %v7746_v29 = vsel %vm10026_vm4, %v10025_v63, %v10024_v32  ;;  %vm10034_vm4 = vmmov %vm10028_vm2 }
 0x502   :  { %2062 = vrot.lane.b32.xlu1 %v4971_v35, %s4987_s18  ;;  %10027 = vst [vmem:[#allocation53_spill] sm:$0xff] %v7746_v29 }
 0x503   :  { %v7724_v44 = vpop.permute.xlu0 %2316 }
 0x504   :  { %v2223_v58 = vpop.permute.xlu1 %2222 }
 0x505   :  { %2534 = vrot.lane.b32.xlu0 %v2096_v41, %s4980_s11  ;;  %v2584_v56 = vsel %vm10003_vm13, %v2223_v58, %v7676_v21  ;;  %v2583_v42 = vsel %vm10021_vm6, %v2221_v7, %v2223_v58  ;;  %vm10029_vm13 = vmmov %vm10028_vm2  ;;  %vm10031_vm6 = vcmask 703488  }
 0x506   :  { %2520 = vrot.lane.b32.xlu1 %v2090_v30, %s4980_s11  ;;  %2965 = vmatprep.subr.bf16.mxu1 %v2584_v56  ;;  %v2588_v56 = vsel %vm10028_vm2, %v7411_v25, %v10022_v49  ;;  %vm10033_vm14 = vmmov %vm10031_vm6  ;;  %v2593_v49 = vsel %vm10034_vm4, %v7460_v11, %v7539_v3  ;;  %v10039_v11 = vld [vmem:[#allocation62_spill] sm:$0xff]  ;;  %vm10043_vm4 = vcmask 703488  }
 0x507   :  { %v7737_v35 = vpop.permute.xlu0 %2366  ;;  %2966 = vmatpush1.bf16.msra.mxu1 %v2583_v42  ;;  %v10032_v42 = vld [vmem:[#allocation32_spill] sm:$0xff] }
 0x508   :  { %2967 = vmatprep.subr.bf16.mxu1 %v2589_v26  ;;  %v2271_v41 = vpop.permute.xlu1 %2270  ;;  %v2594_v26 = vsel %vm10029_vm13, %v7539_v3, %v7448_v37  ;;  %v2097_v25 = vsel %vm10033_vm14, %v10016_v0, %v10032_v42  ;;  %vm10037_vm13 = vcmask 867328   ;;  %vm10040_vm14 = vmmov %vm10028_vm2 }
 0x509   :  { %2074 = vrot.lane.b32.xlu0 %v4972_v43, %s4987_s18  ;;  %v10030_v43 = vld [vmem:[#allocation21_spill] sm:$0xff] }
 0x50a   :  { %2372 = vrot.lane.b32.xlu1 %v7746_v29, %s4980_s11  ;;  %v2095_v7 = vsel %vm10031_vm6, %v10030_v43, %v10017_v46  ;;  %v2599_v46 = vsel %vm10028_vm2, %v7604_v15, %v7634_v19  ;;  %vm10038_vm6 = vmmov %vm10028_vm2  ;;  %v10042_v29 = vld [vmem:[#allocation68_spill] sm:$0xff] }
 0x50b   :  { %v7753_v58 = vpop.permute.xlu0 %2414  ;;  %2968 = vmatpush1.bf16.msra.mxu1 %v2588_v56  ;;  %v10035_v56 = vld [vmem:[#allocation96_spill] sm:$0xff]  ;;  %v2598_v0 = vsel %vm10038_vm6, %v7644_v27, %v7604_v15  ;;  %v10044_v15 = vld [vmem:[#allocation15_spill] sm:$0xff]  ;;  %vm10045_vm2 = vmmov %vm10037_vm13 }
 0x50c   :  { %2969 = vmatprep.subr.bf16.mxu1 %v2594_v26  ;;  %v2319_v30 = vpop.permute.xlu1 %2318  ;;  %v10036_v26 = vld [vmem:[#allocation84_spill] sm:$0xff] }
 0x50d   :  { %2532 = vrot.lane.b32.xlu0 %v2095_v7, %s4980_s11  ;;  %v1890_v43 = vsel %vm10037_vm13, %v10036_v26, %v10035_v56  ;;  %v1889_v27 = vsel %vm10045_vm2, %v10044_v15, %v10036_v26  ;;  %vm10046_vm13 = vmmov %vm10038_vm6  ;;  %v10052_v15 = vld [vmem:[#allocation106_spill] sm:$0xff] }
 0x50e   :  { %2536 = vrot.lane.b32.xlu1 %v2097_v25, %s4980_s11  ;;  %v2604_v25 = vsel %vm10040_vm14, %v2271_v41, %v7699_v52  ;;  %vm10049_vm14 = vmmov %vm10043_vm4 }
 0x50f   :  { %v7769_v63 = vpop.permute.xlu0 %2412  ;;  %2970 = vmatpush1.bf16.msra.mxu1 %v2593_v49  ;;  %v10041_v49 = vld [vmem:[#allocation50_spill] sm:$0xff] }
 0x510   :  { %2971 = vmatprep.subr.bf16.mxu1 %v2599_v46  ;;  %v7777_v7 = vpop.permute.xlu1 %2368  ;;  %v2102_v46 = vsel %vm10043_vm4, %v10042_v29, %v10041_v49  ;;  %vm10050_vm4 = vmmov %vm10038_vm6 }
 0x511   :  { %2384 = vrot.lane.b32.xlu0 %v1890_v43, %s4980_s11  ;;  %v2603_v43 = vsel %vm10046_vm13, %v2269_v61, %v2271_v41  ;;  %vm10051_vm2 = vmmov %vm10050_vm4  ;;  %vm10054_vm13 = vcmask 867328  }
 0x512   :  { %2076 = vrot.lane.b32.xlu1 %v10039_v11, %s4987_s18  ;;  %v10047_v11 = vld [vmem:[#allocation37_spill] sm:$0xff] }
 0x513   :  { %v7785_v3 = vpop.permute.xlu0 %2462  ;;  %2972 = vmatpush1.bf16.msra.mxu1 %v2598_v0  ;;  %v2609_v32 = vsel %vm10038_vm6, %v10047_v11, %v7424_v20  ;;  %v2608_v61 = vsel %vm10050_vm4, %v7436_v33, %v10047_v11  ;;  %vm10055_vm6 = vmmov %vm10051_vm2  ;;  %vm10059_vm4 = vcmask 703488  }
 0x514   :  { %2973 = vmatprep.subr.bf16.mxu1 %v2604_v25  ;;  %v7792_v56 = vpop.permute.xlu1 %2364  ;;  %v2613_v33 = vsel %vm10055_vm6, %v7487_v13, %v7551_v18 }
 0x515   :  { %2548 = vrot.lane.b32.xlu0 %v2102_v46, %s4980_s11  ;;  %v10048_v46 = vld [vmem:[#allocation48_spill] sm:$0xff] }
 0x516   :  { %2382 = vrot.lane.b32.xlu1 %v1889_v27, %s4980_s11  ;;  %v2101_v26 = vsel %vm10049_vm14, %v10048_v46, %v10042_v29  ;;  %v10053_v27 = vld [vmem:[#allocation20_spill] sm:$0xff]  ;;  %vm10056_vm14 = vmmov %vm10051_vm2 }
 0x517   :  { %v7800_v0 = vpop.permute.xlu0 %2460  ;;  %2974 = vmatpush1.bf16.msra.mxu1 %v2603_v43  ;;  %v2619_v11 = vsel %vm10056_vm14, %v7621_v47, %v7657_v59 }
 0x518   :  { %2975 = vmatprep.subr.bf16.mxu1 %v2609_v32  ;;  %v7805_v25 = vpop.permute.xlu1 %2416  ;;  %v2614_v32 = vsel %vm10051_vm2, %v7551_v18, %v7472_v38  ;;  %vm10061_vm2 = vmmov %vm10059_vm4 }
 0x519   :  { %2088 = vrot.lane.b32.xlu0 %v9990_v62, %s4987_s18  ;;  %v1894_v62 = vsel %vm10054_vm13, %v10053_v27, %v10052_v15  ;;  %vm10062_vm13 = vmmov %vm10055_vm6 }
 0x51a   :  { %2546 = vrot.lane.b32.xlu1 %v2101_v26, %s4980_s11  ;;  %v10057_v26 = vld [vmem:[#allocation83_spill] sm:$0xff]  ;;  %v2618_v18 = vsel %vm10062_vm13, %v7666_v39, %v7621_v47  ;;  %vm10064_vm14 = vmmov %vm10061_vm2 }
 0x51b   :  { %v2191_v41 = vpop.permute.xlu0 %2190  ;;  %2976 = vmatpush1.bf16.msra.mxu1 %v2608_v61  ;;  %v10058_v61 = vld [vmem:[#allocation89_spill] sm:$0xff] }
 0x51c   :  { %2977 = vmatprep.subr.bf16.mxu1 %v2614_v32  ;;  %v7822_v43 = vpop.permute.xlu1 %2464  ;;  %v2106_v32 = vsel %vm10059_vm4, %v10058_v61, %v10057_v26  ;;  %vm10066_vm4 = vcmask 867328  }
 0x51d   :  { %2394 = vrot.lane.b32.xlu0 %v1894_v62, %s4980_s11 }
 0x51e   :  { %2086 = vrot.lane.b32.xlu1 %v7648_v8, %s4987_s18  ;;  %v10060_v8 = vld [vmem:[#allocation26_spill] sm:$0xff] }
 0x51f   :  { %v7830_v29 = vpop.permute.xlu0 %2240  ;;  %2978 = vmatpush1.bf16.msra.mxu1 %v2613_v33  ;;  %v2100_v13 = vsel %vm10061_vm2, %v10060_v8, %v10048_v46  ;;  %v2624_v33 = vsel %vm10055_vm6, %v2319_v30, %v7717_v24  ;;  %v10065_v46 = vld [vmem:[#allocation97_spill] sm:$0xff]  ;;  %vm10067_vm2 = vmmov %vm10055_vm6  ;;  %v7867_v8 = vld [vmem:[%s9537_s4] ss:$20 sps:$4 sm:$0xff]  }
 0x520   :  { %2979 = vmatprep.subr.bf16.mxu1 %v2619_v11  ;;  %v7838_v27 = vpop.permute.xlu1 %2238  ;;  %v10063_v11 = vld [vmem:[#allocation76_spill] sm:$0xff]  ;;  %v1895_v39 = vsel %vm10066_vm4, %v10052_v15, %v10065_v46  ;;  %v2623_v47 = vsel %vm10067_vm2, %v7724_v44, %v2319_v30  ;;  %vm10069_vm13 = vmmov %vm10067_vm2  ;;  %v10073_v30 = vld [vmem:[#allocation91_spill] sm:$0xff] }
 0x521   :  { %2558 = vrot.lane.b32.xlu0 %v2106_v32, %s4980_s11  ;;  %v2105_v32 = vsel %vm10064_vm14, %v10063_v11, %v10058_v61  ;;  %v10071_v11 = vld [vmem:[#allocation102_spill] sm:$0xff]  ;;  %vm10072_vm6 = vmmov %vm10066_vm4  ;;  %v10076_v46 = vld [vmem:[#allocation41_spill] sm:$0xff] }
 0x522   :  { %2544 = vrot.lane.b32.xlu1 %v2100_v13, %s4980_s11  ;;  %v10068_v13 = vld [vmem:[#allocation38_spill] sm:$0xff]  ;;  %vm10074_vm4 = vmmov %vm10067_vm2 }
 0x523   :  { %v7848_v62 = vpop.permute.xlu0 %2288  ;;  %2980 = vmatpush1.bf16.msra.mxu1 %v2618_v18  ;;  %v2629_v18 = vsel %vm10069_vm13, %v7443_v14, %v10068_v13  ;;  %vm10077_vm13 = vmmov %vm10072_vm6 }
 0x524   :  { %2981 = vmatprep.subr.bf16.mxu1 %v2624_v33  ;;  %v7855_v49 = vpop.permute.xlu1 %2286  ;;  %v10070_v33 = vld [vmem:[#allocation27_spill] sm:$0xff] }
 0x525   :  { %2556 = vrot.lane.b32.xlu0 %v2105_v32, %s4980_s11  ;;  %v1900_v15 = vsel %vm10072_vm6, %v10071_v11, %v10070_v33  ;;  %v7878_v32 = vld [vmem:[%s9537_s4 + $0x2c] ss:$20 sps:$4 sm:$0xff]  }
 0x526   :  { %2396 = vrot.lane.b32.xlu1 %v1895_v39, %s4980_s11  ;;  %v2107_v39 = vsel %vm10064_vm14, %v10057_v26, %v10073_v30  ;;  %vm10080_vm14 = vmmov %vm10067_vm2 }
 0x527   :  { %v2203_v61 = vpop.permute.xlu0 %2202  ;;  %2982 = vmatpush1.bf16.msra.mxu1 %v2623_v47  ;;  %v2628_v47 = vsel %vm10074_vm4, %v7453_v48, %v7443_v14  ;;  %v10079_v14 = vld [vmem:[#allocation57_spill] sm:$0xff]  ;;  %vm10081_vm4 = vmmov %vm10067_vm2 }
 0x528   :  { %3004 = vmatprep.subr.bf16.mxu1 %v2629_v18  ;;  %v7880_v44 = vpop.permute.xlu1 %2334  ;;  %v2634_v18 = vsel %vm10067_vm2, %v7499_v60, %v7563_v54  ;;  %v1899_v48 = vsel %vm10072_vm6, %v10079_v14, %v10071_v11  ;;  %v10083_v11 = vld [vmem:[#allocation98_spill] sm:$0xff]  ;;  %v10084_v14 = vld [vmem:[#allocation85_spill] sm:$0xff] }
 0x529   :  { %2408 = vrot.lane.b32.xlu0 %v1900_v15, %s4980_s11  ;;  %v10075_v15 = vld [vmem:[#allocation29_spill] sm:$0xff] }
 0x52a   :  { %2560 = vrot.lane.b32.xlu1 %v2107_v39, %s4980_s11  ;;  %2984 = vmatmul.mubr.bf16.vlgmr.msra.gmra.mrb[16].mxu1 %v7867_v8  ;;  %v1905_v42 = vsel %vm10077_vm13, %v10076_v46, %v10075_v15  ;;  %vm10082_vm13 = vmmov %vm10067_vm2 }
 0x52b   :  { %v7891_v33 = vpop.permute.xlu0 %2250  ;;  %3005 = vmatpush1.bf16.msra.mxu1 %v2628_v47  ;;  %2993 = vmatprep.mubr.bf16.mxu1 %v7878_v32  ;;  %v2633_v47 = vsel %vm10081_vm4, %v7509_v1, %v7499_v60  ;;  %vm10087_vm4 = vmmov %vm10067_vm2 }
 0x52c   :  { %3006 = vmatprep.subr.bf16.mxu1 %v2634_v18  ;;  %v7900_v26 = vpop.permute.xlu1 %2192  ;;  %v2570_v18 = vsel %vm10067_vm2, %v7319_v22, %v2191_v41  ;;  %v1904_v22 = vsel %vm10072_vm6, %v9955_v12, %v10076_v46  ;;  %v7946_v12 = vld [vmem:[%s9537_s4 + $0xc] ss:$20 sps:$4 sm:$0xff]   ;;  %vm10092_vm6 = vmmov %vm10067_vm2 }
 0x52d   :  { %10078 = vst [vmem:[#allocation86_spill] sm:$0xff] %v7900_v26  ;;  %2420 = vrot.lane.b32.xlu0 %v1905_v42, %s4980_s11  ;;  %v2571_v39 = vsel %vm10080_vm14, %v2191_v41, %v7900_v26  ;;  %v2639_v42 = vsel %vm10082_vm13, %v7632_v51, %v7681_v10  ;;  %v1958_v26 = vsel %vm9690_vm10, %v10084_v14, %v10083_v11  ;;  %vm10086_vm14 = vmmov %vm10067_vm2  ;;  %v7933_v41 = vld [vmem:[%s9537_s4 + $0x28] ss:$20 sps:$4 sm:$0xff]  }
 0x52e   :  { %2406 = vrot.lane.b32.xlu1 %v1899_v48, %s4980_s11  ;;  %3118 = vmatprep.subr.bf16.mxu0 %v2571_v39  ;;  %v2638_v48 = vsel %vm10087_vm4, %v7642_v23, %v7632_v51  ;;  %vm10088_vm13 = vmmov %vm10067_vm2  ;;  %v10089_v51 = vld [vmem:[#allocation99_spill] sm:$0xff]  ;;  %v10090_v23 = vld [vmem:[#allocation108_spill] sm:$0xff] }
 0x52f   :  { %v7914_v15 = vpop.permute.xlu0 %2298  ;;  %3007 = vmatpush1.bf16.msra.mxu1 %v2633_v47  ;;  %3119 = vmatpush1.bf16.msra.mxu0 %v2570_v18  ;;  %v2644_v46 = vsel %vm10088_vm13, %v7737_v35, %v7777_v7  ;;  %v1963_v47 = vsel %vm9690_vm10, %v10090_v23, %v10089_v51  ;;  %vm10099_vm4 = vmmov %vm10067_vm2 }
 0x530   :  { %3008 = vmatprep.subr.bf16.mxu1 %v2639_v42  ;;  %v7922_v60 = vpop.permute.xlu1 %2204  ;;  %v2643_v42 = vsel %vm10092_vm6, %v7792_v56, %v7737_v35  ;;  %v10097_v35 = vld [vmem:[#allocation22_spill] sm:$0xff]  ;;  %vm10103_vm13 = vmmov %vm10067_vm2 }
 0x531   :  { %10085 = vst [vmem:[#allocation77_spill] sm:$0xff] %v7922_v60  ;;  %2432 = vrot.lane.b32.xlu0 %v1958_v26, %s4980_s11  ;;  %v2576_v1 = vsel %vm10086_vm14, %v2203_v61, %v7922_v60  ;;  %v2575_v26 = vsel %vm10067_vm2, %v7431_v50, %v2203_v61  ;;  %v10091_v50 = vld [vmem:[#allocation16_spill] sm:$0xff]  ;;  %vm10094_vm14 = vmmov %vm10067_vm2  ;;  %v1962_v56 = vsel %vm9690_vm10, %v10097_v35, %v10090_v23  ;;  %v10102_v23 = vld [vmem:[#allocation61_spill] sm:$0xff] }
 0x532   :  { %2418 = vrot.lane.b32.xlu1 %v1904_v22, %s4980_s11  ;;  %3120 = vmatprep.subr.bf16.mxu0 %v2576_v1  ;;  %v1957_v61 = vsel %vm9690_vm10, %v10091_v50, %v10084_v14  ;;  %v10093_v1 = vld [vmem:[#allocation39_spill] sm:$0xff]  ;;  %v10098_v50 = vld [vmem:[#allocation60_spill] sm:$0xff]  ;;  %vm10104_vm6 = vmmov %vm10067_vm2 }
 0x533   :  { %v7941_v39 = vpop.permute.xlu0 %2216  ;;  %3009 = vmatpush1.bf16.msra.mxu1 %v2638_v48  ;;  %3121 = vmatpush1.bf16.msra.mxu0 %v2575_v26  ;;  %v2649_v48 = vsel %vm10094_vm14, %v7465_v5, %v10093_v1  ;;  %v10095_v26 = vld [vmem:[#allocation31_spill] sm:$0xff]  ;;  %v10100_v60 = vld [vmem:[#allocation44_spill] sm:$0xff]  ;;  %vm10105_vm14 = vmmov %vm10067_vm2 }
 0x534   :  { %3010 = vmatprep.subr.bf16.mxu1 %v2644_v46  ;;  %v7954_v18 = vpop.permute.xlu1 %2252  ;;  %2994 = vmatmul.mubr.bf16.gmra.mrb[20].mxu1 %v7933_v41  ;;  %v10096_v46 = vld [vmem:[#allocation103_spill] sm:$0xff] }
 0x535   :  { %2444 = vrot.lane.b32.xlu0 %v1963_v47, %s4980_s11  ;;  %3036 = vmatprep.mubr.bf16.mxu1 %v7946_v12  ;;  %v1968_v14 = vsel %vm9690_vm10, %v10096_v46, %v10095_v26  ;;  %v10101_v26 = vld [vmem:[#allocation78_spill] sm:$0xff]  ;;  %v1967_v35 = vsel %vm9690_vm10, %v10102_v23, %v10096_v46 }
 0x536   :  { %2430 = vrot.lane.b32.xlu1 %v1957_v61, %s4980_s11  ;;  %v2648_v61 = vsel %vm10099_vm4, %v10098_v50, %v7465_v5  ;;  %v2653_v50 = vsel %vm10105_vm14, %v7534_v17, %v7521_v4  ;;  %vm10106_vm4 = vmmov %vm10067_vm2 }
 0x537   :  { %v7965_v22 = vpop.permute.xlu0 %2264  ;;  %3011 = vmatpush1.bf16.msra.mxu1 %v2643_v42  ;;  %v2659_v46 = vsel %vm10106_vm4, %v7693_v55, %v7652_v34  ;;  %vm10112_vm14 = vmmov %vm10067_vm2 }
 0x538   :  { %3012 = vmatprep.subr.bf16.mxu1 %v2649_v48  ;;  %v7974_v47 = vpop.permute.xlu1 %2300  ;;  %v2654_v48 = vsel %vm10067_vm2, %v7521_v4, %v7575_v53  ;;  %v2658_v4 = vsel %vm10067_vm2, %v7704_v57, %v7693_v55  ;;  %v10111_v55 = vld [vmem:[#allocation36_spill] sm:$0xff]  ;;  %v2663_v57 = vsel %vm10112_vm14, %v7769_v63, %v7753_v58  ;;  %vm10114_vm4 = vmmov %vm10067_vm2 }
 0x539   :  { %2456 = vrot.lane.b32.xlu0 %v1968_v14, %s4980_s11  ;;  %v1972_v14 = vsel %vm9690_vm10, %v10101_v26, %v10100_v60  ;;  %vm10121_vm14 = vmmov %vm10114_vm4 }
 0x53a   :  { %2442 = vrot.lane.b32.xlu1 %v1962_v56, %s4980_s11 }
 0x53b   :  { %v7984_v42 = vpop.permute.xlu0 %2312  ;;  %3013 = vmatpush1.bf16.msra.mxu1 %v2648_v61 }
 0x53c   :  { %3014 = vmatprep.subr.bf16.mxu1 %v2654_v48  ;;  %v2215_v51 = vpop.permute.xlu1 %2214  ;;  %v10109_v48 = vld [vmem:[#allocation87_spill] sm:$0xff] }
 0x53d   :  { %2466 = vrot.lane.b32.xlu0 %v1972_v14, %s4980_s11  ;;  %v2581_v5 = vsel %vm10103_vm13, %v2215_v51, %v7941_v39  ;;  %v2580_v56 = vsel %vm10104_vm6, %v7611_v40, %v2215_v51  ;;  %vm10107_vm13 = vmmov %vm10067_vm2  ;;  %v10108_v51 = vld [vmem:[#allocation100_spill] sm:$0xff]  ;;  %vm10110_vm6 = vcmask 711680  }
 0x53e   :  { %2454 = vrot.lane.b32.xlu1 %v1967_v35, %s4980_s11  ;;  %3122 = vmatprep.subr.bf16.mxu0 %v2581_v5  ;;  %v2664_v40 = vsel %vm10107_vm13, %v7753_v58, %v7805_v25  ;;  %v2026_v14 = vsel %vm10110_vm6, %v10109_v48, %v10108_v51  ;;  %v10113_v35 = vld [vmem:[#allocation58_spill] sm:$0xff]  ;;  %vm10117_vm2 = vmmov %vm10110_vm6  ;;  %v10118_v58 = vld [vmem:[#allocation17_spill] sm:$0xff] }
 0x53f   :  { %v2227_v26 = vpop.permute.xlu0 %2226  ;;  %3015 = vmatpush1.bf16.msra.mxu1 %v2653_v50  ;;  %3123 = vmatpush1.bf16.msra.mxu0 %v2580_v56  ;;  %v2669_v5 = vsel %vm10114_vm4, %v7480_v28, %v10113_v35  ;;  %v10115_v56 = vld [vmem:[#allocation110_spill] sm:$0xff]  ;;  %v10116_v50 = vld [vmem:[#allocation24_spill] sm:$0xff]  ;;  %vm10119_vm13 = vmmov %vm10117_vm2 }
 0x540   :  { %3016 = vmatprep.subr.bf16.mxu1 %v2659_v46  ;;  %v8007_v61 = vpop.permute.xlu1 %2262  ;;  %v2030_v46 = vsel %vm10117_vm2, %v10116_v50, %v10115_v56  ;;  %v2025_v63 = vsel %vm10119_vm13, %v10118_v58, %v10109_v48  ;;  %vm10120_vm6 = vmmov %vm10114_vm4  ;;  %v10129_v58 = vld [vmem:[#allocation74_spill] sm:$0xff] }
 0x541   :  { %2206 = vrot.lane.b32.xlu0 %v7067_v31, %s4980_s11  ;;  %vm10122_vm2 = vmmov %vm10114_vm4 }
 0x542   :  { %2194 = vrot.lane.b32.xlu1 %v7019_v36, %s4980_s11  ;;  %v1973_v36 = vsel %vm9690_vm10, %v10100_v60, %v10111_v55  ;;  %v2674_v48 = vsel %vm10122_vm2, %v7546_v6, %v7587_v45  ;;  %vm10123_vm13 = vmmov %vm10122_vm2 }
 0x543   :  { %v8016_v17 = vpop.permute.xlu0 %2274  ;;  %3017 = vmatpush1.bf16.msra.mxu1 %v2658_v4 }
 0x544   :  { %3018 = vmatprep.subr.bf16.mxu1 %v2664_v40  ;;  %v8024_v31 = vpop.permute.xlu1 %2310  ;;  %v2668_v40 = vsel %vm10121_vm14, %v7492_v9, %v7480_v28  ;;  %v10124_v28 = vld [vmem:[#allocation79_spill] sm:$0xff]  ;;  %vm10127_vm14 = vmmov %vm10122_vm2 }
 0x545   :  { %2480 = vrot.lane.b32.xlu0 %v2026_v14, %s4980_s11  ;;  %v2585_v14 = vsel %vm10114_vm4, %v7676_v21, %v2227_v26  ;;  %vm10130_vm4 = vmmov %vm10122_vm2 }
 0x546   :  { %2468 = vrot.lane.b32.xlu1 %v1973_v36, %s4980_s11 }
 0x547   :  { %v8034_v23 = vpop.permute.xlu0 %2322  ;;  %3019 = vmatpush1.bf16.msra.mxu1 %v2663_v57  ;;  %v2591_v57 = vsel %vm10123_vm13, %v7838_v27, %v7830_v29  ;;  %vm10133_vm13 = vcmask 711680  }
 0x548   :  { %3020 = vmatprep.subr.bf16.mxu1 %v2669_v5  ;;  %v8042_v4 = vpop.permute.xlu1 %2228  ;;  %v2590_v5 = vsel %vm10127_vm14, %v7402_v16, %v7838_v27  ;;  %v10134_v27 = vld [vmem:[#allocation101_spill] sm:$0xff]  ;;  %vm10137_vm14 = vmmov %vm10122_vm2 }
 0x549   :  { %2490 = vrot.lane.b32.xlu0 %v2030_v46, %s4980_s11  ;;  %v2586_v60 = vsel %vm10120_vm6, %v2227_v26, %v8042_v4  ;;  %vm10125_vm6 = vmmov %vm10122_vm2  ;;  %v10126_v26 = vld [vmem:[#allocation107_spill] sm:$0xff]  ;;  %v10128_v46 = vld [vmem:[#allocation69_spill] sm:$0xff] }
 0x54a   :  { %2478 = vrot.lane.b32.xlu1 %v2025_v63, %s4980_s11  ;;  %3124 = vmatprep.subr.bf16.mxu0 %v2586_v60  ;;  %v2673_v21 = vsel %vm10125_vm6, %v10124_v28, %v7546_v6  ;;  %v2679_v63 = vsel %vm10130_vm4, %v10129_v58, %v10128_v46  ;;  %v10131_v60 = vld [vmem:[#allocation51_spill] sm:$0xff]  ;;  %vm10135_vm6 = vmmov %vm10133_vm13 }
 0x54b   :  { %v8056_v36 = vpop.permute.xlu0 %2336  ;;  %3021 = vmatpush1.bf16.msra.mxu1 %v2668_v40  ;;  %3125 = vmatpush1.bf16.msra.mxu0 %v2585_v14  ;;  %v10132_v40 = vld [vmem:[#allocation104_spill] sm:$0xff]  ;;  %v2031_v14 = vsel %vm10135_vm6, %v10115_v56, %v10134_v27  ;;  %vm10138_vm4 = vmmov %vm10122_vm2  ;;  %v2684_v56 = vsel %vm10122_vm2, %v7785_v3, %v7822_v43 }
 0x54c   :  { %3022 = vmatprep.subr.bf16.mxu1 %v2674_v48  ;;  %3126 = vmatprep.subr.bf16.mxu0 %v2591_v57  ;;  %v8064_v9 = vpop.permute.xlu1 %2276  ;;  %v2036_v16 = vsel %vm10133_vm13, %v10132_v40, %v10131_v60  ;;  %v10136_v48 = vld [vmem:[#allocation73_spill] sm:$0xff]  ;;  %v2595_v28 = vsel %vm10138_vm4, %v7448_v37, %v7891_v33  ;;  %vm10139_vm13 = vmmov %vm10122_vm2 }
 0x54d   :  { %2230 = vrot.lane.b32.xlu0 %v7251_v2, %s4980_s11  ;;  %v2596_v2 = vsel %vm10122_vm2, %v7891_v33, %v7954_v18  ;;  %v2678_v57 = vsel %vm10137_vm14, %v10136_v48, %v10129_v58  ;;  %v10140_v58 = vld [vmem:[#allocation66_spill] sm:$0xff]  ;;  %vm10141_vm14 = vmmov %vm10122_vm2 }
 0x54e   :  { %2218 = vrot.lane.b32.xlu1 %v10126_v26, %s4980_s11  ;;  %v2601_v26 = vsel %vm10139_vm13, %v8007_v61, %v7965_v22  ;;  %v2683_v37 = vsel %vm10141_vm14, %v7800_v0, %v7785_v3  ;;  %vm10142_vm4 = vmmov %vm10122_vm2  ;;  %v10146_v0 = vld [vmem:[#allocation81_spill] sm:$0xff] }
 0x54f   :  { %v8076_v50 = vpop.permute.xlu0 %2500  ;;  %3023 = vmatpush1.bf16.msra.mxu1 %v2673_v21  ;;  %3127 = vmatpush1.bf16.msra.mxu0 %v2590_v5  ;;  %v2600_v33 = vsel %vm10142_vm4, %v7634_v19, %v8007_v61  ;;  %vm10145_vm13 = vmmov %vm10122_vm2  ;;  %v10147_v19 = vld [vmem:[#allocation65_spill] sm:$0xff] }
 0x550   :  { %3024 = vmatprep.subr.bf16.mxu1 %v2679_v63  ;;  %3128 = vmatprep.subr.bf16.mxu0 %v2596_v2  ;;  %v8084_v6 = vpop.permute.xlu1 %2324  ;;  %v2035_v63 = vsel %vm10135_vm6, %v10140_v58, %v10132_v40  ;;  %v2606_v40 = vsel %vm10145_vm13, %v8016_v17, %v8064_v9  ;;  %vm10148_vm14 = vmmov %vm10122_vm2  ;;  %v10151_v58 = vld [vmem:[#allocation72_spill] sm:$0xff] }
 0x551   :  { %2504 = vrot.lane.b32.xlu0 %v2036_v16, %s4980_s11  ;;  %v10143_v16 = vld [vmem:[#allocation70_spill] sm:$0xff]  ;;  %vm10150_vm4 = vmmov %vm10122_vm2 }
 0x552   :  { %2492 = vrot.lane.b32.xlu1 %v2031_v14, %s4980_s11  ;;  %v10144_v14 = vld [vmem:[#allocation55_spill] sm:$0xff]  ;;  %vm10153_vm13 = vmmov %vm10122_vm2 }
 0x553   :  { %v8100_v21 = vpop.permute.xlu0 %2020  ;;  %3025 = vmatpush1.bf16.msra.mxu1 %v2678_v57  ;;  %3129 = vmatpush1.bf16.msra.mxu0 %v2595_v28  ;;  %v2689_v48 = vsel %vm10122_vm2, %v10144_v14, %v10143_v16  ;;  %v2688_v61 = vsel %vm10148_vm14, %v10147_v19, %v10144_v14  ;;  %v10149_v28 = vld [vmem:[#allocation90_spill] sm:$0xff]  ;;  %vm10155_vm14 = vmmov %vm10122_vm2 }
 0x554   :  { %3026 = vmatprep.subr.bf16.mxu1 %v2684_v56  ;;  %3130 = vmatprep.subr.bf16.mxu0 %v2601_v26  ;;  %v2499_v5 = vpop.permute.xlu1 %2498  ;;  %v2605_v56 = vsel %vm10150_vm4, %v7699_v52, %v8016_v17  ;;  %v10154_v52 = vld [vmem:[#allocation63_spill] sm:$0xff]  ;;  %vm10156_vm4 = vmmov %vm10122_vm2 }
 0x555   :  { %v2699_v19 = vsel %vm10122_vm2, %v2499_v5, %v8076_v50 }
 0x556   :  { %2502 = vrot.lane.b32.xlu1 %v2035_v63, %s4980_s11  ;;  %v10152_v63 = vld [vmem:[#allocation40_spill] sm:$0xff] }
 0x557   :  { %v8118_v2 = vpop.permute.xlu0 %2346  ;;  %3027 = vmatpush1.bf16.msra.mxu1 %v2683_v37  ;;  %3131 = vmatpush1.bf16.msra.mxu0 %v2600_v33  ;;  %v2694_v37 = vsel %vm10122_vm2, %v10152_v63, %v10151_v58  ;;  %v2611_v33 = vsel %vm10153_vm13, %v7855_v49, %v7848_v62  ;;  %v2693_v17 = vsel %vm10155_vm14, %v10154_v52, %v10152_v63  ;;  %vm10158_vm13 = vmmov %vm10122_vm2  ;;  %v8186_v52 = vld [vmem:[%s9537_s4 + $0x8] ss:$20 sps:$4 sm:$0xff]  }
 0x558   :  { %3028 = vmatprep.subr.bf16.mxu1 %v2689_v48  ;;  %3132 = vmatprep.subr.bf16.mxu0 %v2606_v40  ;;  %v2019_v3 = vpop.permute.xlu1 %2018  ;;  %v2610_v40 = vsel %vm10156_vm4, %v7424_v20, %v7855_v49  ;;  %vm10161_vm14 = vmmov %vm10122_vm2 }
 0x559   :  { %v2040_v57 = vsel %vm10135_vm6, %v10146_v0, %v2019_v3  ;;  %v2041_v48 = vsel %vm10135_vm6, %v2019_v3, %v8100_v21  ;;  %v10157_v0 = vld [vmem:[#allocation94_spill] sm:$0xff]  ;;  %v2616_v3 = vsel %vm10158_vm13, %v7914_v15, %v7974_v47  ;;  %vm10160_vm6 = vcmask 703488   ;;  %vm10162_vm4 = vmmov %vm10122_vm2 }
 0x55a   :  { %2242 = vrot.lane.b32.xlu1 %v10149_v28, %s4980_s11  ;;  %2514 = vrot.lane.b32.xlu0 %v2040_v57, %s4980_s11  ;;  %v10159_v28 = vld [vmem:[#allocation19_spill] sm:$0xff]  ;;  %vm10163_vm13 = vmmov %vm10122_vm2 }
 0x55b   :  { %v2511_v26 = vpop.permute.xlu0 %2510  ;;  %3029 = vmatpush1.bf16.msra.mxu1 %v2688_v61  ;;  %3133 = vmatpush1.bf16.msra.mxu0 %v2605_v56  ;;  %v2615_v56 = vsel %vm10162_vm4, %v7472_v38, %v7914_v15  ;;  %vm10167_vm4 = vmmov %vm10122_vm2 }
 0x55c   :  { %3030 = vmatprep.subr.bf16.mxu1 %v2694_v37  ;;  %3134 = vmatprep.subr.bf16.mxu0 %v2611_v33  ;;  %v2497_v14 = vpop.permute.xlu1 %2496  ;;  %v2621_v37 = vsel %vm10122_vm2, %v8024_v31, %v7984_v42 }
 0x55d   :  { %v2698_v49 = vsel %vm10161_vm14, %v2497_v14, %v2499_v5  ;;  %vm10165_vm14 = vmmov %vm10122_vm2  ;;  %v10166_v5 = vld [vmem:[#allocation109_spill] sm:$0xff] }
 0x55e   :  { %2516 = vrot.lane.b32.xlu1 %v2041_v48, %s4980_s11  ;;  %2254 = vrot.lane.b32.xlu0 %v10157_v0, %s4980_s11 }
 0x55f   :  { %v2051_v57 = vpop.permute.xlu0 %2050  ;;  %3031 = vmatpush1.bf16.msra.mxu1 %v2693_v17  ;;  %3135 = vmatpush1.bf16.msra.mxu0 %v2610_v40  ;;  %v2626_v17 = vsel %vm10167_vm4, %v8034_v23, %v8084_v6 }
 0x560   :  { %3032 = vmatprep.subr.bf16.mxu1 %v2699_v19  ;;  %3136 = vmatprep.subr.bf16.mxu0 %v2616_v3  ;;  %v8159_v61 = vpop.permute.xlu1 %2348  ;;  %v2093_v20 = vsel %vm10160_vm6, %v10159_v28, %v2051_v57  ;;  %vm10164_vm6 = vmmov %vm10122_vm2  ;;  %vm10168_vm2 = vcmask 703488  }
 0x561   :  { %v2620_v38 = vsel %vm10164_vm6, %v7657_v59, %v8024_v31  ;;  %v8194_v59 = vld [vmem:[%s9537_s4 + $0x34] ss:$20 sps:$4 sm:$0xff]   ;;  %vm10170_vm6 = vmmov %vm10167_vm4  ;;  %v2636_v28 = vsel %vm10167_vm4, %v8118_v2, %v8159_v61 }
 0x562   :  { %2526 = vrot.lane.b32.xlu1 %v2093_v20, %s4980_s11  ;;  %v2631_v19 = vsel %vm10170_vm6, %v7880_v44, %v8056_v36 }
 0x563   :  { %v2509_v63 = vpop.permute.xlu0 %2508  ;;  %3033 = vmatpush1.bf16.msra.mxu1 %v2698_v49  ;;  %3137 = vmatpush1.bf16.msra.mxu0 %v2615_v56 }
 0x564   :  { %3138 = vmatprep.subr.bf16.mxu0 %v2621_v37  ;;  %v8171_v33 = vpop.permute.xlu1 %2512  ;;  %v2703_v15 = vsel %vm10165_vm14, %v2509_v63, %v2511_v26  ;;  %vm10171_vm14 = vmmov %vm10167_vm4  ;;  %v10175_v63 = vmov 0  }
 0x565   :  { %v2704_v48 = vsel %vm10163_vm13, %v2511_v26, %v8171_v33  ;;  %vm10169_vm13 = vmmov %vm10167_vm4 }
 0x566   :  { %3034 = vmatprep.subr.bf16.mxu1 %v2704_v48  ;;  %2266 = vrot.lane.b32.xlu1 %v10166_v5, %s4980_s11  ;;  %v2625_v40 = vsel %vm10169_vm13, %v7717_v24, %v8034_v23  ;;  %v8220_v23 = vld [vmem:[%s9537_s4 + $0x30] ss:$20 sps:$4 sm:$0xff]  }
 0x567   :  { %v8181_v14 = vpop.permute.xlu0 %2360  ;;  %3139 = vmatpush1.bf16.msra.mxu0 %v2620_v38  ;;  %3035 = vmatpush1.bf16.msra.mxu1 %v2703_v15  ;;  %v10176_v48 = vld [vmem:[#allocation32_spill] sm:$0xff] }
 0x568   :  { %3140 = vmatprep.subr.bf16.mxu0 %v2626_v17  ;;  %v8196_v31 = vpop.permute.xlu1 %2052 }
 0x569   :  { %v2094_v26 = vsel %vm10168_vm2, %v2051_v57, %v8196_v31  ;;  %v2630_v57 = vsel %vm10171_vm14, %v10068_v13, %v7880_v44  ;;  %vm10172_vm2 = vmmov %vm10167_vm4  ;;  %vm10177_vm14 = vcmask 703488  }
 0x56a   :  { %2528 = vrot.lane.b32.xlu0 %v2094_v26, %s4980_s11  ;;  %3037 = vmatmul.mubr.bf16.vlgmr.msra.gmra.mrb[16].mxu1 %v8186_v52  ;;  %vm10173_vm13 = vmmov %vm10172_vm2  ;;  %v10180_v26 = vld [vmem:[#allocation14_spill] sm:$0xff] }
 0x56b   :  { %v8204_v0 = vpop.permute.xlu0 %2524  ;;  %3141 = vmatpush1.bf16.msra.mxu0 %v2625_v40  ;;  %3046 = vmatprep.mubr.bf16.mxu1 %v8194_v59  ;;  %v2635_v13 = vsel %vm10173_vm13, %v7563_v54, %v8118_v2  ;;  %vm10174_vm6 = vmmov %vm10172_vm2 }
 0x56c   :  { %3163 = vmatprep.subr.bf16.mxu0 %v2631_v19  ;;  %v2359_v3 = vpop.permute.xlu1 %2358  ;;  %vm10178_vm4 = vmmov %vm10177_vm14  ;;  %v10181_v19 = vld [vmem:[#allocation50_spill] sm:$0xff] }
 0x56d   :  { %v2641_v56 = vsel %vm10174_vm6, %v2359_v3, %v8181_v14  ;;  %v2640_v54 = vsel %vm10172_vm2, %v7681_v10, %v2359_v3  ;;  %vm10179_vm13 = vmmov %vm10172_vm2 }
 0x56e   :  { %3143 = vmatmul.mubr.bf16.vlgmr.msra.gmra.mrb[32].mxu0 %v7867_v8  ;;  %vm10182_vm6 = vmmov %vm10178_vm4 }
 0x56f   :  { %v8215_v24 = vpop.permute.xlu0 %2064  ;;  %3164 = vmatpush1.bf16.msra.mxu0 %v2630_v57  ;;  %3152 = vmatprep.mubr.bf16.mxu0 %v7878_v32  ;;  %vm10240_vm10 = vmmov %vm10172_vm2 }
 0x570   :  { %3165 = vmatprep.subr.bf16.mxu0 %v2636_v28  ;;  %v2523_v20 = vpop.permute.xlu1 %2522 }
 0x571   :  { %v2709_v49 = vsel %vm10172_vm2, %v2523_v20, %v8204_v0 }
 0x572   :  { %3057 = vmatprep.subr.bf16.mxu1 %v2709_v49  ;;  %3047 = vmatmul.mubr.bf16.gmra.mrb[20].mxu1 %v8220_v23 }
 0x573   :  { %v2371_v44 = vpop.permute.xlu0 %2370  ;;  %3166 = vmatpush1.bf16.msra.mxu0 %v2635_v13  ;;  %3089 = vmatprep.mubr.bf16.mxu1 %v10175_v63  ;;  %v10185_v13 = vld [vmem:[#allocation92_spill] sm:$0xff] }
 0x574   :  { %3167 = vmatprep.subr.bf16.mxu0 %v2641_v56  ;;  %v2063_v37 = vpop.permute.xlu1 %2062 }
 0x575   :  { %v2098_v38 = vsel %vm10177_vm14, %v10176_v48, %v2063_v37  ;;  %v2099_v15 = vsel %vm10178_vm4, %v2063_v37, %v8215_v24  ;;  %vm10183_vm14 = vmmov %vm10172_vm2 }
 0x576   :  { %2538 = vrot.lane.b32.xlu0 %v2098_v38, %s4980_s11  ;;  %2540 = vrot.lane.b32.xlu1 %v2099_v15, %s4980_s11  ;;  %vm10184_vm4 = vmmov %vm10172_vm2 }
 0x577   :  { %v2535_v2 = vpop.permute.xlu0 %2534  ;;  %3168 = vmatpush1.bf16.msra.mxu0 %v2640_v54  ;;  %v2645_v28 = vsel %vm10184_vm4, %v7777_v7, %v2371_v44  ;;  %vm10188_vm4 = vmmov %vm10172_vm2 }
 0x578   :  { %v2521_v5 = vpop.permute.xlu1 %2520  ;;  %3153 = vmatmul.mubr.bf16.gmra.mrb[36].mxu0 %v7933_v41 }
 0x579   :  { %v2708_v17 = vsel %vm10179_vm13, %v2521_v5, %v2523_v20  ;;  %3195 = vmatprep.mubr.bf16.mxu0 %v7946_v12  ;;  %vm10186_vm13 = vmmov %vm10172_vm2 }
 0x57a   :  { %2278 = vrot.lane.b32.xlu0 %v10180_v26, %s4980_s11  ;;  %3058 = vmatpush1.bf16.msra.mxu1 %v2708_v17 }
 0x57b   :  { %v2075_v40 = vpop.permute.xlu0 %2074 }
 0x57c   :  { %v2103_v57 = vsel %vm10182_vm6, %v10181_v19, %v2075_v40  ;;  %v8250_v10 = vpop.permute.xlu1 %2372 }
 0x57d   :  { %2550 = vrot.lane.b32.xlu1 %v2103_v57, %s4980_s11  ;;  %v2646_v3 = vsel %vm10183_vm14, %v2371_v44, %v8250_v10  ;;  %vm10187_vm14 = vmmov %vm10172_vm2 }
 0x57e   :  { %3169 = vmatprep.subr.bf16.mxu0 %v2646_v3 }
 0x57f   :  { %v2533_v20 = vpop.permute.xlu0 %2532  ;;  %3170 = vmatpush1.bf16.msra.mxu0 %v2645_v28 }
 0x580   :  { %v8257_v49 = vpop.permute.xlu1 %2536  ;;  %v2713_v37 = vsel %vm10186_vm13, %v2533_v20, %v2535_v2  ;;  %vm10189_vm13 = vmmov %vm10182_vm6 }
 0x581   :  { %2290 = vrot.lane.b32.xlu1 %v10185_v13, %s4980_s11  ;;  %v2714_v56 = vsel %vm10172_vm2, %v2535_v2, %v8257_v49  ;;  %v10191_v13 = vld [vmem:[#allocation95_spill] sm:$0xff] }
 0x582   :  { %3059 = vmatprep.subr.bf16.mxu1 %v2714_v56 }
 0x583   :  { %v8264_v48 = vpop.permute.xlu0 %2384  ;;  %3060 = vmatpush1.bf16.msra.mxu1 %v2713_v37  ;;  %v10192_v37 = vld [vmem:[#allocation111_spill] sm:$0xff] }
 0x584   :  { %v8266_v38 = vpop.permute.xlu1 %2076 }
 0x585   :  { %v2104_v7 = vsel %vm10182_vm6, %v2075_v40, %v8266_v38 }
 0x586   :  { %2552 = vrot.lane.b32.xlu0 %v2104_v7, %s4980_s11 }
 0x587   :  { %v8271_v44 = vpop.permute.xlu0 %2548 }
 0x588   :  { %v2383_v15 = vpop.permute.xlu1 %2382 }
 0x589   :  { %v2651_v54 = vsel %vm10187_vm14, %v2383_v15, %v8264_v48  ;;  %v2650_v5 = vsel %vm10188_vm4, %v10093_v1, %v2383_v15  ;;  %vm10190_vm14 = vmmov %vm10172_vm2  ;;  %v10194_v15 = vld [vmem:[#allocation47_spill] sm:$0xff] }
 0x58a   :  { %3171 = vmatprep.subr.bf16.mxu0 %v2651_v54  ;;  %vm10193_vm4 = vmmov %vm10172_vm2 }
 0x58b   :  { %v8277_v2 = vpop.permute.xlu0 %2088  ;;  %3172 = vmatpush1.bf16.msra.mxu0 %v2650_v5 }
 0x58c   :  { %v2547_v17 = vpop.permute.xlu1 %2546 }
 0x58d   :  { %v2719_v26 = vsel %vm10172_vm2, %v2547_v17, %v8271_v44 }
 0x58e   :  { %3061 = vmatprep.subr.bf16.mxu1 %v2719_v26 }
 0x58f   :  { %v2395_v40 = vpop.permute.xlu0 %2394 }
 0x590   :  { %v2087_v19 = vpop.permute.xlu1 %2086  ;;  %v2655_v54 = vsel %vm10172_vm2, %v7575_v53, %v2395_v40  ;;  %v8314_v53 = vld [vmem:[%s9537_s4 + $0x10] ss:$20 sps:$4 sm:$0xff]  }
 0x591   :  { %v2108_v57 = vsel %vm10189_vm13, %v10073_v30, %v2087_v19  ;;  %v2109_v3 = vsel %vm10182_vm6, %v2087_v19, %v8277_v2  ;;  %vm10196_vm13 = vmmov %vm10172_vm2 }
 0x592   :  { %2562 = vrot.lane.b32.xlu0 %v2108_v57, %s4980_s11  ;;  %2564 = vrot.lane.b32.xlu1 %v2109_v3, %s4980_s11  ;;  %vm10197_vm6 = vmmov %vm10172_vm2  ;;  %v10198_v3 = vld [vmem:[#allocation28_spill] sm:$0xff] }
 0x593   :  { %v2559_v1 = vpop.permute.xlu0 %2558 }
 0x594   :  { %v2545_v28 = vpop.permute.xlu1 %2544 }
 0x595   :  { %v2718_v20 = vsel %vm10190_vm14, %v2545_v28, %v2547_v17  ;;  %v10195_v17 = vld [vmem:[#allocation93_spill] sm:$0xff]  ;;  %v10199_v28 = vld [vmem:[#allocation23_spill] sm:$0xff]  ;;  %vm2944_vm14 = vcmask 523264  }
 0x596   :  { %2302 = vrot.lane.b32.xlu0 %v10191_v13, %s4980_s11  ;;  %3062 = vmatpush1.bf16.msra.mxu1 %v2718_v20 }
 0x597   :  { %v2557_v56 = vpop.permute.xlu0 %2556  ;;  %2314 = vrot.lane.b32.xlu1 %v10192_v37, %s4980_s11 }
 0x598   :  { %v8292_v30 = vpop.permute.xlu1 %2396  ;;  %v2723_v57 = vsel %vm10197_vm6, %v2557_v56, %v2559_v1  ;;  %v10201_v56 = vld [vmem:[#allocation49_spill] sm:$0xff]  ;;  %vm10205_vm6 = vmmov %vm10172_vm2 }
 0x599   :  { %v2656_v7 = vsel %vm10193_vm4, %v2395_v40, %v8292_v30  ;;  %vm10200_vm4 = vmmov %vm10172_vm2 }
 0x59a   :  { %2326 = vrot.lane.b32.xlu0 %v10194_v15, %s4980_s11  ;;  %3173 = vmatprep.subr.bf16.mxu0 %v2656_v7  ;;  %v10202_v7 = vld [vmem:[#allocation96_spill] sm:$0xff]  ;;  %v10203_v15 = vld [vmem:[#allocation59_spill] sm:$0xff] }
 0x59b   :  { %v8300_v5 = vpop.permute.xlu0 %2408  ;;  %2338 = vrot.lane.b32.xlu1 %v10195_v17, %s4980_s11  ;;  %3174 = vmatpush1.bf16.msra.mxu0 %v2655_v54 }
 0x59c   :  { %v8304_v26 = vpop.permute.xlu1 %2560 }
 0x59d   :  { %v2724_v19 = vsel %vm10196_vm13, %v2559_v1, %v8304_v26  ;;  %vm10204_vm13 = vmmov %vm10172_vm2 }
 0x59e   :  { %2350 = vrot.lane.b32.xlu0 %v10198_v3, %s4980_s11  ;;  %3063 = vmatprep.subr.bf16.mxu1 %v2724_v19  ;;  %v10206_v19 = vld [vmem:[#allocation97_spill] sm:$0xff] }
 0x59f   :  { %v8316_v40 = vpop.permute.xlu0 %2420  ;;  %2362 = vrot.lane.b32.xlu1 %v10199_v28, %s4980_s11  ;;  %3064 = vmatpush1.bf16.msra.mxu1 %v2723_v57  ;;  %v8345_v57 = vld [vmem:[%s9537_s4 + $0x38] ss:$20 sps:$4 sm:$0xff]  }
 0x5a0   :  { %3269 = vmatprep.subr.bf16.mxu1 %v10195_v17  ;;  %v2407_v20 = vpop.permute.xlu1 %2406 }
 0x5a1   :  { %v2661_v1 = vsel %vm10200_vm4, %v2407_v20, %v8300_v5  ;;  %v2660_v13 = vsel %vm10172_vm2, %v7652_v34, %v2407_v20  ;;  %vm10209_vm4 = vmmov %vm10172_vm2 }
 0x5a2   :  { %2374 = vrot.lane.b32.xlu0 %v10201_v56, %s4980_s11  ;;  %4561 = vmatmul.mubr.msk.bf16.vlgmr.msra.gmra.mrb[16].mxu1 %vm2944_vm14, %v8314_v53 }
 0x5a3   :  { %v8329_v37 = vpop.permute.xlu0 %2432  ;;  %2386 = vrot.lane.b32.xlu1 %v10202_v7, %s4980_s11  ;;  %3175 = vmatprep.subr.bf16.mxu0 %v2661_v1  ;;  %v10208_v1 = vld [vmem:[#allocation42_spill] sm:$0xff] }
 0x5a4   :  { %3270 = vmatpush1.bf16.msra.mxu1 %v10203_v15  ;;  %3176 = vmatpush1.bf16.msra.mxu0 %v2660_v13  ;;  %v2419_v54 = vpop.permute.xlu1 %2418  ;;  %v10210_v15 = vld [vmem:[#allocation29_spill] sm:$0xff] }
 0x5a5   :  { %3271 = vmatprep.subr.bf16.mxu1 %v10198_v3  ;;  %v2666_v34 = vsel %vm10204_vm13, %v2419_v54, %v8316_v40  ;;  %v2665_v17 = vsel %vm10205_vm6, %v7805_v25, %v2419_v54  ;;  %3099 = vmatprep.mubr.bf16.mxu1 %v10175_v63  ;;  %v10207_v3 = vld [vmem:[#allocation27_spill] sm:$0xff]  ;;  %vm10212_vm13 = vmmov %vm10172_vm2 }
 0x5a6   :  { %2398 = vrot.lane.b32.xlu0 %v10206_v19, %s4980_s11  ;;  %3177 = vmatprep.subr.bf16.mxu0 %v2666_v34  ;;  %v10211_v34 = vld [vmem:[#allocation67_spill] sm:$0xff]  ;;  %vm10213_vm6 = vmmov %vm10172_vm2 }
 0x5a7   :  { %v8347_v20 = vpop.permute.xlu0 %2444  ;;  %2410 = vrot.lane.b32.xlu1 %v10207_v3, %s4980_s11  ;;  %v4973_v19 = vld [vmem:[%s9537_s4 + $0x4] ss:$20 sps:$4 sm:$0xff]  }
 0x5a8   :  { %3272 = vmatpush1.bf16.msra.mxu1 %v10208_v1  ;;  %3178 = vmatpush1.bf16.msra.mxu0 %v2665_v17  ;;  %v2431_v25 = vpop.permute.xlu1 %2430  ;;  %v10215_v1 = vld [vmem:[#allocation31_spill] sm:$0xff] }
 0x5a9   :  { %3273 = vmatprep.subr.bf16.mxu1 %v10199_v28  ;;  %v2671_v13 = vsel %vm10209_vm4, %v2431_v25, %v8329_v37  ;;  %v2670_v7 = vsel %vm10172_vm2, %v10113_v35, %v2431_v25  ;;  %vm10217_vm4 = vmmov %vm10172_vm2 }
 0x5aa   :  { %2422 = vrot.lane.b32.xlu0 %v10210_v15, %s4980_s11  ;;  %4562 = vmatmul.mubr.msk.bf16.gmra.mrb[20].mxu1 %vm2944_vm14, %v8345_v57 }
 0x5ab   :  { %v8361_v54 = vpop.permute.xlu0 %2456  ;;  %2434 = vrot.lane.b32.xlu1 %v10083_v11, %s4980_s11  ;;  %3179 = vmatprep.subr.bf16.mxu0 %v2671_v13  ;;  %v10214_v11 = vld [vmem:[#allocation99_spill] sm:$0xff] }
 0x5ac   :  { %3274 = vmatpush1.bf16.msra.mxu1 %v10211_v34  ;;  %3180 = vmatpush1.bf16.msra.mxu0 %v2670_v7  ;;  %v2443_v28 = vpop.permute.xlu1 %2442  ;;  %v10218_v34 = vld [vmem:[#allocation86_spill] sm:$0xff] }
 0x5ad   :  { %3275 = vmatprep.subr.bf16.mxu1 %v10201_v56  ;;  %v2676_v35 = vsel %vm10212_vm13, %v2443_v28, %v8347_v20  ;;  %v2675_v17 = vsel %vm10213_vm6, %v7587_v45, %v2443_v28  ;;  %3301 = vmatprep.mubr.bf16.mxu1 %v4973_v19  ;;  %v10216_v56 = vld [vmem:[#allocation53_spill] sm:$0xff]  ;;  %vm10219_vm13 = vmmov %vm10172_vm2 }
 0x5ae   :  { %2446 = vrot.lane.b32.xlu0 %v10214_v11, %s4980_s11  ;;  %3181 = vmatprep.subr.bf16.mxu0 %v2676_v35  ;;  %vm10220_vm6 = vmmov %vm10172_vm2 }
 0x5af   :  { %v2467_v3 = vpop.permute.xlu0 %2466  ;;  %2458 = vrot.lane.b32.xlu1 %v10215_v1, %s4980_s11  ;;  %v2112_v1 = vld [vmem:[%s9538_s5 + $0x10] sm:$0xff] }
 0x5b0   :  { %3276 = vmatpush1.bf16.msra.mxu1 %v10216_v56  ;;  %3182 = vmatpush1.bf16.msra.mxu0 %v2675_v17  ;;  %v2455_v25 = vpop.permute.xlu1 %2454 }
 0x5b1   :  { %v2681_v45 = vsel %vm10217_vm4, %v2455_v25, %v8361_v54  ;;  %v2680_v13 = vsel %vm10172_vm2, %v10128_v46, %v2455_v25  ;;  %vm10221_vm4 = vmmov %vm10172_vm2  ;;  %v2113_v25 = vld [vmem:[%s9538_s5 + $0x18] sm:$0xff] }
 0x5b2   :  { %2470 = vrot.lane.b32.xlu0 %v10111_v55, %s4980_s11  ;;  %3183 = vmatprep.subr.bf16.mxu0 %v2681_v45  ;;  %v2685_v46 = vsel %vm10221_vm4, %v7822_v43, %v2467_v3  ;;  %vm10225_vm4 = vmmov %vm10172_vm2 }
 0x5b3   :  { %v2207_v7 = vpop.permute.xlu0 %2206  ;;  %2482 = vrot.lane.b32.xlu1 %v10108_v51, %s4980_s11 }
 0x5b4   :  { %3184 = vmatpush1.bf16.msra.mxu0 %v2680_v13  ;;  %v2195_v15 = vpop.permute.xlu1 %2194 }
 0x5b5   :  { %3277 = vmatprep.subr.bf16.mxu1 %v2195_v15  ;;  %v2572_v28 = vsel %vm10219_vm13, %v10218_v34, %v2195_v15  ;;  %vm10223_vm13 = vmmov %vm10172_vm2 }
 0x5b6   :  { %2530 = vrot.lane.b32.xlu0 %v8196_v31, %s4980_s11  ;;  %3278 = vmatpush1.bf16.msra.mxu1 %v2572_v28  ;;  %v10222_v31 = vld [vmem:[#allocation77_spill] sm:$0xff] }
 0x5b7   :  { %v8391_v35 = vpop.permute.xlu0 %2480  ;;  %2494 = vrot.lane.b32.xlu1 %v10134_v27, %s4980_s11  ;;  %3279 = vmatprep.subr.bf16.mxu1 %v2207_v7  ;;  %v2577_v27 = vsel %vm10172_vm2, %v10222_v31, %v2207_v7 }
 0x5b8   :  { %v8395_v55 = vpop.permute.xlu1 %2468 }
 0x5b9   :  { %v2686_v51 = vsel %vm10220_vm6, %v2467_v3, %v8395_v55  ;;  %vm10224_vm6 = vmmov %vm10172_vm2 }
 0x5ba   :  { %2542 = vrot.lane.b32.xlu0 %v8215_v24, %s4980_s11  ;;  %3185 = vmatprep.subr.bf16.mxu0 %v2686_v51 }
 0x5bb   :  { %2506 = vrot.lane.b32.xlu1 %v10131_v60, %s4980_s11  ;;  %3186 = vmatpush1.bf16.msra.mxu0 %v2685_v46  ;;  %v2491_v19 = vpop.permute.xlu0 %2490  ;;  %v2110_v60 = vld [vmem:[%s9538_s5] sm:$0xff] }
 0x5bc   :  { %3280 = vmatpush1.bf16.msra.mxu1 %v2577_v27  ;;  %v2479_v17 = vpop.permute.xlu1 %2478 }
 0x5bd   :  { %v2691_v11 = vsel %vm10223_vm13, %v2479_v17, %v8391_v35  ;;  %v2690_v24 = vsel %vm10224_vm6, %v10143_v16, %v2479_v17  ;;  %vm10226_vm13 = vmmov %vm10172_vm2 }
 0x5be   :  { %2554 = vrot.lane.b32.xlu0 %v8266_v38, %s4980_s11  ;;  %3187 = vmatprep.subr.bf16.mxu0 %v2691_v11  ;;  %vm10227_vm6 = vmmov %vm10172_vm2 }
 0x5bf   :  { %2518 = vrot.lane.b32.xlu1 %v8100_v21, %s4980_s11  ;;  %3188 = vmatpush1.bf16.msra.mxu0 %v2690_v24  ;;  %v2231_v16 = vpop.permute.xlu0 %2230  ;;  %v2111_v21 = vld [vmem:[%s9538_s5 + $0x8] sm:$0xff] }
 0x5c0   :  { %v2219_v43 = vpop.permute.xlu1 %2218  ;;  %v2587_v56 = vsel %vm10227_vm6, %v8042_v4, %v2231_v16  ;;  %vm10230_vm6 = vmmov %vm10172_vm2 }
 0x5c1   :  { %3281 = vmatprep.subr.bf16.mxu1 %v2219_v43  ;;  %v2582_v3 = vsel %vm10225_vm4, %v7941_v39, %v2219_v43  ;;  %vm10228_vm4 = vmmov %vm10172_vm2 }
 0x5c2   :  { %2566 = vrot.lane.b32.xlu0 %v8277_v2, %s4980_s11  ;;  %3282 = vmatpush1.bf16.msra.mxu1 %v2582_v3  ;;  %v2695_v2 = vsel %vm10226_vm13, %v10151_v58, %v2491_v19  ;;  %vm10229_vm13 = vmmov %vm10172_vm2 }
 0x5c3   :  { %2116 = vperm.xlu1 %4803, %v2110_v60   ;;  %3283 = vmatprep.subr.bf16.mxu1 %v2231_v16  ;;  %v8439_v13 = vpop.permute.xlu0 %2504 }
 0x5c4   :  { %v8425_v38 = vpop.permute.xlu1 %2492 }
 0x5c5   :  { %v2696_v39 = vsel %vm10172_vm2, %v2491_v19, %v8425_v38 }
 0x5c6   :  { %2121 = vperm.xlu0 %4802, %v2111_v21   ;;  %3189 = vmatprep.subr.bf16.mxu0 %v2696_v39 }
 0x5c7   :  { %2126 = vperm.xlu1 %4803, %v2112_v1   ;;  %3190 = vmatpush1.bf16.msra.mxu0 %v2695_v2 }
 0x5c8   :  { %3284 = vmatpush1.bf16.msra.mxu1 %v2587_v56  ;;  %v2503_v45 = vpop.permute.xlu1 %2502 }
 0x5c9   :  { %v2701_v7 = vsel %vm10228_vm4, %v2503_v45, %v8439_v13  ;;  %v2700_v15 = vsel %vm10172_vm2, %v8076_v50, %v2503_v45  ;;  %vm10231_vm4 = vmmov %vm10172_vm2 }
 0x5ca   :  { %2131 = vperm.xlu0 %4802, %v2113_v25   ;;  %3191 = vmatprep.subr.bf16.mxu0 %v2701_v7 }
 0x5cb   :  { %3192 = vmatpush1.bf16.msra.mxu0 %v2700_v15 }
 0x5cc   :  { %v2243_v58 = vpop.permute.xlu1 %2242  ;;  %v2515_v34 = vpop.permute.xlu0 %2514 }
 0x5cd   :  { %3285 = vmatprep.subr.bf16.mxu1 %v2243_v58  ;;  %v2592_v4 = vsel %vm10229_vm13, %v7830_v29, %v2243_v58  ;;  %v2705_v31 = vsel %vm10172_vm2, %v8171_v33, %v2515_v34  ;;  %vm10232_vm13 = vmmov %vm10172_vm2 }
 0x5ce   :  { %3286 = vmatpush1.bf16.msra.mxu1 %v2592_v4 }
 0x5d0   :  { %v8447_v28 = vpop.permute.xlu1 %2516  ;;  %v2255_v51 = vpop.permute.xlu0 %2254 }
 0x5d1   :  { %v2706_v46 = vsel %vm10230_vm6, %v2515_v34, %v8447_v28  ;;  %3287 = vmatprep.subr.bf16.mxu1 %v2255_v51  ;;  %v2597_v50 = vsel %vm10231_vm4, %v7954_v18, %v2255_v51  ;;  %vm10233_vm6 = vmmov %vm10172_vm2 }
 0x5d2   :  { %3193 = vmatprep.subr.bf16.mxu0 %v2706_v46  ;;  %3288 = vmatpush1.bf16.msra.mxu1 %v2597_v50  ;;  %vm10234_vm4 = vmmov %vm10172_vm2 }
 0x5d3   :  { %3194 = vmatpush1.bf16.msra.mxu0 %v2705_v31 }
 0x5d4   :  { %v2527_v27 = vpop.permute.xlu1 %2526 }
 0x5d5   :  { %v2710_v33 = vsel %vm10234_vm4, %v8204_v0, %v2527_v27  ;;  %vm10237_vm4 = vmmov %vm10172_vm2 }
 0x5d6   :  { %3196 = vmatmul.mubr.bf16.vlgmr.msra.gmra.mrb[32].mxu0 %v8186_v52 }
 0x5d7   :  { %3205 = vmatprep.mubr.bf16.mxu0 %v8194_v59 }
 0x5d8   :  { %v2267_v29 = vpop.permute.xlu1 %2266 }
 0x5d9   :  { %3289 = vmatprep.subr.bf16.mxu1 %v2267_v29  ;;  %v2602_v17 = vsel %vm10232_vm13, %v7965_v22, %v2267_v29  ;;  %vm10235_vm13 = vmmov %vm10172_vm2 }
 0x5da   :  { %3290 = vmatpush1.bf16.msra.mxu1 %v2602_v17 }
 0x5dc   :  { %v8459_v19 = vpop.permute.xlu0 %2528 }
 0x5dd   :  { %v2711_v18 = vsel %vm10233_vm6, %v2527_v27, %v8459_v19  ;;  %vm10236_vm6 = vmmov %vm10172_vm2 }
 0x5de   :  { %3216 = vmatprep.subr.bf16.mxu0 %v2711_v18  ;;  %3206 = vmatmul.mubr.bf16.gmra.mrb[36].mxu0 %v8220_v23 }
 0x5df   :  { %3217 = vmatpush1.bf16.msra.mxu0 %v2710_v33  ;;  %3248 = vmatprep.mubr.bf16.mxu0 %v10175_v63 }
 0x5e8   :  { %v2539_v11 = vpop.permute.xlu0 %2538  ;;  %v8467_v24 = vpop.permute.xlu1 %2540 }
 0x5e9   :  { %v2716_v22 = vsel %vm10172_vm2, %v2539_v11, %v8467_v24  ;;  %v2715_v43 = vsel %vm10235_vm13, %v8257_v49, %v2539_v11  ;;  %vm10238_vm13 = vmmov %vm10172_vm2 }
 0x5ea   :  { %3218 = vmatprep.subr.bf16.mxu0 %v2716_v22 }
 0x5eb   :  { %3219 = vmatpush1.bf16.msra.mxu0 %v2715_v43 }
 0x5ec   :  { %v2279_v60 = vpop.permute.xlu0 %2278 }
 0x5ed   :  { %3291 = vmatprep.subr.bf16.mxu1 %v2279_v60  ;;  %v2607_v0 = vsel %vm10236_vm6, %v8064_v9, %v2279_v60  ;;  %vm10239_vm6 = vmmov %vm10172_vm2 }
 0x5ee   :  { %3292 = vmatpush1.bf16.msra.mxu1 %v2607_v0 }
 0x5ef   :  { %v2551_v3 = vpop.permute.xlu1 %2550 }
 0x5f0   :  { %v2720_v39 = vsel %vm10238_vm13, %v8271_v44, %v2551_v3  ;;  %vm10243_vm13 = vmmov %vm10172_vm2 }
 0x5f3   :  { %v2291_v16 = vpop.permute.xlu1 %2290 }
 0x5f4   :  { %3293 = vmatprep.subr.bf16.mxu1 %v2291_v16  ;;  %v2612_v21 = vsel %vm10237_vm4, %v7848_v62, %v2291_v16  ;;  %vm10241_vm4 = vmmov %vm10172_vm2 }
 0x5f5   :  { %3294 = vmatpush1.bf16.msra.mxu1 %v2612_v21 }
 0x5f8   :  { %v8477_v1 = vpop.permute.xlu0 %2552 }
 0x5f9   :  { %v2721_v49 = vsel %vm10172_vm2, %v2551_v3, %v8477_v1 }
 0x5fa   :  { %3220 = vmatprep.subr.bf16.mxu0 %v2721_v49 }
 0x5fb   :  { %3221 = vmatpush1.bf16.msra.mxu0 %v2720_v39 }
 0x604   :  { %v2563_v2 = vpop.permute.xlu0 %2562  ;;  %v8483_v9 = vpop.permute.xlu1 %2564 }
 0x605   :  { %v2726_v56 = vsel %vm10239_vm6, %v2563_v2, %v8483_v9  ;;  %v2725_v62 = vsel %vm10240_vm10, %v8304_v26, %v2563_v2  ;;  %vm10242_vm10 = vmmov %vm10172_vm2 }
 0x606   :  { %3222 = vmatprep.subr.bf16.mxu0 %v2726_v56  ;;  %vm10244_vm6 = vmmov %vm10172_vm2 }
 0x607   :  { %3223 = vmatpush1.bf16.msra.mxu0 %v2725_v62 }
 0x608   :  { %v2303_v25 = vpop.permute.xlu0 %2302 }
 0x609   :  { %3295 = vmatprep.subr.bf16.mxu1 %v2303_v25  ;;  %v2617_v45 = vsel %vm10241_vm4, %v7974_v47, %v2303_v25  ;;  %v2315_v7 = vpop.permute.xlu1 %2314  ;;  %vm10245_vm4 = vmmov %vm10172_vm2 }
 0x60a   :  { %3296 = vmatpush1.bf16.msra.mxu1 %v2617_v45  ;;  %4563 = vmatmul.mubr.msk.bf16.vlgmr.msra.gmra.mrb[32].mxu0 %vm2944_vm14, %v8314_v53  ;;  %v2622_v15 = vsel %vm10172_vm2, %v7984_v42, %v2315_v7 }
 0x60b   :  { %3297 = vmatprep.subr.bf16.mxu1 %v2315_v7  ;;  %3258 = vmatprep.mubr.bf16.mxu0 %v10175_v63 }
 0x60c   :  { %v2327_v44 = vpop.permute.xlu0 %2326 }
 0x60d   :  { %v2627_v58 = vsel %vm10242_vm10, %v8084_v6, %v2327_v44  ;;  %v2339_v34 = vpop.permute.xlu1 %2338  ;;  %vm10246_vm10 = vmmov %vm10172_vm2 }
 0x60e   :  { %3298 = vmatpush1.bf16.msra.mxu1 %v2622_v15  ;;  %v2632_v42 = vsel %vm10243_vm13, %v8056_v36, %v2339_v34  ;;  %vm10247_vm13 = vmmov %vm10172_vm2 }
 0x60f   :  { %3299 = vmatprep.subr.bf16.mxu1 %v2327_v44 }
 0x610   :  { %v2351_v26 = vpop.permute.xlu0 %2350 }
 0x611   :  { %v2637_v6 = vsel %vm10244_vm6, %v8159_v61, %v2351_v26  ;;  %v2363_v51 = vpop.permute.xlu1 %2362  ;;  %vm10248_vm6 = vmmov %vm10172_vm2 }
 0x612   :  { %3300 = vmatpush1.bf16.msra.mxu1 %v2627_v58  ;;  %4564 = vmatmul.mubr.msk.bf16.gmra.mrb[36].mxu0 %vm2944_vm14, %v8345_v57  ;;  %v2642_v50 = vsel %vm10245_vm4, %v8181_v14, %v2363_v51  ;;  %vm10249_vm4 = vmmov %vm10172_vm2 }
 0x613   :  { %3322 = vmatprep.subr.bf16.mxu1 %v2339_v34  ;;  %3407 = vmatprep.mubr.bf16.mxu0 %v10175_v63 }
 0x614   :  { %v2375_v47 = vpop.permute.xlu0 %2374 }
 0x615   :  { %3302 = vmatmul.mubr.bf16.vlgmr.msra.gmra.mrb[24].mxu1 %v7867_v8  ;;  %v2387_v36 = vpop.permute.xlu1 %2386 }
 0x616   :  { %3323 = vmatpush1.bf16.msra.mxu1 %v2632_v42  ;;  %3311 = vmatprep.mubr.bf16.mxu1 %v7878_v32  ;;  %v2647_v32 = vsel %vm10172_vm2, %v8250_v10, %v2375_v47  ;;  %v2652_v31 = vsel %vm10246_vm10, %v8264_v48, %v2387_v36  ;;  %vm10250_vm10 = vmmov %vm10172_vm2 }
 0x617   :  { %3324 = vmatprep.subr.bf16.mxu1 %v2351_v26 }
 0x618   :  { %v2399_v4 = vpop.permute.xlu0 %2398 }
 0x619   :  { %v2411_v27 = vpop.permute.xlu1 %2410 }
 0x61a   :  { %3325 = vmatpush1.bf16.msra.mxu1 %v2637_v6  ;;  %v2662_v29 = vsel %vm10249_vm4, %v8300_v5, %v2411_v27  ;;  %vm10253_vm4 = vmmov %vm10172_vm2 }
 0x61b   :  { %3326 = vmatprep.subr.bf16.mxu1 %v2363_v51 }
 0x61c   :  { %v2423_v46 = vpop.permute.xlu0 %2422 }
 0x61d   :  { %3312 = vmatmul.mubr.bf16.gmra.mrb[28].mxu1 %v7933_v41  ;;  %v2657_v41 = vsel %vm10247_vm13, %v8292_v30, %v2399_v4  ;;  %v2435_v17 = vpop.permute.xlu1 %2434  ;;  %vm10251_vm13 = vmmov %vm10172_vm2 }
 0x61e   :  { %3327 = vmatpush1.bf16.msra.mxu1 %v2642_v50  ;;  %3354 = vmatprep.mubr.bf16.mxu1 %v7946_v12 }
 0x61f   :  { %3328 = vmatprep.subr.bf16.mxu1 %v2375_v47 }
 0x620   :  { %v2447_v8 = vpop.permute.xlu0 %2446 }
 0x622   :  { %3329 = vmatpush1.bf16.msra.mxu1 %v2647_v32 }
 0x623   :  { %3330 = vmatprep.subr.bf16.mxu1 %v2387_v36 }
 0x624   :  { %v2471_v61 = vpop.permute.xlu0 %2470 }
 0x626   :  { %3331 = vmatpush1.bf16.msra.mxu1 %v2652_v31 }
 0x627   :  { %3332 = vmatprep.subr.bf16.mxu1 %v2399_v4 }
 0x628   :  { %v2531_v14 = vpop.permute.xlu0 %2530 }
 0x629   :  { %3375 = vmatprep.subr.bf16.mxu0 %v2531_v14  ;;  %v2712_v12 = vsel %vm10248_vm6, %v8459_v19, %v2531_v14  ;;  %v2667_v19 = vsel %vm10250_vm10, %v8316_v40, %v2423_v46  ;;  %vm10252_vm6 = vmmov %vm10172_vm2  ;;  %v2677_v40 = vsel %vm10172_vm2, %v8347_v20, %v2447_v8 }
 0x62a   :  { %3333 = vmatpush1.bf16.msra.mxu1 %v2657_v41  ;;  %3376 = vmatpush1.bf16.msra.mxu0 %v2712_v12  ;;  %v2672_v5 = vsel %vm10252_vm6, %v8329_v37, %v2435_v17  ;;  %vm10254_vm10 = vmmov %vm10172_vm2 }
 0x62b   :  { %3334 = vmatprep.subr.bf16.mxu1 %v2411_v27  ;;  %vm10256_vm6 = vmmov %vm10172_vm2 }
 0x62c   :  { %v2543_v10 = vpop.permute.xlu0 %2542 }
 0x62d   :  { %3377 = vmatprep.subr.bf16.mxu0 %v2543_v10  ;;  %v2717_v48 = vsel %vm10172_vm2, %v8467_v24, %v2543_v10  ;;  %v2459_v24 = vpop.permute.xlu1 %2458 }
 0x62e   :  { %3335 = vmatpush1.bf16.msra.mxu1 %v2662_v29  ;;  %3378 = vmatpush1.bf16.msra.mxu0 %v2717_v48  ;;  %v2682_v37 = vsel %vm10254_vm10, %v8361_v54, %v2459_v24 }
 0x62f   :  { %3336 = vmatprep.subr.bf16.mxu1 %v2423_v46 }
 0x630   :  { %v2555_v30 = vpop.permute.xlu0 %2554 }
 0x631   :  { %3379 = vmatprep.subr.bf16.mxu0 %v2555_v30  ;;  %v2722_v18 = vsel %vm10251_vm13, %v8477_v1, %v2555_v30  ;;  %v2483_v22 = vpop.permute.xlu1 %2482  ;;  %vm10255_vm13 = vmmov %vm10172_vm2 }
 0x632   :  { %3337 = vmatpush1.bf16.msra.mxu1 %v2667_v19  ;;  %3380 = vmatpush1.bf16.msra.mxu0 %v2722_v18  ;;  %v2687_v43 = vsel %vm10255_vm13, %v8395_v55, %v2471_v61  ;;  %vm10274_vm13 = vcmask 711680  }
 0x633   :  { %3338 = vmatprep.subr.bf16.mxu1 %v2435_v17 }
 0x634   :  { %v2567_v33 = vpop.permute.xlu0 %2566 }
 0x635   :  { %3381 = vmatprep.subr.bf16.mxu0 %v2567_v33  ;;  %v2727_v11 = vsel %vm10253_vm4, %v8483_v9, %v2567_v33  ;;  %v2495_v20 = vpop.permute.xlu1 %2494  ;;  %vm10257_vm4 = vmmov %vm10172_vm2 }
 0x636   :  { %3339 = vmatpush1.bf16.msra.mxu1 %v2672_v5  ;;  %3382 = vmatpush1.bf16.msra.mxu0 %v2727_v11  ;;  %v2697_v54 = vsel %vm10257_vm4, %v8425_v38, %v2495_v20  ;;  %vm10276_vm4 = vmmov %vm10172_vm2 }
 0x637   :  { %3340 = vmatprep.subr.bf16.mxu1 %v2447_v8 }
 0x639   :  { %4565 = vmatmul.mubr.msk.bf16.vlgmr.msra.gmra.mrb[40].mxu0 %vm2944_vm14, %v8314_v53  ;;  %v2692_v53 = vsel %vm10256_vm6, %v8391_v35, %v2483_v22  ;;  %v2507_v60 = vpop.permute.xlu1 %2506 }
 0x63a   :  { %3341 = vmatpush1.bf16.msra.mxu1 %v2677_v40  ;;  %3417 = vmatprep.mubr.bf16.mxu0 %v10175_v63  ;;  %v2702_v55 = vsel %vm10172_vm2, %v8439_v13, %v2507_v60 }
 0x63b   :  { %3342 = vmatprep.subr.bf16.mxu1 %v2459_v24 }
 0x63d   :  { %v2519_v0 = vpop.permute.xlu1 %2518 }
 0x63e   :  { %3343 = vmatpush1.bf16.msra.mxu1 %v2682_v37 }
 0x63f   :  { %3344 = vmatprep.subr.bf16.mxu1 %v2471_v61 }
 0x641   :  { %4566 = vmatmul.mubr.msk.bf16.gmra.mrb[44].mxu0 %vm2944_vm14, %v8345_v57  ;;  %vm10258_vm14 = vmmov %vm10172_vm2 }
 0x642   :  { %3345 = vmatpush1.bf16.msra.mxu1 %v2687_v43  ;;  %v2707_v57 = vsel %vm10258_vm14, %v8447_v28, %v2519_v0  ;;  %v8553_v35 = vpop.permute.xlu1 %2116 }
 0x643   :  { %3346 = vmatprep.subr.bf16.mxu1 %v2483_v22 }
 0x645   :  { %v8556_v13 = vpop.permute.xlu0 %2121 }
 0x646   :  { %3347 = vmatpush1.bf16.msra.mxu1 %v2692_v53 }
 0x647   :  { %3348 = vmatprep.subr.bf16.mxu1 %v2495_v20 }
 0x649   :  { %v8564_v9 = vpop.permute.xlu0 %2131 }
 0x64a   :  { %3349 = vmatpush1.bf16.msra.mxu1 %v2697_v54 }
 0x64b   :  { %3350 = vmatprep.subr.bf16.mxu1 %v2507_v60 }
 0x64e   :  { %3351 = vmatpush1.bf16.msra.mxu1 %v2702_v55 }
 0x64f   :  { %3352 = vmatprep.subr.bf16.mxu1 %v2519_v0 }
 0x652   :  { %3353 = vmatpush1.bf16.msra.mxu1 %v2707_v57 }
 0x655   :  { %3355 = vmatmul.mubr.bf16.vlgmr.msra.gmra.mrb[24].mxu1 %v8186_v52 }
 0x656   :  { %3364 = vmatprep.mubr.bf16.mxu1 %v8194_v59  ;;  %v8561_v59 = vpop.permute.xlu1 %2126 }
 0x65d   :  { %3365 = vmatmul.mubr.bf16.gmra.mrb[28].mxu1 %v8220_v23 }
 0x675   :  { %v3091_v38 = vpop.f32.mrb[16].mxu1 }
 0x676   :  { %v4570_v3 = vadd.f32 %v3091_v38, %v8553_v35  ;;  %v3093_v16 = vpop.f32.mrb[17].mxu1 }
 0x677   :  { %v4571_v21 = vadd.f32 %v3093_v16, %v8553_v35  ;;  %v3095_v1 = vpop.f32.mrb[18].mxu1 }
 0x678   :  { %4921 = vtanh.f32 %v4570_v3  ;;  %v4572_v28 = vadd.f32 %v3095_v1, %v8556_v13  ;;  %v3097_v49 = vpop.f32.mrb[19].mxu1 }
 0x679   :  { %4923 = vtanh.f32 %v4571_v21  ;;  %v4573_v52 = vadd.f32 %v3097_v49, %v8556_v13 }
 0x67a   :  { %4925 = vtanh.f32 %v4572_v28 }
 0x67b   :  { %4927 = vtanh.f32 %v4573_v52 }
 0x67d   :  { %v3101_v23 = vpop.f32.mrb[20].mxu1 }
 0x67e   :  { %v4574_v39 = vadd.f32 %v3101_v23, %v8561_v59  ;;  %v3103_v2 = vpop.f32.mrb[21].mxu1 }
 0x67f   :  { %v4575_v56 = vadd.f32 %v3103_v2, %v8561_v59  ;;  %v3105_v62 = vpop.f32.mrb[22].mxu1 }
 0x680   :  { %4929 = vtanh.f32 %v4574_v39  ;;  %v4576_v25 = vadd.f32 %v3105_v62, %v8564_v9  ;;  %v3107_v45 = vpop.f32.mrb[23].mxu1 }
 0x681   :  { %4931 = vtanh.f32 %v4575_v56  ;;  %v4577_v7 = vadd.f32 %v3107_v45, %v8564_v9 }
 0x682   :  { %v4922_v44 = vpop.eup %4921  ;;  %4933 = vtanh.f32 %v4576_v25 }
 0x683   :  { %v4924_v15 = vpop.eup %4923  ;;  %4935 = vtanh.f32 %v4577_v7  ;;  %v3452_v47 = vsel %vm1275_vm15, %v4922_v44, 0.0 }
 0x684   :  { %v4926_v26 = vpop.eup %4925  ;;  %v3453_v51 = vsel %vm1276_vm11, %v4924_v15, 0.0 }
 0x685   :  { %v4928_v58 = vpop.eup %4927  ;;  %v3458_v42 = vsel %vm1275_vm15, %v4926_v26, 0.0 }
 0x686   :  { %v3476_v4 = vpack.c.bf16 %v3458_v42, %v3452_v47  ;;  %v3459_v46 = vsel %vm1276_vm11, %v4928_v58, 0.0 }
 0x687   :  { %v3477_v50 = vpack.c.bf16 %v3459_v46, %v3453_v51 }
 0x688   :  { %3500 = vrot.lane.b32.xlu1 %v3476_v4, %s4994_s1 }
 0x689   :  { %3502 = vrot.lane.b32.xlu0 %v3477_v50, %s4994_s1 }
 0x68a   :  { %v4930_v8 = vpop.eup %4929 }
 0x68b   :  { %v4932_v32 = vpop.eup %4931  ;;  %v3464_v31 = vsel %vm1275_vm15, %v4930_v8, 0.0 }
 0x68c   :  { %v4934_v36 = vpop.eup %4933  ;;  %v3465_v12 = vsel %vm1276_vm11, %v4932_v32, 0.0 }
 0x68d   :  { %v4936_v61 = vpop.eup %4935  ;;  %v3470_v14 = vsel %vm1275_vm15, %v4934_v36, 0.0  ;;  %vm10266_vm15 = vcmask 1031168  }
 0x68e   :  { %v3482_v41 = vpack.c.bf16 %v3470_v14, %v3464_v31  ;;  %v3471_v27 = vsel %vm1276_vm11, %v4936_v61, 0.0  ;;  %vm10268_vm11 = vmmov %vm10172_vm2 }
 0x68f   :  { %v3483_v10 = vpack.c.bf16 %v3471_v27, %v3465_v12  ;;  %vm10273_vm10 = vmmov %vm10266_vm15 }
 0x690   :  { %3512 = vrot.lane.b32.xlu1 %v3482_v41, %s4994_s1 }
 0x691   :  { %3514 = vrot.lane.b32.xlu0 %v3483_v10, %s4994_s1 }
 0x6dd   :  { %v3250_v29 = vpop.f32.mrb[32].mxu0 }
 0x6de   :  { %v4578_v48 = vadd.f32 %v3250_v29, %v8553_v35  ;;  %v3252_v17 = vpop.f32.mrb[33].mxu0 }
 0x6df   :  { %v4579_v30 = vadd.f32 %v3252_v17, %v8553_v35  ;;  %v3254_v19 = vpop.f32.mrb[34].mxu0 }
 0x6e0   :  { %4937 = vtanh.f32 %v4578_v48  ;;  %v4580_v18 = vadd.f32 %v3254_v19, %v8556_v13  ;;  %v3256_v33 = vpop.f32.mrb[35].mxu0 }
 0x6e1   :  { %4939 = vtanh.f32 %v4579_v30  ;;  %v4581_v5 = vadd.f32 %v3256_v33, %v8556_v13 }
 0x6e2   :  { %4941 = vtanh.f32 %v4580_v18 }
 0x6e3   :  { %4943 = vtanh.f32 %v4581_v5 }
 0x6e5   :  { %v3260_v11 = vpop.f32.mrb[36].mxu0 }
 0x6e6   :  { %v4582_v24 = vadd.f32 %v3260_v11, %v8561_v59  ;;  %v3262_v40 = vpop.f32.mrb[37].mxu0 }
 0x6e7   :  { %v4583_v22 = vadd.f32 %v3262_v40, %v8561_v59  ;;  %v3264_v37 = vpop.f32.mrb[38].mxu0 }
 0x6e8   :  { %4945 = vtanh.f32 %v4582_v24  ;;  %v4584_v43 = vadd.f32 %v3264_v37, %v8564_v9  ;;  %v3266_v20 = vpop.f32.mrb[39].mxu0 }
 0x6e9   :  { %4947 = vtanh.f32 %v4583_v22  ;;  %v4585_v53 = vadd.f32 %v3266_v20, %v8564_v9 }
 0x6ea   :  { %v4938_v60 = vpop.eup %4937  ;;  %4949 = vtanh.f32 %v4584_v43 }
 0x6eb   :  { %v4940_v54 = vpop.eup %4939  ;;  %4951 = vtanh.f32 %v4585_v53  ;;  %v3454_v38 = vsel %vm1277_vm7, %v4938_v60, 0.0 }
 0x6ec   :  { %v4942_v55 = vpop.eup %4941  ;;  %v3455_v1 = vsel %vm1278_vm3, %v4940_v54, 0.0 }
 0x6ed   :  { %v4944_v0 = vpop.eup %4943  ;;  %v3460_v3 = vsel %vm1277_vm7, %v4942_v55, 0.0 }
 0x6ee   :  { %v3478_v16 = vpack.c.bf16 %v3460_v3, %v3454_v38  ;;  %v3461_v28 = vsel %vm1278_vm3, %v4944_v0, 0.0 }
 0x6ef   :  { %v3479_v49 = vpack.c.bf16 %v3461_v28, %v3455_v1 }
 0x6f0   :  { %3504 = vrot.lane.b32.xlu1 %v3478_v16, %s4994_s1 }
 0x6f1   :  { %3506 = vrot.lane.b32.xlu0 %v3479_v49, %s4994_s1 }
 0x6f2   :  { %v4946_v52 = vpop.eup %4945 }
 0x6f3   :  { %v4948_v23 = vpop.eup %4947  ;;  %v3466_v56 = vsel %vm1277_vm7, %v4946_v52, 0.0 }
 0x6f4   :  { %v4950_v39 = vpop.eup %4949  ;;  %v3467_v45 = vsel %vm1278_vm3, %v4948_v23, 0.0 }
 0x6f5   :  { %v4952_v2 = vpop.eup %4951  ;;  %v3472_v62 = vsel %vm1277_vm7, %v4950_v39, 0.0  ;;  %vm10265_vm7 = vcmask 1039360  }
 0x6f6   :  { %v3484_v25 = vpack.c.bf16 %v3472_v62, %v3466_v56  ;;  %v3473_v7 = vsel %vm1278_vm3, %v4952_v2, 0.0  ;;  %vm10267_vm3 = vcmask 883712  }
 0x6f7   :  { %v3485_v44 = vpack.c.bf16 %v3473_v7, %v3467_v45  ;;  %vm10275_vm6 = vmmov %vm10267_vm3 }
 0x6f8   :  { %3516 = vrot.lane.b32.xlu1 %v3484_v25, %s4994_s1 }
 0x6f9   :  { %3518 = vrot.lane.b32.xlu0 %v3485_v44, %s4994_s1 }
 0x6fa   :  { %v3501_v15 = vpop.permute.xlu1 %3500 }
 0x6fb   :  { %3546 = vst.msk [vmem:[#allocation3] sm:$0xff] %vm1470_vm9, %v3501_v15  ;;  %v8618_v26 = vpop.permute.xlu0 %3502 }
 0x6fc   :  { %3558 = vst.msk [vmem:[#allocation3] sm:$0xff] %vm1496_vm8, %v10175_v63  ;;  %v3524_v58 = vsel %vm1425_vm12, %v3501_v15, %v8618_v26 }
 0x6fd   :  { %3589 = vrot.lane.b32.xlu1 %v3524_v58, %s4976_s29 }
 0x701   :  { %3623 = vrot.lane.b32.xlu1 %v3524_v58, %s4975_s0 }
 0x702   :  { %v3513_v34 = vpop.permute.xlu1 %3512 }
 0x703   :  { %3552 = vst.msk [vmem:[#allocation3 + $0x30] sm:$0xff] %vm1470_vm9, %v3513_v34  ;;  %v8627_v47 = vpop.permute.xlu0 %3514  ;;  %v3563_v42 = vld [vmem:[#allocation3] sm:$0xff]  ;;  %vm10271_vm9 = vmmov %vm10265_vm7 }
 0x704   :  { %3559 = vst.msk [vmem:[#allocation3 + $0x30] sm:$0xff] %vm1496_vm8, %v10175_v63  ;;  %v8633_v4 = vsel %vm1425_vm12, %v3513_v34, %v8627_v47  ;;  %3587 = vrot.lane.b32.xlu0 %v3563_v42, %s4976_s29  ;;  %vm10272_vm8 = vcmask 719872  }
 0x705   :  { %3657 = vrot.lane.b32.xlu1 %v3524_v58, %s4979_s10  ;;  %vm10278_vm14 = vmmov %vm10272_vm8 }
 0x708   :  { %3621 = vrot.lane.b32.xlu0 %v3563_v42, %s4975_s0 }
 0x709   :  { %3691 = vrot.lane.b32.xlu1 %v3524_v58, %s4980_s11 }
 0x70b   :  { %v3569_v28 = vld [vmem:[#allocation3 + $0x30] sm:$0xff] }
 0x70c   :  { %3655 = vrot.lane.b32.xlu0 %v3563_v42, %s4979_s10  ;;  %v3409_v6 = vpop.f32.mrb[40].mxu0 }
 0x70d   :  { %3725 = vrot.lane.b32.xlu1 %v3524_v58, %s4981_s12  ;;  %v3411_v51 = vpop.f32.mrb[41].mxu0 }
 0x70e   :  { %v3413_v46 = vpop.f32.mrb[42].mxu0 }
 0x70f   :  { %v3415_v50 = vpop.f32.mrb[43].mxu0 }
 0x710   :  { %3689 = vrot.lane.b32.xlu0 %v3563_v42, %s4980_s11 }
 0x711   :  { %3759 = vrot.lane.b32.xlu1 %v3524_v58, %s4985_s16 }
 0x714   :  { %3723 = vrot.lane.b32.xlu0 %v3563_v42, %s4981_s12  ;;  %v3419_v8 = vpop.f32.mrb[44].mxu0 }
 0x715   :  { %3793 = vrot.lane.b32.xlu1 %v3524_v58, %s4986_s17  ;;  %v3421_v32 = vpop.f32.mrb[45].mxu0 }
 0x716   :  { %v3423_v36 = vpop.f32.mrb[46].mxu0 }
 0x717   :  { %v3425_v61 = vpop.f32.mrb[47].mxu0 }
 0x718   :  { %3757 = vrot.lane.b32.xlu0 %v3563_v42, %s4985_s16 }
 0x719   :  { %3827 = vrot.lane.b32.xlu1 %v3524_v58, %s4987_s18 }
 0x71c   :  { %3791 = vrot.lane.b32.xlu0 %v3563_v42, %s4986_s17 }
 0x720   :  { %3825 = vrot.lane.b32.xlu0 %v3563_v42, %s4987_s18 }
 0x728   :  { %v3356_v31 = vpop.f32.mrb[24].mxu1 }
 0x729   :  { %v4586_v14 = vadd.f32 %v3356_v31, %v8553_v35  ;;  %v3358_v41 = vpop.f32.mrb[25].mxu1 }
 0x72a   :  { %v4588_v12 = vadd.f32 %v3358_v41, %v8553_v35  ;;  %v3360_v27 = vpop.f32.mrb[26].mxu1 }
 0x72b   :  { %v4587_v10 = vadd.f32 %v4586_v14, %v3409_v6  ;;  %v4590_v29 = vadd.f32 %v3360_v27, %v8556_v13  ;;  %v3362_v48 = vpop.f32.mrb[27].mxu1 }
 0x72c   :  { %v4589_v17 = vadd.f32 %v4588_v12, %v3411_v51  ;;  %v4592_v30 = vadd.f32 %v3362_v48, %v8556_v13 }
 0x72d   :  { %4953 = vtanh.f32 %v4587_v10  ;;  %v4591_v19 = vadd.f32 %v4590_v29, %v3413_v46 }
 0x72e   :  { %4955 = vtanh.f32 %v4589_v17  ;;  %v4593_v18 = vadd.f32 %v4592_v30, %v3415_v50 }
 0x72f   :  { %4957 = vtanh.f32 %v4591_v19 }
 0x730   :  { %4959 = vtanh.f32 %v4593_v18  ;;  %v3366_v33 = vpop.f32.mrb[28].mxu1 }
 0x731   :  { %v4594_v5 = vadd.f32 %v3366_v33, %v8561_v59  ;;  %v3368_v11 = vpop.f32.mrb[29].mxu1 }
 0x732   :  { %v4596_v35 = vadd.f32 %v3368_v11, %v8561_v59  ;;  %v3370_v24 = vpop.f32.mrb[30].mxu1 }
 0x733   :  { %v4598_v40 = vadd.f32 %v3370_v24, %v8564_v9  ;;  %v4595_v22 = vadd.f32 %v4594_v5, %v3419_v8  ;;  %v3372_v37 = vpop.f32.mrb[31].mxu1 }
 0x734   :  { %v4600_v43 = vadd.f32 %v3372_v37, %v8564_v9  ;;  %v4597_v13 = vadd.f32 %v4596_v35, %v3421_v32 }
 0x735   :  { %4961 = vtanh.f32 %v4595_v22  ;;  %v4599_v20 = vadd.f32 %v4598_v40, %v3423_v36 }
 0x736   :  { %4963 = vtanh.f32 %v4597_v13  ;;  %v4601_v53 = vadd.f32 %v4600_v43, %v3425_v61 }
 0x737   :  { %v4954_v60 = vpop.eup %4953  ;;  %4965 = vtanh.f32 %v4599_v20 }
 0x738   :  { %v4956_v54 = vpop.eup %4955  ;;  %4967 = vtanh.f32 %v4601_v53  ;;  %v3456_v59 = vsel %vm1279_vm1, %v4954_v60, 0.0 }
 0x739   :  { %v4958_v55 = vpop.eup %4957  ;;  %v3457_v9 = vsel %vm1280_vm0, %v4956_v54, 0.0 }
 0x73a   :  { %v4960_v0 = vpop.eup %4959  ;;  %v3462_v38 = vsel %vm1279_vm1, %v4958_v55, 0.0 }
 0x73b   :  { %v3480_v3 = vpack.c.bf16 %v3462_v38, %v3456_v59  ;;  %v3463_v21 = vsel %vm1280_vm0, %v4960_v0, 0.0 }
 0x73c   :  { %v3481_v1 = vpack.c.bf16 %v3463_v21, %v3457_v9 }
 0x73d   :  { %3508 = vrot.lane.b32.xlu1 %v3480_v3, %s4994_s1 }
 0x73e   :  { %3510 = vrot.lane.b32.xlu0 %v3481_v1, %s4994_s1 }
 0x73f   :  { %v4962_v49 = vpop.eup %4961 }
 0x740   :  { %v4964_v52 = vpop.eup %4963  ;;  %v3468_v2 = vsel %vm1279_vm1, %v4962_v49, 0.0 }
 0x741   :  { %v4966_v23 = vpop.eup %4965  ;;  %3837 = vrot.lane.b32.xlu1 %v3569_v28, %s4987_s18  ;;  %v3469_v25 = vsel %vm1280_vm0, %v4964_v52, 0.0 }
 0x742   :  { %v4968_v39 = vpop.eup %4967  ;;  %3599 = vrot.lane.b32.xlu0 %v3569_v28, %s4976_s29  ;;  %v3474_v56 = vsel %vm1279_vm1, %v4966_v23, 0.0  ;;  %vm10269_vm1 = vcmask 810608  }
 0x743   :  { %v3486_v62 = vpack.c.bf16 %v3474_v56, %v3468_v2  ;;  %v3475_v45 = vsel %vm1280_vm0, %v4968_v39, 0.0  ;;  %vm10270_vm0 = vcmask 867328  }
 0x744   :  { %v3487_v7 = vpack.c.bf16 %v3475_v45, %v3469_v25  ;;  %vm10277_vm2 = vmmov %vm10270_vm0 }
 0x745   :  { %3601 = vrot.lane.b32.xlu1 %v8633_v4, %s4976_s29 }
 0x746   :  { %3633 = vrot.lane.b32.xlu0 %v3569_v28, %s4975_s0 }
 0x749   :  { %3635 = vrot.lane.b32.xlu1 %v8633_v4, %s4975_s0 }
 0x74a   :  { %3667 = vrot.lane.b32.xlu0 %v3569_v28, %s4979_s10 }
 0x74d   :  { %3669 = vrot.lane.b32.xlu1 %v8633_v4, %s4979_s10 }
 0x74e   :  { %3701 = vrot.lane.b32.xlu0 %v3569_v28, %s4980_s11 }
 0x751   :  { %3703 = vrot.lane.b32.xlu1 %v8633_v4, %s4980_s11 }
 0x752   :  { %3735 = vrot.lane.b32.xlu0 %v3569_v28, %s4981_s12 }
 0x755   :  { %3737 = vrot.lane.b32.xlu1 %v8633_v4, %s4981_s12 }
 0x756   :  { %3769 = vrot.lane.b32.xlu0 %v3569_v28, %s4985_s16 }
 0x759   :  { %3771 = vrot.lane.b32.xlu1 %v8633_v4, %s4985_s16 }
 0x75a   :  { %3803 = vrot.lane.b32.xlu0 %v3569_v28, %s4986_s17 }
 0x75d   :  { %3805 = vrot.lane.b32.xlu1 %v8633_v4, %s4986_s17 }
 0x75e   :  { %3839 = vrot.lane.b32.xlu0 %v8633_v4, %s4987_s18 }
 0x761   :  { %3520 = vrot.lane.b32.xlu1 %v3486_v62, %s4994_s1 }
 0x762   :  { %3522 = vrot.lane.b32.xlu0 %v3487_v7, %s4994_s1  ;;  %v3505_v44 = vpop.permute.xlu1 %3504 }
 0x763   :  { %v3525_v15 = vsel %vm1425_vm12, %v8618_v26, %v3505_v44  ;;  %v3507_v58 = vpop.permute.xlu0 %3506 }
 0x764   :  { %v3526_v34 = vsel %vm1425_vm12, %v3505_v44, %v3507_v58 }
 0x765   :  { %3593 = vrot.lane.b32.xlu1 %v3526_v34, %s4976_s29 }
 0x766   :  { %3591 = vrot.lane.b32.xlu0 %v3525_v15, %s4976_s29 }
 0x769   :  { %3627 = vrot.lane.b32.xlu1 %v3526_v34, %s4975_s0 }
 0x76a   :  { %v3517_v42 = vpop.permute.xlu1 %3516  ;;  %3625 = vrot.lane.b32.xlu0 %v3525_v15, %s4975_s0 }
 0x76b   :  { %v3530_v4 = vsel %vm1425_vm12, %v8627_v47, %v3517_v42  ;;  %v8710_v6 = vpop.permute.xlu0 %3518 }
 0x76c   :  { %v3531_v26 = vsel %vm1425_vm12, %v3517_v42, %v8710_v6 }
 0x76d   :  { %3661 = vrot.lane.b32.xlu1 %v3526_v34, %s4979_s10 }
 0x76e   :  { %3659 = vrot.lane.b32.xlu0 %v3525_v15, %s4979_s10 }
 0x76f   :  { %v8724_v47 = vpop.permute.xlu1 %3589 }
 0x771   :  { %3695 = vrot.lane.b32.xlu1 %v3526_v34, %s4980_s11 }
 0x772   :  { %3693 = vrot.lane.b32.xlu0 %v3525_v15, %s4980_s11 }
 0x773   :  { %v8730_v46 = vpop.permute.xlu1 %3623 }
 0x775   :  { %3729 = vrot.lane.b32.xlu1 %v3526_v34, %s4981_s12 }
 0x776   :  { %3727 = vrot.lane.b32.xlu0 %v3525_v15, %s4981_s12  ;;  %v3588_v51 = vpop.permute.xlu0 %3587 }
 0x777   :  { %v8734_v8 = vpop.permute.xlu1 %3657  ;;  %v3611_v27 = vsel %vm10265_vm7, %v3588_v51, %v8724_v47  ;;  %vm10279_vm7 = vmmov %vm10269_vm1 }
 0x779   :  { %3763 = vrot.lane.b32.xlu1 %v3526_v34, %s4985_s16 }
 0x77a   :  { %3761 = vrot.lane.b32.xlu0 %v3525_v15, %s4985_s16  ;;  %v3622_v50 = vpop.permute.xlu0 %3621 }
 0x77b   :  { %v8740_v36 = vpop.permute.xlu1 %3691  ;;  %v3645_v48 = vsel %vm10266_vm15, %v3622_v50, %v8730_v46  ;;  %vm10282_vm15 = vmmov %vm10267_vm3 }
 0x77d   :  { %3797 = vrot.lane.b32.xlu1 %v3526_v34, %s4986_s17 }
 0x77e   :  { %3795 = vrot.lane.b32.xlu0 %v3525_v15, %s4986_s17  ;;  %v3656_v32 = vpop.permute.xlu0 %3655 }
 0x77f   :  { %v8744_v31 = vpop.permute.xlu1 %3725  ;;  %v3679_v19 = vsel %vm10267_vm3, %v3656_v32, %v8734_v8  ;;  %vm10283_vm3 = vmmov %vm10271_vm9 }
 0x781   :  { %3831 = vrot.lane.b32.xlu1 %v3526_v34, %s4987_s18 }
 0x782   :  { %3829 = vrot.lane.b32.xlu0 %v3525_v15, %s4987_s18  ;;  %v3690_v61 = vpop.permute.xlu0 %3689 }
 0x783   :  { %v8750_v41 = vpop.permute.xlu1 %3759  ;;  %v8774_v11 = vsel %vm10268_vm11, %v3690_v61, %v8740_v36 }
 0x785   :  { %3841 = vrot.lane.b32.xlu1 %v3530_v4, %s4987_s18 }
 0x786   :  { %3603 = vrot.lane.b32.xlu0 %v3530_v4, %s4976_s29  ;;  %v3724_v14 = vpop.permute.xlu0 %3723 }
 0x787   :  { %v8756_v10 = vpop.permute.xlu1 %3793  ;;  %v3747_v22 = vsel %vm10270_vm0, %v3724_v14, %v8744_v31 }
 0x789   :  { %3605 = vrot.lane.b32.xlu1 %v3531_v26, %s4976_s29 }
 0x78a   :  { %3637 = vrot.lane.b32.xlu0 %v3530_v4, %s4975_s0  ;;  %v3758_v12 = vpop.permute.xlu0 %3757 }
 0x78b   :  { %v8762_v17 = vpop.permute.xlu1 %3827  ;;  %v3781_v20 = vsel %vm10272_vm8, %v3758_v12, %v8750_v41 }
 0x78d   :  { %3639 = vrot.lane.b32.xlu1 %v3531_v26, %s4975_s0 }
 0x78e   :  { %3671 = vrot.lane.b32.xlu0 %v3530_v4, %s4979_s10  ;;  %v3792_v29 = vpop.permute.xlu0 %3791 }
 0x78f   :  { %v3815_v55 = vsel %vm10274_vm13, %v3792_v29, %v8756_v10 }
 0x791   :  { %3673 = vrot.lane.b32.xlu1 %v3531_v26, %s4979_s10 }
 0x792   :  { %3705 = vrot.lane.b32.xlu0 %v3530_v4, %s4980_s11  ;;  %v8764_v30 = vpop.permute.xlu0 %3825 }
 0x795   :  { %3707 = vrot.lane.b32.xlu1 %v3531_v26, %s4980_s11 }
 0x796   :  { %3739 = vrot.lane.b32.xlu0 %v3530_v4, %s4981_s12 }
 0x799   :  { %3741 = vrot.lane.b32.xlu1 %v3531_v26, %s4981_s12 }
 0x79a   :  { %3773 = vrot.lane.b32.xlu0 %v3530_v4, %s4985_s16 }
 0x79d   :  { %3775 = vrot.lane.b32.xlu1 %v3531_v26, %s4985_s16 }
 0x79e   :  { %3807 = vrot.lane.b32.xlu0 %v3530_v4, %s4986_s17 }
 0x7a1   :  { %3809 = vrot.lane.b32.xlu1 %v3531_v26, %s4986_s17 }
 0x7a2   :  { %3843 = vrot.lane.b32.xlu0 %v3531_v26, %s4987_s18 }
 0x7a5   :  { %3884 = vrot.lane.b32.xlu1 %v3611_v27, %s4980_s11 }
 0x7a9   :  { %3908 = vrot.lane.b32.xlu1 %v3645_v48, %s4980_s11 }
 0x7ad   :  { %3932 = vrot.lane.b32.xlu1 %v3679_v19, %s4980_s11 }
 0x7af   :  { %v3509_v18 = vpop.permute.xlu1 %3508 }
 0x7b0   :  { %v8770_v33 = vsel %vm1425_vm12, %v3507_v58, %v3509_v18  ;;  %v3511_v5 = vpop.permute.xlu0 %3510 }
 0x7b1   :  { %v3528_v35 = vsel %vm1425_vm12, %v3509_v18, %v3511_v5  ;;  %3956 = vrot.lane.b32.xlu1 %v8774_v11, %s4980_s11 }
 0x7b2   :  { %3551 = vst.msk [vmem:[#allocation3 + $0x28] sm:$0xff] %vm1476_vm5, %v3528_v35 }
 0x7b3   :  { %3560 = vst.msk [vmem:[#allocation3 + $0x28] sm:$0xff] %vm10269_vm1, %v10175_v63  ;;  %v8782_v24 = vpop.permute.xlu1 %3837  ;;  %vm10285_vm1 = vmmov %vm10270_vm0 }
 0x7b4   :  { %v3600_v40 = vpop.permute.xlu0 %3599  ;;  %vm10286_vm0 = vmmov %vm10275_vm6 }
 0x7b5   :  { %3980 = vrot.lane.b32.xlu1 %v3747_v22, %s4980_s11 }
 0x7b7   :  { %v8787_v37 = vpop.permute.xlu1 %3601 }
 0x7b8   :  { %v3634_v43 = vpop.permute.xlu0 %3633  ;;  %v3616_v13 = vsel %vm10271_vm9, %v3600_v40, %v8787_v37  ;;  %vm10287_vm9 = vmmov %vm10272_vm8 }
 0x7b9   :  { %3896 = vrot.lane.b32.xlu0 %v3616_v13, %s4980_s11  ;;  %4004 = vrot.lane.b32.xlu1 %v3781_v20, %s4980_s11  ;;  %vm10288_vm8 = vmmov %vm10276_vm4 }
 0x7ba   :  { %v8836_v23 = vld [vmem:[#allocation3 + $0x28] sm:$0xff] }
 0x7bb   :  { %v8795_v53 = vpop.permute.xlu1 %3635 }
 0x7bc   :  { %v3668_v60 = vpop.permute.xlu0 %3667  ;;  %v3650_v54 = vsel %vm10273_vm10, %v3634_v43, %v8795_v53 }
 0x7bd   :  { %3920 = vrot.lane.b32.xlu0 %v3650_v54, %s4980_s11  ;;  %4028 = vrot.lane.b32.xlu1 %v3815_v55, %s4980_s11 }
 0x7bf   :  { %v8803_v0 = vpop.permute.xlu1 %3669 }
 0x7c0   :  { %v3702_v57 = vpop.permute.xlu0 %3701  ;;  %v3684_v59 = vsel %vm10275_vm6, %v3668_v60, %v8803_v0  ;;  %vm10290_vm6 = vmmov %vm10285_vm1 }
 0x7c1   :  { %3944 = vrot.lane.b32.xlu0 %v3684_v59, %s4980_s11  ;;  %3595 = vrot.lane.b32.xlu1 %v8770_v33, %s4976_s29 }
 0x7c3   :  { %v8810_v38 = vpop.permute.xlu1 %3703 }
 0x7c4   :  { %v3736_v3 = vpop.permute.xlu0 %3735  ;;  %v8814_v16 = vsel %vm10276_vm4, %v3702_v57, %v8810_v38 }
 0x7c5   :  { %3968 = vrot.lane.b32.xlu0 %v8814_v16, %s4980_s11  ;;  %3629 = vrot.lane.b32.xlu1 %v8770_v33, %s4975_s0 }
 0x7c7   :  { %v8820_v9 = vpop.permute.xlu1 %3737 }
 0x7c8   :  { %v3770_v21 = vpop.permute.xlu0 %3769  ;;  %v3752_v1 = vsel %vm10277_vm2, %v3736_v3, %v8820_v9  ;;  %vm10292_vm2 = vmmov %vm10287_vm9 }
 0x7c9   :  { %3992 = vrot.lane.b32.xlu0 %v3752_v1, %s4980_s11  ;;  %3663 = vrot.lane.b32.xlu1 %v8770_v33, %s4979_s10 }
 0x7cb   :  { %v8827_v28 = vpop.permute.xlu1 %3771 }
 0x7cc   :  { %v8829_v49 = vpop.permute.xlu0 %3803  ;;  %v3786_v52 = vsel %vm10278_vm14, %v3770_v21, %v8827_v28  ;;  %vm10293_vm14 = vmmov %vm10283_vm3 }
 0x7cd   :  { %4016 = vrot.lane.b32.xlu0 %v3786_v52, %s4980_s11  ;;  %3697 = vrot.lane.b32.xlu1 %v8770_v33, %s4980_s11 }
 0x7cf   :  { %v8838_v39 = vpop.permute.xlu1 %3805 }
 0x7d0   :  { %v8840_v2 = vpop.permute.xlu0 %3839 }
 0x7d1   :  { %3597 = vrot.lane.b32.xlu0 %v8836_v23, %s4976_s29  ;;  %3731 = vrot.lane.b32.xlu1 %v8770_v33, %s4981_s12 }
 0x7d3   :  { %v3521_v56 = vpop.permute.xlu1 %3520 }
 0x7d4   :  { %v8848_v62 = vsel %vm1425_vm12, %v8710_v6, %v3521_v56  ;;  %v3523_v25 = vpop.permute.xlu0 %3522 }
 0x7d5   :  { %v3533_v45 = vsel %vm1425_vm12, %v3521_v56, %v3523_v25  ;;  %3631 = vrot.lane.b32.xlu0 %v8836_v23, %s4975_s0  ;;  %vm10280_vm12 = vmmov %vm10276_vm4 }
 0x7d6   :  { %3557 = vst.msk [vmem:[#allocation3 + $0x58] sm:$0xff] %vm1476_vm5, %v3533_v45  ;;  %vm10281_vm5 = vmmov %vm10273_vm10 }
 0x7d7   :  { %3561 = vst.msk [vmem:[#allocation3 + $0x58] sm:$0xff] %vm10279_vm7, %v10175_v63  ;;  %v8856_v7 = vpop.permute.xlu1 %3593  ;;  %vm10284_vm11 = vmmov %vm10281_vm5 }
 0x7d8   :  { %v8858_v44 = vpop.permute.xlu0 %3591  ;;  %vm10289_vm10 = vmmov %vm10276_vm4 }
 0x7d9   :  { %3665 = vrot.lane.b32.xlu0 %v8836_v23, %s4979_s10  ;;  %vm10291_vm4 = vmmov %vm10283_vm3 }
 0x7da   :  { %v3613_v59 = vsel %vm10291_vm4, %v8858_v44, %v8856_v7  ;;  %vm10294_vm7 = vmmov %vm10274_vm13 }
 0x7db   :  { %v8862_v15 = vpop.permute.xlu1 %3627 }
 0x7dc   :  { %v3626_v58 = vpop.permute.xlu0 %3625 }
 0x7dd   :  { %3699 = vrot.lane.b32.xlu0 %v8836_v23, %s4980_s11  ;;  %v3646_v27 = vsel %vm10281_vm5, %v8730_v46, %v3626_v58  ;;  %v3612_v46 = vsel %vm10283_vm3, %v8724_v47, %v8858_v44  ;;  %v3647_v35 = vsel %vm10284_vm11, %v3626_v58, %v8862_v15  ;;  %vm10299_vm11 = vmmov %vm10285_vm1 }
 0x7de   :  { %v8866_v34 = vld [vmem:[#allocation3 + $0x58] sm:$0xff] }
 0x7df   :  { %3609 = vrot.lane.b32.xlu1 %v8866_v34, %s4976_s29  ;;  %v8870_v42 = vpop.permute.xlu1 %3661 }
 0x7e0   :  { %v3660_v4 = vpop.permute.xlu0 %3659 }
 0x7e1   :  { %3733 = vrot.lane.b32.xlu0 %v8836_v23, %s4981_s12  ;;  %v3680_v19 = vsel %vm10282_vm15, %v8734_v8, %v3660_v4  ;;  %v3681_v22 = vsel %vm10286_vm0, %v3660_v4, %v8870_v42  ;;  %vm10297_vm15 = vmmov %vm10286_vm0 }
 0x7e2   :  { %vm10301_vm0 = vmmov %vm10294_vm7 }
 0x7e3   :  { %3643 = vrot.lane.b32.xlu1 %v8866_v34, %s4975_s0  ;;  %v8876_v6 = vpop.permute.xlu1 %3695 }
 0x7e4   :  { %v3694_v26 = vpop.permute.xlu0 %3693 }
 0x7e5   :  { %3607 = vrot.lane.b32.xlu0 %v8848_v62, %s4976_s29  ;;  %v3714_v51 = vsel %vm10280_vm12, %v8740_v36, %v3694_v26  ;;  %vm10295_vm12 = vmmov %vm10281_vm5  ;;  %vm10296_vm5 = vcmask 703488  }
 0x7e6   :  { %4268 = vmatprep.subr.bf16.mxu0 %v3714_v51  ;;  %vm10298_vm3 = vmmov %vm10296_vm5 }
 0x7e7   :  { %3677 = vrot.lane.b32.xlu1 %v8866_v34, %s4979_s10  ;;  %4269 = vmatpush1.bf16.msra.mxu0 %v8774_v11  ;;  %v8885_v50 = vpop.permute.xlu1 %3729  ;;  %v3849_v58 = vsel %vm10298_vm3, %v8764_v30, %v8762_v17 }
 0x7e8   :  { %v3728_v32 = vpop.permute.xlu0 %3727 }
 0x7e9   :  { %3641 = vrot.lane.b32.xlu0 %v8848_v62, %s4975_s0  ;;  %v3748_v40 = vsel %vm10285_vm1, %v8744_v31, %v3728_v32  ;;  %v8944_v31 = vsel %vm10288_vm8, %v3694_v26, %v8876_v6  ;;  %v3749_v57 = vsel %vm10290_vm6, %v3728_v32, %v8885_v50  ;;  %vm10300_vm1 = vmmov %vm10292_vm2 }
 0x7ea   :  { %vm10303_vm8 = vmmov %vm10291_vm4  ;;  %vm10307_vm4 = vcmask 875520  }
 0x7eb   :  { %3711 = vrot.lane.b32.xlu1 %v8866_v34, %s4980_s11  ;;  %v8891_v61 = vpop.permute.xlu1 %3763  ;;  %vm10306_vm6 = vmmov %vm10298_vm3 }
 0x7ec   :  { %v3762_v14 = vpop.permute.xlu0 %3761 }
 0x7ed   :  { %3675 = vrot.lane.b32.xlu0 %v8848_v62, %s4979_s10  ;;  %v3782_v13 = vsel %vm10287_vm9, %v8750_v41, %v3762_v14  ;;  %vm10302_vm9 = vmmov %vm10295_vm12 }
 0x7ef   :  { %3745 = vrot.lane.b32.xlu1 %v8866_v34, %s4981_s12  ;;  %v8897_v36 = vpop.permute.xlu1 %3797 }
 0x7f0   :  { %v3796_v12 = vpop.permute.xlu0 %3795 }
 0x7f1   :  { %3709 = vrot.lane.b32.xlu0 %v8848_v62, %s4980_s11  ;;  %v3816_v41 = vsel %vm10274_vm13, %v8756_v10, %v3796_v12  ;;  %v3783_v10 = vsel %vm10292_vm2, %v3762_v14, %v8891_v61  ;;  %v3817_v21 = vsel %vm10294_vm7, %v3796_v12, %v8897_v36  ;;  %vm10305_vm13 = vmmov %vm10297_vm15 }
 0x7f2   :  { %vm10308_vm2 = vmmov %vm10299_vm11 }
 0x7f3   :  { %3910 = vrot.lane.b32.xlu1 %v3646_v27, %s4980_s11  ;;  %v8904_v29 = vpop.permute.xlu1 %3831  ;;  %vm10310_vm7 = vmmov %vm10300_vm1 }
 0x7f4   :  { %v8906_v48 = vpop.permute.xlu0 %3829 }
 0x7f5   :  { %3743 = vrot.lane.b32.xlu0 %v8848_v62, %s4981_s12 }
 0x7f7   :  { %3934 = vrot.lane.b32.xlu1 %v3680_v19, %s4980_s11  ;;  %v8913_v18 = vpop.permute.xlu1 %3841 }
 0x7f8   :  { %v8918_v5 = vpop.permute.xlu0 %3603 }
 0x7f9   :  { %3886 = vrot.lane.b32.xlu0 %v3612_v46, %s4980_s11  ;;  %v3617_v3 = vsel %vm10293_vm14, %v8787_v37, %v8918_v5  ;;  %v3850_v37 = vsel %vm10296_vm5, %v8762_v17, %v8906_v48  ;;  %vm10309_vm14 = vmmov %vm10298_vm3 }
 0x7fa   :  { %vm10312_vm5 = vmmov %vm10298_vm3 }
 0x7fb   :  { %3958 = vrot.lane.b32.xlu1 %v3714_v51, %s4980_s11  ;;  %v8922_v11 = vpop.permute.xlu1 %3605 }
 0x7fc   :  { %v3638_v8 = vpop.permute.xlu0 %3637  ;;  %v3618_v27 = vsel %vm10303_vm8, %v8918_v5, %v8922_v11 }
 0x7fd   :  { %3912 = vrot.lane.b32.xlu0 %v3647_v35, %s4980_s11  ;;  %v3651_v52 = vsel %vm10295_vm12, %v8795_v53, %v3638_v8  ;;  %vm10311_vm12 = vmmov %vm10301_vm0 }
 0x7ff   :  { %3982 = vrot.lane.b32.xlu1 %v3748_v40, %s4980_s11  ;;  %v8930_v47 = vpop.permute.xlu1 %3639 }
 0x800   :  { %v8934_v43 = vpop.permute.xlu0 %3671  ;;  %v3652_v14 = vsel %vm10302_vm9, %v3638_v8, %v8930_v47 }
 0x801   :  { %3936 = vrot.lane.b32.xlu0 %v3681_v22, %s4980_s11  ;;  %v3685_v45 = vsel %vm10297_vm15, %v8803_v0, %v8934_v43  ;;  %vm10313_vm15 = vmmov %vm10298_vm3 }
 0x802   :  { %vm10314_vm3 = vmmov %vm10303_vm8 }
 0x803   :  { %4006 = vrot.lane.b32.xlu1 %v3782_v13, %s4980_s11  ;;  %v8940_v20 = vpop.permute.xlu1 %3673  ;;  %vm10320_vm8 = vmmov %vm10307_vm4 }
 0x804   :  { %v8946_v60 = vpop.permute.xlu0 %3705  ;;  %v3686_v8 = vsel %vm10305_vm13, %v8934_v43, %v8940_v20 }
 0x805   :  { %3960 = vrot.lane.b32.xlu0 %v8944_v31, %s4980_s11  ;;  %v3719_v54 = vsel %vm10289_vm10, %v8810_v38, %v8946_v60  ;;  %vm10304_vm10 = vmmov %vm10301_vm0 }
 0x806   :  { %4270 = vmatprep.subr.bf16.mxu0 %v3719_v54  ;;  %v3820_v35 = vsel %vm10304_vm10, %v8829_v49, %v8838_v39  ;;  %v3851_v49 = vsel %vm10306_vm6, %v8906_v48, %v8904_v29  ;;  %vm10323_vm6 = vmmov %vm10307_vm4 }
 0x807   :  { %4030 = vrot.lane.b32.xlu1 %v3816_v41, %s4980_s11  ;;  %4271 = vmatpush1.bf16.msra.mxu0 %v8814_v16  ;;  %v8957_v55 = vpop.permute.xlu1 %3707 }
 0x808   :  { %v3740_v56 = vpop.permute.xlu0 %3739 }
 0x809   :  { %3984 = vrot.lane.b32.xlu0 %v3749_v57, %s4980_s11  ;;  %v3753_v0 = vsel %vm10299_vm11, %v8820_v9, %v3740_v56  ;;  %vm10315_vm11 = vmmov %vm10307_vm4 }
 0x80b   :  { %3888 = vrot.lane.b32.xlu1 %v3613_v59, %s4980_s11  ;;  %v8966_v38 = vpop.permute.xlu1 %3741 }
 0x80c   :  { %v3774_v44 = vpop.permute.xlu0 %3773 }
 0x80d   :  { %4008 = vrot.lane.b32.xlu0 %v3783_v10, %s4980_s11  ;;  %v3787_v32 = vsel %vm10300_vm1, %v8827_v28, %v3774_v44  ;;  %vm10317_vm1 = vmmov %vm10302_vm9 }
 0x80e   :  { %vm10319_vm9 = vmmov %vm10314_vm3 }
 0x80f   :  { %3898 = vrot.lane.b32.xlu1 %v3617_v3, %s4980_s11  ;;  %v8975_v16 = vpop.permute.xlu1 %3775  ;;  %vm10321_vm10 = vmmov %vm10317_vm1 }
 0x810   :  { %v3808_v26 = vpop.permute.xlu0 %3807  ;;  %v3788_v57 = vsel %vm10310_vm7, %v3774_v44, %v8975_v16 }
 0x811   :  { %4032 = vrot.lane.b32.xlu0 %v3817_v21, %s4980_s11  ;;  %v3821_v9 = vsel %vm10301_vm0, %v8838_v39, %v3808_v26  ;;  %v9067_v39 = vsel %vm10307_vm4, %v8946_v60, %v8957_v55  ;;  %v3855_v60 = vsel %vm10309_vm14, %v8840_v2, %v8913_v18  ;;  %vm10318_vm0 = vmmov %vm10305_vm13 }
 0x812   :  { %vm10322_vm13 = vmmov %vm10318_vm0 }
 0x813   :  { %3765 = vrot.lane.b32.xlu1 %v8770_v33, %s4985_s16  ;;  %v8982_v1 = vpop.permute.xlu1 %3809  ;;  %vm10324_vm4 = vmmov %vm10308_vm2 }
 0x814   :  { %v9018_v17 = vpop.permute.xlu0 %3843  ;;  %v3822_v10 = vsel %vm10311_vm12, %v3808_v26, %v8982_v1  ;;  %v10316_v26 = vld [vmem:[#allocation4_spill] sm:$0xff]  ;;  %vm10326_vm14 = vmmov %vm10317_vm1 }
 0x815   :  { %3922 = vrot.lane.b32.xlu0 %v3651_v52, %s4980_s11  ;;  %v3854_v52 = vsel %vm10312_vm5, %v8782_v24, %v8840_v2  ;;  %vm10328_vm12 = vmmov %vm10318_vm0 }
 0x816   :  { %vm10329_vm5 = vmmov %vm10324_vm4 }
 0x817   :  { %4054 = vrot.lane.b32.xlu1 %v3850_v37, %s4980_s11  ;;  %v8991_v25 = vpop.permute.xlu1 %3884 }
 0x819   :  { %3946 = vrot.lane.b32.xlu0 %v3685_v45, %s4980_s11  ;;  %v4995_v45 = vmov 1983009808  }
 0x81a   :  { %v3868_v44 = vunpack.c.l.s4 %v4995_v45 }
 0x81b   :  { %3777 = vrot.lane.b32.xlu1 %v8848_v62, %s4985_s16  ;;  %v8999_v53 = vpop.permute.xlu1 %3908 }
 0x81c   :  { %v3869_v2 = vunpack.c.0.s8 %v3868_v44 }
 0x81d   :  { %3970 = vrot.lane.b32.xlu0 %v3719_v54, %s4980_s11  ;;  %v3754_v54 = vsel %vm10308_vm2, %v3740_v56, %v8966_v38  ;;  %v3856_v56 = vsel %vm10313_vm15, %v8913_v18, %v9018_v17  ;;  %vm10325_vm2 = vmmov %vm10314_vm3 }
 0x81e   :  { %vm10327_vm7 = vmmov %vm10325_vm2 }
 0x81f   :  { %4052 = vrot.lane.b32.xlu1 %v3849_v58, %s4980_s11  ;;  %v9006_v4 = vpop.permute.xlu1 %3932  ;;  %vm10330_vm15 = vmmov %vm10323_vm6 }
 0x821   :  { %3994 = vrot.lane.b32.xlu0 %v3753_v0, %s4980_s11 }
 0x823   :  { %3801 = vrot.lane.b32.xlu1 %v8836_v23, %s4986_s17  ;;  %v9013_v51 = vpop.permute.xlu1 %3956 }
 0x825   :  { %4018 = vrot.lane.b32.xlu0 %v3787_v32, %s4980_s11 }
 0x827   :  { %3811 = vrot.lane.b32.xlu1 %v8848_v62, %s4986_s17  ;;  %v9022_v30 = vpop.permute.xlu1 %3980 }
 0x829   :  { %4042 = vrot.lane.b32.xlu0 %v3821_v9, %s4980_s11 }
 0x82b   :  { %v9029_v12 = vpop.permute.xlu0 %3896  ;;  %3924 = vrot.lane.b32.xlu1 %v3652_v14, %s4980_s11  ;;  %v9032_v28 = vpop.permute.xlu1 %4004 }
 0x82d   :  { %3900 = vrot.lane.b32.xlu0 %v3618_v27, %s4980_s11 }
 0x82f   :  { %v9038_v19 = vpop.permute.xlu0 %3920  ;;  %3833 = vrot.lane.b32.xlu1 %v8770_v33, %s4987_s18  ;;  %v9042_v46 = vpop.permute.xlu1 %4028 }
 0x831   :  { %4040 = vrot.lane.b32.xlu0 %v3820_v35, %s4980_s11 }
 0x833   :  { %v9051_v5 = vpop.permute.xlu0 %3944  ;;  %3948 = vrot.lane.b32.xlu1 %v3686_v8, %s4980_s11  ;;  %v3596_v40 = vpop.permute.xlu1 %3595 }
 0x834   :  { %v3614_v58 = vsel %vm10314_vm3, %v8856_v7, %v3596_v40  ;;  %v3562_v7 = vld [vmem:[%s9539_s6] sm:$0x3f]  ;;  %vm10331_vm3 = vmmov %vm10317_vm1 }
 0x835   :  { %3767 = vrot.lane.b32.xlu0 %v8836_v23, %s4985_s16 }
 0x837   :  { %v9056_v22 = vpop.permute.xlu0 %3968  ;;  %3847 = vrot.lane.b32.xlu1 %v8866_v34, %s4987_s18  ;;  %v3630_v13 = vpop.permute.xlu1 %3629 }
 0x838   :  { %v3648_v32 = vsel %vm10317_vm1, %v8862_v15, %v3630_v13  ;;  %vm10333_vm1 = vmmov %vm10323_vm6 }
 0x839   :  { %4056 = vrot.lane.b32.xlu0 %v3851_v49, %s4980_s11 }
 0x83b   :  { %v9069_v43 = vpop.permute.xlu0 %3992  ;;  %3972 = vrot.lane.b32.xlu1 %v9067_v39, %s4980_s11  ;;  %v3664_v41 = vpop.permute.xlu1 %3663 }
 0x83c   :  { %v3682_v15 = vsel %vm10318_vm0, %v8870_v42, %v3664_v41 }
 0x83d   :  { %3779 = vrot.lane.b32.xlu0 %v8866_v34, %s4985_s16 }
 0x83f   :  { %v9077_v48 = vpop.permute.xlu0 %4016  ;;  %3996 = vrot.lane.b32.xlu1 %v3754_v54, %s4980_s11  ;;  %v3698_v21 = vpop.permute.xlu1 %3697 }
 0x840   :  { %v9138_v49 = vsel %vm10320_vm8, %v8876_v6, %v3698_v21  ;;  %vm10336_vm8 = vmmov %vm10324_vm4 }
 0x841   :  { %4066 = vrot.lane.b32.xlu0 %v3855_v60, %s4980_s11 }
 0x843   :  { %v3598_v59 = vpop.permute.xlu0 %3597  ;;  %4020 = vrot.lane.b32.xlu1 %v3788_v57, %s4980_s11 }
 0x844   :  { %v3615_v8 = vsel %vm10319_vm9, %v3596_v40, %v3598_v59  ;;  %vm10335_vm9 = vcmask 719872  }
 0x845   :  { %3799 = vrot.lane.b32.xlu0 %v8770_v33, %s4986_s17  ;;  %v9100_v33 = vpop.permute.xlu1 %3731 }
 0x847   :  { %v3632_v3 = vpop.permute.xlu0 %3631  ;;  %4044 = vrot.lane.b32.xlu1 %v3822_v10, %s4980_s11  ;;  %v3866_v10 = vcombine.high %v3562_v7, %v3562_v7 }
 0x848   :  { %v3649_v42 = vsel %vm10321_vm10, %v3630_v13, %v3632_v3  ;;  %vm10337_vm10 = vmmov %vm10324_vm4 }
 0x849   :  { %4064 = vrot.lane.b32.xlu0 %v3854_v52, %s4980_s11 }
 0x84b   :  { %v3666_v37 = vpop.permute.xlu0 %3665  ;;  %4068 = vrot.lane.b32.xlu1 %v3856_v56, %s4980_s11 }
 0x84c   :  { %v3683_v57 = vsel %vm10322_vm13, %v3664_v41, %v3666_v37 }
 0x84d   :  { %3813 = vrot.lane.b32.xlu0 %v8866_v34, %s4986_s17  ;;  %v3872_v34 = vsub.s32 %v3869_v2, %v10316_v26 }
 0x84f   :  { %v3700_v24 = vpop.permute.xlu0 %3699  ;;  %3890 = vrot.lane.b32.xlu1 %v3614_v58, %s4980_s11  ;;  %v9121_v14 = vrot.slane %v3562_v7, %v3872_v34 }
 0x850   :  { %4432 = vmatprep.subr.bf16.mxu1 %v3700_v24  ;;  %v3717_v18 = vsel %vm10315_vm11, %v3698_v21, %v3700_v24  ;;  %v9149_v21 = vrot.slane %v3866_v10, %v3872_v34  ;;  %vm10332_vm11 = vmmov %vm10318_vm0 }
 0x851   :  { %3835 = vrot.lane.b32.xlu0 %v8836_v23, %s4987_s18  ;;  %4433 = vmatpush1.bf16.msra.mxu1 %v3717_v18  ;;  %v9110_v0 = vpop.permute.xlu1 %3609  ;;  %v9127_v27 = vcombine.high %v9121_v14, %v9121_v14  ;;  %vm10334_vm0 = vmmov %vm10333_vm1 }
 0x852   :  { %vm10338_vm13 = vmmov %vm10334_vm0 }
 0x853   :  { %v9118_v9 = vpop.permute.xlu0 %3733  ;;  %3914 = vrot.lane.b32.xlu1 %v3648_v32, %s4980_s11  ;;  %4300 = vmatprep.mubr.bf16.mxu0 %v9127_v27 }
 0x854   :  { %4464 = vmatprep.mubr.bf16.mxu1 %v9127_v27 }
 0x855   :  { %3845 = vrot.lane.b32.xlu0 %v8848_v62, %s4987_s18  ;;  %v3644_v23 = vpop.permute.xlu1 %3643 }
 0x857   :  { %v3608_v35 = vpop.permute.xlu0 %3607  ;;  %3938 = vrot.lane.b32.xlu1 %v3682_v15, %s4980_s11 }
 0x858   :  { %v3619_v45 = vsel %vm10325_vm2, %v8922_v11, %v3608_v35  ;;  %v3620_v2 = vsel %vm10327_vm7, %v3608_v35, %v9110_v0  ;;  %vm10341_vm2 = vmmov %vm10334_vm0 }
 0x859   :  { %3892 = vrot.lane.b32.xlu0 %v3615_v8, %s4980_s11  ;;  %v3678_v62 = vpop.permute.xlu1 %3677  ;;  %vm10343_vm7 = vmmov %vm10334_vm0 }
 0x85b   :  { %v3642_v54 = vpop.permute.xlu0 %3641  ;;  %3962 = vrot.lane.b32.xlu1 %v9138_v49, %s4980_s11 }
 0x85c   :  { %v3653_v58 = vsel %vm10326_vm14, %v8930_v47, %v3642_v54  ;;  %v3750_v47 = vsel %vm10329_vm5, %v8885_v50, %v9100_v33  ;;  %v3654_v32 = vsel %vm10331_vm3, %v3642_v54, %v3644_v23  ;;  %vm10342_vm14 = vmmov %vm10334_vm0 }
 0x85d   :  { %3916 = vrot.lane.b32.xlu0 %v3649_v42, %s4980_s11  ;;  %v3712_v60 = vpop.permute.xlu1 %3711  ;;  %vm10345_vm5 = vmmov %vm10334_vm0 }
 0x85e   :  { %4434 = vmatprep.subr.bf16.mxu1 %v3712_v60  ;;  %vm10347_vm3 = vmmov %vm10335_vm9 }
 0x85f   :  { %v3676_v40 = vpop.permute.xlu0 %3675  ;;  %3894 = vrot.lane.b32.xlu1 %v3598_v59, %s4980_s11 }
 0x860   :  { %v3687_v11 = vsel %vm10328_vm12, %v8940_v20, %v3676_v40  ;;  %v3688_v35 = vsel %vm10332_vm11, %v3676_v40, %v3678_v62  ;;  %vm10344_vm12 = vmmov %vm10335_vm9 }
 0x861   :  { %3940 = vrot.lane.b32.xlu0 %v3683_v57, %s4980_s11  ;;  %v9147_v6 = vpop.permute.xlu1 %3745  ;;  %vm10348_vm11 = vmmov %vm10334_vm0 }
 0x863   :  { %v3710_v52 = vpop.permute.xlu0 %3709  ;;  %3918 = vrot.lane.b32.xlu1 %v3632_v3, %s4980_s11 }
 0x864   :  { %v3722_v13 = vsel %vm10323_vm6, %v3710_v52, %v3712_v60  ;;  %v9190_v34 = vsel %vm10330_vm15, %v8957_v55, %v3710_v52  ;;  %vm10339_vm6 = vmmov %vm10334_vm0 }
 0x865   :  { %3964 = vrot.lane.b32.xlu0 %v3717_v18, %s4980_s11  ;;  %4435 = vmatpush1.bf16.msra.mxu1 %v3722_v13  ;;  %v9154_v56 = vpop.permute.xlu1 %3910  ;;  %vm10346_vm15 = vmmov %vm10334_vm0 }
 0x867   :  { %v3744_v59 = vpop.permute.xlu0 %3743  ;;  %3942 = vrot.lane.b32.xlu1 %v3666_v37, %s4980_s11 }
 0x868   :  { %v9159_v41 = vsel %vm10324_vm4, %v3744_v59, %v9147_v6  ;;  %vm10340_vm4 = vmmov %vm10334_vm0 }
 0x869   :  { %3902 = vrot.lane.b32.xlu0 %v3619_v45, %s4980_s11  ;;  %v9164_v3 = vpop.permute.xlu1 %3934 }
 0x86b   :  { %v3887_v44 = vpop.permute.xlu0 %3886  ;;  %3966 = vrot.lane.b32.xlu1 %v3700_v24, %s4980_s11 }
 0x86c   :  { %v4076_v54 = vsel %vm10334_vm0, %v8991_v25, %v3887_v44  ;;  %v3751_v25 = vsel %vm10336_vm8, %v9100_v33, %v9118_v9  ;;  %vm10351_vm8 = vmmov %vm10334_vm0 }
 0x86d   :  { %3926 = vrot.lane.b32.xlu0 %v3653_v58, %s4980_s11  ;;  %v9170_v37 = vpop.permute.xlu1 %3958 }
 0x86f   :  { %v9174_v18 = vpop.permute.xlu0 %3912  ;;  %3904 = vrot.lane.b32.xlu1 %v3620_v2, %s4980_s11 }
 0x871   :  { %3950 = vrot.lane.b32.xlu0 %v3687_v11, %s4980_s11  ;;  %v9180_v24 = vpop.permute.xlu1 %3982 }
 0x873   :  { %v9185_v26 = vpop.permute.xlu0 %3936  ;;  %3986 = vrot.lane.b32.xlu1 %v3750_v47, %s4980_s11 }
 0x875   :  { %3974 = vrot.lane.b32.xlu0 %v9190_v34, %s4980_s11  ;;  %v9194_v20 = vpop.permute.xlu1 %4006 }
 0x877   :  { %v9197_v7 = vpop.permute.xlu0 %3960  ;;  %3928 = vrot.lane.b32.xlu1 %v3654_v32, %s4980_s11 }
 0x879   :  { %3906 = vrot.lane.b32.xlu0 %v9110_v0, %s4980_s11  ;;  %v9202_v50 = vpop.permute.xlu1 %4030 }
 0x87b   :  { %v9204_v15 = vpop.permute.xlu0 %3984  ;;  %3990 = vrot.lane.b32.xlu1 %v9118_v9, %s4980_s11 }
 0x87d   :  { %3930 = vrot.lane.b32.xlu0 %v3644_v23, %s4980_s11  ;;  %v9209_v55 = vpop.permute.xlu1 %3888 }
 0x87e   :  { %v4077_v8 = vsel %vm10333_vm1, %v3887_v44, %v9209_v55  ;;  %vm10349_vm1 = vmmov %vm10334_vm0 }
 0x87f   :  { %v9216_v0 = vpop.permute.xlu0 %4008  ;;  %3952 = vrot.lane.b32.xlu1 %v3688_v35, %s4980_s11  ;;  %4272 = vmatprep.subr.bf16.mxu0 %v4077_v8  ;;  %v4087_v35 = vsel %vm10341_vm2, %v9154_v56, %v9174_v18  ;;  %vm10356_vm2 = vmmov %vm10334_vm0 }
 0x880   :  { %4273 = vmatpush1.bf16.msra.mxu0 %v4076_v54  ;;  %v4086_v54 = vsel %vm10342_vm14, %v8999_v53, %v9154_v56  ;;  %v4097_v53 = vsel %vm10346_vm15, %v9164_v3, %v9185_v26  ;;  %vm10361_vm15 = vmmov %vm10334_vm0 }
 0x881   :  { %3954 = vrot.lane.b32.xlu0 %v3678_v62, %s4980_s11  ;;  %v3899_v42 = vpop.permute.xlu1 %3898 }
 0x882   :  { %v4081_v47 = vsel %vm10340_vm4, %v9029_v12, %v3899_v42  ;;  %vm10355_vm4 = vmmov %vm10334_vm0 }
 0x883   :  { %v9220_v23 = vpop.permute.xlu0 %4032 }
 0x885   :  { %3978 = vrot.lane.b32.xlu0 %v3712_v60, %s4980_s11  ;;  %v3766_v40 = vpop.permute.xlu1 %3765  ;;  %v3755_v60 = vsel %vm10337_vm10, %v8966_v38, %v3744_v59  ;;  %vm10352_vm10 = vmmov %vm10334_vm0 }
 0x886   :  { %v3784_v57 = vsel %vm10335_vm9, %v8891_v61, %v3766_v40  ;;  %vm10350_vm9 = vmmov %vm10334_vm0 }
 0x887   :  { %v3923_v10 = vpop.permute.xlu0 %3922  ;;  %4010 = vrot.lane.b32.xlu1 %v3784_v57, %s4980_s11 }
 0x889   :  { %3988 = vrot.lane.b32.xlu0 %v3751_v25, %s4980_s11  ;;  %v9230_v52 = vpop.permute.xlu1 %4054 }
 0x88b   :  { %v3947_v62 = vpop.permute.xlu0 %3946  ;;  %3976 = vrot.lane.b32.xlu1 %v3722_v13, %s4980_s11 }
 0x88d   :  { %3998 = vrot.lane.b32.xlu0 %v3755_v60, %s4980_s11  ;;  %v9236_v61 = vpop.permute.xlu1 %3777  ;;  %v4091_v60 = vsel %vm10345_vm5, %v9038_v19, %v3923_v10  ;;  %v4096_v19 = vsel %vm10348_vm11, %v9006_v4, %v9164_v3  ;;  %v4107_v4 = vsel %vm10350_vm9, %v9170_v37, %v9197_v7  ;;  %vm10360_vm5 = vmmov %vm10334_vm0 }
 0x88e   :  { %vm10365_vm9 = vmmov %vm10334_vm0 }
 0x88f   :  { %v3971_v45 = vpop.permute.xlu0 %3970 }
 0x891   :  { %4002 = vrot.lane.b32.xlu0 %v9147_v6, %s4980_s11  ;;  %v4053_v44 = vpop.permute.xlu1 %4052 }
 0x892   :  { %v9242_v33 = vsel %vm10338_vm13, %v4053_v44, %v9230_v52  ;;  %vm10353_vm13 = vcmask 711680  }
 0x893   :  { %v9244_v9 = vpop.permute.xlu0 %3994 }
 0x895   :  { %v9246_v58 = vpop.permute.xlu1 %3801 }
 0x897   :  { %v9248_v13 = vpop.permute.xlu0 %4018 }
 0x899   :  { %v9250_v38 = vpop.permute.xlu1 %3811 }
 0x89b   :  { %v9252_v59 = vpop.permute.xlu0 %4042 }
 0x89d   :  { %v9254_v2 = vpop.permute.xlu1 %3924 }
 0x89e   :  { %v4092_v12 = vsel %vm10343_vm7, %v3923_v10, %v9254_v2  ;;  %vm10358_vm7 = vmmov %vm10347_vm3 }
 0x89f   :  { %v9256_v11 = vpop.permute.xlu0 %3900 }
 0x8a0   :  { %v4082_v6 = vsel %vm10339_vm6, %v3899_v42, %v9256_v11  ;;  %vm10354_vm6 = vmmov %vm10353_vm13 }
 0x8a1   :  { %4274 = vmatprep.subr.bf16.mxu0 %v4082_v6  ;;  %v9262_v32 = vpop.permute.xlu1 %3833  ;;  %vm10357_vm14 = vmmov %vm10354_vm6 }
 0x8a2   :  { %4275 = vmatpush1.bf16.msra.mxu0 %v4081_v47  ;;  %vm10363_vm11 = vmmov %vm10354_vm6 }
 0x8a3   :  { %v9267_v8 = vpop.permute.xlu0 %4040  ;;  %4276 = vmatprep.subr.bf16.mxu0 %v4087_v35  ;;  %v4106_v35 = vsel %vm10351_vm8, %v9013_v51, %v9170_v37  ;;  %v4117_v37 = vsel %vm10356_vm2, %v9180_v24, %v9204_v15  ;;  %vm10371_vm2 = vmmov %vm10334_vm0 }
 0x8a5   :  { %v9272_v57 = vpop.permute.xlu1 %3948 }
 0x8a6   :  { %4277 = vmatpush1.bf16.msra.mxu0 %v4086_v54  ;;  %v4102_v6 = vsel %vm10349_vm1, %v3947_v62, %v9272_v57  ;;  %vm10364_vm1 = vcmask 703488  }
 0x8a7   :  { %v3768_v42 = vpop.permute.xlu0 %3767  ;;  %4278 = vmatprep.subr.bf16.mxu0 %v4092_v12  ;;  %vm10366_vm8 = vmmov %vm10364_vm1 }
 0x8a8   :  { %v3785_v25 = vsel %vm10344_vm12, %v3766_v40, %v3768_v42  ;;  %4014 = vrot.lane.b32.xlu1 %v3768_v42, %s4980_s11  ;;  %v3789_v40 = vsel %vm10347_vm3, %v8975_v16, %v9236_v61  ;;  %v4101_v16 = vsel %vm10334_vm0, %v9051_v5, %v3947_v62  ;;  %vm10359_vm12 = vmmov %vm10334_vm0 }
 0x8a9   :  { %4012 = vrot.lane.b32.xlu0 %v3785_v25, %s4980_s11  ;;  %v9281_v44 = vpop.permute.xlu1 %3847  ;;  %v4111_v25 = vsel %vm10355_vm4, %v9056_v22, %v3971_v45  ;;  %vm10362_vm3 = vmmov %vm10334_vm0 }
 0x8aa   :  { %4279 = vmatpush1.bf16.msra.mxu0 %v4091_v60  ;;  %vm10370_vm4 = vmmov %vm10334_vm0 }
 0x8ab   :  { %v9286_v56 = vpop.permute.xlu0 %4056  ;;  %4280 = vmatprep.subr.bf16.mxu0 %v4097_v53 }
 0x8ac   :  { %4000 = vrot.lane.b32.xlu1 %v9159_v41, %s4980_s11 }
 0x8ad   :  { %4022 = vrot.lane.b32.xlu0 %v3789_v40, %s4980_s11  ;;  %v9297_v10 = vpop.permute.xlu1 %3972 }
 0x8ae   :  { %4281 = vmatpush1.bf16.msra.mxu0 %v4096_v19  ;;  %v4112_v5 = vsel %vm10352_vm10, %v3971_v45, %v9297_v10  ;;  %v4116_v45 = vsel %vm10359_vm12, %v9022_v30, %v9180_v24  ;;  %v4127_v24 = vsel %vm10362_vm3, %v9194_v20, %v9216_v0  ;;  %vm10367_vm10 = vmmov %vm10364_vm1 }
 0x8af   :  { %v3780_v47 = vpop.permute.xlu0 %3779  ;;  %4282 = vmatprep.subr.bf16.mxu0 %v4102_v6  ;;  %vm10374_vm12 = vmmov %vm10334_vm0 }
 0x8b0   :  { %v3790_v22 = vsel %vm10358_vm7, %v9236_v61, %v3780_v47  ;;  %vm10373_vm7 = vmmov %vm10334_vm0 }
 0x8b1   :  { %4026 = vrot.lane.b32.xlu0 %v3780_v47, %s4980_s11  ;;  %v9304_v41 = vpop.permute.xlu1 %3996  ;;  %vm10377_vm3 = vmmov %vm10334_vm0 }
 0x8b2   :  { %4283 = vmatpush1.bf16.msra.mxu0 %v4101_v16  ;;  %v4122_v40 = vsel %vm10360_vm5, %v9244_v9, %v9304_v41  ;;  %vm10375_vm5 = vmmov %vm10334_vm0 }
 0x8b3   :  { %v9309_v3 = vpop.permute.xlu0 %4066  ;;  %4284 = vmatprep.subr.bf16.mxu0 %v4107_v4 }
 0x8b5   :  { %v9314_v54 = vpop.permute.xlu1 %4020 }
 0x8b6   :  { %4285 = vmatpush1.bf16.msra.mxu0 %v4106_v35  ;;  %v4132_v47 = vsel %vm10365_vm9, %v9248_v13, %v9314_v54  ;;  %vm10379_vm9 = vmmov %vm10334_vm0 }
 0x8b7   :  { %v3800_v62 = vpop.permute.xlu0 %3799  ;;  %4286 = vmatprep.subr.bf16.mxu0 %v4112_v5 }
 0x8b8   :  { %v3818_v12 = vsel %vm10353_vm13, %v8897_v36, %v3800_v62  ;;  %v3819_v42 = vsel %vm10354_vm6, %v3800_v62, %v9246_v58  ;;  %v3823_v36 = vsel %vm10357_vm14, %v8982_v1, %v9250_v38  ;;  %v4121_v1 = vsel %vm10361_vm15, %v9069_v43, %v9244_v9  ;;  %vm10368_vm13 = vmmov %vm10334_vm0 }
 0x8b9   :  { %4034 = vrot.lane.b32.xlu1 %v3818_v12, %s4980_s11  ;;  %4036 = vrot.lane.b32.xlu0 %v3819_v42, %s4980_s11  ;;  %v9326_v51 = vpop.permute.xlu1 %4044  ;;  %v4126_v9 = vsel %vm10334_vm0, %v9032_v28, %v9194_v20  ;;  %v4131_v20 = vsel %vm10368_vm13, %v9077_v48, %v9248_v13  ;;  %vm10369_vm6 = vmmov %vm10334_vm0  ;;  %v4147_v12 = vsel %vm10375_vm5, %v9230_v52, %v9286_v56  ;;  %v3859_v42 = vld [vmem:[%s9540_s7] sm:$0xf] }
 0x8ba   :  { %4287 = vmatpush1.bf16.msra.mxu0 %v4111_v25  ;;  %v4137_v35 = vsel %vm10369_vm6, %v9202_v50, %v9220_v23  ;;  %v4142_v48 = vsel %vm10371_vm2, %v9252_v59, %v9326_v51  ;;  %vm10372_vm14 = vmmov %vm10364_vm1 }
 0x8bb   :  { %v9331_v60 = vpop.permute.xlu0 %4064  ;;  %4288 = vmatprep.subr.bf16.mxu0 %v4117_v37  ;;  %vm10376_vm15 = vmmov %vm10334_vm0 }
 0x8bc   :  { %v4151_v25 = vsel %vm10377_vm3, %v9331_v60, %v9309_v3  ;;  %vm10382_vm13 = vmmov %vm10334_vm0 }
 0x8bd   :  { %4024 = vrot.lane.b32.xlu1 %v3790_v22, %s4980_s11  ;;  %4046 = vrot.lane.b32.xlu0 %v3823_v36, %s4980_s11  ;;  %v9343_v53 = vpop.permute.xlu1 %4068  ;;  %vm10383_vm6 = vmmov %vm10334_vm0 }
 0x8be   :  { %4289 = vmatpush1.bf16.msra.mxu0 %v4116_v45  ;;  %vm10385_vm2 = vmmov %vm10334_vm0 }
 0x8bf   :  { %v3814_v19 = vpop.permute.xlu0 %3813  ;;  %4290 = vmatprep.subr.bf16.mxu0 %v4122_v40  ;;  %vm10389_vm5 = vmmov %vm10334_vm0 }
 0x8c0   :  { %v3824_v6 = vsel %vm10363_vm11, %v9250_v38, %v3814_v19  ;;  %v3852_v38 = vsel %vm10366_vm8, %v8904_v29, %v9262_v32  ;;  %v4136_v29 = vsel %vm10370_vm4, %v9042_v46, %v9202_v50  ;;  %v4141_v46 = vsel %vm10373_vm7, %v9267_v8, %v9252_v59  ;;  %vm10380_vm8 = vmmov %vm10334_vm0 }
 0x8c1   :  { %4038 = vrot.lane.b32.xlu1 %v9246_v58, %s4980_s11  ;;  %4050 = vrot.lane.b32.xlu0 %v3814_v19, %s4980_s11  ;;  %v9354_v30 = vpop.permute.xlu1 %3890  ;;  %v4152_v8 = vsel %vm10376_vm15, %v9309_v3, %v9343_v53  ;;  %vm4264_vm11 = vcmask 261120   ;;  %vm10384_vm4 = vmmov %vm10334_vm0 }
 0x8c2   :  { %4291 = vmatpush1.bf16.msra.mxu0 %v4121_v1  ;;  %v4078_v19 = vsel %vm10334_vm0, %v9209_v55, %v9354_v30  ;;  %vm10387_vm7 = vmmov %vm10334_vm0 }
 0x8c3   :  { %v3836_v61 = vpop.permute.xlu0 %3835  ;;  %4292 = vmatprep.subr.bf16.mxu0 %v4127_v24  ;;  %vm10390_vm15 = vmmov %vm10334_vm0 }
 0x8c4   :  { %v3853_v43 = vsel %vm10364_vm1, %v9262_v32, %v3836_v61  ;;  %vm10378_vm1 = vmmov %vm10334_vm0 }
 0x8c5   :  { %4048 = vrot.lane.b32.xlu1 %v3824_v6, %s4980_s11  ;;  %4060 = vrot.lane.b32.xlu0 %v3853_v43, %s4980_s11  ;;  %v9368_v58 = vpop.permute.xlu1 %3914  ;;  %vm10391_vm3 = vmmov %vm10334_vm0 }
 0x8c6   :  { %4293 = vmatpush1.bf16.msra.mxu0 %v4126_v9  ;;  %v4088_v6 = vsel %vm10384_vm4, %v9174_v18, %v9368_v58  ;;  %vm10398_vm4 = vmmov %vm10334_vm0 }
 0x8c7   :  { %v3846_v16 = vpop.permute.xlu0 %3845  ;;  %4294 = vmatprep.subr.bf16.mxu0 %v4132_v47 }
 0x8c8   :  { %v3857_v28 = vsel %vm10367_vm10, %v9018_v17, %v3846_v16  ;;  %v3858_v32 = vsel %vm10372_vm14, %v3846_v16, %v9281_v44  ;;  %vm10381_vm10 = vmmov %vm10334_vm0 }
 0x8c9   :  { %4070 = vrot.lane.b32.xlu0 %v3857_v28, %s4980_s11  ;;  %4058 = vrot.lane.b32.xlu1 %v3852_v38, %s4980_s11  ;;  %v9383_v4 = vpop.permute.xlu1 %3938  ;;  %vm10386_vm14 = vmmov %vm10334_vm0 }
 0x8ca   :  { %4295 = vmatpush1.bf16.msra.mxu0 %v4131_v20  ;;  %v4098_v28 = vsel %vm10390_vm15, %v9185_v26, %v9383_v4  ;;  %vm10404_vm15 = vmmov %vm10334_vm0 }
 0x8cb   :  { %v3893_v5 = vpop.permute.xlu0 %3892  ;;  %4296 = vmatprep.subr.bf16.mxu0 %v4137_v35 }
 0x8cd   :  { %4062 = vrot.lane.b32.xlu1 %v3836_v61, %s4980_s11  ;;  %v9392_v17 = vpop.permute.xlu1 %3962  ;;  %4074 = vrot.lane.b32.xlu0 %v9281_v44, %s4980_s11 }
 0x8ce   :  { %4297 = vmatpush1.bf16.msra.mxu0 %v4136_v29 }
 0x8cf   :  { %v3917_v13 = vpop.permute.xlu0 %3916  ;;  %4298 = vmatprep.subr.bf16.mxu0 %v4142_v48 }
 0x8d0   :  { %v4089_v24 = vsel %vm10382_vm13, %v9368_v58, %v3917_v13  ;;  %vm10396_vm13 = vmmov %vm10334_vm0 }
 0x8d1   :  { %4072 = vrot.lane.b32.xlu1 %v3858_v32, %s4980_s11  ;;  %v3895_v50 = vpop.permute.xlu1 %3894 }
 0x8d2   :  { %v4080_v62 = vsel %vm10374_vm12, %v3893_v5, %v3895_v50  ;;  %4299 = vmatpush1.bf16.msra.mxu0 %v4141_v46  ;;  %4436 = vmatprep.subr.bf16.mxu1 %v3895_v50  ;;  %vm10388_vm12 = vmmov %vm10334_vm0 }
 0x8d3   :  { %v9412_v44 = vpop.permute.xlu0 %3940  ;;  %4309 = vmatprep.subr.bf16.mxu0 %v4147_v12  ;;  %4437 = vmatpush1.bf16.msra.mxu1 %v4080_v62 }
 0x8d4   :  { %v4099_v38 = vsel %vm10388_vm12, %v9383_v4, %v9412_v44  ;;  %vm10402_vm12 = vmmov %vm10334_vm0 }
 0x8d5   :  { %3862 = vperm.xlu1 %4803, %v3859_v42   ;;  %4301 = vmatmul.mubr.bf16.vlgmr.msra.gmra.mrb[48].mxu0 %v9121_v14  ;;  %v3919_v59 = vpop.permute.xlu1 %3918 }
 0x8d6   :  { %4310 = vmatpush1.bf16.msra.mxu0 %v9242_v33  ;;  %4341 = vmatprep.mubr.bf16.mxu0 %v10175_v63 }
 0x8d7   :  { %v9420_v52 = vpop.permute.xlu0 %3964  ;;  %4311 = vmatprep.subr.bf16.mxu0 %v4152_v8 }
 0x8d9   :  { %v3943_v37 = vpop.permute.xlu1 %3942 }
 0x8da   :  { %4312 = vmatpush1.bf16.msra.mxu0 %v4151_v25  ;;  %v4100_v58 = vsel %vm10389_vm5, %v9412_v44, %v3943_v37  ;;  %vm10403_vm5 = vmmov %vm10334_vm0 }
 0x8db   :  { %v3903_v36 = vpop.permute.xlu0 %3902  ;;  %4350 = vmatprep.subr.bf16.mxu0 %v9138_v49  ;;  %v4079_v49 = vsel %vm10378_vm1, %v9354_v30, %v3893_v5  ;;  %v4090_v30 = vsel %vm10383_vm6, %v3917_v13, %v3919_v59  ;;  %vm10392_vm1 = vmmov %vm10334_vm0 }
 0x8dc   :  { %vm10397_vm6 = vmmov %vm10334_vm0 }
 0x8dd   :  { %v9426_v22 = vpop.permute.xlu1 %3966 }
 0x8df   :  { %v3927_v33 = vpop.permute.xlu0 %3926 }
 0x8e0   :  { %v4093_v47 = vsel %vm10387_vm7, %v9254_v2, %v3927_v33  ;;  %vm10401_vm7 = vmmov %vm10334_vm0 }
 0x8e1   :  { %4567 = vmatmul.mubr.msk.bf16.vlgmr.msra.gmra.mrb[48].mxu0 %vm4264_vm11, %v9149_v21  ;;  %v3905_v45 = vpop.permute.xlu1 %3904 }
 0x8e2   :  { %4351 = vmatpush1.bf16.msra.mxu0 %v8944_v31  ;;  %4382 = vmatprep.mubr.bf16.mxu0 %v9127_v27  ;;  %v4084_v31 = vsel %vm10379_vm9, %v3903_v36, %v3905_v45  ;;  %vm10393_vm9 = vmmov %vm10334_vm0 }
 0x8e3   :  { %4352 = vmatprep.subr.bf16.mxu0 %v9190_v34  ;;  %v3951_v3 = vpop.permute.xlu0 %3950  ;;  %v4109_v48 = vsel %vm10393_vm9, %v9392_v17, %v9420_v52  ;;  %vm10407_vm9 = vmmov %vm10334_vm0 }
 0x8e4   :  { %v4103_v5 = vsel %vm10334_vm0, %v9272_v57, %v3951_v3 }
 0x8e5   :  { %v9433_v60 = vpop.permute.xlu1 %3986 }
 0x8e6   :  { %4353 = vmatpush1.bf16.msra.mxu0 %v9067_v39  ;;  %v4083_v39 = vsel %vm10381_vm10, %v9256_v11, %v3903_v36  ;;  %vm10395_vm10 = vmmov %vm10334_vm0 }
 0x8e7   :  { %4354 = vmatprep.subr.bf16.mxu0 %v4079_v49  ;;  %v3975_v40 = vpop.permute.xlu0 %3974  ;;  %v4108_v13 = vsel %vm10395_vm10, %v9197_v7, %v9392_v17  ;;  %v4118_v17 = vsel %vm10401_vm7, %v9204_v15, %v9433_v60  ;;  %vm10409_vm10 = vmmov %vm10334_vm0 }
 0x8e8   :  { %v4113_v50 = vsel %vm10398_vm4, %v9297_v10, %v3975_v40  ;;  %vm10412_vm4 = vmmov %vm10334_vm0 }
 0x8e9   :  { %v3929_v1 = vpop.permute.xlu1 %3928  ;;  %vm10415_vm7 = vmmov %vm10334_vm0 }
 0x8ea   :  { %4355 = vmatpush1.bf16.msra.mxu0 %v4078_v19  ;;  %v4094_v43 = vsel %vm10385_vm2, %v3927_v33, %v3929_v1  ;;  %vm10399_vm2 = vmmov %vm10334_vm0 }
 0x8eb   :  { %4356 = vmatprep.subr.bf16.mxu0 %v4084_v31  ;;  %v3907_v27 = vpop.permute.xlu0 %3906 }
 0x8ec   :  { %v4085_v34 = vsel %vm10380_vm8, %v3905_v45, %v3907_v27  ;;  %4438 = vmatprep.subr.bf16.mxu1 %v3907_v27  ;;  %vm10394_vm8 = vmmov %vm10334_vm0 }
 0x8ed   :  { %4439 = vmatpush1.bf16.msra.mxu1 %v4085_v34  ;;  %v3991_v61 = vpop.permute.xlu1 %3990  ;;  %v4110_v4 = vsel %vm10394_vm8, %v9420_v52, %v9426_v22  ;;  %vm10408_vm8 = vmmov %vm10334_vm0 }
 0x8ee   :  { %4357 = vmatpush1.bf16.msra.mxu0 %v4083_v39  ;;  %4440 = vmatprep.subr.bf16.mxu1 %v3919_v59 }
 0x8ef   :  { %4358 = vmatprep.subr.bf16.mxu0 %v4089_v24  ;;  %v3931_v55 = vpop.permute.xlu0 %3930 }
 0x8f0   :  { %v4095_v9 = vsel %vm10386_vm14, %v3929_v1, %v3931_v55  ;;  %vm10400_vm14 = vmmov %vm10334_vm0 }
 0x8f1   :  { %4441 = vmatpush1.bf16.msra.mxu1 %v4090_v30  ;;  %v3953_v16 = vpop.permute.xlu1 %3952 }
 0x8f2   :  { %4359 = vmatpush1.bf16.msra.mxu0 %v4088_v6  ;;  %4442 = vmatprep.subr.bf16.mxu1 %v3931_v55  ;;  %v4104_v2 = vsel %vm10391_vm3, %v3951_v3, %v3953_v16  ;;  %vm10405_vm3 = vmmov %vm10334_vm0 }
 0x8f3   :  { %4360 = vmatprep.subr.bf16.mxu0 %v4094_v43  ;;  %v3955_v11 = vpop.permute.xlu0 %3954 }
 0x8f4   :  { %v4105_v35 = vsel %vm10392_vm1, %v3953_v16, %v3955_v11  ;;  %vm10406_vm1 = vmmov %vm10334_vm0 }
 0x8f5   :  { %4443 = vmatpush1.bf16.msra.mxu1 %v4095_v9 }
 0x8f6   :  { %4361 = vmatpush1.bf16.msra.mxu0 %v4093_v47  ;;  %4444 = vmatprep.subr.bf16.mxu1 %v3943_v37 }
 0x8f7   :  { %4362 = vmatprep.subr.bf16.mxu0 %v4099_v38  ;;  %v3979_v18 = vpop.permute.xlu0 %3978 }
 0x8f9   :  { %4445 = vmatpush1.bf16.msra.mxu1 %v4100_v58  ;;  %v4011_v20 = vpop.permute.xlu1 %4010 }
 0x8fa   :  { %4363 = vmatpush1.bf16.msra.mxu0 %v4098_v28  ;;  %4446 = vmatprep.subr.bf16.mxu1 %v3955_v11 }
 0x8fb   :  { %4364 = vmatprep.subr.bf16.mxu0 %v4104_v2  ;;  %v3989_v29 = vpop.permute.xlu0 %3988 }
 0x8fc   :  { %v4119_v62 = vsel %vm10399_vm2, %v9433_v60, %v3989_v29  ;;  %v4120_v7 = vsel %vm10400_vm14, %v3989_v29, %v3991_v61  ;;  %vm10413_vm2 = vmmov %vm10334_vm0 }
 0x8fd   :  { %4447 = vmatpush1.bf16.msra.mxu1 %v4105_v35  ;;  %v3977_v26 = vpop.permute.xlu1 %3976  ;;  %vm10414_vm14 = vmmov %vm10334_vm0 }
 0x8fe   :  { %4365 = vmatpush1.bf16.msra.mxu0 %v4103_v5  ;;  %4448 = vmatprep.subr.bf16.mxu1 %v9426_v22  ;;  %v4114_v57 = vsel %vm10396_vm13, %v3975_v40, %v3977_v26  ;;  %v4115_v46 = vsel %vm10397_vm6, %v3977_v26, %v3979_v18  ;;  %v4128_v22 = vsel %vm10334_vm0, %v9216_v0, %v4011_v20  ;;  %vm10410_vm13 = vmmov %vm10334_vm0 }
 0x8ff   :  { %4366 = vmatprep.subr.bf16.mxu0 %v4109_v48  ;;  %v3999_v32 = vpop.permute.xlu0 %3998  ;;  %vm10411_vm6 = vmmov %vm10334_vm0 }
 0x900   :  { %v4123_v25 = vsel %vm10404_vm15, %v9304_v41, %v3999_v32  ;;  %vm10418_vm15 = vmmov %vm10334_vm0 }
 0x901   :  { %4449 = vmatpush1.bf16.msra.mxu1 %v4110_v4 }
 0x902   :  { %4367 = vmatpush1.bf16.msra.mxu0 %v4108_v13  ;;  %4450 = vmatprep.subr.bf16.mxu1 %v3979_v18 }
 0x903   :  { %4368 = vmatprep.subr.bf16.mxu0 %v4114_v57  ;;  %v4003_v12 = vpop.permute.xlu0 %4002 }
 0x905   :  { %4451 = vmatpush1.bf16.msra.mxu1 %v4115_v46 }
 0x906   :  { %4369 = vmatpush1.bf16.msra.mxu0 %v4113_v50  ;;  %4452 = vmatprep.subr.bf16.mxu1 %v3991_v61 }
 0x907   :  { %4370 = vmatprep.subr.bf16.mxu0 %v4119_v62 }
 0x909   :  { %4453 = vmatpush1.bf16.msra.mxu1 %v4120_v7 }
 0x90a   :  { %4371 = vmatpush1.bf16.msra.mxu0 %v4118_v17  ;;  %4454 = vmatprep.subr.bf16.mxu1 %v4003_v12 }
 0x91a   :  { %v4015_v42 = vpop.permute.xlu1 %4014 }
 0x91b   :  { %v4013_v44 = vpop.permute.xlu0 %4012 }
 0x91c   :  { %v4129_v15 = vsel %vm10405_vm3, %v4011_v20, %v4013_v44  ;;  %v4130_v37 = vsel %vm10406_vm1, %v4013_v44, %v4015_v42  ;;  %vm10419_vm3 = vmmov %vm10334_vm0 }
 0x91d   :  { %vm10420_vm1 = vmmov %vm10334_vm0 }
 0x91e   :  { %v4001_v10 = vpop.permute.xlu1 %4000 }
 0x91f   :  { %v4125_v59 = vsel %vm10402_vm12, %v4001_v10, %v4003_v12  ;;  %v4023_v8 = vpop.permute.xlu0 %4022  ;;  %v4124_v52 = vsel %vm10403_vm5, %v3999_v32, %v4001_v10  ;;  %vm10416_vm12 = vmmov %vm10334_vm0 }
 0x920   :  { %4372 = vmatprep.subr.bf16.mxu0 %v4124_v52  ;;  %4455 = vmatpush1.bf16.msra.mxu1 %v4125_v59  ;;  %v4133_v40 = vsel %vm10409_vm10, %v9314_v54, %v4023_v8  ;;  %vm10417_vm5 = vmmov %vm10334_vm0 }
 0x921   :  { %4373 = vmatpush1.bf16.msra.mxu0 %v4123_v25  ;;  %4456 = vmatprep.subr.bf16.mxu1 %v4015_v42 }
 0x922   :  { %4374 = vmatprep.subr.bf16.mxu0 %v4129_v15 }
 0x923   :  { %v4027_v36 = vpop.permute.xlu0 %4026 }
 0x924   :  { %4457 = vmatpush1.bf16.msra.mxu1 %v4130_v37 }
 0x925   :  { %4375 = vmatpush1.bf16.msra.mxu0 %v4128_v22  ;;  %4458 = vmatprep.subr.bf16.mxu1 %v4027_v36 }
 0x92b   :  { %v4037_v33 = vpop.permute.xlu0 %4036  ;;  %v4035_v45 = vpop.permute.xlu1 %4034 }
 0x92c   :  { %v4139_v19 = vsel %vm10410_vm13, %v4035_v45, %v4037_v33  ;;  %v4138_v27 = vsel %vm10412_vm4, %v9220_v23, %v4035_v45 }
 0x92f   :  { %v4047_v3 = vpop.permute.xlu0 %4046  ;;  %v4025_v41 = vpop.permute.xlu1 %4024 }
 0x930   :  { %v4135_v60 = vsel %vm10407_vm9, %v4025_v41, %v4027_v36  ;;  %v4134_v49 = vsel %vm10408_vm8, %v4023_v8, %v4025_v41  ;;  %v4143_v61 = vsel %vm10415_vm7, %v9326_v51, %v4047_v3  ;;  %vm4528_vm9 = vcmask 293892  }
 0x931   :  { %4376 = vmatprep.subr.bf16.mxu0 %v4134_v49  ;;  %4459 = vmatpush1.bf16.msra.mxu1 %v4135_v60 }
 0x932   :  { %4377 = vmatpush1.bf16.msra.mxu0 %v4133_v40 }
 0x933   :  { %v4051_v0 = vpop.permute.xlu0 %4050  ;;  %4378 = vmatprep.subr.bf16.mxu0 %v4139_v19  ;;  %v4039_v1 = vpop.permute.xlu1 %4038 }
 0x934   :  { %v4140_v31 = vsel %vm10411_vm6, %v4037_v33, %v4039_v1  ;;  %4460 = vmatprep.subr.bf16.mxu1 %v4039_v1 }
 0x935   :  { %4461 = vmatpush1.bf16.msra.mxu1 %v4140_v31 }
 0x936   :  { %4379 = vmatpush1.bf16.msra.mxu0 %v4138_v27  ;;  %4462 = vmatprep.subr.bf16.mxu1 %v4051_v0 }
 0x937   :  { %v4061_v34 = vpop.permute.xlu0 %4060  ;;  %v4049_v39 = vpop.permute.xlu1 %4048 }
 0x938   :  { %v4145_v54 = vsel %vm10413_vm2, %v4049_v39, %v4051_v0  ;;  %v4144_v24 = vsel %vm10414_vm14, %v4047_v3, %v4049_v39 }
 0x939   :  { %4380 = vmatprep.subr.bf16.mxu0 %v4144_v24  ;;  %4463 = vmatpush1.bf16.msra.mxu1 %v4145_v54 }
 0x93a   :  { %4381 = vmatpush1.bf16.msra.mxu0 %v4143_v61 }
 0x93b   :  { %v4071_v55 = vpop.permute.xlu0 %4070  ;;  %v4059_v30 = vpop.permute.xlu1 %4058 }
 0x93c   :  { %v4148_v23 = vsel %vm10416_vm12, %v9286_v56, %v4059_v30  ;;  %4465 = vmatmul.mubr.bf16.vlgmr.msra.gmra.mrb[32].mxu1 %v9121_v14  ;;  %v4149_v6 = vsel %vm10417_vm5, %v4059_v30, %v4061_v34 }
 0x93d   :  { %4383 = vmatmul.mubr.bf16.vlgmr.msra.gmra.mrb[52].mxu0 %v9121_v14  ;;  %4391 = vmatprep.subr.bf16.mxu0 %v4149_v6  ;;  %v4153_v14 = vsel %vm10334_vm0, %v9343_v53, %v4071_v55 }
 0x93e   :  { %4392 = vmatpush1.bf16.msra.mxu0 %v4148_v23  ;;  %4505 = vmatprep.mubr.bf16.mxu1 %v10175_v63 }
 0x93f   :  { %v4063_v43 = vpop.permute.xlu1 %4062  ;;  %v4075_v51 = vpop.permute.xlu0 %4074  ;;  %4423 = vmatprep.mubr.bf16.mxu0 %v10175_v63 }
 0x940   :  { %v4150_v11 = vsel %vm10418_vm15, %v4061_v34, %v4063_v43  ;;  %4473 = vmatprep.subr.bf16.mxu1 %v4063_v43 }
 0x941   :  { %4474 = vmatpush1.bf16.msra.mxu1 %v4150_v11 }
 0x942   :  { %4475 = vmatprep.subr.bf16.mxu1 %v4075_v51 }
 0x943   :  { %v4073_v56 = vpop.permute.xlu1 %4072 }
 0x944   :  { %v4155_v9 = vsel %vm10419_vm3, %v4073_v56, %v4075_v51  ;;  %v4154_v47 = vsel %vm10420_vm1, %v4071_v55, %v4073_v56 }
 0x945   :  { %4393 = vmatprep.subr.bf16.mxu0 %v4154_v47  ;;  %4476 = vmatpush1.bf16.msra.mxu1 %v4155_v9 }
 0x946   :  { %4394 = vmatpush1.bf16.msra.mxu0 %v4153_v14 }
 0x948   :  { %4569 = vmatmul.mubr.msk.bf16.vlgmr.msra.gmra.mrb[32].mxu1 %vm4264_vm11, %v9149_v21 }
 0x949   :  { %4568 = vmatmul.mubr.msk.bf16.vlgmr.msra.gmra.mrb[52].mxu0 %vm4264_vm11, %v9149_v21  ;;  %vm10421_vm11 = vcmask 1043456  }
 0x94a   :  { %vm4529_vm8 = vmor %vm4528_vm9, %vm10421_vm11 }
 0x954   :  { %v3863_v63 = vpop.permute.xlu1 %3862 }
 0x9b4   :  { %v4343_v16 = vpop.f32.mrb[48].mxu0 }
 0x9b5   :  { %v4602_v38 = vadd.f32 %v4343_v16, %v3863_v63  ;;  %v4345_v18 = vpop.f32.mrb[49].mxu0 }
 0x9b6   :  { %v4603_v58 = vadd.f32 %v4345_v18, %v3863_v63  ;;  %v4347_v28 = vpop.f32.mrb[50].mxu0 }
 0x9b7   :  { %v4348_v20 = vpop.f32.mrb[51].mxu0 }
 0x9b8   :  { %v4520_v2 = vcombine.low %v4602_v38, %v4603_v58 }
 0x9ba   :  { %4526 = vst [vmem:[%s9541_s8] sm:$0xff] %v4520_v2 }
 0xa1b   :  { %v4507_v53 = vpop.f32.mrb[32].mxu1 }
 0xa1c   :  { %v4606_v35 = vadd.f32 %v4507_v53, %v3863_v63  ;;  %v4425_v5 = vpop.f32.mrb[52].mxu0  ;;  %v4509_v29 = vpop.f32.mrb[33].mxu1 }
 0xa1d   :  { %v4604_v48 = vadd.f32 %v4425_v5, %v3863_v63  ;;  %v4607_v26 = vadd.f32 %v4509_v29, %v3863_v63  ;;  %v4427_v21 = vpop.f32.mrb[53].mxu0  ;;  %v4511_v4 = vpop.f32.mrb[34].mxu1 }
 0xa1e   :  { %v4605_v13 = vadd.f32 %v4427_v21, %v3863_v63  ;;  %v4429_v57 = vpop.f32.mrb[54].mxu0  ;;  %v4512_v32 = vpop.f32.mrb[35].mxu1 }
 0xa1f   :  { %v4522_v46 = vcombine.low %v4606_v35, %v4607_v26  ;;  %v4430_v50 = vpop.f32.mrb[55].mxu0 }
 0xa20   :  { %v4521_v62 = vcombine.low %v4604_v48, %v4605_v13 }
 0xa21   :  { %4530 = vst.msk [vmem:[%s9541_s8 + $0x10] sm:$0xff] %vm4529_vm8, %v4522_v46 }
 0xa22   :  { %4527 = vst [vmem:[%s9541_s8 + $0x8] sm:$0xff] %v4521_v62 }

</bundles_post_ra>
